<compile_context>
chip_gen: v7x
topology: tpu7x:2x2x1
jax: 0.10.0
libtpu: 0.0.40
codegen_flags: <defaults>
</compile_context>

<pallas_src>
import functools

import jax
import jax.numpy as jnp
from jax import lax
from jax.experimental import pallas as pl
from jax.experimental.pallas import tpu as pltpu

# ---------------- small synthetic config (stand-in for xlnet-base-cased) ----
VOCAB = 64
D_MODEL = 128      # (768 in the real model)
N_HEAD = 4
D_HEAD = 32
HD = N_HEAD * D_HEAD          # == D_MODEL (as in xlnet-base: 12 * 64 = 768)
D_INNER = 256
N_LAYER = 2
NUM_LABELS = 5
CLS_PAD = 128                 # lane-dense classifier output (sliced to 5)
SEQ_LEN = 128                 # lane-aligned demo sequence length
LN_EPS = 1e-12                # XLNet layer_norm_eps

assert HD == D_MODEL


# ============================ Pallas kernels ================================

def _layer_norm(x, g, b):
    # Post-LN with f32 statistics.
    mu = jnp.mean(x, axis=-1, keepdims=True)
    xc = x - mu
    var = jnp.mean(xc * xc, axis=-1, keepdims=True)
    return xc * lax.rsqrt(var + LN_EPS) * g + b


def _layer_kernel(h_ref, pos_ref, wr_ref, wqkv_ref, rw_ref, rr_ref, mask_ref,
                  wo_ref, ln1g_ref, ln1b_ref,
                  w1_ref, b1_ref, w2_ref, b2_ref, ln2g_ref, ln2b_ref,
                  o_ref, ctx_ref, *, seq):
    """One batch element: full XLNet layer (rel-attn block + FFN block)."""
    f32, bf16 = jnp.float32, jnp.bfloat16
    scale = 1.0 / (D_HEAD ** 0.5)
    dn_nt = (((1,), (1,)), ((), ()))                      # A(M,K) @ B(N,K)^T

    h = h_ref[...]                                        # (S, D) bf16

    # ---- relative multi-head attention -------------------------------------
    # Fused QKV projection; cast to bf16 right at the dot output (halves the
    # live footprint of the largest resident intermediate).
    qkv = jnp.dot(h, wqkv_ref[...], preferred_element_type=f32).astype(bf16)
    # Per-layer position-key projection folded into the layer kernel
    # (tiny matmul; removes a separate pallas_call).
    kr = jnp.dot(pos_ref[...], wr_ref[...],
                 preferred_element_type=f32).astype(bf16)  # (2S, HD) bf16

    # Fold 1/sqrt(d_head) into the q-side operands (once over (S, HD)) instead
    # of scaling the (S, S) / (S, 2S) score matrices.
    q = qkv[:, :HD]
    q_rw = q * scale + (rw_ref[...] * scale).astype(bf16)  # (S, HD) bf16
    q_rr = q * scale + (rr_ref[...] * scale).astype(bf16)
    k = qkv[:, HD:2 * HD]
    v = qkv[:, 2 * HD:3 * HD]
    mask = mask_ref[...]                                   # (1, S) f32 additive

    for hd in range(N_HEAD):                               # static unroll (4)
        lo, hi = hd * D_HEAD, (hd + 1) * D_HEAD
        # content score AC = (q + r_w_bias) k^T   (already scaled)
        ac = lax.dot_general(q_rw[:, lo:hi], k[:, lo:hi], dn_nt,
                             preferred_element_type=f32)   # (S, S) f32
        # position score BD_full = (q + r_r_bias) k_r^T, shape (S, 2S)
        bd_full = lax.dot_general(q_rr[:, lo:hi], kr[:, lo:hi], dn_nt,
                                  preferred_element_type=f32)
        # XLNet rel_shift: bd[i, j] = bd_full[i, S - i + j].  One strided XLU
        # lane rotation (row i rolled right by S + i) + aligned static slice;
        # no wrap-around enters the kept [:, :S] region.
        bd = pltpu.roll(bd_full, shift=seq, axis=1,
                        stride=1, stride_axis=0)[:, :seq]  # (S, S) f32

        score = ac + bd + mask                             # (S, S) f32
        m = jnp.max(score, axis=-1, keepdims=True)
        p = jnp.exp(score - m)
        inv = pl.reciprocal(jnp.sum(p, axis=-1, keepdims=True), approx=True)
        attn = (p * inv).astype(bf16)
        # write per-head context into VMEM scratch (no lane-offset concat)
        ctx_ref[:, lo:hi] = jnp.dot(attn, v[:, lo:hi],
                                    preferred_element_type=f32).astype(bf16)

    # output projection + residual + post-LN (f32 statistics)
    out = jnp.dot(ctx_ref[...], wo_ref[...], preferred_element_type=f32)
    a = _layer_norm(out + h.astype(f32), ln1g_ref[...], ln1b_ref[...])

    # ---- position-wise FFN --------------------------------------------------
    a16 = a.astype(bf16)
    y = jnp.dot(a16, w1_ref[...], preferred_element_type=f32).astype(bf16)
    # TODO(synk): XLNet reference uses exact erf-GELU; tanh approximation here.
    # bf16 bias-add + GELU (v6e/v7x bf16 VPU/EUP; use f32 on v5e).
    y = jax.nn.gelu(y + b1_ref[...].astype(bf16), approximate=True)
    z = jnp.dot(y, w2_ref[...], preferred_element_type=f32) + b2_ref[...]
    o_ref[...] = _layer_norm(z + a, ln2g_ref[...], ln2b_ref[...]
                             ).astype(o_ref.dtype)


def xlnet_layer(h, pos_emb, addmask, p, *, B, S):
    kern = functools.partial(_layer_kernel, seq=S)
    bsd = pl.BlockSpec((None, S, D_MODEL), lambda b: (b, 0, 0))

    def rep(shape):                      # broadcast (replicated) operand
        return pl.BlockSpec(shape, lambda b: tuple(0 for _ in shape))

    return pl.pallas_call(
        kern,
        out_shape=jax.ShapeDtypeStruct((B, S, D_MODEL), jnp.bfloat16),
        grid=(B,),
        in_specs=[
            bsd,                                             # h
            rep((2 * S, D_MODEL)),                           # pos_emb (sinusoid)
            rep((D_MODEL, HD)),                              # w_r
            rep((D_MODEL, 3 * HD)),                          # w_qkv (fused q|k|v)
            rep((1, HD)),                                    # r_w_bias
            rep((1, HD)),                                    # r_r_bias
            pl.BlockSpec((None, 1, S), lambda b: (b, 0, 0)),  # additive mask
            rep((HD, D_MODEL)),                              # w_o
            rep((1, D_MODEL)), rep((1, D_MODEL)),            # ln1 gamma/beta
            rep((D_MODEL, D_INNER)), rep((1, D_INNER)),      # ff1 w/b
            rep((D_INNER, D_MODEL)), rep((1, D_MODEL)),      # ff2 w/b
            rep((1, D_MODEL)), rep((1, D_MODEL)),            # ln2 gamma/beta
        ],
        out_specs=bsd,
        scratch_shapes=[pltpu.VMEM((S, HD), jnp.bfloat16)],  # per-head context
        compiler_params=pltpu.CompilerParams(
            dimension_semantics=("parallel",)),              # v7x: 2 TCs busy
    )(h, pos_emb, p["wr"], p["wqkv"], p["r_w_bias"], p["r_r_bias"], addmask,
      p["wo"], p["ln1_g"], p["ln1_b"],
      p["ff1_w"], p["ff1_b"], p["ff2_w"], p["ff2_b"], p["ln2_g"], p["ln2_b"])


def _pool_cls_kernel(h_ref, w_ref, b_ref, o_ref):
    # mean over the sequence axis (f32) then classifier matmul into a 128-lane
    # padded output tile (sliced to num_labels outside the kernel).
    pooled = jnp.mean(h_ref[...].astype(jnp.float32), axis=1)       # (B, D)
    o_ref[...] = jnp.dot(pooled.astype(jnp.bfloat16), w_ref[...],
                         preferred_element_type=jnp.float32) + b_ref[...]


def pool_and_classify(h_bsd, w_cls_pad, b_cls_pad):
    B = h_bsd.shape[0]
    return pl.pallas_call(
        _pool_cls_kernel,
        out_shape=jax.ShapeDtypeStruct((B, CLS_PAD), jnp.float32),
    )(h_bsd, w_cls_pad, b_cls_pad)


# ============================ glue / model ==================================

def relative_positional_encoding(seq, d_model):
    # XLNet: pos_seq = arange(klen, -qlen, -1), sinusoid, length 2*seq
    pos_seq = jnp.arange(seq, -seq, -1, dtype=jnp.float32)
    inv_freq = 1.0 / (10000.0 ** (jnp.arange(0, d_model, 2, dtype=jnp.float32)
                                  / d_model))
    sinusoid = pos_seq[:, None] * inv_freq[None, :]
    return jnp.concatenate([jnp.sin(sinusoid), jnp.cos(sinusoid)], axis=-1)


def xlnet_for_multilabel_forward(params, input_ids, token_type_ids=None,
                                 attention_mask=None, labels=None):
    B, S = input_ids.shape
    # Kernel tiling assumes a lane-aligned sequence (rel-shift rotate needs the
    # 2S lane dim to be a multiple of 128).  TODO(synk): pad ragged sequences.
    assert S % 128 == 0, "demo kernels require seq_len % 128 == 0"

    # embedding lookup (gather) done in glue — no tiny-Pallas equivalent needed
    h = jnp.take(params["word_emb"], input_ids, axis=0).astype(jnp.bfloat16)
    pos_emb = relative_positional_encoding(S, D_MODEL).astype(jnp.bfloat16)

    if attention_mask is None:
        attention_mask = jnp.ones((B, S), jnp.float32)
    # XLNet: attn_score -= 1e30 * (1 - attention_mask) over the key axis (f32)
    addmask = (-1e30 * (1.0 - attention_mask.astype(jnp.float32))
               ).reshape(B, 1, S)
    # TODO(synk): segment-based relative bias (token_type_ids / seg_mat / r_s_bias)
    # is not implemented.

    for layer_params in params["layers"]:
        h = xlnet_layer(h, pos_emb, addmask, layer_params, B=B, S=S)

    # mean-pool over seq + classifier (logits.view(-1, num_labels))
    logits_pad = pool_and_classify(h, params["cls_w"], params["cls_b"])
    logits = logits_pad[:, :NUM_LABELS].reshape(-1, NUM_LABELS)

    if labels is not None:
        z = labels.astype(jnp.float32)
        x = logits
        loss = jnp.mean(jnp.maximum(x, 0.0) - x * z
                        + jnp.log1p(jnp.exp(-jnp.abs(x))))       # BCEWithLogitsLoss
        return loss
    return logits


def init_params(key):
    keys = list(jax.random.split(key, 64))
    it = iter(keys)

    def nrm(shape, std=0.02, dtype=jnp.float32):
        return (std * jax.random.normal(next(it), shape)).astype(dtype)

    # classifier: xavier_normal_ weight (padded to 128 lanes), zero bias
    cls_w = nrm((D_MODEL, NUM_LABELS), std=(2.0 / (D_MODEL + NUM_LABELS)) ** 0.5)
    cls_w_pad = jnp.zeros((D_MODEL, CLS_PAD), jnp.float32).at[:, :NUM_LABELS].set(cls_w)

    params = {
        "word_emb": nrm((VOCAB, D_MODEL)),
        "layers": [],
        "cls_w": cls_w_pad.astype(jnp.bfloat16),
        "cls_b": jnp.zeros((1, CLS_PAD), jnp.float32),
    }
    for _ in range(N_LAYER):
        params["layers"].append({
            "wr": nrm((D_MODEL, HD), dtype=jnp.bfloat16),
            # fused Q|K|V projection weight (XLNet q/k/v/o have no bias)
            "wqkv": nrm((D_MODEL, 3 * HD), dtype=jnp.bfloat16),
            "wo": nrm((HD, D_MODEL), dtype=jnp.bfloat16),
            "r_w_bias": nrm((1, HD)),
            "r_r_bias": nrm((1, HD)),
            "ln1_g": jnp.ones((1, D_MODEL), jnp.float32),
            "ln1_b": jnp.zeros((1, D_MODEL), jnp.float32),
            "ff1_w": nrm((D_MODEL, D_INNER), dtype=jnp.bfloat16),
            "ff1_b": jnp.zeros((1, D_INNER), jnp.float32),
            "ff2_w": nrm((D_INNER, D_MODEL), dtype=jnp.bfloat16),
            "ff2_b": jnp.zeros((1, D_MODEL), jnp.float32),
            "ln2_g": jnp.ones((1, D_MODEL), jnp.float32),
            "ln2_b": jnp.zeros((1, D_MODEL), jnp.float32),
        })
    return params


if __name__ == "__main__":
    key = jax.random.PRNGKey(0)
    pkey, dkey = jax.random.split(key)
    params = init_params(pkey)

    B, S = 2, SEQ_LEN
    input_ids = jax.random.randint(dkey, (B, S), 0, VOCAB, dtype=jnp.int32)
    attention_mask = jnp.ones((B, S), jnp.float32)

    fwd = jax.jit(xlnet_for_multilabel_forward)
    logits = fwd(params, input_ids, attention_mask=attention_mask)
    logits = jax.block_until_ready(logits)
    assert logits.shape == (B, NUM_LABELS) and logits.dtype == jnp.float32
    assert bool(jnp.all(jnp.isfinite(logits)))
    print("KERNEL_OK")
</pallas_src>

<mosaic_0001>
module attributes {stable_mosaic.version = 11 : i64} {
  func.func @_pool_cls_kernel(%arg0: memref<2x128x128xbf16, #tpu.memory_space<vmem>>, %arg1: memref<128x128xbf16, #tpu.memory_space<vmem>>, %arg2: memref<1x128xf32, #tpu.memory_space<vmem>>, %arg3: memref<2x128xf32, #tpu.memory_space<vmem>>) attributes {dimension_semantics = [], scalar_prefetch = 0 : i64, scratch_operands = 0 : i64, tpu.core_type = #tpu.core_type<tc>} {
    %c0 = arith.constant 0 : index
    %c0_0 = arith.constant 0 : index
    %c0_1 = arith.constant 0 : index
    %0 = vector.load %arg0[%c0, %c0_0, %c0_1] : memref<2x128x128xbf16, #tpu.memory_space<vmem>>, vector<2x128x128xbf16>
    %1 = arith.extf %0 : vector<2x128x128xbf16> to vector<2x128x128xf32>
    %cst = arith.constant dense<0.000000e+00> : vector<2x128xf32>
    %2 = vector.multi_reduction <add>, %1, %cst [1] : vector<2x128x128xf32> to vector<2x128xf32>
    %cst_2 = arith.constant 1.280000e+02 : f32
    %3 = vector.broadcast %cst_2 : f32 to vector<2x128xf32>
    %4 = arith.divf %2, %3 : vector<2x128xf32>
    %5 = arith.truncf %4 : vector<2x128xf32> to vector<2x128xbf16>
    %c0_3 = arith.constant 0 : index
    %c0_4 = arith.constant 0 : index
    %6 = vector.load %arg1[%c0_3, %c0_4] : memref<128x128xbf16, #tpu.memory_space<vmem>>, vector<128x128xbf16>
    %cst_5 = arith.constant dense<0.000000e+00> : vector<2x128xf32>
    %7 = tpu.matmul %5, %6, %cst_5 {dimension_numbers = #tpu.dot_dimension_numbers<[1], [0], [0], [1], [0, 0, 1, 1], [], []>} : vector<2x128xbf16>, vector<128x128xbf16>, vector<2x128xf32> -> vector<2x128xf32>
    %c0_6 = arith.constant 0 : index
    %c0_7 = arith.constant 0 : index
    %8 = vector.load %arg2[%c0_6, %c0_7] : memref<1x128xf32, #tpu.memory_space<vmem>>, vector<1x128xf32>
    %9 = vector.broadcast %8 : vector<1x128xf32> to vector<2x128xf32>
    %10 = arith.addf %7, %9 : vector<2x128xf32>
    %c0_8 = arith.constant 0 : index
    %c0_9 = arith.constant 0 : index
    %11 = vector.load %arg3[%c0_8, %c0_9] : memref<2x128xf32, #tpu.memory_space<vmem>>, vector<2x128xf32>
    tpu.vector_store %arg3[%c0_8, %c0_9], %10 {strides = array<i32>} : memref<2x128xf32, #tpu.memory_space<vmem>>, vector<2x128xf32>,
    return
  }
}

module attributes {stable_mosaic.version = 11 : i64} {
  func.func @_layer_kernel(%arg0: i32, %arg1: memref<1x128x128xbf16, #tpu.memory_space<vmem>>, %arg2: memref<256x128xbf16, #tpu.memory_space<vmem>>, %arg3: memref<128x128xbf16, #tpu.memory_space<vmem>>, %arg4: memref<128x384xbf16, #tpu.memory_space<vmem>>, %arg5: memref<1x128xf32, #tpu.memory_space<vmem>>, %arg6: memref<1x128xf32, #tpu.memory_space<vmem>>, %arg7: memref<1x1x128xf32, #tpu.memory_space<vmem>>, %arg8: memref<128x128xbf16, #tpu.memory_space<vmem>>, %arg9: memref<1x128xf32, #tpu.memory_space<vmem>>, %arg10: memref<1x128xf32, #tpu.memory_space<vmem>>, %arg11: memref<128x256xbf16, #tpu.memory_space<vmem>>, %arg12: memref<1x256xf32, #tpu.memory_space<vmem>>, %arg13: memref<256x128xbf16, #tpu.memory_space<vmem>>, %arg14: memref<1x128xf32, #tpu.memory_space<vmem>>, %arg15: memref<1x128xf32, #tpu.memory_space<vmem>>, %arg16: memref<1x128xf32, #tpu.memory_space<vmem>>, %arg17: memref<1x128x128xbf16, #tpu.memory_space<vmem>>, %arg18: memref<128x128xbf16, #tpu.memory_space<vmem>>) attributes {dimension_semantics = [#tpu.dimension_semantics<parallel>], iteration_bounds = array<i64: 2>, scalar_prefetch = 0 : i64, scratch_operands = 1 : i64, tpu.core_type = #tpu.core_type<tc>, window_params = [{transform_indices = @transform_0, window_bounds = array<i64: 1, 128, 128>}, {pipeline_mode = #tpu.pipeline_mode<synchronous>, transform_indices = @transform_1, window_bounds = array<i64: 256, 128>}, {pipeline_mode = #tpu.pipeline_mode<synchronous>, transform_indices = @transform_2, window_bounds = array<i64: 128, 128>}, {pipeline_mode = #tpu.pipeline_mode<synchronous>, transform_indices = @transform_3, window_bounds = array<i64: 128, 384>}, {pipeline_mode = #tpu.pipeline_mode<synchronous>, transform_indices = @transform_4, window_bounds = array<i64: 1, 128>}, {pipeline_mode = #tpu.pipeline_mode<synchronous>, transform_indices = @transform_5, window_bounds = array<i64: 1, 128>}, {transform_indices = @transform_6, window_bounds = array<i64: 1, 1, 128>}, {pipeline_mode = #tpu.pipeline_mode<synchronous>, transform_indices = @transform_7, window_bounds = array<i64: 128, 128>}, {pipeline_mode = #tpu.pipeline_mode<synchronous>, transform_indices = @transform_8, window_bounds = array<i64: 1, 128>}, {pipeline_mode = #tpu.pipeline_mode<synchronous>, transform_indices = @transform_9, window_bounds = array<i64: 1, 128>}, {pipeline_mode = #tpu.pipeline_mode<synchronous>, transform_indices = @transform_10, window_bounds = array<i64: 128, 256>}, {pipeline_mode = #tpu.pipeline_mode<synchronous>, transform_indices = @transform_11, window_bounds = array<i64: 1, 256>}, {pipeline_mode = #tpu.pipeline_mode<synchronous>, transform_indices = @transform_12, window_bounds = array<i64: 256, 128>}, {pipeline_mode = #tpu.pipeline_mode<synchronous>, transform_indices = @transform_13, window_bounds = array<i64: 1, 128>}, {pipeline_mode = #tpu.pipeline_mode<synchronous>, transform_indices = @transform_14, window_bounds = array<i64: 1, 128>}, {pipeline_mode = #tpu.pipeline_mode<synchronous>, transform_indices = @transform_15, window_bounds = array<i64: 1, 128>}, {transform_indices = @transform_16, window_bounds = array<i64: 1, 128, 128>}]} {
    %c0 = arith.constant 0 : index
    %c0_0 = arith.constant 0 : index
    %c0_1 = arith.constant 0 : index
    %0 = vector.load %arg1[%c0, %c0_0, %c0_1] : memref<1x128x128xbf16, #tpu.memory_space<vmem>>, vector<1x128x128xbf16>
    %1 = vector.shape_cast %0 : vector<1x128x128xbf16> to vector<128x128xbf16>
    %c0_2 = arith.constant 0 : index
    %c0_3 = arith.constant 0 : index
    %2 = vector.load %arg4[%c0_2, %c0_3] : memref<128x384xbf16, #tpu.memory_space<vmem>>, vector<128x384xbf16>
    %cst = arith.constant dense<0.000000e+00> : vector<128x384xf32>
    %3 = tpu.matmul %1, %2, %cst {dimension_numbers = #tpu.dot_dimension_numbers<[1], [0], [0], [1], [0, 0, 1, 1], [], []>} : vector<128x128xbf16>, vector<128x384xbf16>, vector<128x384xf32> -> vector<128x384xf32>
    %4 = arith.truncf %3 : vector<128x384xf32> to vector<128x384xbf16>
    %c0_4 = arith.constant 0 : index
    %c0_5 = arith.constant 0 : index
    %5 = vector.load %arg2[%c0_4, %c0_5] : memref<256x128xbf16, #tpu.memory_space<vmem>>, vector<256x128xbf16>
    %c0_6 = arith.constant 0 : index
    %c0_7 = arith.constant 0 : index
    %6 = vector.load %arg3[%c0_6, %c0_7] : memref<128x128xbf16, #tpu.memory_space<vmem>>, vector<128x128xbf16>
    %cst_8 = arith.constant dense<0.000000e+00> : vector<256x128xf32>
    %7 = tpu.matmul %5, %6, %cst_8 {dimension_numbers = #tpu.dot_dimension_numbers<[1], [0], [0], [1], [0, 0, 1, 1], [], []>} : vector<256x128xbf16>, vector<128x128xbf16>, vector<256x128xf32> -> vector<256x128xf32>
    %8 = arith.truncf %7 : vector<256x128xf32> to vector<256x128xbf16>
    %9 = vector.extract_strided_slice %4 {offsets = [0, 0], sizes = [128, 128], strides = [1, 1]} : vector<128x384xbf16> to vector<128x128xbf16>
    %cst_9 = arith.constant 1.767580e-01 : bf16
    %10 = vector.broadcast %cst_9 : bf16 to vector<128x128xbf16>
    %11 = arith.mulf %9, %10 : vector<128x128xbf16>
    %c0_10 = arith.constant 0 : index
    %c0_11 = arith.constant 0 : index
    %12 = vector.load %arg5[%c0_10, %c0_11] : memref<1x128xf32, #tpu.memory_space<vmem>>, vector<1x128xf32>
    %cst_12 = arith.constant 0.176776692 : f32
    %13 = vector.broadcast %cst_12 : f32 to vector<1x128xf32>
    %14 = arith.mulf %12, %13 : vector<1x128xf32>
    %15 = arith.truncf %14 : vector<1x128xf32> to vector<1x128xbf16>
    %16 = vector.broadcast %15 : vector<1x128xbf16> to vector<128x128xbf16>
    %17 = arith.addf %11, %16 : vector<128x128xbf16>
    %cst_13 = arith.constant 1.767580e-01 : bf16
    %18 = vector.broadcast %cst_13 : bf16 to vector<128x128xbf16>
    %19 = arith.mulf %9, %18 : vector<128x128xbf16>
    %c0_14 = arith.constant 0 : index
    %c0_15 = arith.constant 0 : index
    %20 = vector.load %arg6[%c0_14, %c0_15] : memref<1x128xf32, #tpu.memory_space<vmem>>, vector<1x128xf32>
    %cst_16 = arith.constant 0.176776692 : f32
    %21 = vector.broadcast %cst_16 : f32 to vector<1x128xf32>
    %22 = arith.mulf %20, %21 : vector<1x128xf32>
    %23 = arith.truncf %22 : vector<1x128xf32> to vector<1x128xbf16>
    %24 = vector.broadcast %23 : vector<1x128xbf16> to vector<128x128xbf16>
    %25 = arith.addf %19, %24 : vector<128x128xbf16>
    %26 = vector.extract_strided_slice %4 {offsets = [0, 128], sizes = [128, 128], strides = [1, 1]} : vector<128x384xbf16> to vector<128x128xbf16>
    %27 = vector.extract_strided_slice %4 {offsets = [0, 256], sizes = [128, 128], strides = [1, 1]} : vector<128x384xbf16> to vector<128x128xbf16>
    %c0_17 = arith.constant 0 : index
    %c0_18 = arith.constant 0 : index
    %c0_19 = arith.constant 0 : index
    %28 = vector.load %arg7[%c0_17, %c0_18, %c0_19] : memref<1x1x128xf32, #tpu.memory_space<vmem>>, vector<1x1x128xf32>
    %29 = vector.shape_cast %28 : vector<1x1x128xf32> to vector<1x128xf32>
    %30 = vector.extract_strided_slice %17 {offsets = [0, 0], sizes = [128, 32], strides = [1, 1]} : vector<128x128xbf16> to vector<128x32xbf16>
    %31 = vector.extract_strided_slice %26 {offsets = [0, 0], sizes = [128, 32], strides = [1, 1]} : vector<128x128xbf16> to vector<128x32xbf16>
    %cst_20 = arith.constant dense<0.000000e+00> : vector<128x128xf32>
    %32 = tpu.matmul %30, %31, %cst_20 {dimension_numbers = #tpu.dot_dimension_numbers<[1], [1], [0], [0], [0, 0, 1, 0], [], []>} : vector<128x32xbf16>, vector<128x32xbf16>, vector<128x128xf32> -> vector<128x128xf32>
    %33 = vector.extract_strided_slice %25 {offsets = [0, 0], sizes = [128, 32], strides = [1, 1]} : vector<128x128xbf16> to vector<128x32xbf16>
    %34 = vector.extract_strided_slice %8 {offsets = [0, 0], sizes = [256, 32], strides = [1, 1]} : vector<256x128xbf16> to vector<256x32xbf16>
    %cst_21 = arith.constant dense<0.000000e+00> : vector<128x256xf32>
    %35 = tpu.matmul %33, %34, %cst_21 {dimension_numbers = #tpu.dot_dimension_numbers<[1], [1], [0], [0], [0, 0, 1, 0], [], []>} : vector<128x32xbf16>, vector<256x32xbf16>, vector<128x256xf32> -> vector<128x256xf32>
    %c128_i32 = arith.constant 128 : i32
    %36 = tpu.dynamic_rotate %35 by %c128_i32 dim 1 {stride = 1 : si32, stride_dimension = 0 : si32} : vector<128x256xf32>, i32 -> vector<128x256xf32>
    %37 = vector.extract_strided_slice %36 {offsets = [0, 0], sizes = [128, 128], strides = [1, 1]} : vector<128x256xf32> to vector<128x128xf32>
    %38 = arith.addf %32, %37 : vector<128x128xf32>
    %39 = vector.broadcast %29 : vector<1x128xf32> to vector<128x128xf32>
    %40 = arith.addf %38, %39 : vector<128x128xf32>
    %cst_22 = arith.constant dense<0xFF800000> : vector<128xf32>
    %41 = vector.multi_reduction <maximumf>, %40, %cst_22 [1] : vector<128x128xf32> to vector<128xf32>
    %42 = vector.shape_cast %41 : vector<128xf32> to vector<128x1xf32>
    %43 = vector.broadcast %42 : vector<128x1xf32> to vector<128x128xf32>
    %44 = arith.subf %40, %43 : vector<128x128xf32>
    %45 = math.exp %44 : vector<128x128xf32>
    %cst_23 = arith.constant dense<0.000000e+00> : vector<128xf32>
    %46 = vector.multi_reduction <add>, %45, %cst_23 [1] : vector<128x128xf32> to vector<128xf32>
    %47 = vector.shape_cast %46 : vector<128xf32> to vector<128x1xf32>
    %48 = tpu.reciprocal %47 {approx = true} : vector<128x1xf32> -> vector<128x1xf32>
    %49 = vector.broadcast %48 : vector<128x1xf32> to vector<128x128xf32>
    %50 = arith.mulf %45, %49 : vector<128x128xf32>
    %51 = arith.truncf %50 : vector<128x128xf32> to vector<128x128xbf16>
    %52 = vector.extract_strided_slice %27 {offsets = [0, 0], sizes = [128, 32], strides = [1, 1]} : vector<128x128xbf16> to vector<128x32xbf16>
    %cst_24 = arith.constant dense<0.000000e+00> : vector<128x32xf32>
    %53 = tpu.matmul %51, %52, %cst_24 {dimension_numbers = #tpu.dot_dimension_numbers<[1], [0], [0], [1], [0, 0, 1, 1], [], []>} : vector<128x128xbf16>, vector<128x32xbf16>, vector<128x32xf32> -> vector<128x32xf32>
    %54 = arith.truncf %53 : vector<128x32xf32> to vector<128x32xbf16>
    %c0_25 = arith.constant 0 : index
    %c0_26 = arith.constant 0 : index
    %55 = vector.load %arg18[%c0_25, %c0_26] : memref<128x128xbf16, #tpu.memory_space<vmem>>, vector<128x32xbf16>
    tpu.vector_store %arg18[%c0_25, %c0_26], %54 {strides = array<i32>} : memref<128x128xbf16, #tpu.memory_space<vmem>>, vector<128x32xbf16>,
    %56 = vector.extract_strided_slice %17 {offsets = [0, 32], sizes = [128, 32], strides = [1, 1]} : vector<128x128xbf16> to vector<128x32xbf16>
    %57 = vector.extract_strided_slice %26 {offsets = [0, 32], sizes = [128, 32], strides = [1, 1]} : vector<128x128xbf16> to vector<128x32xbf16>
    %cst_27 = arith.constant dense<0.000000e+00> : vector<128x128xf32>
    %58 = tpu.matmul %56, %57, %cst_27 {dimension_numbers = #tpu.dot_dimension_numbers<[1], [1], [0], [0], [0, 0, 1, 0], [], []>} : vector<128x32xbf16>, vector<128x32xbf16>, vector<128x128xf32> -> vector<128x128xf32>
    %59 = vector.extract_strided_slice %25 {offsets = [0, 32], sizes = [128, 32], strides = [1, 1]} : vector<128x128xbf16> to vector<128x32xbf16>
    %60 = vector.extract_strided_slice %8 {offsets = [0, 32], sizes = [256, 32], strides = [1, 1]} : vector<256x128xbf16> to vector<256x32xbf16>
    %cst_28 = arith.constant dense<0.000000e+00> : vector<128x256xf32>
    %61 = tpu.matmul %59, %60, %cst_28 {dimension_numbers = #tpu.dot_dimension_numbers<[1], [1], [0], [0], [0, 0, 1, 0], [], []>} : vector<128x32xbf16>, vector<256x32xbf16>, vector<128x256xf32> -> vector<128x256xf32>
    %c128_i32_29 = arith.constant 128 : i32
    %62 = tpu.dynamic_rotate %61 by %c128_i32_29 dim 1 {stride = 1 : si32, stride_dimension = 0 : si32} : vector<128x256xf32>, i32 -> vector<128x256xf32>
    %63 = vector.extract_strided_slice %62 {offsets = [0, 0], sizes = [128, 128], strides = [1, 1]} : vector<128x256xf32> to vector<128x128xf32>
    %64 = arith.addf %58, %63 : vector<128x128xf32>
    %65 = vector.broadcast %29 : vector<1x128xf32> to vector<128x128xf32>
    %66 = arith.addf %64, %65 : vector<128x128xf32>
    %cst_30 = arith.constant dense<0xFF800000> : vector<128xf32>
    %67 = vector.multi_reduction <maximumf>, %66, %cst_30 [1] : vector<128x128xf32> to vector<128xf32>
    %68 = vector.shape_cast %67 : vector<128xf32> to vector<128x1xf32>
    %69 = vector.broadcast %68 : vector<128x1xf32> to vector<128x128xf32>
    %70 = arith.subf %66, %69 : vector<128x128xf32>
    %71 = math.exp %70 : vector<128x128xf32>
    %cst_31 = arith.constant dense<0.000000e+00> : vector<128xf32>
    %72 = vector.multi_reduction <add>, %71, %cst_31 [1] : vector<128x128xf32> to vector<128xf32>
    %73 = vector.shape_cast %72 : vector<128xf32> to vector<128x1xf32>
    %74 = tpu.reciprocal %73 {approx = true} : vector<128x1xf32> -> vector<128x1xf32>
    %75 = vector.broadcast %74 : vector<128x1xf32> to vector<128x128xf32>
    %76 = arith.mulf %71, %75 : vector<128x128xf32>
    %77 = arith.truncf %76 : vector<128x128xf32> to vector<128x128xbf16>
    %78 = vector.extract_strided_slice %27 {offsets = [0, 32], sizes = [128, 32], strides = [1, 1]} : vector<128x128xbf16> to vector<128x32xbf16>
    %cst_32 = arith.constant dense<0.000000e+00> : vector<128x32xf32>
    %79 = tpu.matmul %77, %78, %cst_32 {dimension_numbers = #tpu.dot_dimension_numbers<[1], [0], [0], [1], [0, 0, 1, 1], [], []>} : vector<128x128xbf16>, vector<128x32xbf16>, vector<128x32xf32> -> vector<128x32xf32>
    %80 = arith.truncf %79 : vector<128x32xf32> to vector<128x32xbf16>
    %c0_33 = arith.constant 0 : index
    %c32 = arith.constant 32 : index
    %81 = vector.load %arg18[%c0_33, %c32] : memref<128x128xbf16, #tpu.memory_space<vmem>>, vector<128x32xbf16>
    tpu.vector_store %arg18[%c0_33, %c32], %80 {strides = array<i32>} : memref<128x128xbf16, #tpu.memory_space<vmem>>, vector<128x32xbf16>,
    %82 = vector.extract_strided_slice %17 {offsets = [0, 64], sizes = [128, 32], strides = [1, 1]} : vector<128x128xbf16> to vector<128x32xbf16>
    %83 = vector.extract_strided_slice %26 {offsets = [0, 64], sizes = [128, 32], strides = [1, 1]} : vector<128x128xbf16> to vector<128x32xbf16>
    %cst_34 = arith.constant dense<0.000000e+00> : vector<128x128xf32>
    %84 = tpu.matmul %82, %83, %cst_34 {dimension_numbers = #tpu.dot_dimension_numbers<[1], [1], [0], [0], [0, 0, 1, 0], [], []>} : vector<128x32xbf16>, vector<128x32xbf16>, vector<128x128xf32> -> vector<128x128xf32>
    %85 = vector.extract_strided_slice %25 {offsets = [0, 64], sizes = [128, 32], strides = [1, 1]} : vector<128x128xbf16> to vector<128x32xbf16>
    %86 = vector.extract_strided_slice %8 {offsets = [0, 64], sizes = [256, 32], strides = [1, 1]} : vector<256x128xbf16> to vector<256x32xbf16>
    %cst_35 = arith.constant dense<0.000000e+00> : vector<128x256xf32>
    %87 = tpu.matmul %85, %86, %cst_35 {dimension_numbers = #tpu.dot_dimension_numbers<[1], [1], [0], [0], [0, 0, 1, 0], [], []>} : vector<128x32xbf16>, vector<256x32xbf16>, vector<128x256xf32> -> vector<128x256xf32>
    %c128_i32_36 = arith.constant 128 : i32
    %88 = tpu.dynamic_rotate %87 by %c128_i32_36 dim 1 {stride = 1 : si32, stride_dimension = 0 : si32} : vector<128x256xf32>, i32 -> vector<128x256xf32>
    %89 = vector.extract_strided_slice %88 {offsets = [0, 0], sizes = [128, 128], strides = [1, 1]} : vector<128x256xf32> to vector<128x128xf32>
    %90 = arith.addf %84, %89 : vector<128x128xf32>
    %91 = vector.broadcast %29 : vector<1x128xf32> to vector<128x128xf32>
    %92 = arith.addf %90, %91 : vector<128x128xf32>
    %cst_37 = arith.constant dense<0xFF800000> : vector<128xf32>
    %93 = vector.multi_reduction <maximumf>, %92, %cst_37 [1] : vector<128x128xf32> to vector<128xf32>
    %94 = vector.shape_cast %93 : vector<128xf32> to vector<128x1xf32>
    %95 = vector.broadcast %94 : vector<128x1xf32> to vector<128x128xf32>
    %96 = arith.subf %92, %95 : vector<128x128xf32>
    %97 = math.exp %96 : vector<128x128xf32>
    %cst_38 = arith.constant dense<0.000000e+00> : vector<128xf32>
    %98 = vector.multi_reduction <add>, %97, %cst_38 [1] : vector<128x128xf32> to vector<128xf32>
    %99 = vector.shape_cast %98 : vector<128xf32> to vector<128x1xf32>
    %100 = tpu.reciprocal %99 {approx = true} : vector<128x1xf32> -> vector<128x1xf32>
    %101 = vector.broadcast %100 : vector<128x1xf32> to vector<128x128xf32>
    %102 = arith.mulf %97, %101 : vector<128x128xf32>
    %103 = arith.truncf %102 : vector<128x128xf32> to vector<128x128xbf16>
    %104 = vector.extract_strided_slice %27 {offsets = [0, 64], sizes = [128, 32], strides = [1, 1]} : vector<128x128xbf16> to vector<128x32xbf16>
    %cst_39 = arith.constant dense<0.000000e+00> : vector<128x32xf32>
    %105 = tpu.matmul %103, %104, %cst_39 {dimension_numbers = #tpu.dot_dimension_numbers<[1], [0], [0], [1], [0, 0, 1, 1], [], []>} : vector<128x128xbf16>, vector<128x32xbf16>, vector<128x32xf32> -> vector<128x32xf32>
    %106 = arith.truncf %105 : vector<128x32xf32> to vector<128x32xbf16>
    %c0_40 = arith.constant 0 : index
    %c64 = arith.constant 64 : index
    %107 = vector.load %arg18[%c0_40, %c64] : memref<128x128xbf16, #tpu.memory_space<vmem>>, vector<128x32xbf16>
    tpu.vector_store %arg18[%c0_40, %c64], %106 {strides = array<i32>} : memref<128x128xbf16, #tpu.memory_space<vmem>>, vector<128x32xbf16>,
    %108 = vector.extract_strided_slice %17 {offsets = [0, 96], sizes = [128, 32], strides = [1, 1]} : vector<128x128xbf16> to vector<128x32xbf16>
    %109 = vector.extract_strided_slice %26 {offsets = [0, 96], sizes = [128, 32], strides = [1, 1]} : vector<128x128xbf16> to vector<128x32xbf16>
    %cst_41 = arith.constant dense<0.000000e+00> : vector<128x128xf32>
    %110 = tpu.matmul %108, %109, %cst_41 {dimension_numbers = #tpu.dot_dimension_numbers<[1], [1], [0], [0], [0, 0, 1, 0], [], []>} : vector<128x32xbf16>, vector<128x32xbf16>, vector<128x128xf32> -> vector<128x128xf32>
    %111 = vector.extract_strided_slice %25 {offsets = [0, 96], sizes = [128, 32], strides = [1, 1]} : vector<128x128xbf16> to vector<128x32xbf16>
    %112 = vector.extract_strided_slice %8 {offsets = [0, 96], sizes = [256, 32], strides = [1, 1]} : vector<256x128xbf16> to vector<256x32xbf16>
    %cst_42 = arith.constant dense<0.000000e+00> : vector<128x256xf32>
    %113 = tpu.matmul %111, %112, %cst_42 {dimension_numbers = #tpu.dot_dimension_numbers<[1], [1], [0], [0], [0, 0, 1, 0], [], []>} : vector<128x32xbf16>, vector<256x32xbf16>, vector<128x256xf32> -> vector<128x256xf32>
    %c128_i32_43 = arith.constant 128 : i32
    %114 = tpu.dynamic_rotate %113 by %c128_i32_43 dim 1 {stride = 1 : si32, stride_dimension = 0 : si32} : vector<128x256xf32>, i32 -> vector<128x256xf32>
    %115 = vector.extract_strided_slice %114 {offsets = [0, 0], sizes = [128, 128], strides = [1, 1]} : vector<128x256xf32> to vector<128x128xf32>
    %116 = arith.addf %110, %115 : vector<128x128xf32>
    %117 = vector.broadcast %29 : vector<1x128xf32> to vector<128x128xf32>
    %118 = arith.addf %116, %117 : vector<128x128xf32>
    %cst_44 = arith.constant dense<0xFF800000> : vector<128xf32>
    %119 = vector.multi_reduction <maximumf>, %118, %cst_44 [1] : vector<128x128xf32> to vector<128xf32>
    %120 = vector.shape_cast %119 : vector<128xf32> to vector<128x1xf32>
    %121 = vector.broadcast %120 : vector<128x1xf32> to vector<128x128xf32>
    %122 = arith.subf %118, %121 : vector<128x128xf32>
    %123 = math.exp %122 : vector<128x128xf32>
    %cst_45 = arith.constant dense<0.000000e+00> : vector<128xf32>
    %124 = vector.multi_reduction <add>, %123, %cst_45 [1] : vector<128x128xf32> to vector<128xf32>
    %125 = vector.shape_cast %124 : vector<128xf32> to vector<128x1xf32>
    %126 = tpu.reciprocal %125 {approx = true} : vector<128x1xf32> -> vector<128x1xf32>
    %127 = vector.broadcast %126 : vector<128x1xf32> to vector<128x128xf32>
    %128 = arith.mulf %123, %127 : vector<128x128xf32>
    %129 = arith.truncf %128 : vector<128x128xf32> to vector<128x128xbf16>
    %130 = vector.extract_strided_slice %27 {offsets = [0, 96], sizes = [128, 32], strides = [1, 1]} : vector<128x128xbf16> to vector<128x32xbf16>
    %cst_46 = arith.constant dense<0.000000e+00> : vector<128x32xf32>
    %131 = tpu.matmul %129, %130, %cst_46 {dimension_numbers = #tpu.dot_dimension_numbers<[1], [0], [0], [1], [0, 0, 1, 1], [], []>} : vector<128x128xbf16>, vector<128x32xbf16>, vector<128x32xf32> -> vector<128x32xf32>
    %132 = arith.truncf %131 : vector<128x32xf32> to vector<128x32xbf16>
    %c0_47 = arith.constant 0 : index
    %c96 = arith.constant 96 : index
    %133 = vector.load %arg18[%c0_47, %c96] : memref<128x128xbf16, #tpu.memory_space<vmem>>, vector<128x32xbf16>
    tpu.vector_store %arg18[%c0_47, %c96], %132 {strides = array<i32>} : memref<128x128xbf16, #tpu.memory_space<vmem>>, vector<128x32xbf16>,
    %c0_48 = arith.constant 0 : index
    %c0_49 = arith.constant 0 : index
    %134 = vector.load %arg18[%c0_48, %c0_49] : memref<128x128xbf16, #tpu.memory_space<vmem>>, vector<128x128xbf16>
    %c0_50 = arith.constant 0 : index
    %c0_51 = arith.constant 0 : index
    %135 = vector.load %arg8[%c0_50, %c0_51] : memref<128x128xbf16, #tpu.memory_space<vmem>>, vector<128x128xbf16>
    %cst_52 = arith.constant dense<0.000000e+00> : vector<128x128xf32>
    %136 = tpu.matmul %134, %135, %cst_52 {dimension_numbers = #tpu.dot_dimension_numbers<[1], [0], [0], [1], [0, 0, 1, 1], [], []>} : vector<128x128xbf16>, vector<128x128xbf16>, vector<128x128xf32> -> vector<128x128xf32>
    %137 = arith.extf %1 : vector<128x128xbf16> to vector<128x128xf32>
    %138 = arith.addf %136, %137 : vector<128x128xf32>
    %c0_53 = arith.constant 0 : index
    %c0_54 = arith.constant 0 : index
    %139 = vector.load %arg9[%c0_53, %c0_54] : memref<1x128xf32, #tpu.memory_space<vmem>>, vector<1x128xf32>
    %c0_55 = arith.constant 0 : index
    %c0_56 = arith.constant 0 : index
    %140 = vector.load %arg10[%c0_55, %c0_56] : memref<1x128xf32, #tpu.memory_space<vmem>>, vector<1x128xf32>
    %cst_57 = arith.constant dense<0.000000e+00> : vector<128xf32>
    %141 = vector.multi_reduction <add>, %138, %cst_57 [1] : vector<128x128xf32> to vector<128xf32>
    %142 = vector.shape_cast %141 : vector<128xf32> to vector<128x1xf32>
    %cst_58 = arith.constant 1.280000e+02 : f32
    %143 = vector.broadcast %cst_58 : f32 to vector<128x1xf32>
    %144 = arith.divf %142, %143 : vector<128x1xf32>
    %145 = vector.broadcast %144 : vector<128x1xf32> to vector<128x128xf32>
    %146 = arith.subf %138, %145 : vector<128x128xf32>
    %147 = arith.mulf %146, %146 : vector<128x128xf32>
    %cst_59 = arith.constant dense<0.000000e+00> : vector<128xf32>
    %148 = vector.multi_reduction <add>, %147, %cst_59 [1] : vector<128x128xf32> to vector<128xf32>
    %149 = vector.shape_cast %148 : vector<128xf32> to vector<128x1xf32>
    %cst_60 = arith.constant 1.280000e+02 : f32
    %150 = vector.broadcast %cst_60 : f32 to vector<128x1xf32>
    %151 = arith.divf %149, %150 : vector<128x1xf32>
    %cst_61 = arith.constant 9.99999996E-13 : f32
    %152 = vector.broadcast %cst_61 : f32 to vector<128x1xf32>
    %153 = arith.addf %151, %152 : vector<128x1xf32>
    %154 = math.rsqrt %153 : vector<128x1xf32>
    %155 = vector.broadcast %154 : vector<128x1xf32> to vector<128x128xf32>
    %156 = arith.mulf %146, %155 : vector<128x128xf32>
    %157 = vector.broadcast %139 : vector<1x128xf32> to vector<128x128xf32>
    %158 = arith.mulf %156, %157 : vector<128x128xf32>
    %159 = vector.broadcast %140 : vector<1x128xf32> to vector<128x128xf32>
    %160 = arith.addf %158, %159 : vector<128x128xf32>
    %161 = arith.truncf %160 : vector<128x128xf32> to vector<128x128xbf16>
    %c0_62 = arith.constant 0 : index
    %c0_63 = arith.constant 0 : index
    %162 = vector.load %arg11[%c0_62, %c0_63] : memref<128x256xbf16, #tpu.memory_space<vmem>>, vector<128x256xbf16>
    %cst_64 = arith.constant dense<0.000000e+00> : vector<128x256xf32>
    %163 = tpu.matmul %161, %162, %cst_64 {dimension_numbers = #tpu.dot_dimension_numbers<[1], [0], [0], [1], [0, 0, 1, 1], [], []>} : vector<128x128xbf16>, vector<128x256xbf16>, vector<128x256xf32> -> vector<128x256xf32>
    %164 = arith.truncf %163 : vector<128x256xf32> to vector<128x256xbf16>
    %c0_65 = arith.constant 0 : index
    %c0_66 = arith.constant 0 : index
    %165 = vector.load %arg12[%c0_65, %c0_66] : memref<1x256xf32, #tpu.memory_space<vmem>>, vector<1x256xf32>
    %166 = arith.truncf %165 : vector<1x256xf32> to vector<1x256xbf16>
    %167 = vector.broadcast %166 : vector<1x256xbf16> to vector<128x256xbf16>
    %168 = arith.addf %164, %167 : vector<128x256xbf16>
    %169 = arith.mulf %168, %168 : vector<128x256xbf16>
    %170 = arith.mulf %168, %169 : vector<128x256xbf16>
    %cst_67 = arith.constant 4.467770e-02 : bf16
    %171 = vector.broadcast %cst_67 : bf16 to vector<128x256xbf16>
    %172 = arith.mulf %171, %170 : vector<128x256xbf16>
    %173 = arith.addf %168, %172 : vector<128x256xbf16>
    %cst_68 = arith.constant 7.968750e-01 : bf16
    %174 = vector.broadcast %cst_68 : bf16 to vector<128x256xbf16>
    %175 = arith.mulf %174, %173 : vector<128x256xbf16>
    %176 = math.tanh %175 : vector<128x256xbf16>
    %cst_69 = arith.constant 1.000000e+00 : bf16
    %177 = vector.broadcast %cst_69 : bf16 to vector<128x256xbf16>
    %178 = arith.addf %177, %176 : vector<128x256xbf16>
    %cst_70 = arith.constant 5.000000e-01 : bf16
    %179 = vector.broadcast %cst_70 : bf16 to vector<128x256xbf16>
    %180 = arith.mulf %179, %178 : vector<128x256xbf16>
    %181 = arith.mulf %168, %180 : vector<128x256xbf16>
    %c0_71 = arith.constant 0 : index
    %c0_72 = arith.constant 0 : index
    %182 = vector.load %arg13[%c0_71, %c0_72] : memref<256x128xbf16, #tpu.memory_space<vmem>>, vector<256x128xbf16>
    %cst_73 = arith.constant dense<0.000000e+00> : vector<128x128xf32>
    %183 = tpu.matmul %181, %182, %cst_73 {dimension_numbers = #tpu.dot_dimension_numbers<[1], [0], [0], [1], [0, 0, 1, 1], [], []>} : vector<128x256xbf16>, vector<256x128xbf16>, vector<128x128xf32> -> vector<128x128xf32>
    %c0_74 = arith.constant 0 : index
    %c0_75 = arith.constant 0 : index
    %184 = vector.load %arg14[%c0_74, %c0_75] : memref<1x128xf32, #tpu.memory_space<vmem>>, vector<1x128xf32>
    %185 = vector.broadcast %184 : vector<1x128xf32> to vector<128x128xf32>
    %186 = arith.addf %183, %185 : vector<128x128xf32>
    %187 = arith.addf %186, %160 : vector<128x128xf32>
    %c0_76 = arith.constant 0 : index
    %c0_77 = arith.constant 0 : index
    %188 = vector.load %arg15[%c0_76, %c0_77] : memref<1x128xf32, #tpu.memory_space<vmem>>, vector<1x128xf32>
    %c0_78 = arith.constant 0 : index
    %c0_79 = arith.constant 0 : index
    %189 = vector.load %arg16[%c0_78, %c0_79] : memref<1x128xf32, #tpu.memory_space<vmem>>, vector<1x128xf32>
    %cst_80 = arith.constant dense<0.000000e+00> : vector<128xf32>
    %190 = vector.multi_reduction <add>, %187, %cst_80 [1] : vector<128x128xf32> to vector<128xf32>
    %191 = vector.shape_cast %190 : vector<128xf32> to vector<128x1xf32>
    %cst_81 = arith.constant 1.280000e+02 : f32
    %192 = vector.broadcast %cst_81 : f32 to vector<128x1xf32>
    %193 = arith.divf %191, %192 : vector<128x1xf32>
    %194 = vector.broadcast %193 : vector<128x1xf32> to vector<128x128xf32>
    %195 = arith.subf %187, %194 : vector<128x128xf32>
    %196 = arith.mulf %195, %195 : vector<128x128xf32>
    %cst_82 = arith.constant dense<0.000000e+00> : vector<128xf32>
    %197 = vector.multi_reduction <add>, %196, %cst_82 [1] : vector<128x128xf32> to vector<128xf32>
    %198 = vector.shape_cast %197 : vector<128xf32> to vector<128x1xf32>
    %cst_83 = arith.constant 1.280000e+02 : f32
    %199 = vector.broadcast %cst_83 : f32 to vector<128x1xf32>
    %200 = arith.divf %198, %199 : vector<128x1xf32>
    %cst_84 = arith.constant 9.99999996E-13 : f32
    %201 = vector.broadcast %cst_84 : f32 to vector<128x1xf32>
    %202 = arith.addf %200, %201 : vector<128x1xf32>
    %203 = math.rsqrt %202 : vector<128x1xf32>
    %204 = vector.broadcast %203 : vector<128x1xf32> to vector<128x128xf32>
    %205 = arith.mulf %195, %204 : vector<128x128xf32>
    %206 = vector.broadcast %188 : vector<1x128xf32> to vector<128x128xf32>
    %207 = arith.mulf %205, %206 : vector<128x128xf32>
    %208 = vector.broadcast %189 : vector<1x128xf32> to vector<128x128xf32>
    %209 = arith.addf %207, %208 : vector<128x128xf32>
    %210 = arith.truncf %209 : vector<128x128xf32> to vector<128x128xbf16>
    %c0_85 = arith.constant 0 : index
    %c0_86 = arith.constant 0 : index
    %c0_87 = arith.constant 0 : index
    %211 = vector.load %arg17[%c0_85, %c0_86, %c0_87] : memref<1x128x128xbf16, #tpu.memory_space<vmem>>, vector<1x128x128xbf16>
    %212 = vector.shape_cast %211 : vector<1x128x128xbf16> to vector<128x128xbf16>
    %213 = vector.shape_cast %210 : vector<128x128xbf16> to vector<1x128x128xbf16>
    tpu.vector_store %arg17[%c0_85, %c0_86, %c0_87], %213 {strides = array<i32>} : memref<1x128x128xbf16, #tpu.memory_space<vmem>>, vector<1x128x128xbf16>,
    return
  }
  func.func @transform_0(%arg0: i32) -> (i32, i32, i32) {
    %c0_i32 = arith.constant 0 : i32
    %c0_i32_0 = arith.constant 0 : i32
    %c0_i32_1 = arith.constant 0 : i32
    return %arg0, %c0_i32, %c0_i32_0 : i32, i32, i32
  }
  func.func @transform_1(%arg0: i32) -> (i32, i32) {
    %c0_i32 = arith.constant 0 : i32
    %c0_i32_0 = arith.constant 0 : i32
    %c0_i32_1 = arith.constant 0 : i32
    return %c0_i32, %c0_i32_0 : i32, i32
  }
  func.func @transform_2(%arg0: i32) -> (i32, i32) {
    %c0_i32 = arith.constant 0 : i32
    %c0_i32_0 = arith.constant 0 : i32
    %c0_i32_1 = arith.constant 0 : i32
    return %c0_i32, %c0_i32_0 : i32, i32
  }
  func.func @transform_3(%arg0: i32) -> (i32, i32) {
    %c0_i32 = arith.constant 0 : i32
    %c0_i32_0 = arith.constant 0 : i32
    %c0_i32_1 = arith.constant 0 : i32
    return %c0_i32, %c0_i32_0 : i32, i32
  }
  func.func @transform_4(%arg0: i32) -> (i32, i32) {
    %c0_i32 = arith.constant 0 : i32
    %c0_i32_0 = arith.constant 0 : i32
    %c0_i32_1 = arith.constant 0 : i32
    return %c0_i32, %c0_i32_0 : i32, i32
  }
  func.func @transform_5(%arg0: i32) -> (i32, i32) {
    %c0_i32 = arith.constant 0 : i32
    %c0_i32_0 = arith.constant 0 : i32
    %c0_i32_1 = arith.constant 0 : i32
    return %c0_i32, %c0_i32_0 : i32, i32
  }
  func.func @transform_6(%arg0: i32) -> (i32, i32, i32) {
    %c0_i32 = arith.constant 0 : i32
    %c0_i32_0 = arith.constant 0 : i32
    %c0_i32_1 = arith.constant 0 : i32
    return %arg0, %c0_i32, %c0_i32_0 : i32, i32, i32
  }
  func.func @transform_7(%arg0: i32) -> (i32, i32) {
    %c0_i32 = arith.constant 0 : i32
    %c0_i32_0 = arith.constant 0 : i32
    %c0_i32_1 = arith.constant 0 : i32
    return %c0_i32, %c0_i32_0 : i32, i32
  }
  func.func @transform_8(%arg0: i32) -> (i32, i32) {
    %c0_i32 = arith.constant 0 : i32
    %c0_i32_0 = arith.constant 0 : i32
    %c0_i32_1 = arith.constant 0 : i32
    return %c0_i32, %c0_i32_0 : i32, i32
  }
  func.func @transform_9(%arg0: i32) -> (i32, i32) {
    %c0_i32 = arith.constant 0 : i32
    %c0_i32_0 = arith.constant 0 : i32
    %c0_i32_1 = arith.constant 0 : i32
    return %c0_i32, %c0_i32_0 : i32, i32
  }
  func.func @transform_10(%arg0: i32) -> (i32, i32) {
    %c0_i32 = arith.constant 0 : i32
    %c0_i32_0 = arith.constant 0 : i32
    %c0_i32_1 = arith.constant 0 : i32
    return %c0_i32, %c0_i32_0 : i32, i32
  }
  func.func @transform_11(%arg0: i32) -> (i32, i32) {
    %c0_i32 = arith.constant 0 : i32
    %c0_i32_0 = arith.constant 0 : i32
    %c0_i32_1 = arith.constant 0 : i32
    return %c0_i32, %c0_i32_0 : i32, i32
  }
  func.func @transform_12(%arg0: i32) -> (i32, i32) {
    %c0_i32 = arith.constant 0 : i32
    %c0_i32_0 = arith.constant 0 : i32
    %c0_i32_1 = arith.constant 0 : i32
    return %c0_i32, %c0_i32_0 : i32, i32
  }
  func.func @transform_13(%arg0: i32) -> (i32, i32) {
    %c0_i32 = arith.constant 0 : i32
    %c0_i32_0 = arith.constant 0 : i32
    %c0_i32_1 = arith.constant 0 : i32
    return %c0_i32, %c0_i32_0 : i32, i32
  }
  func.func @transform_14(%arg0: i32) -> (i32, i32) {
    %c0_i32 = arith.constant 0 : i32
    %c0_i32_0 = arith.constant 0 : i32
    %c0_i32_1 = arith.constant 0 : i32
    return %c0_i32, %c0_i32_0 : i32, i32
  }
  func.func @transform_15(%arg0: i32) -> (i32, i32) {
    %c0_i32 = arith.constant 0 : i32
    %c0_i32_0 = arith.constant 0 : i32
    %c0_i32_1 = arith.constant 0 : i32
    return %c0_i32, %c0_i32_0 : i32, i32
  }
  func.func @transform_16(%arg0: i32) -> (i32, i32, i32) {
    %c0_i32 = arith.constant 0 : i32
    %c0_i32_0 = arith.constant 0 : i32
    %c0_i32_1 = arith.constant 0 : i32
    return %arg0, %c0_i32, %c0_i32_0 : i32, i32, i32
  }
}

</mosaic_0001>

<bundles_post_ra>
// kernel: xlnet_for_multilabel_forward.5
= control target key start
LH: loop header
LB: loop body
LE: loop exit
PB: predicated region body
PF: predicated region fallthrough
CT: control target
= control target key end

     0   :  { %v413_v1 = vmov 0.0   ;;  %vm414_vm0 = vmmov 0   ;;  %s523_s0 = inlined_call_operand.vmem [shape: bf16[2,128,128], index: 0, kind: input, shape index: {}]   ;;  %s524_s1 = inlined_call_operand.vmem [shape: bf16[128,128], index: 1, kind: input, shape index: {}]   ;;  %s525_s2 = inlined_call_operand.vmem [shape: f32[1,128], index: 2, kind: input, shape index: {}]   ;;  %s526_s3 = inlined_call_operand.hbm [shape: f32[2,128], index: 3, kind: output, shape index: {}]  }
   0x1   :  { %v381_v0 = vld [vmem:[%s524_s1] sm:$0xff]   ;;  %358 = vmatprep.subr.bf16.mxu0 %v413_v1  ;;  %v382_v2 = vld [vmem:[%s524_s1 + $0x8] sm:$0xff]   ;;  %374 = vmatprep.mubr.msk.bf16.mxu0 %vm414_vm0, %v413_v1  ;;  %v383_v3 = vld [vmem:[%s524_s1 + $0x10] sm:$0xff]  }
   0x2   :  { %359 = vmatpush3.bf16.msra.mxu0 %v381_v0  ;;  %v384_v4 = vld [vmem:[%s524_s1 + $0x18] sm:$0xff]   ;;  %v271_v5 = vld [vmem:[%s523_s0] sm:$0xff]   ;;  %v334_v7 = vld [vmem:[%s523_s0 + $0x8] sm:$0xff]  }
   0x3   :  { %360 = vmatprep.subr.bf16.mxu0 %v413_v1  ;;  %v341_v6 = vld [vmem:[%s523_s0 + $0x40] sm:$0xff]   ;;  %v342_v8 = vld [vmem:[%s523_s0 + $0x48] sm:$0xff]   ;;  %v272_v9 = vunpack.c.l.bf16 %v271_v5  ;;  %v273_v10 = vunpack.c.h.bf16 %v271_v5 }
   0x4   :  { %v304_v11 = vunpack.c.l.bf16 %v341_v6  ;;  %v305_v12 = vunpack.c.h.bf16 %v341_v6 }
   0x6   :  { %361 = vmatpush3.bf16.msra.mxu0 %v382_v2 }
   0x7   :  { %362 = vmatprep.subr.bf16.mxu0 %v413_v1 }
   0xa   :  { %363 = vmatpush3.bf16.msra.mxu0 %v383_v3 }
   0xb   :  { %364 = vmatprep.subr.bf16.mxu0 %v413_v1 }
   0xc   :  { %8 = vsyncpa [#allocation3], 0  ;;  %v385_v13 = vld [vmem:[%s524_s1 + $0x20] sm:$0xff]   ;;  %v276_v14 = vunpack.c.l.bf16 %v334_v7  ;;  %v308_v15 = vunpack.c.l.bf16 %v342_v8  ;;  %v335_v16 = vld [vmem:[%s523_s0 + $0x10] sm:$0xff]   ;;  %v277_v18 = vunpack.c.h.bf16 %v334_v7  ;;  %v309_v19 = vunpack.c.h.bf16 %v342_v8  ;;  %s415_s6 = smov [#allocation2]  }
   0xd   :  { %v343_v17 = vld [vmem:[%s523_s0 + $0x50] sm:$0xff]   ;;  %v80_v20 = vadd.f32 %v273_v10, %v272_v9  ;;  %v101_v21 = vadd.f32 %v305_v12, %v304_v11  ;;  %v386_v22 = vld [vmem:[%s524_s1 + $0x28] sm:$0xff]   ;;  %v280_v23 = vunpack.c.l.bf16 %v335_v16  ;;  %v336_v27 = vld [vmem:[%s523_s0 + $0x18] sm:$0xff]   ;;  %v281_v29 = vunpack.c.h.bf16 %v335_v16  ;;  %s253_s7 = sshll.u32 %s415_s6, 4  ;;  %s254_s7 = int_to_ptr.vmem [resolvable:$true] %s253_s7 }
   0xe   :  { %365 = vmatpush3.bf16.msra.mxu0 %v384_v4  ;;  %v312_v24 = vunpack.c.l.bf16 %v343_v17  ;;  %v344_v28 = vld [vmem:[%s523_s0 + $0x58] sm:$0xff]   ;;  %v313_v30 = vunpack.c.h.bf16 %v343_v17  ;;  %v387_v33 = vld [vmem:[%s524_s1 + $0x30] sm:$0xff]   ;;  %v284_v34 = vunpack.c.l.bf16 %v336_v27  ;;  %v337_v38 = vld [vmem:[%s523_s0 + $0x20] sm:$0xff]   ;;  %v285_v40 = vunpack.c.h.bf16 %v336_v27  ;;  %s389_s8 = scalar_lea.vmem %s254_s7, 32  ;;  %p394_p1 = scmp.lt.s32.totalorder %s254_s7, %s254_s7 }
   0xf   :  { %366 = vmatprep.subr.bf16.mxu0 %v413_v1  ;;  %v81_v25 = vadd.f32 %v276_v14, %v80_v20  ;;  %v102_v26 = vadd.f32 %v308_v15, %v101_v21  ;;  %v316_v35 = vunpack.c.l.bf16 %v344_v28  ;;  %v345_v39 = vld [vmem:[%s523_s0 + $0x60] sm:$0xff]   ;;  %v317_v41 = vunpack.c.h.bf16 %v344_v28  ;;  %v388_v44 = vld [vmem:[%s524_s1 + $0x38] sm:$0xff]   ;;  %v338_v49 = vld [vmem:[%s523_s0 + $0x28] sm:$0xff]   ;;  %p390_p0 = scmp.ne.s32.totalorder %s254_s7, %s389_s8  ;;  %p395_p2 = scmp.lt.s32.totalorder %s389_s8, %s389_s8 }
  0x10   :  { %v288_v45 = vunpack.c.l.bf16 %v337_v38  ;;  %v320_v46 = vunpack.c.l.bf16 %v345_v39  ;;  %v346_v50 = vld [vmem:[%s523_s0 + $0x68] sm:$0xff]   ;;  %v289_v51 = vunpack.c.h.bf16 %v337_v38  ;;  %v321_v52 = vunpack.c.h.bf16 %v345_v39  ;;  %v339_v59 = vld [vmem:[%s523_s0 + $0x30] sm:$0xff]   ;;  %v340_v5 = vld [vmem:[%s523_s0 + $0x38] sm:$0xff]  }
  0x11   :  { %v82_v31 = vadd.f32 %v277_v18, %v81_v25  ;;  %v103_v32 = vadd.f32 %v309_v19, %v102_v26  ;;  %v292_v55 = vunpack.c.l.bf16 %v338_v49  ;;  %v324_v56 = vunpack.c.l.bf16 %v346_v50  ;;  %v347_v60 = vld [vmem:[%s523_s0 + $0x70] sm:$0xff]   ;;  %v348_v6 = vld [vmem:[%s523_s0 + $0x78] sm:$0xff]   ;;  %p396_p3 = por %p395_p2, %p394_p1 }
  0x12   :  { %367 = vmatpush3.bf16.msra.mxu0 %v385_v13  ;;  %v293_v61 = vunpack.c.h.bf16 %v338_v49  ;;  %v325_v62 = vunpack.c.h.bf16 %v346_v50  ;;  %v328_v2 = vunpack.c.l.bf16 %v347_v60  ;;  %v297_v7 = vunpack.c.h.bf16 %v339_v59 }
  0x13   :  { %368 = vmatprep.subr.bf16.mxu0 %v413_v1  ;;  %v83_v36 = vadd.f32 %v280_v23, %v82_v31  ;;  %v104_v37 = vadd.f32 %v312_v24, %v103_v32  ;;  %v329_v8 = vunpack.c.h.bf16 %v347_v60  ;;  %v300_v11 = vunpack.c.l.bf16 %v340_v5  ;;  %p397_p4 = pnand %p396_p3, %p390_p0 }
  0x14   :  { %v332_v12 = vunpack.c.l.bf16 %v348_v6  ;;  %v301_v15 = vunpack.c.h.bf16 %v340_v5  ;;  %v333_v16 = vunpack.c.h.bf16 %v348_v6  ;;  %vm154_vm1 = vcmask 1041409  }
  0x15   :  { %v84_v42 = vadd.f32 %v281_v29, %v83_v36  ;;  %v105_v43 = vadd.f32 %v313_v30, %v104_v37 }
  0x16   :  { %369 = vmatpush3.bf16.msra.mxu0 %v386_v22 }
  0x17   :  { %370 = vmatprep.subr.bf16.mxu0 %v413_v1  ;;  %v85_v47 = vadd.f32 %v284_v34, %v84_v42  ;;  %v106_v48 = vadd.f32 %v316_v35, %v105_v43  ;;  %v261_v43 = vld [vmem:[%s525_s2] ss:$0 sm:$0xff] }
  0x19   :  { %v86_v53 = vadd.f32 %v285_v40, %v85_v47  ;;  %v107_v54 = vadd.f32 %v317_v41, %v106_v48 }
  0x1a   :  { %371 = vmatpush3.bf16.msra.mxu0 %v387_v33 }
  0x1b   :  { %372 = vmatprep.subr.bf16.mxu0 %v413_v1  ;;  %v87_v57 = vadd.f32 %v288_v45, %v86_v53  ;;  %v108_v58 = vadd.f32 %v320_v46, %v107_v54  ;;  %v296_v1 = vunpack.c.l.bf16 %v339_v59 }
  0x1d   :  { %v88_v63 = vadd.f32 %v289_v51, %v87_v57  ;;  %v109_v0 = vadd.f32 %v321_v52, %v108_v58 }
  0x1e   :  { %373 = vmatpush3.bf16.msra.mxu0 %v388_v44 }
  0x1f   :  { %v89_v3 = vadd.f32 %v292_v55, %v88_v63  ;;  %v110_v4 = vadd.f32 %v324_v56, %v109_v0 }
  0x21   :  { %v90_v9 = vadd.f32 %v293_v61, %v89_v3  ;;  %v111_v10 = vadd.f32 %v325_v62, %v110_v4 }
  0x23   :  { %v91_v13 = vadd.f32 %v296_v1, %v90_v9  ;;  %v112_v14 = vadd.f32 %v328_v2, %v111_v10 }
  0x25   :  { %v92_v17 = vadd.f32 %v297_v7, %v91_v13  ;;  %v113_v18 = vadd.f32 %v329_v8, %v112_v14 }
  0x27   :  { %v93_v19 = vadd.f32 %v300_v11, %v92_v17  ;;  %v114_v20 = vadd.f32 %v332_v12, %v113_v18 }
  0x29   :  { %v94_v21 = vadd.f32 %v301_v15, %v93_v19  ;;  %v115_v22 = vadd.f32 %v333_v16, %v114_v20 }
  0x2b   :  { %v95_v23 = vrot.slane %v94_v21, 4  ;;  %v116_v24 = vrot.slane %v115_v22, 4 }
  0x2d   :  { %v96_v25 = vadd.f32 %v95_v23, %v94_v21  ;;  %v117_v26 = vadd.f32 %v116_v24, %v115_v22 }
  0x2f   :  { %v97_v27 = vrot.slane %v96_v25, 2  ;;  %v118_v28 = vrot.slane %v117_v26, 2 }
  0x31   :  { %v98_v29 = vadd.f32 %v97_v27, %v96_v25  ;;  %v119_v30 = vadd.f32 %v118_v28, %v117_v26 }
  0x33   :  { %v99_v31 = vrot.slane %v98_v29, 1  ;;  %v120_v32 = vrot.slane %v119_v30, 1 }
  0x35   :  { %v100_v33 = vadd.f32 %v99_v31, %v98_v29  ;;  %v121_v34 = vadd.f32 %v120_v32, %v119_v30 }
  0x37   :  { %v123_v35 = vmul.f32 0.0078125, %v100_v33  ;;  %v124_v36 = vmul.f32 0.0078125, %v121_v34 }
  0x39   :  { %v125_v37 = vpack.c.bf16 %v123_v35, %v123_v35  ;;  %v126_v38 = vpack.c.bf16 %v124_v36, %v124_v36 }
  0x3b   :  { %v152_v39 = vunpack.c.l.b16 %v125_v37  ;;  %v153_v40 = vunpack.c.l.b16 %v126_v38 }
  0x3d   :  { %v155_v41 = vsel %vm154_vm1, %v153_v40, %v152_v39 }
  0x3e   :  { %v156_v42 = vpack.c.b16 %v155_v41, %v155_v41 }
  0x40   :  { %375 = vmatmul.mubr.bf16.vlgmr.msra.gmra.mrb[0].mxu0 %v156_v42 }
 0x113   :  { %v240_v44 = vpop.f32.mrb[0].mxu0 }
 0x114   :  { %v241_v45 = vadd.f32 %v261_v43, %v240_v44  ;;  %v376_v46 = vpop.f32.mrb[1].mxu0 }
 0x115   :  { %v243_v47 = vpop.f32.mrb[2].mxu0 }
 0x116   :  { %246 = vst [vmem:[#allocation2] sm:$0x3] %v241_v45  ;;  %v377_v48 = vpop.f32.mrb[3].mxu0 }
 0x117   :  { %400 = shalt.err (!%p397_p4)
}
 0x118   :  { %s401_s2 = scalar_lea.hbm %s526_s3, 32 }
 0x119   :  { %p402_p5 = scmp.ne.s32.totalorder %s526_s3, %s401_s2  ;;  %p405_p6 = scmp.lt.u32.totalorder %s401_s2, %s526_s3 }
 0x11b   :  { %p407_p7 = pnand %p405_p6, %p402_p5 }
 0x11d   :  { %410 = shalt.err (!%p407_p7)
}
 0x11e   :  { %256 = dma.vmem_to_hbm [thread:$0]  %s254_s7, 32, %s526_s3, [#allocation3]  }
 0x11f   :  { %411 = dma.done.wait [#allocation3], 32  }
 0x120   :  { %412 = vsyncadd [#allocation3], 4294967264 }
 0x121   :  { %260 = vsyncpa [#allocation3], 1 }

// kernel: xlnet_for_multilabel_forward.3
= control target key start
LH: loop header
LB: loop body
LE: loop exit
PB: predicated region body
PF: predicated region fallthrough
CT: control target
= control target key end

     0   :  { %s8076_s21 = smov 0   ;;  %s11146_s0 = inlined_call_operand.vmem [shape: bf16[2,128,128], index: 0, kind: input, shape index: {}]   ;;  %s11147_s1 = inlined_call_operand.vmem [shape: bf16[256,128], index: 1, kind: input, shape index: {}]   ;;  %s11148_s2 = inlined_call_operand.vmem [shape: bf16[128,128], index: 2, kind: input, shape index: {}]   ;;  %s11149_s3 = inlined_call_operand.vmem [shape: bf16[128,384], index: 3, kind: input, shape index: {}]   ;;  %s11150_s4 = inlined_call_operand.vmem [shape: f32[1,128], index: 4, kind: input, shape index: {}]   ;;  %s11151_s5 = inlined_call_operand.vmem [shape: f32[1,128], index: 5, kind: input, shape index: {}]   ;;  %s11152_s6 = inlined_call_operand.vmem [shape: f32[2,1,128], index: 6, kind: input, shape index: {}]   ;;  %s11153_s7 = inlined_call_operand.vmem [shape: bf16[128,128], index: 7, kind: input, shape index: {}]   ;;  %s11154_s8 = inlined_call_operand.vmem [shape: f32[1,128], index: 8, kind: input, shape index: {}]   ;;  %s11155_s9 = inlined_call_operand.vmem [shape: f32[1,128], index: 9, kind: input, shape index: {}]   ;;  %s11156_s10 = inlined_call_operand.vmem [shape: bf16[128,256], index: 10, kind: input, shape index: {}]   ;;  %s11157_s11 = inlined_call_operand.vmem [shape: f32[1,256], index: 11, kind: input, shape index: {}]   ;;  %s11158_s12 = inlined_call_operand.vmem [shape: bf16[256,128], index: 12, kind: input, shape index: {}]   ;;  %s11159_s13 = inlined_call_operand.vmem [shape: f32[1,128], index: 13, kind: input, shape index: {}]   ;;  %s11160_s14 = inlined_call_operand.vmem [shape: f32[1,128], index: 14, kind: input, shape index: {}]   ;;  %s11161_s15 = inlined_call_operand.vmem [shape: f32[1,128], index: 15, kind: input, shape index: {}]   ;;  %s11162_s16 = inlined_call_operand.vmem [shape: bf16[2,128,128], index: 16, kind: output, shape index: {}]  }
   0x1   :  { %11324 = sst [smem:[#allocation70_spill]] %s11146_s0 }
   0x2   :  { %11325 = sst [smem:[#allocation71_spill]] %s11147_s1 }
   0x3   :  { %11326 = sst [smem:[#allocation72_spill]] %s11148_s2 }
   0x4   :  { %11327 = sst [smem:[#allocation73_spill]] %s11149_s3 }
   0x5   :  { %11328 = sst [smem:[#allocation74_spill]] %s11150_s4 }
   0x6   :  { %11329 = sst [smem:[#allocation75_spill]] %s11151_s5 }
   0x7   :  { %11330 = sst [smem:[#allocation76_spill]] %s11152_s6 }
   0x8   :  { %11331 = sst [smem:[#allocation77_spill]] %s11162_s16 }
   0x9 LB: > { %11332 = sst [smem:[#allocation3_spill]] %s7969_s21  ;;  %s6370_s22 = sadd.s32 4294967295, %s7969_s21   ;;  %s7969_s21 = sphi %s8076_s21, %s26_s21  }
   0xa   : > { %p6374_p0 = scmp.ge.s32.totalorder %s7969_s21, 1  ;;  %p470_p1 = scmp.lt.s32.totalorder %s7969_s21, 3 }
   0xc   : > { %p471_p2 = pnand %p6374_p0, %p470_p1 }
   0xe   : > { %474 = sbr.rel (%p471_p2) target bundleno = 4883 (0x1313), region = 84 }
  0x15   : > { %s11333_s3 = sld [smem:[#allocation73_spill]]  ;;  %v11163_v2 = vmov 0   ;;  %p523_p3 = scmp.lt.s32.totalorder %s6370_s22, 1  ;;  %v11165_v60 = vlaneseq  ;;  %vm1414_vm0 = vcmask 261120  }
  0x16   : > { %798 = vmatprep.mubr.bf16.mxu0 %v11163_v2  ;;  %s11334_s30 = sld [smem:[#allocation70_spill]]  ;;  %s11335_s2 = sld [smem:[#allocation72_spill]] }
  0x17   : > { %s11597_s22 = smov (!%p523_p3, %s6370_s22), 1  ;;  %s11336_s1 = sld [smem:[#allocation71_spill]]  ;;  %v8261_v63 = vshrl.u32 %v11165_v60, 7 }
  0x18   : > { %s11194_s19 = sshll.u32 %s11597_s22, 6  ;;  %s11337_s4 = sld [smem:[#allocation74_spill]] }
  0x19   : > { %s11338_s5 = sld [smem:[#allocation75_spill]]  ;;  %s11279_s24 = smov 96  }
  0x1a   : > { %s11277_s25 = smov 256   ;;  %s11275_s26 = smov 264  }
  0x1b   : > { %v7480_v0 = vld [vmem:[%s11333_s3 + $0x4] ss:$12 sps:$4 sm:$0xff]   ;;  %v7482_v1 = vld [vmem:[%s11333_s3 + $0x8] ss:$12 sps:$4 sm:$0xff]   ;;  %v7483_v3 = vld [vmem:[%s11333_s3] ss:$12 sps:$4 sm:$0xff]  }
  0x1c   : > { %766 = vmatprep.subr.bf16.mxu0 %v7480_v0  ;;  %7004 = vmatprep.subr.bf16.mxu1 %v7482_v1  ;;  %v7484_v4 = vld [vmem:[%s11333_s3 + $0x1c] ss:$12 sps:$4 sm:$0xff]   ;;  %v7486_v5 = vld [vmem:[%s11333_s3 + $0x20] ss:$12 sps:$4 sm:$0xff]   ;;  %v7487_v6 = vld [vmem:[%s11333_s3 + $0x18] ss:$12 sps:$4 sm:$0xff]   ;;  %s8138_s0 = scalar_lea.vmem %s11334_s30, %s11194_s19 }
  0x1d   : > { %767 = vmatpush1.bf16.msra.mxu0 %v7483_v3  ;;  %7005 = vmatpush3.bf16.msra.mxu1 %v7482_v1  ;;  %v7488_v7 = vld [vmem:[%s11333_s3 + $0x34] ss:$12 sps:$4 sm:$0xff]   ;;  %v7490_v8 = vld [vmem:[%s11333_s3 + $0x38] ss:$12 sps:$4 sm:$0xff]   ;;  %v7491_v9 = vld [vmem:[%s11333_s3 + $0x30] ss:$12 sps:$4 sm:$0xff]  }
  0x1e   : > { %768 = vmatprep.subr.bf16.mxu0 %v7484_v4  ;;  %7006 = vmatprep.subr.bf16.mxu1 %v7486_v5  ;;  %v7492_v10 = vld [vmem:[%s11333_s3 + $0x4c] ss:$12 sps:$4 sm:$0xff]   ;;  %v7494_v11 = vld [vmem:[%s11333_s3 + $0x50] ss:$12 sps:$4 sm:$0xff]   ;;  %v7495_v12 = vld [vmem:[%s11333_s3 + $0x48] ss:$12 sps:$4 sm:$0xff]  }
  0x1f   : > { %v7496_v13 = vld [vmem:[%s11333_s3 + $0x64] ss:$12 sps:$4 sm:$0xff]   ;;  %v7498_v14 = vld [vmem:[%s11333_s3 + $0x68] ss:$12 sps:$4 sm:$0xff]   ;;  %v7499_v15 = vld [vmem:[%s11333_s3 + $0x60] ss:$12 sps:$4 sm:$0xff]  }
  0x20   : > { %v7500_v16 = vld [vmem:[%s11333_s3 + $0x7c] ss:$12 sps:$4 sm:$0xff]   ;;  %v7502_v17 = vld [vmem:[%s11333_s3 + $0x80] ss:$12 sps:$4 sm:$0xff]   ;;  %v7503_v19 = vld [vmem:[%s11333_s3 + $0x78] ss:$12 sps:$4 sm:$0xff]  }
  0x21   : > { %769 = vmatpush1.bf16.msra.mxu0 %v7487_v6  ;;  %7007 = vmatpush3.bf16.msra.mxu1 %v7486_v5  ;;  %v542_v18 = vld [vmem:[%s8138_s0] sm:$0xff]   ;;  %v7507_v22 = vld [vmem:[%s11333_s3 + $0x90] ss:$12 sps:$4 sm:$0xff]   ;;  %v7508_v23 = vld [vmem:[%s11333_s3 + $0xac] ss:$12 sps:$4 sm:$0xff]   ;;  %s11273_s27 = smov 272  }
  0x22   : > { %770 = vmatprep.subr.bf16.mxu0 %v7488_v7  ;;  %7008 = vmatprep.subr.bf16.mxu1 %v7490_v8  ;;  %v7504_v20 = vld [vmem:[%s11333_s3 + $0x94] ss:$12 sps:$4 sm:$0xff]   ;;  %v7506_v21 = vld [vmem:[%s11333_s3 + $0x98] ss:$12 sps:$4 sm:$0xff]   ;;  %v7510_v24 = vld [vmem:[%s11333_s3 + $0xb0] ss:$12 sps:$4 sm:$0xff]  }
  0x23   : > { %7020 = vmatprep.mubr.bf16.mxu1 %v542_v18  ;;  %v7511_v25 = vld [vmem:[%s11333_s3 + $0xa8] ss:$12 sps:$4 sm:$0xff]   ;;  %v7514_v27 = vld [vmem:[%s11335_s2] sm:$0xff]   ;;  %v548_v30 = vld [vmem:[%s8138_s0 + $0x18] sm:$0xff]   ;;  %v8264_v7 = vsub.s32 0, %v8261_v63  ;;  %s11271_s28 = smov 280  }
  0x24   : > { %v544_v26 = vld [vmem:[%s8138_s0 + $0x8] sm:$0xff]   ;;  %v546_v28 = vld [vmem:[%s8138_s0 + $0x10] sm:$0xff]   ;;  %v550_v32 = vld [vmem:[%s8138_s0 + $0x20] sm:$0xff]   ;;  %s11267_s29 = smov 288   ;;  %s11269_s30 = smov 296  }
  0x25   : > { %771 = vmatpush1.bf16.msra.mxu0 %v7491_v9  ;;  %7009 = vmatpush3.bf16.msra.mxu1 %v7490_v8  ;;  %v7515_v29 = vld [vmem:[%s11335_s2 + $0x8] sm:$0xff]   ;;  %v7518_v31 = vld [vmem:[%s11335_s2 + $0x10] sm:$0xff]   ;;  %v7519_v33 = vld [vmem:[%s11335_s2 + $0x18] sm:$0xff]   ;;  %11339 = vst [vmem:[#allocation4_spill] sm:$0xff] %v8264_v7  ;;  %s11209_s17 = smov 304   ;;  %s11195_s18 = smov 312  }
  0x26   : > { %772 = vmatprep.subr.bf16.mxu0 %v7492_v10  ;;  %7010 = vmatprep.subr.bf16.mxu1 %v7494_v11  ;;  %v552_v34 = vld [vmem:[%s8138_s0 + $0x28] sm:$0xff]   ;;  %v7522_v35 = vld [vmem:[%s11335_s2 + $0x20] sm:$0xff]   ;;  %v554_v36 = vld [vmem:[%s8138_s0 + $0x30] sm:$0xff]   ;;  %s11197_s20 = smov 320   ;;  %s11199_s23 = smov 328  }
  0x27   : > { %v7523_v37 = vld [vmem:[%s11335_s2 + $0x28] sm:$0xff]   ;;  %v556_v38 = vld [vmem:[%s8138_s0 + $0x38] sm:$0xff]   ;;  %v7526_v39 = vld [vmem:[%s11335_s2 + $0x30] sm:$0xff]   ;;  %s11201_s19 = smov 336   ;;  %s11390_s6 = sld [smem:[#allocation76_spill]] }
  0x28   : > { %v7528_v40 = vld [vmem:[%s11336_s1] sm:$0xff]   ;;  %v7527_v41 = vld [vmem:[%s11335_s2 + $0x38] sm:$0xff]   ;;  %v7529_v42 = vld [vmem:[%s11336_s1 + $0x8] sm:$0xff]   ;;  %s11479_s2 = smov 280   ;;  %s11480_s3 = smov 288  }
  0x29   : > { %773 = vmatpush1.bf16.msra.mxu0 %v7495_v12  ;;  %7011 = vmatpush3.bf16.msra.mxu1 %v7494_v11  ;;  %v7530_v43 = vld [vmem:[%s11336_s1 + $0x10] sm:$0xff]   ;;  %v7531_v44 = vld [vmem:[%s11336_s1 + $0x18] sm:$0xff]   ;;  %v7532_v45 = vld [vmem:[%s11336_s1 + $0x20] sm:$0xff]   ;;  %s7990_s21 = smov 32   ;;  %s11502_s16 = smov 64  }
  0x2a   : > { %774 = vmatprep.subr.bf16.mxu0 %v7496_v13  ;;  %7012 = vmatprep.subr.bf16.mxu1 %v7498_v14  ;;  %v7533_v46 = vld [vmem:[%s11336_s1 + $0x28] sm:$0xff]   ;;  %v7534_v47 = vld [vmem:[%s11336_s1 + $0x30] sm:$0xff]   ;;  %v7535_v48 = vld [vmem:[%s11336_s1 + $0x38] sm:$0xff]  }
  0x2b   : > { %v7536_v49 = vld [vmem:[%s11336_s1 + $0x40] sm:$0xff]   ;;  %v7537_v50 = vld [vmem:[%s11336_s1 + $0x48] sm:$0xff]   ;;  %v7538_v51 = vld [vmem:[%s11336_s1 + $0x50] sm:$0xff]  }
  0x2c   : > { %v7539_v52 = vld [vmem:[%s11336_s1 + $0x58] sm:$0xff]   ;;  %v7540_v53 = vld [vmem:[%s11336_s1 + $0x60] sm:$0xff]   ;;  %v7541_v54 = vld [vmem:[%s11336_s1 + $0x68] sm:$0xff]  }
  0x2d   : > { %775 = vmatpush1.bf16.msra.mxu0 %v7499_v15  ;;  %7013 = vmatpush3.bf16.msra.mxu1 %v7498_v14  ;;  %v7542_v55 = vld [vmem:[%s11336_s1 + $0x70] sm:$0xff]   ;;  %v7543_v56 = vld [vmem:[%s11336_s1 + $0x78] sm:$0xff]   ;;  %v1377_v57 = vld [vmem:[%s11337_s4] sm:$0x1]  ;;  %s11477_s1 = smov 264   ;;  %s11481_s4 = smov 296  }
  0x2e   : > { %776 = vmatprep.subr.bf16.mxu0 %v7500_v16  ;;  %7014 = vmatprep.subr.bf16.mxu1 %v7502_v17  ;;  %v1395_v58 = vld [vmem:[%s11338_s5] sm:$0x1]  ;;  %v1378_v59 = vmul.f32 0.17677669, %v1377_v57  ;;  %s11494_s5 = smov 368  }
  0x2f   : > { %v1396_v61 = vmul.f32 0.17677669, %v1395_v58 }
  0x30   : > { %v1379_v62 = vpack.c.bf16 %v1378_v59, %v1378_v59 }
  0x31   : > { %777 = vmatpush1.bf16.msra.mxu0 %v7503_v19  ;;  %7015 = vmatpush3.bf16.msra.mxu1 %v7502_v17  ;;  %v1397_v0 = vpack.c.bf16 %v1396_v61, %v1396_v61 }
  0x32   : > { %778 = vmatprep.subr.bf16.mxu0 %v7504_v20  ;;  %7016 = vmatprep.subr.bf16.mxu1 %v7506_v21  ;;  %v1381_v1 = vpack.i.b16 %v1379_v62, %v1379_v62 }
  0x33   : > { %v1399_v8 = vpack.i.b16 %v1397_v0, %v1397_v0 }
  0x34   : > { %v8269_v14 = vrot.slane %v1381_v1, %v8264_v7 }
  0x35   : > { %779 = vmatpush1.bf16.msra.mxu0 %v7507_v22  ;;  %7017 = vmatpush3.bf16.msra.mxu1 %v7506_v21  ;;  %v8276_v19 = vrot.slane %v1399_v8, %v8264_v7 }
  0x36   : > { %780 = vmatprep.subr.bf16.mxu0 %v7508_v23  ;;  %7018 = vmatprep.subr.bf16.mxu1 %v7510_v24 }
  0x39   : > { %781 = vmatpush1.bf16.msra.mxu0 %v7511_v25  ;;  %7019 = vmatpush3.bf16.msra.mxu1 %v7510_v24 }
  0x3a   : > { %7036 = vmatprep.subr.bf16.mxu1 %v7514_v27 }
  0x3c   : > { %799 = vmatmul.mubr.bf16.vlgmr.msra.gmra.mrb[0].mxu0 %v542_v18  ;;  %7021 = vmatmul.mubr.bf16.vlgmr.msra.gmra.mrb[0].mxu1 %v544_v26 }
  0x3d   : > { %7037 = vmatpush3.bf16.msra.mxu1 %v7514_v27  ;;  %808 = vmatprep.mubr.bf16.mxu0 %v11163_v2 }
  0x3e   : > { %7038 = vmatprep.subr.bf16.mxu1 %v7515_v29  ;;  %7024 = vmatprep.mubr.bf16.mxu1 %v546_v28 }
  0x41   : > { %7039 = vmatpush3.bf16.msra.mxu1 %v7515_v29 }
  0x42   : > { %7040 = vmatprep.subr.bf16.mxu1 %v7518_v31 }
  0x44   : > { %809 = vmatmul.mubr.bf16.gmra.mrb[4].mxu0 %v544_v26  ;;  %7025 = vmatmul.mubr.bf16.gmra.mrb[4].mxu1 %v548_v30 }
  0x45   : > { %7041 = vmatpush3.bf16.msra.mxu1 %v7518_v31  ;;  %818 = vmatprep.mubr.bf16.mxu0 %v11163_v2 }
  0x46   : > { %7042 = vmatprep.subr.bf16.mxu1 %v7519_v33  ;;  %7028 = vmatprep.mubr.bf16.mxu1 %v550_v32 }
  0x49   : > { %7043 = vmatpush3.bf16.msra.mxu1 %v7519_v33 }
  0x4a   : > { %7044 = vmatprep.subr.bf16.mxu1 %v7522_v35 }
  0x4c   : > { %819 = vmatmul.mubr.bf16.gmra.mrb[8].mxu0 %v546_v28  ;;  %7029 = vmatmul.mubr.bf16.gmra.mrb[8].mxu1 %v552_v34 }
  0x4d   : > { %7045 = vmatpush3.bf16.msra.mxu1 %v7522_v35  ;;  %828 = vmatprep.mubr.bf16.mxu0 %v11163_v2 }
  0x4e   : > { %7046 = vmatprep.subr.bf16.mxu1 %v7523_v37  ;;  %7032 = vmatprep.mubr.bf16.mxu1 %v554_v36 }
  0x51   : > { %7047 = vmatpush3.bf16.msra.mxu1 %v7523_v37 }
  0x52   : > { %7048 = vmatprep.subr.bf16.mxu1 %v7526_v39 }
  0x54   : > { %829 = vmatmul.mubr.bf16.gmra.mrb[12].mxu0 %v548_v30  ;;  %7033 = vmatmul.mubr.bf16.gmra.mrb[12].mxu1 %v556_v38 }
  0x55   : > { %7049 = vmatpush3.bf16.msra.mxu1 %v7526_v39  ;;  %7052 = vmatprep.mubr.bf16.mxu1 %v7528_v40 }
  0x56   : > { %7050 = vmatprep.subr.bf16.mxu1 %v7527_v41  ;;  %838 = vmatprep.mubr.bf16.mxu0 %v11163_v2 }
  0x59   : > { %7051 = vmatpush3.bf16.msra.mxu1 %v7527_v41 }
  0x5c   : > { %7053 = vmatmul.mubr.bf16.vlgmr.msra.gmra.mrb[16].mxu1 %v7529_v42  ;;  %839 = vmatmul.mubr.bf16.gmra.mrb[16].mxu0 %v550_v32 }
  0x5d   : > { %7056 = vmatprep.mubr.bf16.mxu1 %v7530_v43  ;;  %848 = vmatprep.mubr.bf16.mxu0 %v11163_v2 }
  0x64   : > { %7057 = vmatmul.mubr.bf16.gmra.mrb[20].mxu1 %v7531_v44  ;;  %849 = vmatmul.mubr.bf16.gmra.mrb[20].mxu0 %v552_v34 }
  0x65   : > { %7060 = vmatprep.mubr.bf16.mxu1 %v7532_v45  ;;  %858 = vmatprep.mubr.bf16.mxu0 %v11163_v2 }
  0x6c   : > { %7061 = vmatmul.mubr.bf16.gmra.mrb[24].mxu1 %v7533_v46  ;;  %859 = vmatmul.mubr.bf16.gmra.mrb[24].mxu0 %v554_v36 }
  0x6d   : > { %7064 = vmatprep.mubr.bf16.mxu1 %v7534_v47  ;;  %868 = vmatprep.mubr.bf16.mxu0 %v11163_v2 }
  0x74   : > { %7065 = vmatmul.mubr.bf16.gmra.mrb[28].mxu1 %v7535_v48  ;;  %869 = vmatmul.mubr.bf16.gmra.mrb[28].mxu0 %v556_v38 }
  0x75   : > { %7068 = vmatprep.mubr.bf16.mxu1 %v7536_v49 }
  0x7c   : > { %7069 = vmatmul.mubr.bf16.gmra.mrb[32].mxu1 %v7537_v50 }
  0x7d   : > { %7072 = vmatprep.mubr.bf16.mxu1 %v7538_v51 }
  0x84   : > { %7073 = vmatmul.mubr.bf16.gmra.mrb[36].mxu1 %v7539_v52 }
  0x85   : > { %7076 = vmatprep.mubr.bf16.mxu1 %v7540_v53 }
  0x8c   : > { %7077 = vmatmul.mubr.bf16.gmra.mrb[40].mxu1 %v7541_v54 }
  0x8d   : > { %7080 = vmatprep.mubr.bf16.mxu1 %v7542_v55 }
  0x94   : > { %7081 = vmatmul.mubr.bf16.gmra.mrb[44].mxu1 %v7543_v56 }
 0x10f   : > { %v7022_v3 = vpop.f32.mrb[0].mxu1  ;;  %v800_v4 = vpop.f32.mrb[0].mxu0 }
 0x110   : > { %v913_v5 = vpop.f32.mrb[1].mxu1  ;;  %v802_v6 = vpop.f32.mrb[1].mxu0 }
 0x111   : > { %v7023_v9 = vpop.f32.mrb[2].mxu1  ;;  %v804_v10 = vpop.f32.mrb[2].mxu0 }
 0x112   : > { %v8266_v11 = vpack.c.bf16 %v7023_v9, %v7022_v3  ;;  %v916_v12 = vpop.f32.mrb[3].mxu1  ;;  %v976_v13 = vpack.c.bf16 %v804_v10, %v800_v4  ;;  %v806_v15 = vpop.f32.mrb[3].mxu0 }
 0x113   : > { %v8271_v16 = vpack.c.bf16 %v916_v12, %v913_v5  ;;  %v8273_v17 = vpack.c.bf16 %v806_v15, %v802_v6 }
 0x114   : > { %11340 = vst [vmem:[#allocation5_spill] sm:$0xff] %v8266_v11  ;;  %v1369_v18 = vmul.bf16 1043676725, %v976_v13 }
 0x115   : > { %11341 = vst [vmem:[#allocation6_spill] sm:$0xff] %v8271_v16  ;;  %11342 = vst [vmem:[#allocation7_spill] sm:$0xff] %v8273_v17  ;;  %2640 = vrot.lane.b32.xlu1 %v8273_v17, %s11279_s24  ;;  %7396 = vmatprep.subr.msk.bf16.mxu1 %vm1414_vm0, %v8273_v17  ;;  %v1802_v20 = vsel %vm1414_vm0, %v8273_v17, 0 }
 0x116   : > { %v8285_v21 = vadd.bf16 %v8269_v14, %v1369_v18  ;;  %v8288_v22 = vadd.bf16 %v8276_v19, %v1369_v18  ;;  %7085 = vmatpush3.bf16.xpose.msra.mxu1 %v1802_v20 }
 0x117   : > { %v7026_v23 = vpop.f32.mrb[4].mxu1  ;;  %v810_v24 = vpop.f32.mrb[4].mxu0 }
 0x118   : > { %11343 = vst [vmem:[#allocation8_spill] sm:$0xff] %v8285_v21  ;;  %11344 = vst [vmem:[#allocation9_spill] sm:$0xff] %v8288_v22  ;;  %v929_v25 = vpop.f32.mrb[5].mxu1  ;;  %v812_v26 = vpop.f32.mrb[5].mxu0  ;;  %2217 = vrot.lane.b32.xlu0 %v8288_v22, %s11279_s24  ;;  %6684 = vmatprep.mubr.msk.bf16.mxu0 %vm1414_vm0, %v8288_v22 }
 0x119   : > { %v7027_v27 = vpop.f32.mrb[6].mxu1  ;;  %v814_v28 = vpop.f32.mrb[6].mxu0  ;;  %7100 = vmatprep.mubr.msk.bf16.mxu1 %vm1414_vm0, %v8285_v21 }
 0x11a   : > { %v8296_v29 = vpack.c.bf16 %v7027_v27, %v7026_v23  ;;  %v932_v30 = vpop.f32.mrb[7].mxu1  ;;  %v979_v31 = vpack.c.bf16 %v814_v28, %v810_v24  ;;  %v816_v32 = vpop.f32.mrb[7].mxu0 }
 0x11b   : > { %v8298_v33 = vpack.c.bf16 %v932_v30, %v929_v25  ;;  %v8300_v34 = vpack.c.bf16 %v816_v32, %v812_v26 }
 0x11c   : > { %11345 = vst [vmem:[#allocation10_spill] sm:$0xff] %v8296_v29  ;;  %v8302_v35 = vmul.bf16 1043676725, %v979_v31 }
 0x11d   : > { %11346 = vst [vmem:[#allocation11_spill] sm:$0xff] %v8298_v33  ;;  %11347 = vst [vmem:[#allocation12_spill] sm:$0xff] %v8300_v34  ;;  %2642 = vrot.lane.b32.xlu1 %v8300_v34, %s11279_s24  ;;  %7397 = vmatprep.subr.msk.bf16.mxu1 %vm1414_vm0, %v8300_v34  ;;  %v1805_v36 = vsel %vm1414_vm0, %v8300_v34, 0 }
 0x11e   : > { %v8312_v37 = vadd.bf16 %v8276_v19, %v8302_v35  ;;  %7087 = vmatpush3.bf16.xpose.msra.mxu1 %v1805_v36 }
 0x11f   : > { %v7030_v38 = vpop.f32.mrb[8].mxu1  ;;  %v820_v39 = vpop.f32.mrb[8].mxu0 }
 0x120   : > { %11348 = vst [vmem:[#allocation13_spill] sm:$0xff] %v8312_v37  ;;  %v945_v40 = vpop.f32.mrb[9].mxu1  ;;  %v822_v41 = vpop.f32.mrb[9].mxu0  ;;  %2219 = vrot.lane.b32.xlu0 %v8312_v37, %s11279_s24 }
 0x121   : > { %v7031_v42 = vpop.f32.mrb[10].mxu1  ;;  %v824_v43 = vpop.f32.mrb[10].mxu0 }
 0x122   : > { %v8316_v44 = vpack.c.bf16 %v7031_v42, %v7030_v38  ;;  %v948_v45 = vpop.f32.mrb[11].mxu1  ;;  %v982_v46 = vpack.c.bf16 %v824_v43, %v820_v39  ;;  %v826_v47 = vpop.f32.mrb[11].mxu0 }
 0x123   : > { %v8318_v48 = vpack.c.bf16 %v948_v45, %v945_v40  ;;  %v8320_v49 = vpack.c.bf16 %v826_v47, %v822_v41 }
 0x124   : > { %11349 = vst [vmem:[#allocation14_spill] sm:$0xff] %v8316_v44  ;;  %v8322_v50 = vmul.bf16 1043676725, %v982_v46 }
 0x125   : > { %11350 = vst [vmem:[#allocation15_spill] sm:$0xff] %v8318_v48  ;;  %11351 = vst [vmem:[#allocation16_spill] sm:$0xff] %v8320_v49  ;;  %2644 = vrot.lane.b32.xlu1 %v8320_v49, %s11279_s24  ;;  %7398 = vmatprep.subr.msk.bf16.mxu1 %vm1414_vm0, %v8320_v49  ;;  %v1808_v51 = vsel %vm1414_vm0, %v8320_v49, 0 }
 0x126   : > { %v8332_v52 = vadd.bf16 %v8276_v19, %v8322_v50  ;;  %7089 = vmatpush3.bf16.xpose.msra.mxu1 %v1808_v51 }
 0x127   : > { %v830_v53 = vpop.f32.mrb[12].mxu0  ;;  %v7034_v54 = vpop.f32.mrb[12].mxu1 }
 0x128   : > { %11352 = vst [vmem:[#allocation17_spill] sm:$0xff] %v8332_v52  ;;  %v961_v55 = vpop.f32.mrb[13].mxu1  ;;  %v832_v56 = vpop.f32.mrb[13].mxu0 }
 0x129   : > { %v834_v57 = vpop.f32.mrb[14].mxu0  ;;  %v7035_v58 = vpop.f32.mrb[14].mxu1  ;;  %2221 = vrot.lane.b32.xlu1 %v8332_v52, %s11279_s24 }
 0x12a   : > { %v985_v59 = vpack.c.bf16 %v834_v57, %v830_v53  ;;  %v8336_v61 = vpack.c.bf16 %v7035_v58, %v7034_v54  ;;  %v964_v62 = vpop.f32.mrb[15].mxu1  ;;  %v836_v0 = vpop.f32.mrb[15].mxu0 }
 0x12b   : > { %v8338_v1 = vpack.c.bf16 %v964_v62, %v961_v55  ;;  %v8340_v3 = vpack.c.bf16 %v836_v0, %v832_v56 }
 0x12c   : > { %11353 = vst [vmem:[#allocation18_spill] sm:$0xff] %v8336_v61  ;;  %v1372_v4 = vmul.bf16 1043676725, %v985_v59 }
 0x12d   : > { %11354 = vst [vmem:[#allocation19_spill] sm:$0xff] %v8338_v1  ;;  %11355 = vst [vmem:[#allocation20_spill] sm:$0xff] %v8340_v3  ;;  %2646 = vrot.lane.b32.xlu0 %v8340_v3, %s11279_s24  ;;  %7399 = vmatprep.subr.msk.bf16.mxu1 %vm1414_vm0, %v8340_v3  ;;  %v1811_v5 = vsel %vm1414_vm0, %v8340_v3, 0 }
 0x12e   : > { %v8349_v6 = vadd.bf16 %v8269_v14, %v1372_v4  ;;  %v8352_v8 = vadd.bf16 %v8276_v19, %v1372_v4  ;;  %7091 = vmatpush3.bf16.xpose.msra.mxu1 %v1811_v5 }
 0x12f   : > { %v7054_v9 = vpop.f32.mrb[16].mxu1  ;;  %v840_v10 = vpop.f32.mrb[16].mxu0 }
 0x130   : > { %11356 = vst [vmem:[#allocation21_spill] sm:$0xff] %v8349_v6  ;;  %11357 = vst [vmem:[#allocation22_spill] sm:$0xff] %v8352_v8  ;;  %v1226_v12 = vpop.f32.mrb[17].mxu1  ;;  %2223 = vrot.lane.b32.xlu1 %v8352_v8, %s11279_s24  ;;  %v842_v13 = vpop.f32.mrb[17].mxu0 }
 0x131   : > { %v7055_v15 = vpop.f32.mrb[18].mxu1  ;;  %v844_v18 = vpop.f32.mrb[18].mxu0 }
 0x132   : > { %v8356_v20 = vpack.c.bf16 %v7055_v15, %v7054_v9  ;;  %v1229_v23 = vpop.f32.mrb[19].mxu1  ;;  %v988_v24 = vpack.c.bf16 %v844_v18, %v840_v10  ;;  %v846_v25 = vpop.f32.mrb[19].mxu0 }
 0x133   : > { %v8358_v26 = vpack.c.bf16 %v1229_v23, %v1226_v12  ;;  %v8360_v27 = vpack.c.bf16 %v846_v25, %v842_v13 }
 0x134   : > { %11358 = vst [vmem:[#allocation23_spill] sm:$0xff] %v8356_v20  ;;  %2251 = vrot.lane.b32.xlu1 %v8356_v20, %s11279_s24  ;;  %v1373_v28 = vmul.bf16 1043676725, %v988_v24 }
 0x135   : > { %11359 = vst [vmem:[#allocation24_spill] sm:$0xff] %v8358_v26  ;;  %11360 = vst [vmem:[#allocation25_spill] sm:$0xff] %v8360_v27  ;;  %7400 = vmatprep.subr.msk.bf16.mxu1 %vm1414_vm0, %v8360_v27  ;;  %v1814_v30 = vsel %vm1414_vm0, %v8360_v27, 0 }
 0x136   : > { %v8369_v31 = vadd.bf16 %v8269_v14, %v1373_v28  ;;  %v8372_v32 = vadd.bf16 %v8276_v19, %v1373_v28  ;;  %7093 = vmatpush3.bf16.xpose.msra.mxu1 %v1814_v30 }
 0x137   : > { %v7058_v36 = vpop.f32.mrb[20].mxu1  ;;  %v850_v38 = vpop.f32.mrb[20].mxu0 }
 0x138   : > { %11361 = vst [vmem:[#allocation26_spill] sm:$0xff] %v8369_v31  ;;  %11362 = vst [vmem:[#allocation27_spill] sm:$0xff] %v8372_v32  ;;  %v1242_v39 = vpop.f32.mrb[21].mxu1  ;;  %2249 = vrot.lane.b32.xlu1 %v8358_v26, %s11279_s24  ;;  %v852_v40 = vpop.f32.mrb[21].mxu0 }
 0x139   : > { %v7059_v41 = vpop.f32.mrb[22].mxu1  ;;  %v854_v42 = vpop.f32.mrb[22].mxu0 }
 0x13a   : > { %v8376_v43 = vpack.c.bf16 %v7059_v41, %v7058_v36  ;;  %v1245_v45 = vpop.f32.mrb[23].mxu1  ;;  %v991_v46 = vpack.c.bf16 %v854_v42, %v850_v38  ;;  %v856_v47 = vpop.f32.mrb[23].mxu0 }
 0x13b   : > { %v8378_v51 = vpack.c.bf16 %v1245_v45, %v1242_v39  ;;  %v8380_v53 = vpack.c.bf16 %v856_v47, %v852_v40 }
 0x13c   : > { %11363 = vst [vmem:[#allocation28_spill] sm:$0xff] %v8376_v43  ;;  %2255 = vrot.lane.b32.xlu0 %v8376_v43, %s11279_s24  ;;  %v1374_v54 = vmul.bf16 1043676725, %v991_v46 }
 0x13d   : > { %11364 = vst [vmem:[#allocation29_spill] sm:$0xff] %v8378_v51  ;;  %11365 = vst [vmem:[#allocation30_spill] sm:$0xff] %v8380_v53  ;;  %2253 = vrot.lane.b32.xlu1 %v8378_v51, %s11279_s24  ;;  %7401 = vmatprep.subr.msk.bf16.mxu1 %vm1414_vm0, %v8380_v53  ;;  %v1817_v55 = vsel %vm1414_vm0, %v8380_v53, 0 }
 0x13e   : > { %v8391_v56 = vadd.bf16 %v8269_v14, %v1374_v54  ;;  %v8394_v57 = vadd.bf16 %v8276_v19, %v1374_v54  ;;  %7095 = vmatpush3.bf16.xpose.msra.mxu1 %v1817_v55 }
 0x13f   : > { %v7062_v58 = vpop.f32.mrb[24].mxu1  ;;  %v860_v59 = vpop.f32.mrb[24].mxu0 }
 0x140   : > { %11366 = vst [vmem:[#allocation31_spill] sm:$0xff] %v8391_v56  ;;  %v1258_v62 = vpop.f32.mrb[25].mxu1  ;;  %v862_v0 = vpop.f32.mrb[25].mxu0 }
 0x141   : > { %v7063_v4 = vpop.f32.mrb[26].mxu1  ;;  %v864_v5 = vpop.f32.mrb[26].mxu0 }
 0x142   : > { %v8396_v9 = vpack.c.bf16 %v7063_v4, %v7062_v58  ;;  %v1261_v10 = vpop.f32.mrb[27].mxu1  ;;  %v994_v12 = vpack.c.bf16 %v864_v5, %v860_v59  ;;  %v866_v13 = vpop.f32.mrb[27].mxu0 }
 0x143   : > { %v8398_v15 = vpack.c.bf16 %v1261_v10, %v1258_v62  ;;  %v8400_v18 = vpack.c.bf16 %v866_v13, %v862_v0  ;;  %v8438_v10 = vadd.bf16 %v8269_v14, %v8302_v35  ;;  %v8442_v13 = vadd.bf16 %v8269_v14, %v8322_v50 }
 0x144   : > { %11367 = vst [vmem:[#allocation32_spill] sm:$0xff] %v8396_v9  ;;  %2259 = vrot.lane.b32.xlu1 %v8396_v9, %s11279_s24  ;;  %v1375_v23 = vmul.bf16 1043676725, %v994_v12 }
 0x145   : > { %11368 = vst [vmem:[#allocation33_spill] sm:$0xff] %v8398_v15  ;;  %11369 = vst [vmem:[#allocation34_spill] sm:$0xff] %v8400_v18  ;;  %2257 = vrot.lane.b32.xlu0 %v8398_v15, %s11279_s24  ;;  %7402 = vmatprep.subr.msk.bf16.mxu1 %vm1414_vm0, %v8400_v18  ;;  %v1820_v24 = vsel %vm1414_vm0, %v8400_v18, 0 }
 0x146   : > { %v8411_v25 = vadd.bf16 %v8269_v14, %v1375_v23  ;;  %v8414_v28 = vadd.bf16 %v8276_v19, %v1375_v23  ;;  %7097 = vmatpush3.bf16.xpose.msra.mxu1 %v1820_v24  ;;  %11377 = vst [vmem:[#allocation42_spill] sm:$0xff] %v8438_v10  ;;  %11378 = vst [vmem:[#allocation43_spill] sm:$0xff] %v8442_v13 }
 0x147   : > { %v7066_v30 = vpop.f32.mrb[28].mxu1  ;;  %v870_v36 = vpop.f32.mrb[28].mxu0 }
 0x148   : > { %11370 = vst [vmem:[#allocation35_spill] sm:$0xff] %v8411_v25  ;;  %11371 = vst [vmem:[#allocation36_spill] sm:$0xff] %v8414_v28  ;;  %v1274_v38 = vpop.f32.mrb[29].mxu1  ;;  %v872_v39 = vpop.f32.mrb[29].mxu0 }
 0x149   : > { %v7067_v40 = vpop.f32.mrb[30].mxu1  ;;  %v874_v41 = vpop.f32.mrb[30].mxu0 }
 0x14a   : > { %v8416_v42 = vpack.c.bf16 %v7067_v40, %v7066_v30  ;;  %v1277_v45 = vpop.f32.mrb[31].mxu1  ;;  %v997_v46 = vpack.c.bf16 %v874_v41, %v870_v36  ;;  %v876_v47 = vpop.f32.mrb[31].mxu0  ;;  %v1443_v40 = vsel %vm1414_vm0, %v8356_v20, 0 }
 0x14b   : > { %v8418_v54 = vpack.c.bf16 %v1277_v45, %v1274_v38  ;;  %v8420_v55 = vpack.c.bf16 %v876_v47, %v872_v39 }
 0x14c   : > { %11372 = vst [vmem:[#allocation37_spill] sm:$0xff] %v8416_v42  ;;  %2263 = vrot.lane.b32.xlu0 %v8416_v42, %s11279_s24  ;;  %v1376_v58 = vmul.bf16 1043676725, %v997_v46 }
 0x14d   : > { %11373 = vst [vmem:[#allocation38_spill] sm:$0xff] %v8418_v54  ;;  %11374 = vst [vmem:[#allocation39_spill] sm:$0xff] %v8420_v55  ;;  %2261 = vrot.lane.b32.xlu1 %v8418_v54, %s11279_s24  ;;  %7403 = vmatprep.subr.msk.bf16.mxu1 %vm1414_vm0, %v8420_v55  ;;  %v1823_v59 = vsel %vm1414_vm0, %v8420_v55, 0 }
 0x14e   : > { %v8431_v62 = vadd.bf16 %v8269_v14, %v1376_v58  ;;  %v8434_v0 = vadd.bf16 %v8276_v19, %v1376_v58  ;;  %7099 = vmatpush3.bf16.xpose.msra.mxu1 %v1823_v59  ;;  %v1440_v19 = vsel %vm1414_vm0, %v8358_v26, 0 }
 0x14f   : > { %v7070_v4 = vpop.f32.mrb[32].mxu1 }
 0x150   : > { %11375 = vst [vmem:[#allocation40_spill] sm:$0xff] %v8431_v62  ;;  %11376 = vst [vmem:[#allocation41_spill] sm:$0xff] %v8434_v0  ;;  %v1290_v5 = vpop.f32.mrb[33].mxu1 }
 0x151   : > { %v7071_v12 = vpop.f32.mrb[34].mxu1 }
 0x152   : > { %v8444_v23 = vpack.c.bf16 %v7071_v12, %v7070_v4  ;;  %v1293_v24 = vpop.f32.mrb[35].mxu1  ;;  %v1446_v4 = vsel %vm1414_vm0, %v8378_v51, 0 }
 0x153   : > { %v8446_v30 = vpack.c.bf16 %v1293_v24, %v1290_v5 }
 0x154   : > { %11379 = vst [vmem:[#allocation44_spill] sm:$0xff] %v8444_v23  ;;  %2267 = vrot.lane.b32.xlu0 %v8444_v23, %s11279_s24 }
 0x155   : > { %11380 = vst [vmem:[#allocation45_spill] sm:$0xff] %v8446_v30  ;;  %7388 = vmatprep.subr.msk.bf16.mxu0 %vm1414_vm0, %v8446_v30  ;;  %7101 = vmatmul.mubr.msk.bf16.vlgmr.msra.gmra.mrb[48].mxu1 %vm1414_vm0, %v8438_v10 }
 0x156   : > { %6669 = vmatpush3.bf16.xpose.msra.mxu0 %v1440_v19  ;;  %7104 = vmatprep.mubr.msk.bf16.mxu1 %vm1414_vm0, %v8442_v13 }
 0x157   : > { %7389 = vmatprep.subr.msk.bf16.mxu0 %vm1414_vm0, %v8444_v23  ;;  %v7074_v14 = vpop.f32.mrb[36].mxu1 }
 0x158   : > { %2265 = vrot.lane.b32.xlu0 %v8446_v30, %s11279_s24  ;;  %v1306_v35 = vpop.f32.mrb[37].mxu1 }
 0x159   : > { %v7075_v50 = vpop.f32.mrb[38].mxu1 }
 0x15a   : > { %v8462_v36 = vpack.c.bf16 %v7075_v50, %v7074_v14  ;;  %v1309_v38 = vpop.f32.mrb[39].mxu1  ;;  %v1449_v50 = vsel %vm1414_vm0, %v8376_v43, 0 }
 0x15b   : > { %v8464_v39 = vpack.c.bf16 %v1309_v38, %v1306_v35  ;;  %v1452_v38 = vsel %vm1414_vm0, %v8398_v15, 0 }
 0x15c   : > { %11381 = vst [vmem:[#allocation46_spill] sm:$0xff] %v8462_v36  ;;  %2271 = vrot.lane.b32.xlu1 %v8462_v36, %s11279_s24 }
 0x15d   : > { %11382 = vst [vmem:[#allocation47_spill] sm:$0xff] %v8464_v39  ;;  %7105 = vmatmul.mubr.msk.bf16.gmra.mrb[52].mxu1 %vm1414_vm0, %v8349_v6 }
 0x15e   : > { %6671 = vmatpush3.bf16.xpose.msra.mxu0 %v1443_v40  ;;  %7108 = vmatprep.mubr.msk.bf16.mxu1 %vm1414_vm0, %v8369_v31  ;;  %v1455_v40 = vsel %vm1414_vm0, %v8396_v9, 0 }
 0x15f   : > { %7390 = vmatprep.subr.msk.bf16.mxu0 %vm1414_vm0, %v8464_v39  ;;  %v7078_v41 = vpop.f32.mrb[40].mxu1 }
 0x160   : > { %2269 = vrot.lane.b32.xlu1 %v8464_v39, %s11279_s24  ;;  %v1322_v45 = vpop.f32.mrb[41].mxu1 }
 0x161   : > { %v7079_v46 = vpop.f32.mrb[42].mxu1 }
 0x162   : > { %v8478_v47 = vpack.c.bf16 %v7079_v46, %v7078_v41  ;;  %v1325_v58 = vpop.f32.mrb[43].mxu1  ;;  %v1458_v41 = vsel %vm1414_vm0, %v8418_v54, 0  ;;  %v1461_v46 = vsel %vm1414_vm0, %v8416_v42, 0 }
 0x163   : > { %v8480_v59 = vpack.c.bf16 %v1325_v58, %v1322_v45 }
 0x164   : > { %11383 = vst [vmem:[#allocation48_spill] sm:$0xff] %v8478_v47  ;;  %2275 = vrot.lane.b32.xlu0 %v8478_v47, %s11279_s24 }
 0x165   : > { %11384 = vst [vmem:[#allocation49_spill] sm:$0xff] %v8480_v59  ;;  %2273 = vrot.lane.b32.xlu1 %v8480_v59, %s11279_s24  ;;  %7109 = vmatmul.mubr.msk.bf16.gmra.mrb[56].mxu1 %vm1414_vm0, %v8391_v56 }
 0x166   : > { %6673 = vmatpush3.bf16.xpose.msra.mxu0 %v1446_v4  ;;  %7112 = vmatprep.mubr.msk.bf16.mxu1 %vm1414_vm0, %v8411_v25 }
 0x167   : > { %7391 = vmatprep.subr.msk.bf16.mxu0 %vm1414_vm0, %v8462_v36  ;;  %v7082_v5 = vpop.f32.mrb[44].mxu1 }
 0x168   : > { %v1338_v12 = vpop.f32.mrb[45].mxu1 }
 0x169   : > { %v7083_v24 = vpop.f32.mrb[46].mxu1 }
 0x16a   : > { %v8494_v19 = vpack.c.bf16 %v7083_v24, %v7082_v5  ;;  %v1341_v14 = vpop.f32.mrb[47].mxu1 }
 0x16b   : > { %v8496_v35 = vpack.c.bf16 %v1341_v14, %v1338_v12 }
 0x16c   : > { %11385 = vst [vmem:[#allocation50_spill] sm:$0xff] %v8494_v19  ;;  %2279 = vrot.lane.b32.xlu1 %v8494_v19, %s11279_s24 }
 0x16d   : > { %11386 = vst [vmem:[#allocation51_spill] sm:$0xff] %v8496_v35  ;;  %7113 = vmatmul.mubr.msk.bf16.gmra.mrb[60].mxu1 %vm1414_vm0, %v8431_v62 }
 0x16e   : > { %6675 = vmatpush3.bf16.xpose.msra.mxu0 %v1449_v50 }
 0x16f   : > { %7392 = vmatprep.subr.msk.bf16.mxu0 %vm1414_vm0, %v8480_v59 }
 0x170   : > { %2277 = vrot.lane.b32.xlu1 %v8496_v35, %s11279_s24 }
 0x176   : > { %6677 = vmatpush3.bf16.xpose.msra.mxu0 %v1452_v38 }
 0x177   : > { %7393 = vmatprep.subr.msk.bf16.mxu0 %vm1414_vm0, %v8478_v47 }
 0x17e   : > { %6679 = vmatpush3.bf16.xpose.msra.mxu0 %v1455_v40 }
 0x17f   : > { %7394 = vmatprep.subr.msk.bf16.mxu0 %vm1414_vm0, %v8496_v35 }
 0x186   : > { %6681 = vmatpush3.bf16.xpose.msra.mxu0 %v1458_v41 }
 0x187   : > { %7395 = vmatprep.subr.msk.bf16.mxu0 %vm1414_vm0, %v8494_v19  ;;  %v8533_v58 = vpop.permute.xlu1 %2640 }
 0x18a   : > { %v8520_v45 = vpop.permute.xlu0 %2217 }
 0x18b   : > { %6748 = vmatprep.mubr.msk.bf16.mxu1 %vm1414_vm0, %v8520_v45 }
 0x18e   : > { %6683 = vmatpush3.bf16.xpose.msra.mxu0 %v1461_v46 }
 0x18f   : > { %7116 = vmatprep.subr.bf16.mxu0 %v8271_v16  ;;  %v8539_v4 = vpop.permute.xlu1 %2642 }
 0x192   : > { %v2220_v24 = vpop.permute.xlu0 %2219 }
 0x195   : > { %6685 = vmatmul.mubr.msk.bf16.vlgmr.msra.gmra.mrb[32].mxu0 %vm1414_vm0, %v8288_v22 }
 0x196   : > { %7117 = vmatpush3.bf16.msra.mxu0 %v8271_v16  ;;  %6686 = vmatprep.mubr.msk.bf16.mxu0 %vm1414_vm0, %v8312_v37 }
 0x197   : > { %7118 = vmatprep.subr.bf16.mxu0 %v8266_v11  ;;  %v8547_v5 = vpop.permute.xlu1 %2644 }
 0x19a   : > { %7119 = vmatpush3.bf16.msra.mxu0 %v8266_v11 }
 0x19b   : > { %7120 = vmatprep.subr.bf16.mxu0 %v8298_v33  ;;  %v8555_v12 = vpop.permute.xlu1 %2221 }
 0x19d   : > { %6687 = vmatmul.mubr.msk.bf16.gmra.mrb[36].mxu0 %vm1414_vm0, %v8312_v37 }
 0x19e   : > { %7121 = vmatpush3.bf16.msra.mxu0 %v8298_v33  ;;  %6688 = vmatprep.mubr.msk.bf16.mxu0 %vm1414_vm0, %v8332_v52 }
 0x19f   : > { %7122 = vmatprep.subr.bf16.mxu0 %v8296_v29  ;;  %v8568_v50 = vpop.permute.xlu0 %2646 }
 0x1a0   : > { %11387 = vst [vmem:[#allocation52_spill] sm:$0xff] %v8568_v50  ;;  %v8792_v50 = vadd.s32 56, %v8261_v63 }
 0x1a2   : > { %7123 = vmatpush3.bf16.msra.mxu0 %v8296_v29  ;;  %v2224_v14 = vpop.permute.xlu1 %2223 }
 0x1a3   : > { %7124 = vmatprep.subr.bf16.mxu0 %v8318_v48 }
 0x1a5   : > { %6689 = vmatmul.mubr.msk.bf16.gmra.mrb[40].mxu0 %vm1414_vm0, %v8332_v52 }
 0x1a6   : > { %7125 = vmatpush3.bf16.msra.mxu0 %v8318_v48  ;;  %6690 = vmatprep.mubr.msk.bf16.mxu0 %vm1414_vm0, %v8352_v8  ;;  %v2252_v38 = vpop.permute.xlu1 %2251 }
 0x1a7   : > { %7126 = vmatprep.subr.bf16.mxu0 %v8316_v44  ;;  %v2309_v17 = vsel %vm1414_vm0, %v2252_v38, 0 }
 0x1aa   : > { %7127 = vmatpush3.bf16.msra.mxu0 %v8316_v44  ;;  %v2250_v41 = vpop.permute.xlu1 %2249 }
 0x1ab   : > { %7128 = vmatprep.subr.bf16.mxu0 %v8338_v1  ;;  %v2306_v3 = vsel %vm1414_vm0, %v2250_v41, 0 }
 0x1ad   : > { %6691 = vmatmul.mubr.msk.bf16.gmra.mrb[44].mxu0 %vm1414_vm0, %v8352_v8 }
 0x1ae   : > { %7129 = vmatpush3.bf16.msra.mxu0 %v8338_v1  ;;  %6692 = vmatprep.mubr.msk.bf16.mxu0 %vm1414_vm0, %v8372_v32  ;;  %v2256_v40 = vpop.permute.xlu0 %2255 }
 0x1af   : > { %7130 = vmatprep.subr.bf16.mxu0 %v8336_v61  ;;  %v2254_v2 = vpop.permute.xlu1 %2253 }
 0x1b0   : > { %v2312_v22 = vsel %vm1414_vm0, %v2254_v2, 0 }
 0x1b2   : > { %7131 = vmatpush3.bf16.msra.mxu0 %v8336_v61 }
 0x1b3   : > { %7412 = vmatprep.subr.msk.bf16.mxu0 %vm1414_vm0, %v8533_v58 }
 0x1b5   : > { %6693 = vmatmul.mubr.msk.bf16.gmra.mrb[48].mxu0 %vm1414_vm0, %v8372_v32 }
 0x1b6   : > { %6694 = vmatprep.mubr.msk.bf16.mxu0 %vm1414_vm0, %v8394_v57  ;;  %v2260_v7 = vpop.permute.xlu1 %2259 }
 0x1b7   : > { %v2258_v46 = vpop.permute.xlu0 %2257 }
 0x1bd   : > { %6695 = vmatmul.mubr.msk.bf16.gmra.mrb[52].mxu0 %vm1414_vm0, %v8394_v57 }
 0x1be   : > { %6696 = vmatprep.mubr.msk.bf16.mxu0 %vm1414_vm0, %v8414_v28  ;;  %v2264_v60 = vpop.permute.xlu0 %2263 }
 0x1bf   : > { %v2262_v52 = vpop.permute.xlu1 %2261 }
 0x1c0   : > { %v2324_v2 = vsel %vm1414_vm0, %v2262_v52, 0 }
 0x1c5   : > { %6697 = vmatmul.mubr.msk.bf16.gmra.mrb[56].mxu0 %vm1414_vm0, %v8414_v28 }
 0x1c6   : > { %v2268_v8 = vpop.permute.xlu0 %2267  ;;  %6698 = vmatprep.mubr.msk.bf16.mxu0 %vm1414_vm0, %v8434_v0 }
 0x1ca   : > { %v2266_v49 = vpop.permute.xlu0 %2265 }
 0x1cb   : > { %7404 = vmatprep.subr.msk.bf16.mxu1 %vm1414_vm0, %v2266_v49  ;;  %v2315_v49 = vsel %vm1414_vm0, %v2256_v40, 0 }
 0x1cc   : > { %6733 = vmatpush3.bf16.xpose.msra.mxu1 %v2306_v3  ;;  %v2318_v3 = vsel %vm1414_vm0, %v2258_v46, 0 }
 0x1cd   : > { %7405 = vmatprep.subr.msk.bf16.mxu1 %vm1414_vm0, %v2268_v8  ;;  %6699 = vmatmul.mubr.msk.bf16.gmra.mrb[60].mxu0 %vm1414_vm0, %v8434_v0 }
 0x1ce   : > { %v2272_v34 = vpop.permute.xlu1 %2271 }
 0x1d2   : > { %v2270_v37 = vpop.permute.xlu1 %2269 }
 0x1d4   : > { %6735 = vmatpush3.bf16.xpose.msra.mxu1 %v2309_v17 }
 0x1d5   : > { %7406 = vmatprep.subr.msk.bf16.mxu1 %vm1414_vm0, %v2270_v37  ;;  %v2321_v37 = vsel %vm1414_vm0, %v2260_v7, 0 }
 0x1d6   : > { %v2276_v8 = vpop.permute.xlu0 %2275 }
 0x1d7   : > { %v2274_v41 = vpop.permute.xlu1 %2273 }
 0x1dc   : > { %6737 = vmatpush3.bf16.xpose.msra.mxu1 %v2312_v22  ;;  %v2327_v22 = vsel %vm1414_vm0, %v2264_v60, 0 }
 0x1dd   : > { %7407 = vmatprep.subr.msk.bf16.mxu1 %vm1414_vm0, %v2272_v34 }
 0x1de   : > { %v2280_v61 = vpop.permute.xlu1 %2279 }
 0x1e2   : > { %v2278_v17 = vpop.permute.xlu1 %2277 }
 0x1e4   : > { %6739 = vmatpush3.bf16.xpose.msra.mxu1 %v2315_v49 }
 0x1e5   : > { %7408 = vmatprep.subr.msk.bf16.mxu1 %vm1414_vm0, %v2274_v41 }
 0x1ec   : > { %6741 = vmatpush3.bf16.xpose.msra.mxu1 %v2318_v3 }
 0x1ed   : > { %7409 = vmatprep.subr.msk.bf16.mxu1 %vm1414_vm0, %v2276_v8 }
 0x1f4   : > { %6743 = vmatpush3.bf16.xpose.msra.mxu1 %v2321_v37 }
 0x1f5   : > { %7410 = vmatprep.subr.msk.bf16.mxu1 %vm1414_vm0, %v2278_v17 }
 0x1fc   : > { %6745 = vmatpush3.bf16.xpose.msra.mxu1 %v2324_v2 }
 0x1fd   : > { %7411 = vmatprep.subr.msk.bf16.mxu1 %vm1414_vm0, %v2280_v61 }
 0x204   : > { %6747 = vmatpush3.bf16.xpose.msra.mxu1 %v2327_v22 }
 0x20b   : > { %6749 = vmatmul.mubr.msk.bf16.vlgmr.msra.gmra.mrb[64].mxu1 %vm1414_vm0, %v8520_v45 }
 0x20c   : > { %6750 = vmatprep.mubr.msk.bf16.mxu1 %vm1414_vm0, %v2220_v24 }
 0x213   : > { %6751 = vmatmul.mubr.msk.bf16.gmra.mrb[68].mxu1 %vm1414_vm0, %v2220_v24 }
 0x214   : > { %6752 = vmatprep.mubr.msk.bf16.mxu1 %vm1414_vm0, %v8555_v12 }
 0x21b   : > { %6753 = vmatmul.mubr.msk.bf16.gmra.mrb[72].mxu1 %vm1414_vm0, %v8555_v12 }
 0x21c   : > { %6754 = vmatprep.mubr.msk.bf16.mxu1 %vm1414_vm0, %v2224_v14 }
 0x223   : > { %6755 = vmatmul.mubr.msk.bf16.gmra.mrb[76].mxu1 %vm1414_vm0, %v2224_v14 }
 0x228   : > { %v8610_v7 = vpop.f32.mrb[48].mxu1 }
 0x229   : > { %v8612_v60 = vpop.f32.mrb[49].mxu1 }
 0x22a   : > { %v8614_v34 = vpop.f32.mrb[50].mxu1 }
 0x22b   : > { %v8616_v52 = vpop.f32.mrb[51].mxu1 }
 0x230   : > { %v8618_v61 = vpop.f32.mrb[52].mxu1 }
 0x231   : > { %v8620_v45 = vpop.f32.mrb[53].mxu1 }
 0x232   : > { %v8622_v24 = vpop.f32.mrb[54].mxu1 }
 0x233   : > { %v8624_v38 = vpop.f32.mrb[55].mxu1 }
 0x238   : > { %v8626_v12 = vpop.f32.mrb[56].mxu1 }
 0x239   : > { %v8628_v40 = vpop.f32.mrb[57].mxu1 }
 0x23a   : > { %v8630_v14 = vpop.f32.mrb[58].mxu1 }
 0x23b   : > { %v8632_v46 = vpop.f32.mrb[59].mxu1 }
 0x240   : > { %v8634_v41 = vpop.f32.mrb[60].mxu1 }
 0x241   : > { %v8636_v49 = vpop.f32.mrb[61].mxu1 }
 0x242   : > { %v8638_v3 = vpop.f32.mrb[62].mxu1 }
 0x243   : > { %v8640_v8 = vpop.f32.mrb[63].mxu1 }
 0x268   : > { %v1521_v17 = vpop.f32.mrb[32].mxu0 }
 0x269   : > { %1601 = vrot.lane.b32.xlu0 %v1521_v17, %s11277_s25  ;;  %v1523_v37 = vpop.f32.mrb[33].mxu0 }
 0x26a   : > { %v1525_v2 = vpop.f32.mrb[34].mxu0 }
 0x26b   : > { %1614 = vrot.lane.b32.xlu1 %v1525_v2, %s11275_s26  ;;  %v1527_v22 = vpop.f32.mrb[35].mxu0 }
 0x26d   : > { %1604 = vrot.lane.b32.xlu0 %v1523_v37, %s11277_s25 }
 0x26f   : > { %1618 = vrot.lane.b32.xlu1 %v1527_v22, %s11275_s26 }
 0x270   : > { %v1531_v19 = vpop.f32.mrb[36].mxu0 }
 0x271   : > { %1625 = vrot.lane.b32.xlu0 %v1531_v19, %s11273_s27  ;;  %v1533_v42 = vpop.f32.mrb[37].mxu0 }
 0x272   : > { %v1535_v1 = vpop.f32.mrb[38].mxu0 }
 0x273   : > { %1629 = vrot.lane.b32.xlu1 %v1533_v42, %s11273_s27  ;;  %v1537_v44 = vpop.f32.mrb[39].mxu0 }
 0x275   : > { %1636 = vrot.lane.b32.xlu0 %v1535_v1, %s11271_s28 }
 0x277   : > { %1640 = vrot.lane.b32.xlu1 %v1537_v44, %s11271_s28 }
 0x278   : > { %v1541_v17 = vpop.f32.mrb[40].mxu0 }
 0x279   : > { %v1543_v2 = vpop.f32.mrb[41].mxu0  ;;  %1647 = vrot.lane.b32.xlu0 %v1541_v17, %s11267_s29 }
 0x27a   : > { %v1545_v37 = vpop.f32.mrb[42].mxu0 }
 0x27b   : > { %1651 = vrot.lane.b32.xlu1 %v1543_v2, %s11267_s29  ;;  %v1547_v22 = vpop.f32.mrb[43].mxu0 }
 0x27d   : > { %1658 = vrot.lane.b32.xlu0 %v1545_v37, %s11269_s30 }
 0x27f   : > { %1662 = vrot.lane.b32.xlu1 %v1547_v22, %s11269_s30 }
 0x280   : > { %v1551_v42 = vpop.f32.mrb[44].mxu0 }
 0x281   : > { %v1553_v19 = vpop.f32.mrb[45].mxu0  ;;  %1669 = vrot.lane.b32.xlu0 %v1551_v42, %s11209_s17 }
 0x282   : > { %v1555_v44 = vpop.f32.mrb[46].mxu0 }
 0x283   : > { %1673 = vrot.lane.b32.xlu1 %v1553_v19, %s11209_s17  ;;  %v1557_v1 = vpop.f32.mrb[47].mxu0  ;;  %s8684_s17 = scalar_lea.vmem %s11390_s6, %s11597_s22  ;;  %s11495_s6 = smov 376  }
 0x284   : > { %v8698_v35 = vld [vmem:[%s8684_s17] ss:$0 sm:$0xff] }
 0x285   : > { %1680 = vrot.lane.b32.xlu0 %v1555_v44, %s11195_s18 }
 0x287   : > { %1684 = vrot.lane.b32.xlu1 %v1557_v1, %s11195_s18  ;;  %s11203_s18 = smov 344  }
 0x288   : > { %v1561_v17 = vpop.f32.mrb[48].mxu0 }
 0x289   : > { %v1563_v2 = vpop.f32.mrb[49].mxu0  ;;  %1691 = vrot.lane.b32.xlu0 %v1561_v17, %s11197_s20 }
 0x28a   : > { %v1565_v37 = vpop.f32.mrb[50].mxu0 }
 0x28b   : > { %1695 = vrot.lane.b32.xlu1 %v1563_v2, %s11197_s20  ;;  %v1567_v22 = vpop.f32.mrb[51].mxu0  ;;  %s11207_s20 = smov 352  }
 0x28d   : > { %1702 = vrot.lane.b32.xlu0 %v1565_v37, %s11199_s23 }
 0x28f   : > { %1706 = vrot.lane.b32.xlu1 %v1567_v22, %s11199_s23  ;;  %s11205_s23 = smov 360  }
 0x290   : > { %v1571_v42 = vpop.f32.mrb[52].mxu0 }
 0x291   : > { %v1573_v19 = vpop.f32.mrb[53].mxu0  ;;  %1713 = vrot.lane.b32.xlu0 %v1571_v42, %s11201_s19 }
 0x292   : > { %v1575_v44 = vpop.f32.mrb[54].mxu0 }
 0x293   : > { %1717 = vrot.lane.b32.xlu1 %v1573_v19, %s11201_s19  ;;  %v1577_v1 = vpop.f32.mrb[55].mxu0  ;;  %s11296_s19 = smov 368  }
 0x295   : > { %1724 = vrot.lane.b32.xlu0 %v1575_v44, %s11203_s18 }
 0x297   : > { %1728 = vrot.lane.b32.xlu1 %v1577_v1, %s11203_s18  ;;  %s11281_s18 = smov 376  }
 0x298   : > { %v1581_v17 = vpop.f32.mrb[56].mxu0 }
 0x299   : > { %v1583_v2 = vpop.f32.mrb[57].mxu0  ;;  %1735 = vrot.lane.b32.xlu0 %v1581_v17, %s11207_s20  ;;  %v11388_v17 = vlaneseq }
 0x29a   : > { %v1585_v37 = vpop.f32.mrb[58].mxu0 }
 0x29b   : > { %1739 = vrot.lane.b32.xlu1 %v1583_v2, %s11207_s20  ;;  %v1587_v22 = vpop.f32.mrb[59].mxu0  ;;  %v8675_v2 = vand.u32 127, %v11388_v17  ;;  %v8695_v17 = vadd.s32 16, %v8261_v63  ;;  %s11412_s20 = smov 304  }
 0x29d   : > { %1746 = vrot.lane.b32.xlu0 %v1585_v37, %s11205_s23  ;;  %vm1610_vm1 = vcmp.lt.s32.totalorder %v8675_v2, %v8261_v63  ;;  %11392 = vst [vmem:[#allocation55_spill] sm:$0xff] %v8695_v17  ;;  %vm1632_vm3 = vcmp.lt.s32.totalorder %v8675_v2, %v8695_v17  ;;  %vm1687_vm8 = vcmp.lt.s32.totalorder %v8675_v2, %v8792_v50 }
 0x29f   : > { %1750 = vrot.lane.b32.xlu1 %v1587_v22, %s11205_s23  ;;  %v8678_v22 = vadd.s32 8, %v8261_v63  ;;  %s11415_s23 = smov 312  }
 0x2a0   : > { %v1591_v42 = vpop.f32.mrb[60].mxu0 }
 0x2a1   : > { %v1593_v19 = vpop.f32.mrb[61].mxu0  ;;  %1757 = vrot.lane.b32.xlu0 %v1591_v42, %s11296_s19  ;;  %11389 = vst [vmem:[#allocation53_spill] sm:$0xff] %v8678_v22  ;;  %vm1621_vm2 = vcmp.lt.s32.totalorder %v8675_v2, %v8678_v22 }
 0x2a2   : > { %v1595_v44 = vpop.f32.mrb[62].mxu0 }
 0x2a3   : > { %1761 = vrot.lane.b32.xlu1 %v1593_v19, %s11296_s19  ;;  %v1597_v1 = vpop.f32.mrb[63].mxu0 }
 0x2a5   : > { %1768 = vrot.lane.b32.xlu0 %v1595_v44, %s11281_s18 }
 0x2a7   : > { %1772 = vrot.lane.b32.xlu1 %v1597_v1, %s11281_s18 }
 0x2db   : > { %v1602_v37 = vpop.permute.xlu0 %1601 }
 0x2dd   : > { %v1615_v42 = vpop.permute.xlu1 %1614 }
 0x2de   : > { %v8688_v19 = vpop.f32.mrb[64].mxu1 }
 0x2df   : > { %11391 = vst [vmem:[#allocation54_spill] sm:$0xff] %v8688_v19  ;;  %v1605_v44 = vpop.permute.xlu0 %1604  ;;  %v8690_v1 = vpop.f32.mrb[65].mxu1 }
 0x2e0   : > { %v1611_v54 = vsel %vm1610_vm1, %v1602_v37, %v1605_v44  ;;  %v8703_v48 = vpop.f32.mrb[66].mxu1  ;;  %v8718_v37 = vadd.s32 24, %v8261_v63 }
 0x2e1   : > { %11393 = vst [vmem:[#allocation56_spill] sm:$0xff] %v8703_v48  ;;  %v1860_v9 = vadd.f32 %v8612_v60, %v1611_v54  ;;  %v1619_v29 = vpop.permute.xlu1 %1618  ;;  %v8706_v11 = vpop.f32.mrb[67].mxu1  ;;  %v8795_v48 = vadd.s32 64, %v8261_v63 }
 0x2e2   : > { %v1622_v47 = vsel %vm1621_vm2, %v1615_v42, %v1619_v29  ;;  %11394 = vst [vmem:[#allocation57_spill] sm:$0xff] %v8718_v37  ;;  %vm1643_vm4 = vcmp.lt.s32.totalorder %v8675_v2, %v8718_v37 }
 0x2e3   : > { %v1863_v15 = vadd.f32 %v8616_v52, %v1622_v47  ;;  %v1626_v33 = vpop.permute.xlu0 %1625  ;;  %v8715_v36 = vadd.f32 %v8698_v35, %v1860_v9  ;;  %11406 = vst [vmem:[#allocation69_spill] sm:$0xff] %v8795_v48  ;;  %vm1698_vm9 = vcmp.lt.s32.totalorder %v8675_v2, %v8795_v48 }
 0x2e5   : > { %v1630_v54 = vpop.permute.xlu1 %1629  ;;  %1944 = vmax.xlane.f32.xlu0 %v8715_v36  ;;  %v8722_v60 = vadd.f32 %v8698_v35, %v1863_v15 }
 0x2e6   : > { %v1633_v29 = vsel %vm1632_vm3, %v1626_v33, %v1630_v54  ;;  %v8727_v47 = vpop.f32.mrb[68].mxu1 }
 0x2e7   : > { %11395 = vst [vmem:[#allocation58_spill] sm:$0xff] %v8727_v47  ;;  %v1868_v52 = vadd.f32 %v8610_v7, %v1633_v29  ;;  %v1637_v42 = vpop.permute.xlu0 %1636  ;;  %v8730_v9 = vpop.f32.mrb[69].mxu1  ;;  %1946 = vmax.xlane.f32.xlu1 %v8722_v60 }
 0x2e8   : > { %v8735_v44 = vpop.f32.mrb[70].mxu1 }
 0x2e9   : > { %11396 = vst [vmem:[#allocation59_spill] sm:$0xff] %v8735_v44  ;;  %v1641_v15 = vpop.permute.xlu1 %1640  ;;  %v8737_v22 = vpop.f32.mrb[71].mxu1  ;;  %v8740_v17 = vadd.f32 %v8698_v35, %v1868_v52 }
 0x2ea   : > { %v1644_v33 = vsel %vm1643_vm4, %v1637_v42, %v1641_v15 }
 0x2eb   : > { %v1871_v7 = vadd.f32 %v8614_v34, %v1644_v33  ;;  %1948 = vmax.xlane.f32.xlu0 %v8740_v17  ;;  %v1648_v54 = vpop.permute.xlu0 %1647 }
 0x2ed   : > { %v1652_v29 = vpop.permute.xlu1 %1651  ;;  %v8748_v59 = vadd.f32 %v8698_v35, %v1871_v7 }
 0x2ee   : > { %v8750_v39 = vpop.f32.mrb[72].mxu1 }
 0x2ef   : > { %11397 = vst [vmem:[#allocation60_spill] sm:$0xff] %v8750_v39  ;;  %1950 = vmax.xlane.f32.xlu0 %v8748_v59  ;;  %v1659_v16 = vpop.permute.xlu0 %1658  ;;  %v8753_v52 = vpop.f32.mrb[73].mxu1 }
 0x2f0   : > { %11398 = vst [vmem:[#allocation61_spill] sm:$0xff] %v8753_v52  ;;  %v8755_v51 = vpop.f32.mrb[74].mxu1 }
 0x2f1   : > { %11399 = vst [vmem:[#allocation62_spill] sm:$0xff] %v8755_v51  ;;  %v1663_v37 = vpop.permute.xlu1 %1662  ;;  %v8757_v42 = vpop.f32.mrb[75].mxu1 }
 0x2f2   : > { %11400 = vst [vmem:[#allocation63_spill] sm:$0xff] %v8757_v42 }
 0x2f3   : > { %v1670_v34 = vpop.permute.xlu0 %1669 }
 0x2f5   : > { %v1674_v15 = vpop.permute.xlu1 %1673 }
 0x2f6   : > { %v8759_v33 = vpop.f32.mrb[76].mxu1 }
 0x2f7   : > { %11401 = vst [vmem:[#allocation64_spill] sm:$0xff] %v8759_v33  ;;  %v8761_v43 = vpop.f32.mrb[77].mxu1  ;;  %v1681_v23 = vpop.permute.xlu0 %1680 }
 0x2f8   : > { %11402 = vst [vmem:[#allocation65_spill] sm:$0xff] %v8761_v43  ;;  %2225 = vrot.lane.b32.xlu1 %v8372_v32, %s11279_s24  ;;  %v8765_v7 = vpop.f32.mrb[78].mxu1  ;;  %v8774_v32 = vadd.s32 32, %v8261_v63 }
 0x2f9   : > { %11403 = vst [vmem:[#allocation66_spill] sm:$0xff] %v8765_v7  ;;  %v8767_v20 = vpop.f32.mrb[79].mxu1  ;;  %v1685_v26 = vpop.permute.xlu1 %1684  ;;  %v8779_v7 = vadd.s32 40, %v8261_v63 }
 0x2fa   : > { %11404 = vst [vmem:[#allocation67_spill] sm:$0xff] %v8767_v20  ;;  %11405 = vst [vmem:[#allocation68_spill] sm:$0xff] %v8774_v32  ;;  %vm1654_vm5 = vcmp.lt.s32.totalorder %v8675_v2, %v8774_v32  ;;  %v8809_v32 = vadd.s32 72, %v8261_v63 }
 0x2fb   : > { %v1692_v30 = vpop.permute.xlu0 %1691  ;;  %vm1665_vm6 = vcmp.lt.s32.totalorder %v8675_v2, %v8779_v7 }
 0x2fc   : > { %2650 = vrot.lane.b32.xlu1 %v8380_v53, %s11279_s24  ;;  %v8782_v53 = vadd.s32 48, %v8261_v63  ;;  %vm1709_vm10 = vcmp.lt.s32.totalorder %v8675_v2, %v8809_v32 }
 0x2fd   : > { %v1696_v51 = vpop.permute.xlu1 %1695 }
 0x2fe   : > { %vm1676_vm7 = vcmp.lt.s32.totalorder %v8675_v2, %v8782_v53 }
 0x2ff   : > { %v1703_v33 = vpop.permute.xlu0 %1702 }
 0x301   : > { %v1707_v39 = vpop.permute.xlu1 %1706 }
 0x303   : > { %v1714_v44 = vpop.permute.xlu0 %1713 }
 0x305   : > { %2648 = vrot.lane.b32.xlu0 %v8360_v27, %s11279_s24  ;;  %v1718_v47 = vpop.permute.xlu1 %1717  ;;  %v1655_v27 = vsel %vm1654_vm5, %v1648_v54, %v1652_v29  ;;  %v1666_v54 = vsel %vm1665_vm6, %v1659_v16, %v1663_v37  ;;  %v1677_v29 = vsel %vm1676_vm7, %v1670_v34, %v1674_v15  ;;  %v1688_v34 = vsel %vm1687_vm8, %v1681_v23, %v1685_v26 }
 0x306   : > { %v1876_v42 = vadd.f32 %v8620_v45, %v1655_v27  ;;  %v8812_v27 = vadd.s32 80, %v8261_v63  ;;  %v1879_v45 = vadd.f32 %v8624_v38, %v1666_v54  ;;  %v1884_v16 = vadd.f32 %v8618_v61, %v1677_v29 }
 0x307   : > { %v1725_v20 = vpop.permute.xlu0 %1724  ;;  %v1699_v15 = vsel %vm1698_vm9, %v1692_v30, %v1696_v51  ;;  %v8830_v38 = vadd.s32 88, %v8261_v63  ;;  %v8833_v61 = vadd.s32 96, %v8261_v63  ;;  %v1887_v26 = vadd.f32 %v8622_v24, %v1688_v34 }
 0x308   : > { %v8817_v37 = vadd.f32 %v8698_v35, %v1876_v42  ;;  %vm1720_vm11 = vcmp.lt.s32.totalorder %v8675_v2, %v8812_v27  ;;  %v1892_v51 = vadd.f32 %v8628_v40, %v1699_v15  ;;  %v8839_v23 = vadd.f32 %v8698_v35, %v1884_v16 }
 0x309   : > { %v1729_v43 = vpop.permute.xlu1 %1728  ;;  %v8842_v30 = vadd.f32 %v8698_v35, %v1879_v45  ;;  %v1710_v29 = vsel %vm1709_vm10, %v1703_v33, %v1707_v39  ;;  %v1721_v48 = vsel %vm1720_vm11, %v1714_v44, %v1718_v47  ;;  %vm1731_vm12 = vcmp.lt.s32.totalorder %v8675_v2, %v8830_v38 }
 0x30a   : > { %vm11266_vm13 = vcmp.lt.s32.totalorder %v8675_v2, %v8833_v61  ;;  %v8855_v24 = vadd.s32 104, %v8261_v63  ;;  %v8858_v40 = vadd.s32 112, %v8261_v63  ;;  %v1895_v39 = vadd.f32 %v8632_v46, %v1710_v29 }
 0x30b   : > { %v1736_v19 = vpop.permute.xlu0 %1735  ;;  %v1900_v47 = vadd.f32 %v8626_v12, %v1721_v48  ;;  %v8865_v45 = vadd.f32 %v8698_v35, %v1892_v51  ;;  %v8868_v16 = vadd.f32 %v8698_v35, %v1887_v26  ;;  %v1732_v34 = vsel %vm1731_vm12, %v1725_v20, %v1729_v43 }
 0x30c   : > { %vm11295_vm14 = vcmp.lt.s32.totalorder %v8675_v2, %v8855_v24  ;;  %vm1764_vm15 = vcmp.lt.s32.totalorder %v8675_v2, %v8858_v40  ;;  %v8881_v48 = vadd.s32 120, %v8261_v63  ;;  %v1903_v12 = vadd.f32 %v8630_v14, %v1732_v34 }
 0x30d   : > { %v1740_v52 = vpop.permute.xlu1 %1739  ;;  %v8888_v43 = vadd.f32 %v8698_v35, %v1900_v47  ;;  %v8891_v46 = vadd.f32 %v8698_v35, %v1895_v39 }
 0x30e   : > { %v1743_v15 = vsel %vm11266_vm13, %v1736_v19, %v1740_v52  ;;  %vm11323_vm13 = vcmp.lt.s32.totalorder %v8675_v2, %v8881_v48 }
 0x30f   : > { %v1747_v42 = vpop.permute.xlu0 %1746  ;;  %v1908_v20 = vadd.f32 %v8636_v49, %v1743_v15 }
 0x311   : > { %v1751_v54 = vpop.permute.xlu1 %1750  ;;  %v8906_v29 = vadd.f32 %v8698_v35, %v1908_v20 }
 0x312   : > { %v1754_v19 = vsel %vm11295_vm14, %v1747_v42, %v1751_v54  ;;  %v8909_v42 = vadd.f32 %v8698_v35, %v1903_v12 }
 0x313   : > { %v1758_v44 = vpop.permute.xlu0 %1757  ;;  %v1911_v49 = vadd.f32 %v8640_v8, %v1754_v19 }
 0x315   : > { %v1762_v33 = vpop.permute.xlu1 %1761 }
 0x316   : > { %v1765_v52 = vsel %vm1764_vm15, %v1758_v44, %v1762_v33 }
 0x317   : > { %v1769_v26 = vpop.permute.xlu0 %1768  ;;  %v1916_v51 = vadd.f32 %v8634_v41, %v1765_v52  ;;  %v8921_v41 = vadd.f32 %v8698_v35, %v1911_v49 }
 0x319   : > { %v1773_v14 = vpop.permute.xlu1 %1772  ;;  %v8918_v8 = vadd.f32 %v8698_v35, %v1916_v51 }
 0x31a   : > { %v1776_v54 = vsel %vm11323_vm13, %v1769_v26, %v1773_v14 }
 0x31b   : > { %v1919_v39 = vadd.f32 %v8638_v3, %v1776_v54 }
 0x31d   : > { %v8926_v47 = vadd.f32 %v8698_v35, %v1919_v39 }
 0x320   : > { %1952 = vmax.xlane.f32.xlu1 %v8817_v37 }
 0x324   : > { %1956 = vmax.xlane.f32.xlu1 %v8839_v23  ;;  %1954 = vmax.xlane.f32.xlu0 %v8842_v30 }
 0x328   : > { %1960 = vmax.xlane.f32.xlu1 %v8865_v45  ;;  %1958 = vmax.xlane.f32.xlu0 %v8868_v16 }
 0x32c   : > { %1964 = vmax.xlane.f32.xlu1 %v8888_v43  ;;  %1962 = vmax.xlane.f32.xlu0 %v8891_v46 }
 0x330   : > { %1968 = vmax.xlane.f32.xlu1 %v8906_v29  ;;  %1966 = vmax.xlane.f32.xlu0 %v8909_v42 }
 0x334   : > { %1972 = vmax.xlane.f32.xlu1 %v8918_v8  ;;  %1970 = vmax.xlane.f32.xlu0 %v8921_v41 }
 0x338   : > { %1974 = vmax.xlane.f32.xlu0 %v8926_v47 }
 0x345   : > { %2227 = vrot.lane.b32.xlu1 %v8394_v57, %s11279_s24 }
 0x372   : > { %v1945_v44 = vpop.xlane.xlu0 %1944 }
 0x373   : > { %v1976_v3 = vsub.f32 %v8715_v36, %v1945_v44 }
 0x374   : > { %v1947_v33 = vpop.xlane.xlu1 %1946 }
 0x375   : > { %v1992_v34 = vmul.f32 1.442695, %v1976_v3  ;;  %v1977_v15 = vsub.f32 %v8722_v60, %v1947_v33 }
 0x377   : > { %7600 = vpow2.f32 %v1992_v34  ;;  %v1994_v12 = vmul.f32 1.442695, %v1977_v15 }
 0x378   : > { %v2226_v20 = vpop.permute.xlu1 %2225  ;;  %v1949_v19 = vpop.xlane.xlu0 %1948 }
 0x379   : > { %7602 = vpow2.f32 %v1994_v12  ;;  %v1978_v35 = vsub.f32 %v8740_v17, %v1949_v19  ;;  %6756 = vmatprep.mubr.msk.bf16.mxu1 %vm1414_vm0, %v2226_v20 }
 0x37a   : > { %6757 = vmatmul.mubr.msk.bf16.gmra.mrb[80].mxu1 %vm1414_vm0, %v2226_v20 }
 0x37b   : > { %v1996_v52 = vmul.f32 1.442695, %v1978_v35 }
 0x37c   : > { %v1951_v26 = vpop.xlane.xlu0 %1950  ;;  %v8949_v54 = vpop.permute.xlu1 %2650 }
 0x37d   : > { %7604 = vpow2.f32 %v1996_v52  ;;  %v1979_v36 = vsub.f32 %v8748_v59, %v1951_v26 }
 0x37f   : > { %v1998_v14 = vmul.f32 1.442695, %v1979_v36 }
 0x380   : > { %v8951_v59 = vpop.permute.xlu0 %2648 }
 0x381   : > { %v8937_v49 = vpop.eup %7600  ;;  %7606 = vpow2.f32 %v1998_v14 }
 0x382   : > { %2024 = vadd.xlane.f32.xlu0 %v8937_v49 }
 0x383   : > { %v8940_v60 = vpop.eup %7602 }
 0x384   : > { %2026 = vadd.xlane.f32.xlu1 %v8940_v60 }
 0x387   : > { %v8943_v17 = vpop.eup %7604 }
 0x388   : > { %2028 = vadd.xlane.f32.xlu0 %v8943_v17 }
 0x38b   : > { %v8946_v51 = vpop.eup %7606 }
 0x38c   : > { %2030 = vadd.xlane.f32.xlu0 %v8946_v51 }
 0x3ad   : > { %v1953_v39 = vpop.xlane.xlu1 %1952 }
 0x3ae   : > { %v1980_v44 = vsub.f32 %v8817_v37, %v1953_v39 }
 0x3b0   : > { %v2000_v3 = vmul.f32 1.442695, %v1980_v44 }
 0x3b1   : > { %v1957_v33 = vpop.xlane.xlu1 %1956  ;;  %v1955_v34 = vpop.xlane.xlu0 %1954 }
 0x3b2   : > { %7608 = vpow2.f32 %v2000_v3  ;;  %v1982_v15 = vsub.f32 %v8839_v23, %v1957_v33  ;;  %v1981_v12 = vsub.f32 %v8842_v30, %v1955_v34 }
 0x3b4   : > { %v2004_v20 = vmul.f32 1.442695, %v1982_v15  ;;  %v2002_v19 = vmul.f32 1.442695, %v1981_v12 }
 0x3b5   : > { %v1961_v35 = vpop.xlane.xlu1 %1960  ;;  %v1959_v52 = vpop.xlane.xlu0 %1958 }
 0x3b6   : > { %7610 = vpow2.f32 %v2004_v20  ;;  %v1983_v26 = vsub.f32 %v8868_v16, %v1959_v52  ;;  %v1984_v36 = vsub.f32 %v8865_v45, %v1961_v35 }
 0x3b7   : > { %7612 = vpow2.f32 %v2002_v19 }
 0x3b8   : > { %v2006_v14 = vmul.f32 1.442695, %v1983_v26  ;;  %v2008_v44 = vmul.f32 1.442695, %v1984_v36 }
 0x3b9   : > { %v1965_v37 = vpop.xlane.xlu1 %1964  ;;  %v1963_v39 = vpop.xlane.xlu0 %1962 }
 0x3ba   : > { %7614 = vpow2.f32 %v2006_v14  ;;  %v1985_v3 = vsub.f32 %v8891_v46, %v1963_v39  ;;  %v1986_v33 = vsub.f32 %v8888_v43, %v1965_v37 }
 0x3bb   : > { %7616 = vpow2.f32 %v2008_v44 }
 0x3bc   : > { %v8959_v23 = vpop.eup %7608  ;;  %v2010_v34 = vmul.f32 1.442695, %v1985_v3  ;;  %v2012_v46 = vmul.f32 1.442695, %v1986_v33 }
 0x3bd   : > { %v1969_v30 = vpop.xlane.xlu1 %1968  ;;  %2032 = vadd.xlane.f32.xlu0 %v8959_v23  ;;  %v1967_v15 = vpop.xlane.xlu0 %1966 }
 0x3be   : > { %7618 = vpow2.f32 %v2010_v34  ;;  %v1987_v20 = vsub.f32 %v8909_v42, %v1967_v15  ;;  %v1988_v37 = vsub.f32 %v8906_v29, %v1969_v30 }
 0x3bf   : > { %7620 = vpow2.f32 %v2012_v46 }
 0x3c0   : > { %v8963_v16 = vpop.eup %7610  ;;  %v2014_v43 = vmul.f32 1.442695, %v1987_v20  ;;  %v2016_v39 = vmul.f32 1.442695, %v1988_v37 }
 0x3c1   : > { %v8965_v45 = vpop.eup %7612  ;;  %v1973_v12 = vpop.xlane.xlu1 %1972  ;;  %2036 = vadd.xlane.f32.xlu0 %v8963_v16 }
 0x3c2   : > { %2034 = vadd.xlane.f32.xlu1 %v8965_v45  ;;  %7622 = vpow2.f32 %v2014_v43  ;;  %v1971_v14 = vpop.xlane.xlu0 %1970  ;;  %v1990_v44 = vsub.f32 %v8918_v8, %v1973_v12 }
 0x3c3   : > { %7624 = vpow2.f32 %v2016_v39  ;;  %v1989_v29 = vsub.f32 %v8921_v41, %v1971_v14 }
 0x3c4   : > { %v8970_v19 = vpop.eup %7614  ;;  %v2020_v33 = vmul.f32 1.442695, %v1990_v44 }
 0x3c5   : > { %v2228_v35 = vpop.permute.xlu1 %2227  ;;  %2038 = vadd.xlane.f32.xlu0 %v8970_v19  ;;  %v8975_v52 = vpop.eup %7616  ;;  %v2018_v8 = vmul.f32 1.442695, %v1989_v29 }
 0x3c6   : > { %6758 = vmatprep.mubr.msk.bf16.mxu1 %vm1414_vm0, %v2228_v35  ;;  %v1975_v3 = vpop.xlane.xlu0 %1974  ;;  %7626 = vpow2.f32 %v2020_v33 }
 0x3c7   : > { %6759 = vmatmul.mubr.msk.bf16.gmra.mrb[84].mxu1 %vm1414_vm0, %v2228_v35  ;;  %v1991_v34 = vsub.f32 %v8926_v47, %v1975_v3 }
 0x3c8   : > { %v8978_v26 = vpop.eup %7618 }
 0x3c9   : > { %2040 = vadd.xlane.f32.xlu0 %v8975_v52  ;;  %v8981_v42 = vpop.eup %7620  ;;  %v2022_v15 = vmul.f32 1.442695, %v1991_v34 }
 0x3cb   : > { %7628 = vpow2.f32 %v2022_v15 }
 0x3cc   : > { %v8986_v36 = vpop.eup %7622  ;;  %7630 = vpow2.f32 %v2018_v8  ;;  %v11414_v8 = vld [vmem:[#allocation58_spill] sm:$0xff] }
 0x3cd   : > { %2042 = vadd.xlane.f32.xlu0 %v8978_v26  ;;  %v8994_v46 = vpop.eup %7624 }
 0x3d0   : > { %v8998_v30 = vpop.eup %7626 }
 0x3d1   : > { %2044 = vadd.xlane.f32.xlu0 %v8981_v42 }
 0x3d3   : > { %2229 = vrot.lane.b32.xlu1 %v8414_v28, %s11279_s24 }
 0x3d5   : > { %2046 = vadd.xlane.f32.xlu0 %v8986_v36  ;;  %v9001_v12 = vpop.eup %7628 }
 0x3d6   : > { %v9004_v47 = vpop.eup %7630 }
 0x3eb   : > { %2652 = vrot.lane.b32.xlu0 %v8400_v18, %s11279_s24 }
 0x3f7   : > { %2048 = vadd.xlane.f32.xlu1 %v8994_v46 }
 0x3fb   : > { %2052 = vadd.xlane.f32.xlu1 %v8998_v30 }
 0x3ff   : > { %2054 = vadd.xlane.f32.xlu1 %v9001_v12 }
 0x40a   : > { %2050 = vadd.xlane.f32.xlu0 %v9004_v47 }
 0x40f   : > { %v2025_v20 = vpop.xlane.xlu0 %2024 }
 0x410   : > { %2231 = vrot.lane.b32.xlu1 %v8434_v0, %s11279_s24  ;;  %7632 = vrcp.f32 %v2025_v20  ;;  %v11416_v20 = vld [vmem:[#allocation67_spill] sm:$0xff] }
 0x411   : > { %v2027_v41 = vpop.xlane.xlu1 %2026 }
 0x412   : > { %7634 = vrcp.f32 %v2027_v41  ;;  %v11417_v41 = vld [vmem:[#allocation59_spill] sm:$0xff] }
 0x414   : > { %2618 = vrot.lane.b32.xlu1 %v8438_v10, %s11279_s24 }
 0x415   : > { %v2029_v35 = vpop.xlane.xlu0 %2028 }
 0x416   : > { %7636 = vrcp.f32 %v2029_v35 }
 0x418   : > { %2622 = vrot.lane.b32.xlu1 %v8349_v6, %s11279_s24 }
 0x419   : > { %v2031_v43 = vpop.xlane.xlu0 %2030 }
 0x41a   : > { %v7633_v14 = vpop.eup %7632  ;;  %7638 = vrcp.f32 %v2031_v43  ;;  %v11419_v43 = vld [vmem:[#allocation62_spill] sm:$0xff] }
 0x41b   : > { %v2072_v39 = vmul.f32 %v7633_v14, %v8937_v49  ;;  %v2693_v14 = vsel %vm1414_vm0, %v8951_v59, 0 }
 0x41c   : > { %v7635_v37 = vpop.eup %7634  ;;  %2626 = vrot.lane.b32.xlu1 %v8391_v56, %s11279_s24 }
 0x41d   : > { %v2073_v44 = vmul.f32 %v7635_v37, %v8940_v60  ;;  %v2681_v60 = vsel %vm1414_vm0, %v8533_v58, 0  ;;  %v11407_v58 = vld [vmem:[#allocation61_spill] sm:$0xff] }
 0x41f   : > { %v2088_v3 = vpack.c.bf16 %v2073_v44, %v2072_v39  ;;  %v11420_v39 = vld [vmem:[#allocation64_spill] sm:$0xff] }
 0x420   : > { %2630 = vrot.lane.b32.xlu1 %v8431_v62, %s11279_s24  ;;  %2654 = vrot.lane.b32.xlu0 %v8420_v55, %s11279_s24  ;;  %v7637_v33 = vpop.eup %7636 }
 0x421   : > { %7132 = vmatprep.mubr.bf16.mxu0 %v2088_v3  ;;  %v2074_v15 = vmul.f32 %v7637_v33, %v8943_v17  ;;  %v2687_v17 = vsel %vm1414_vm0, %v8547_v5, 0 }
 0x424   : > { %v7639_v34 = vpop.eup %7638  ;;  %2470 = vrot.lane.b32.xlu1 %v8690_v1, %s11277_s25  ;;  %2616 = vrot.lane.b32.xlu0 %v8285_v21, %s11279_s24  ;;  %v11408_v1 = vld [vmem:[#allocation54_spill] sm:$0xff] }
 0x425   : > { %v2075_v29 = vmul.f32 %v7639_v34, %v8946_v51  ;;  %v11413_v51 = vld [vmem:[#allocation65_spill] sm:$0xff] }
 0x427   : > { %v2089_v49 = vpack.c.bf16 %v2075_v29, %v2074_v15 }
 0x428   : > { %2479 = vrot.lane.b32.xlu1 %v8706_v11, %s11275_s26  ;;  %2620 = vrot.lane.b32.xlu0 %v8442_v13, %s11279_s24  ;;  %v2684_v11 = vsel %vm1414_vm0, %v8539_v4, 0  ;;  %v9234_v13 = vld [vmem:[%s8684_s17] ss:$0 sm:$0xff] }
 0x429   : > { %7133 = vmatmul.mubr.bf16.vlgmr.msra.gmra.mrb[64].mxu0 %v2089_v49  ;;  %v2696_v49 = vsel %vm1414_vm0, %v8949_v54, 0 }
 0x42a   : > { %7149 = vmatpush3.bf16.xpose.msra.mxu0 %v2681_v60 }
 0x42b   : > { %7413 = vmatprep.subr.msk.bf16.mxu0 %vm1414_vm0, %v8539_v4  ;;  %v11411_v4 = vld [vmem:[#allocation52_spill] sm:$0xff] }
 0x42c   : > { %2488 = vrot.lane.b32.xlu1 %v8730_v9, %s11273_s27  ;;  %2624 = vrot.lane.b32.xlu0 %v8369_v31, %s11279_s24  ;;  %v11409_v9 = vld [vmem:[#allocation63_spill] sm:$0xff]  ;;  %v2690_v35 = vsel %vm1414_vm0, %v11411_v4, 0 }
 0x430   : > { %2497 = vrot.lane.b32.xlu1 %v8737_v22, %s11271_s28  ;;  %2628 = vrot.lane.b32.xlu0 %v8411_v25, %s11279_s24  ;;  %v11410_v22 = vld [vmem:[#allocation56_spill] sm:$0xff]  ;;  %s11298_s24 = smov 64  }
 0x432   : > { %7151 = vmatpush3.bf16.xpose.msra.mxu0 %v2684_v11 }
 0x433   : > { %7414 = vmatprep.subr.msk.bf16.mxu0 %vm1414_vm0, %v8547_v5  ;;  %v11418_v5 = vld [vmem:[#allocation60_spill] sm:$0xff] }
 0x434   : > { %2506 = vrot.lane.b32.xlu1 %v11407_v58, %s11267_s29  ;;  %2467 = vrot.lane.b32.xlu0 %v11408_v1, %s11277_s25  ;;  %s11427_s25 = smov 360  }
 0x438   : > { %2515 = vrot.lane.b32.xlu1 %v11409_v9, %s11269_s30  ;;  %2475 = vrot.lane.b32.xlu0 %v11410_v22, %s11275_s26  ;;  %s11426_s26 = smov 352  }
 0x43a   : > { %7153 = vmatpush3.bf16.xpose.msra.mxu0 %v2687_v17 }
 0x43b   : > { %7415 = vmatprep.subr.msk.bf16.mxu0 %vm1414_vm0, %v11411_v4 }
 0x43c   : > { %2524 = vrot.lane.b32.xlu1 %v11413_v51, %s11412_s20  ;;  %2484 = vrot.lane.b32.xlu0 %v11414_v8, %s11273_s27  ;;  %s11425_s27 = smov 344  }
 0x440   : > { %2533 = vrot.lane.b32.xlu1 %v11416_v20, %s11415_s23  ;;  %2493 = vrot.lane.b32.xlu0 %v11417_v41, %s11271_s28  ;;  %s11424_s28 = smov 336  }
 0x442   : > { %7155 = vmatpush3.bf16.xpose.msra.mxu0 %v2690_v35 }
 0x443   : > { %7416 = vmatprep.subr.msk.bf16.mxu0 %vm1414_vm0, %v8951_v59  ;;  %v11422_v59 = vld [vmem:[#allocation66_spill] sm:$0xff] }
 0x444   : > { %2502 = vrot.lane.b32.xlu0 %v11418_v5, %s11267_s29  ;;  %s11421_s29 = smov 320  }
 0x448   : > { %2511 = vrot.lane.b32.xlu0 %v11419_v43, %s11269_s30  ;;  %s11423_s30 = smov 328  }
 0x44a   : > { %7157 = vmatpush3.bf16.xpose.msra.mxu0 %v2693_v14  ;;  %v2033_v37 = vpop.xlane.xlu0 %2032 }
 0x44b   : > { %7417 = vmatprep.subr.msk.bf16.mxu0 %vm1414_vm0, %v8949_v54  ;;  %7640 = vrcp.f32 %v2033_v37 }
 0x44c   : > { %2520 = vrot.lane.b32.xlu0 %v11420_v39, %s11412_s20 }
 0x44d   : > { %v2427_v44 = vpop.f32.mrb[80].mxu1 }
 0x44e   : > { %v2429_v3 = vpop.f32.mrb[81].mxu1  ;;  %v2037_v33 = vpop.xlane.xlu0 %2036 }
 0x44f   : > { %v2035_v34 = vpop.xlane.xlu1 %2034  ;;  %v2431_v15 = vpop.f32.mrb[82].mxu1  ;;  %2542 = vrot.lane.b32.xlu1 %v2429_v3, %s11421_s29 }
 0x450   : > { %7642 = vrcp.f32 %v2035_v34  ;;  %v2433_v29 = vpop.f32.mrb[83].mxu1  ;;  %2529 = vrot.lane.b32.xlu0 %v11422_v59, %s11415_s23 }
 0x451   : > { %7644 = vrcp.f32 %v2037_v33 }
 0x452   : > { %7159 = vmatpush3.bf16.xpose.msra.mxu0 %v2696_v49  ;;  %v2039_v11 = vpop.xlane.xlu0 %2038 }
 0x453   : > { %v2230_v60 = vpop.permute.xlu1 %2229  ;;  %2551 = vrot.lane.b32.xlu1 %v2433_v29, %s11423_s30  ;;  %7646 = vrcp.f32 %v2039_v11 }
 0x454   : > { %6760 = vmatprep.mubr.msk.bf16.mxu1 %vm1414_vm0, %v2230_v60  ;;  %2538 = vrot.lane.b32.xlu0 %v2427_v44, %s11421_s29 }
 0x455   : > { %6761 = vmatmul.mubr.msk.bf16.gmra.mrb[88].mxu1 %vm1414_vm0, %v2230_v60  ;;  %v7641_v1 = vpop.eup %7640 }
 0x456   : > { %v2041_v58 = vpop.xlane.xlu0 %2040  ;;  %v2076_v22 = vmul.f32 %v7641_v1, %v8959_v23 }
 0x457   : > { %7648 = vrcp.f32 %v2041_v58 }
 0x458   : > { %2547 = vrot.lane.b32.xlu0 %v2431_v15, %s11423_s30 }
 0x45a   : > { %v7643_v9 = vpop.eup %7642  ;;  %v2043_v54 = vpop.xlane.xlu0 %2042 }
 0x45b   : > { %v2077_v17 = vmul.f32 %v7643_v9, %v8965_v45  ;;  %v7645_v4 = vpop.eup %7644  ;;  %7650 = vrcp.f32 %v2043_v54 }
 0x45c   : > { %v2078_v41 = vmul.f32 %v7645_v4, %v8963_v16 }
 0x45d   : > { %v2090_v51 = vpack.c.bf16 %v2077_v17, %v2076_v22  ;;  %v7647_v8 = vpop.eup %7646 }
 0x45e   : > { %v2045_v20 = vpop.xlane.xlu0 %2044  ;;  %v2079_v35 = vmul.f32 %v7647_v8, %v8970_v19 }
 0x45f   : > { %7136 = vmatprep.mubr.bf16.mxu0 %v2090_v51  ;;  %7652 = vrcp.f32 %v2045_v20 }
 0x460   : > { %v2091_v5 = vpack.c.bf16 %v2079_v35, %v2078_v41 }
 0x461   : > { %v7649_v14 = vpop.eup %7648 }
 0x462   : > { %7137 = vmatmul.mubr.bf16.gmra.mrb[68].mxu0 %v2091_v5  ;;  %v2047_v43 = vpop.xlane.xlu0 %2046  ;;  %v2080_v45 = vmul.f32 %v7649_v14, %v8975_v52 }
 0x463   : > { %7654 = vrcp.f32 %v2047_v43 }
 0x465   : > { %v7651_v37 = vpop.eup %7650 }
 0x466   : > { %v2653_v23 = vpop.permute.xlu0 %2652  ;;  %v2081_v39 = vmul.f32 %v7651_v37, %v8978_v26 }
 0x467   : > { %7418 = vmatprep.subr.msk.bf16.mxu0 %vm1414_vm0, %v2653_v23  ;;  %v2699_v44 = vsel %vm1414_vm0, %v2653_v23, 0 }
 0x468   : > { %7161 = vmatpush3.bf16.xpose.msra.mxu0 %v2699_v44  ;;  %v2092_v16 = vpack.c.bf16 %v2081_v39, %v2080_v45 }
 0x469   : > { %v7653_v19 = vpop.eup %7652 }
 0x46a   : > { %7140 = vmatprep.mubr.bf16.mxu0 %v2092_v16  ;;  %v2082_v33 = vmul.f32 %v7653_v19, %v8981_v42 }
 0x46d   : > { %v7655_v3 = vpop.eup %7654 }
 0x46e   : > { %v2083_v34 = vmul.f32 %v7655_v3, %v8986_v36 }
 0x470   : > { %v2093_v15 = vpack.c.bf16 %v2083_v34, %v2082_v33 }
 0x472   : > { %7141 = vmatmul.mubr.bf16.gmra.mrb[72].mxu0 %v2093_v15 }
 0x484   : > { %v2049_v29 = vpop.xlane.xlu1 %2048 }
 0x488   : > { %v2053_v59 = vpop.xlane.xlu1 %2052 }
 0x48c   : > { %v2055_v52 = vpop.xlane.xlu1 %2054 }
 0x48d   : > { %7656 = vrcp.f32 %v2055_v52 }
 0x48e   : > { %7658 = vrcp.f32 %v2049_v29 }
 0x48f   : > { %7660 = vrcp.f32 %v2053_v59 }
 0x490   : > { %v2232_v49 = vpop.permute.xlu1 %2231 }
 0x491   : > { %6762 = vmatprep.mubr.msk.bf16.mxu1 %vm1414_vm0, %v2232_v49 }
 0x492   : > { %6763 = vmatmul.mubr.msk.bf16.gmra.mrb[92].mxu1 %vm1414_vm0, %v2232_v49 }
 0x494   : > { %v2619_v43 = vpop.permute.xlu1 %2618 }
 0x497   : > { %v2051_v26 = vpop.xlane.xlu0 %2050  ;;  %v7657_v9 = vpop.eup %7656 }
 0x498   : > { %7662 = vrcp.f32 %v2051_v26  ;;  %v7659_v54 = vpop.eup %7658  ;;  %v2087_v4 = vmul.f32 %v7657_v9, %v9001_v12  ;;  %v2623_v12 = vpop.permute.xlu1 %2622 }
 0x499   : > { %v7661_v22 = vpop.eup %7660  ;;  %v2084_v51 = vmul.f32 %v7659_v54, %v8994_v46 }
 0x49a   : > { %v2437_v60 = vpop.f32.mrb[84].mxu1  ;;  %v2086_v20 = vmul.f32 %v7661_v22, %v8998_v30 }
 0x49b   : > { %v2439_v11 = vpop.f32.mrb[85].mxu1  ;;  %2556 = vrot.lane.b32.xlu0 %v2437_v60, %s11424_s28  ;;  %v2655_v42 = vpop.permute.xlu0 %2654 }
 0x49c   : > { %2560 = vrot.lane.b32.xlu1 %v2439_v11, %s11424_s28  ;;  %v2441_v36 = vpop.f32.mrb[86].mxu1  ;;  %7419 = vmatprep.subr.msk.bf16.mxu0 %vm1414_vm0, %v2655_v42  ;;  %v2702_v58 = vsel %vm1414_vm0, %v2655_v42, 0  ;;  %v2095_v35 = vpack.c.bf16 %v2087_v4, %v2086_v20  ;;  %v2627_v46 = vpop.permute.xlu1 %2626  ;;  %v11430_v20 = vld [vmem:[#allocation44_spill] sm:$0xff] }
 0x49d   : > { %v2443_v1 = vpop.f32.mrb[87].mxu1  ;;  %7163 = vmatpush3.bf16.xpose.msra.mxu0 %v2702_v58 }
 0x49f   : > { %2565 = vrot.lane.b32.xlu0 %v2441_v36, %s11425_s27  ;;  %v2617_v5 = vpop.permute.xlu0 %2616 }
 0x4a0   : > { %2569 = vrot.lane.b32.xlu1 %v2443_v1, %s11425_s27 }
 0x4a2   : > { %v7663_v17 = vpop.eup %7662 }
 0x4a3   : > { %v2085_v8 = vmul.f32 %v7663_v17, %v9004_v47  ;;  %v2621_v14 = vpop.permute.xlu0 %2620  ;;  %v2631_v47 = vpop.permute.xlu1 %2630 }
 0x4a5   : > { %v2094_v41 = vpack.c.bf16 %v2085_v8, %v2084_v51  ;;  %v11428_v51 = vld [vmem:[#allocation45_spill] sm:$0xff]  ;;  %v11429_v8 = vld [vmem:[#allocation24_spill] sm:$0xff] }
 0x4a7   : > { %7144 = vmatprep.mubr.bf16.mxu0 %v2094_v41  ;;  %v2625_v37 = vpop.permute.xlu0 %2624  ;;  %v11431_v41 = vld [vmem:[#allocation23_spill] sm:$0xff] }
 0x4a8   : > { %7145 = vmatmul.mubr.bf16.gmra.mrb[76].mxu0 %v2095_v35  ;;  %v11432_v35 = vld [vmem:[#allocation28_spill] sm:$0xff] }
 0x4a9   : > { %7164 = vmatprep.mubr.msk.bf16.mxu0 %vm1414_vm0, %v2617_v5  ;;  %v11433_v5 = vld [vmem:[#allocation29_spill] sm:$0xff] }
 0x4ab   : > { %v2629_v30 = vpop.permute.xlu0 %2628 }
 0x4b0   : > { %7165 = vmatmul.mubr.msk.bf16.vlgmr.msra.gmra.mrb[80].mxu0 %vm1414_vm0, %v2619_v43  ;;  %v11435_v43 = vld [vmem:[#allocation6_spill] sm:$0xff] }
 0x4b1   : > { %7168 = vmatprep.mubr.msk.bf16.mxu0 %vm1414_vm0, %v2621_v14  ;;  %v11436_v14 = vld [vmem:[#allocation47_spill] sm:$0xff] }
 0x4b8   : > { %7169 = vmatmul.mubr.msk.bf16.gmra.mrb[84].mxu0 %vm1414_vm0, %v2623_v12 }
 0x4b9   : > { %7172 = vmatprep.mubr.msk.bf16.mxu0 %vm1414_vm0, %v2625_v37 }
 0x4c0   : > { %7173 = vmatmul.mubr.msk.bf16.gmra.mrb[88].mxu0 %vm1414_vm0, %v2627_v46  ;;  %v11437_v46 = vld [vmem:[#allocation49_spill] sm:$0xff] }
 0x4c1   : > { %7176 = vmatprep.mubr.msk.bf16.mxu0 %vm1414_vm0, %v2629_v30 }
 0x4c8   : > { %7177 = vmatmul.mubr.msk.bf16.gmra.mrb[92].mxu0 %vm1414_vm0, %v2631_v47 }
 0x4fc   : > { %v7134_v23 = vpop.f32.mrb[64].mxu0 }
 0x4fd   : > { %v2130_v45 = vpop.f32.mrb[65].mxu0 }
 0x4fe   : > { %v7135_v39 = vpop.f32.mrb[66].mxu0 }
 0x4ff   : > { %v2194_v44 = vpack.c.bf16 %v7135_v39, %v7134_v23  ;;  %v2133_v16 = vpop.f32.mrb[67].mxu0  ;;  %v11438_v23 = vld [vmem:[#allocation46_spill] sm:$0xff] }
 0x500   : > { %v2193_v19 = vpack.c.bf16 %v2133_v16, %v2130_v45  ;;  %v11440_v16 = vld [vmem:[#allocation33_spill] sm:$0xff] }
 0x501   : > { %2202 = vst.msk [vmem:[#allocation2 + $0x8] sm:$0xff] %vm1414_vm0, %v2194_v44  ;;  %v11439_v44 = vld [vmem:[#allocation11_spill] sm:$0xff] }
 0x502   : > { %2201 = vst.msk [vmem:[#allocation2] sm:$0xff] %vm1414_vm0, %v2193_v19 }
 0x528   : > { %v2447_v3 = vpop.f32.mrb[88].mxu1 }
 0x529   : > { %v2449_v33 = vpop.f32.mrb[89].mxu1  ;;  %2574 = vrot.lane.b32.xlu0 %v2447_v3, %s11426_s26 }
 0x52a   : > { %v2451_v34 = vpop.f32.mrb[90].mxu1  ;;  %2578 = vrot.lane.b32.xlu1 %v2449_v33, %s11426_s26  ;;  %v11441_v33 = vld [vmem:[#allocation48_spill] sm:$0xff] }
 0x52b   : > { %v2453_v15 = vpop.f32.mrb[91].mxu1 }
 0x52d   : > { %2583 = vrot.lane.b32.xlu0 %v2451_v34, %s11427_s25 }
 0x52e   : > { %2587 = vrot.lane.b32.xlu1 %v2453_v15, %s11427_s25  ;;  %v11442_v15 = vld [vmem:[#allocation5_spill] sm:$0xff] }
 0x535   : > { %v7138_v29 = vpop.f32.mrb[68].mxu0 }
 0x536   : > { %v2146_v59 = vpop.f32.mrb[69].mxu0 }
 0x537   : > { %v7139_v52 = vpop.f32.mrb[70].mxu0 }
 0x538   : > { %v2196_v49 = vpack.c.bf16 %v7139_v52, %v7138_v29  ;;  %v2149_v26 = vpop.f32.mrb[71].mxu0  ;;  %v11443_v52 = vld [vmem:[#allocation10_spill] sm:$0xff] }
 0x539   : > { %v2195_v60 = vpack.c.bf16 %v2149_v26, %v2146_v59  ;;  %v2468_v59 = vpop.permute.xlu0 %2467  ;;  %v11444_v26 = vld [vmem:[#allocation32_spill] sm:$0xff] }
 0x53a   : > { %2204 = vst.msk [vmem:[#allocation2 + $0x18] sm:$0xff] %vm1414_vm0, %v2196_v49  ;;  %v2471_v49 = vpop.permute.xlu1 %2470 }
 0x53b   : > { %2203 = vst.msk [vmem:[#allocation2 + $0x10] sm:$0xff] %vm1414_vm0, %v2195_v60 }
 0x545   : > { %v7142_v11 = vpop.f32.mrb[72].mxu0 }
 0x546   : > { %v2162_v42 = vpop.f32.mrb[73].mxu0 }
 0x547   : > { %v7143_v36 = vpop.f32.mrb[74].mxu0 }
 0x548   : > { %v2198_v58 = vpack.c.bf16 %v7143_v36, %v7142_v11  ;;  %v2165_v1 = vpop.f32.mrb[75].mxu0 }
 0x549   : > { %v2197_v9 = vpack.c.bf16 %v2165_v1, %v2162_v42  ;;  %v11445_v42 = vld [vmem:[#allocation15_spill] sm:$0xff] }
 0x54a   : > { %2206 = vst.msk [vmem:[#allocation2 + $0x28] sm:$0xff] %vm1414_vm0, %v2198_v58  ;;  %v11446_v58 = vld [vmem:[#allocation38_spill] sm:$0xff] }
 0x54b   : > { %2205 = vst.msk [vmem:[#allocation2 + $0x20] sm:$0xff] %vm1414_vm0, %v2197_v9  ;;  %v2476_v9 = vpop.permute.xlu0 %2475 }
 0x565   : > { %v2457_v54 = vpop.f32.mrb[92].mxu1 }
 0x566   : > { %2592 = vrot.lane.b32.xlu0 %v2457_v54, %s11296_s19  ;;  %v2459_v22 = vpop.f32.mrb[93].mxu1  ;;  %v2480_v54 = vpop.permute.xlu1 %2479 }
 0x567   : > { %2596 = vrot.lane.b32.xlu1 %v2459_v22, %s11296_s19  ;;  %v2461_v17 = vpop.f32.mrb[94].mxu1  ;;  %v11447_v22 = vld [vmem:[#allocation51_spill] sm:$0xff]  ;;  %s11476_s19 = smov 256  }
 0x568   : > { %v2463_v4 = vpop.f32.mrb[95].mxu1 }
 0x56a   : > { %2601 = vrot.lane.b32.xlu0 %v2461_v17, %s11281_s18  ;;  %v11448_v17 = vld [vmem:[#allocation14_spill] sm:$0xff] }
 0x56b   : > { %2605 = vrot.lane.b32.xlu1 %v2463_v4, %s11281_s18  ;;  %s11434_s18 = smov 96  }
 0x56e   : > { %3179 = vrot.lane.b32.xlu0 %v11428_v51, %s11298_s24 }
 0x56f   : > { %3163 = vrot.lane.b32.xlu1 %v11429_v8, %s11298_s24 }
 0x572   : > { %3181 = vrot.lane.b32.xlu0 %v11430_v20, %s11298_s24 }
 0x573   : > { %3165 = vrot.lane.b32.xlu1 %v11431_v41, %s11298_s24 }
 0x576   : > { %3169 = vrot.lane.b32.xlu0 %v11432_v35, %s11298_s24 }
 0x577   : > { %3167 = vrot.lane.b32.xlu1 %v11433_v5, %s11298_s24 }
 0x57a   : > { %2977 = vrot.lane.b32.xlu0 %v11435_v43, %s11434_s18 }
 0x57b   : > { %3183 = vrot.lane.b32.xlu1 %v11436_v14, %s11298_s24  ;;  %v7146_v12 = vpop.f32.mrb[76].mxu0 }
 0x57c   : > { %v2178_v37 = vpop.f32.mrb[77].mxu0 }
 0x57d   : > { %v7147_v30 = vpop.f32.mrb[78].mxu0 }
 0x57e   : > { %3187 = vrot.lane.b32.xlu0 %v11437_v46, %s11298_s24  ;;  %v2200_v47 = vpack.c.bf16 %v7147_v30, %v7146_v12  ;;  %v2181_v45 = vpop.f32.mrb[79].mxu0  ;;  %v11449_v30 = vld [vmem:[#allocation19_spill] sm:$0xff]  ;;  %v11457_v46 = vld [vmem:[#allocation20_spill] sm:$0xff] }
 0x57f   : > { %3185 = vrot.lane.b32.xlu1 %v11438_v23, %s11298_s24  ;;  %v2199_v39 = vpack.c.bf16 %v2181_v45, %v2178_v37  ;;  %v2485_v37 = vpop.permute.xlu0 %2484  ;;  %v2489_v45 = vpop.permute.xlu1 %2488  ;;  %v11456_v23 = vld [vmem:[#allocation12_spill] sm:$0xff] }
 0x580   : > { %2208 = vst.msk [vmem:[#allocation2 + $0x38] sm:$0xff] %vm1414_vm0, %v2200_v47  ;;  %v2490_v51 = vsel %vm1632_vm3, %v2485_v37, %v2489_v45 }
 0x581   : > { %2207 = vst.msk [vmem:[#allocation2 + $0x30] sm:$0xff] %vm1414_vm0, %v2199_v39  ;;  %v11450_v39 = vld [vmem:[#allocation37_spill] sm:$0xff] }
 0x582   : > { %2981 = vrot.lane.b32.xlu0 %v11439_v44, %s11434_s18  ;;  %v11455_v44 = vld [vmem:[#allocation13_spill] sm:$0xff] }
 0x583   : > { %3171 = vrot.lane.b32.xlu1 %v11440_v16, %s11298_s24  ;;  %v7166_v19 = vpop.f32.mrb[80].mxu0 }
 0x584   : > { %v2738_v3 = vpop.f32.mrb[81].mxu0 }
 0x585   : > { %v9163_v34 = vpop.f32.mrb[82].mxu0 }
 0x586   : > { %3189 = vrot.lane.b32.xlu0 %v11441_v33, %s11298_s24  ;;  %v9167_v29 = vpop.f32.mrb[83].mxu0 }
 0x587   : > { %2979 = vrot.lane.b32.xlu1 %v11442_v15, %s11434_s18 }
 0x58a   : > { %2983 = vrot.lane.b32.xlu0 %v11443_v52, %s11434_s18  ;;  %v2498_v52 = vpop.permute.xlu1 %2497 }
 0x58b   : > { %3173 = vrot.lane.b32.xlu1 %v11444_v26, %s11298_s24  ;;  %v9173_v60 = vpop.f32.mrb[84].mxu0 }
 0x58c   : > { %v9175_v11 = vpop.f32.mrb[85].mxu0 }
 0x58d   : > { %v7171_v36 = vpop.f32.mrb[86].mxu0 }
 0x58e   : > { %2985 = vrot.lane.b32.xlu0 %v11445_v42, %s11434_s18  ;;  %v9181_v1 = vpop.f32.mrb[87].mxu0  ;;  %v2494_v42 = vpop.permute.xlu0 %2493 }
 0x58f   : > { %3175 = vrot.lane.b32.xlu1 %v11446_v58, %s11298_s24 }
 0x592   : > { %3191 = vrot.lane.b32.xlu0 %v11447_v22, %s11298_s24  ;;  %v11451_v22 = vld [vmem:[#allocation50_spill] sm:$0xff] }
 0x593   : > { %2987 = vrot.lane.b32.xlu1 %v11448_v17, %s11434_s18  ;;  %v9187_v4 = vpop.f32.mrb[88].mxu0  ;;  %v11452_v17 = vld [vmem:[#allocation18_spill] sm:$0xff] }
 0x594   : > { %v9189_v12 = vpop.f32.mrb[89].mxu0 }
 0x595   : > { %v9193_v47 = vpop.f32.mrb[90].mxu0 }
 0x596   : > { %2989 = vrot.lane.b32.xlu0 %v11449_v30, %s11434_s18  ;;  %v9197_v58 = vpop.f32.mrb[91].mxu0  ;;  %v11453_v30 = vld [vmem:[#allocation9_spill] sm:$0xff] }
 0x597   : > { %3177 = vrot.lane.b32.xlu1 %v11450_v39, %s11298_s24  ;;  %v11454_v39 = vld [vmem:[#allocation7_spill] sm:$0xff] }
 0x59a   : > { %3193 = vrot.lane.b32.xlu0 %v11451_v22, %s11298_s24  ;;  %v2503_v22 = vpop.permute.xlu0 %2502 }
 0x59b   : > { %2991 = vrot.lane.b32.xlu1 %v11452_v17, %s11434_s18  ;;  %v9203_v26 = vpop.f32.mrb[92].mxu0  ;;  %v2507_v17 = vpop.permute.xlu1 %2506 }
 0x59c   : > { %v9205_v15 = vpop.f32.mrb[93].mxu0 }
 0x59d   : > { %v9209_v33 = vpop.f32.mrb[94].mxu0 }
 0x59e   : > { %3147 = vrot.lane.b32.xlu0 %v11453_v30, %s11298_s24  ;;  %v9213_v16 = vpop.f32.mrb[95].mxu0  ;;  %v11458_v30 = vld [vmem:[#allocation16_spill] sm:$0xff]  ;;  %v2512_v14 = vpop.permute.xlu0 %2511 }
 0x59f   : > { %3538 = vrot.lane.b32.xlu1 %v11454_v39, %s11298_s24  ;;  %v2516_v43 = vpop.permute.xlu1 %2515  ;;  %v11459_v39 = vld [vmem:[#allocation17_spill] sm:$0xff] }
 0x5a2   : > { %3149 = vrot.lane.b32.xlu0 %v11455_v44, %s11298_s24  ;;  %v2521_v5 = vpop.permute.xlu0 %2520  ;;  %v11460_v44 = vld [vmem:[#allocation22_spill] sm:$0xff] }
 0x5a3   : > { %3540 = vrot.lane.b32.xlu1 %v11456_v23, %s11298_s24  ;;  %v2525_v35 = vpop.permute.xlu1 %2524 }
 0x5a6   : > { %3544 = vrot.lane.b32.xlu0 %v11457_v46, %s11298_s24  ;;  %v2530_v41 = vpop.permute.xlu0 %2529 }
 0x5a7   : > { %3542 = vrot.lane.b32.xlu1 %v11458_v30, %s11298_s24  ;;  %v2534_v20 = vpop.permute.xlu1 %2533  ;;  %v2747_v30 = vadd.f32 %v7166_v19, %v2490_v51  ;;  %v2499_v51 = vsel %vm1643_vm4, %v2494_v42, %v2498_v52  ;;  %v2481_v52 = vsel %vm1621_vm2, %v2476_v9, %v2480_v54 }
 0x5a8   : > { %v2750_v37 = vadd.f32 %v9163_v34, %v2499_v51  ;;  %v2517_v34 = vsel %vm1665_vm6, %v2512_v14, %v2516_v43 }
 0x5a9   : > { %v9237_v21 = vadd.f32 %v9234_v13, %v2747_v30 }
 0x5aa   : > { %v2539_v23 = vpop.permute.xlu0 %2538  ;;  %v9252_v30 = vadd.f32 %v9234_v13, %v2750_v37 }
 0x5ab   : > { %3151 = vrot.lane.b32.xlu1 %v11459_v39, %s11298_s24  ;;  %v2543_v8 = vpop.permute.xlu1 %2542  ;;  %v2472_v39 = vsel %vm1610_vm1, %v2468_v59, %v2471_v49 }
 0x5ae   : > { %v2548_v25 = vpop.permute.xlu0 %2547 }
 0x5af   : > { %3153 = vrot.lane.b32.xlu1 %v11460_v44, %s11298_s24  ;;  %v2552_v31 = vpop.permute.xlu1 %2551  ;;  %v2739_v44 = vadd.f32 %v2738_v3, %v2472_v39  ;;  %v2535_v3 = vsel %vm1687_vm8, %v2530_v41, %v2534_v20  ;;  %v2758_v41 = vadd.f32 %v9181_v1, %v2517_v34 }
 0x5b0   : > { %v2766_v45 = vadd.f32 %v7171_v36, %v2535_v3  ;;  %v2526_v36 = vsel %vm1676_vm7, %v2521_v5, %v2525_v35  ;;  %v2508_v5 = vsel %vm1654_vm5, %v2503_v22, %v2507_v17 }
 0x5b1   : > { %v9244_v19 = vadd.f32 %v9234_v13, %v2739_v44  ;;  %v2742_v44 = vadd.f32 %v9167_v29, %v2481_v52  ;;  %v2763_v29 = vadd.f32 %v9173_v60, %v2526_v36  ;;  %v9278_v14 = vadd.f32 %v9234_v13, %v2758_v41 }
 0x5b2   : > { %v2557_v55 = vpop.permute.xlu0 %2556  ;;  %v9263_v20 = vadd.f32 %v9234_v13, %v2766_v45  ;;  %v2755_v37 = vadd.f32 %v9175_v11, %v2508_v5 }
 0x5b3   : > { %v2561_v62 = vpop.permute.xlu1 %2560  ;;  %v9270_v9 = vadd.f32 %v9234_v13, %v2742_v44  ;;  %v9286_v60 = vadd.f32 %v9234_v13, %v2763_v29 }
 0x5b4   : > { %v2562_v22 = vsel %vm1720_vm11, %v2557_v55, %v2561_v62  ;;  %v9302_v11 = vadd.f32 %v9234_v13, %v2755_v37 }
 0x5b5   : > { %v2779_v45 = vadd.f32 %v9187_v4, %v2562_v22 }
 0x5b6   : > { %v2566_v59 = vpop.permute.xlu0 %2565 }
 0x5b7   : > { %v2570_v49 = vpop.permute.xlu1 %2569  ;;  %v9314_v55 = vadd.f32 %v9234_v13, %v2779_v45 }
 0x5b8   : > { %v2571_v43 = vsel %vm1731_vm12, %v2566_v59, %v2570_v49  ;;  %v2553_v59 = vsel %vm1709_vm10, %v2548_v25, %v2552_v31 }
 0x5b9   : > { %v2782_v1 = vadd.f32 %v9193_v47, %v2571_v43  ;;  %v2774_v49 = vadd.f32 %v9197_v58, %v2553_v59  ;;  %v2544_v58 = vsel %vm1698_vm9, %v2539_v23, %v2543_v8 }
 0x5ba   : > { %v2575_v42 = vpop.permute.xlu0 %2574  ;;  %v2771_v62 = vadd.f32 %v9189_v12, %v2544_v58 }
 0x5bb   : > { %v2579_v51 = vpop.permute.xlu1 %2578  ;;  %v9294_v47 = vadd.f32 %v9234_v13, %v2782_v1  ;;  %v9307_v31 = vadd.f32 %v9234_v13, %v2774_v49 }
 0x5bc   : > { %v9330_v36 = vadd.f32 %v9234_v13, %v2771_v62 }
 0x5be   : > { %v2584_v54 = vpop.permute.xlu0 %2583 }
 0x5bf   : > { %v2588_v3 = vpop.permute.xlu1 %2587 }
 0x5c0   : > { %v2589_v4 = vsel %vm11295_vm14, %v2584_v54, %v2588_v3  ;;  %vm11466_vm14 = vcmp.lt.s32.totalorder %v8675_v2, %v8833_v61 }
 0x5c1   : > { %v2790_v29 = vadd.f32 %v9213_v16, %v2589_v4 }
 0x5c3   : > { %v9350_v59 = vadd.f32 %v9234_v13, %v2790_v29  ;;  %v11469_v29 = vld [vmem:[#allocation30_spill] sm:$0xff] }
 0x5c5   : > { %2821 = vmax.xlane.f32.xlu0 %v9237_v21 }
 0x5c9   : > { %2817 = vmax.xlane.f32.xlu0 %v9244_v19 }
 0x5cd   : > { %2823 = vmax.xlane.f32.xlu0 %v9252_v30 }
 0x5d1   : > { %2831 = vmax.xlane.f32.xlu0 %v9263_v20 }
 0x5d3   : > { %2819 = vmax.xlane.f32.xlu1 %v9270_v9 }
 0x5d5   : > { %2827 = vmax.xlane.f32.xlu0 %v9278_v14 }
 0x5d7   : > { %2829 = vmax.xlane.f32.xlu1 %v9286_v60 }
 0x5d8   : > { %v2593_v17 = vpop.permute.xlu0 %2592 }
 0x5d9   : > { %v2597_v52 = vpop.permute.xlu1 %2596  ;;  %2839 = vmax.xlane.f32.xlu0 %v9294_v47 }
 0x5da   : > { %v2598_v41 = vsel %vm1764_vm15, %v2593_v17, %v2597_v52 }
 0x5db   : > { %2825 = vmax.xlane.f32.xlu1 %v9302_v11  ;;  %v2795_v43 = vadd.f32 %v9203_v26, %v2598_v41  ;;  %v11467_v41 = vld [vmem:[#allocation27_spill] sm:$0xff] }
 0x5dc   : > { %v2602_v44 = vpop.permute.xlu0 %2601 }
 0x5dd   : > { %v2606_v34 = vpop.permute.xlu1 %2605  ;;  %2835 = vmax.xlane.f32.xlu0 %v9307_v31  ;;  %v9347_v3 = vadd.f32 %v9234_v13, %v2795_v43 }
 0x5de   : > { %v2607_v8 = vsel %vm11323_vm13, %v2602_v44, %v2606_v34 }
 0x5df   : > { %v2798_v23 = vadd.f32 %v9209_v33, %v2607_v8  ;;  %2837 = vmax.xlane.f32.xlu1 %v9314_v55  ;;  %v2580_v33 = vsel %vm11466_vm14, %v2575_v42, %v2579_v51  ;;  %vm11534_vm14 = vcmp.lt.s32.totalorder %v8675_v2, %v8855_v24 }
 0x5e0   : > { %v3180_v12 = vpop.permute.xlu0 %3179  ;;  %v2787_v26 = vadd.f32 %v9205_v15, %v2580_v33 }
 0x5e1   : > { %v3164_v1 = vpop.permute.xlu1 %3163  ;;  %7420 = vmatprep.subr.msk.bf16.mxu1 %vm1414_vm0, %v3180_v12  ;;  %v9336_v5 = vadd.f32 %v9234_v13, %v2798_v23  ;;  %v11468_v12 = vld [vmem:[#allocation25_spill] sm:$0xff] }
 0x5e2   : > { %v3220_v54 = vsel %vm1414_vm0, %v3164_v1, 0  ;;  %v9355_v51 = vadd.f32 %v9234_v13, %v2787_v26 }
 0x5e3   : > { %2833 = vmax.xlane.f32.xlu1 %v9330_v36  ;;  %2847 = vmax.xlane.f32.xlu0 %v9336_v5 }
 0x5e4   : > { %6797 = vmatpush3.bf16.xpose.msra.mxu1 %v3220_v54  ;;  %v3182_v16 = vpop.permute.xlu0 %3181 }
 0x5e5   : > { %v3166_v37 = vpop.permute.xlu1 %3165  ;;  %7421 = vmatprep.subr.msk.bf16.mxu1 %vm1414_vm0, %v3182_v16 }
 0x5e6   : > { %v3223_v15 = vsel %vm1414_vm0, %v3166_v37, 0 }
 0x5e7   : > { %2845 = vmax.xlane.f32.xlu1 %v9347_v3  ;;  %2843 = vmax.xlane.f32.xlu0 %v9350_v59 }
 0x5e8   : > { %v3170_v42 = vpop.permute.xlu0 %3169 }
 0x5e9   : > { %v3168_v49 = vpop.permute.xlu1 %3167  ;;  %v3229_v4 = vsel %vm1414_vm0, %v3170_v42, 0 }
 0x5ea   : > { %v3226_v58 = vsel %vm1414_vm0, %v3168_v49, 0 }
 0x5eb   : > { %2841 = vmax.xlane.f32.xlu1 %v9355_v51 }
 0x5ec   : > { %6799 = vmatpush3.bf16.xpose.msra.mxu1 %v3223_v15  ;;  %v2978_v22 = vpop.permute.xlu0 %2977 }
 0x5ed   : > { %v3184_v17 = vpop.permute.xlu1 %3183  ;;  %7180 = vmatprep.subr.bf16.mxu0 %v2978_v22 }
 0x5ee   : > { %7181 = vmatpush3.bf16.msra.mxu0 %v2978_v22  ;;  %7422 = vmatprep.subr.msk.bf16.mxu1 %vm1414_vm0, %v3184_v17 }
 0x5f0   : > { %v3188_v45 = vpop.permute.xlu0 %3187 }
 0x5f1   : > { %v3186_v52 = vpop.permute.xlu1 %3185 }
 0x5f4   : > { %6801 = vmatpush3.bf16.xpose.msra.mxu1 %v3226_v58  ;;  %v2982_v44 = vpop.permute.xlu0 %2981 }
 0x5f5   : > { %7423 = vmatprep.subr.msk.bf16.mxu1 %vm1414_vm0, %v3186_v52  ;;  %v3172_v13 = vpop.permute.xlu1 %3171 }
 0x5f6   : > { %v3232_v33 = vsel %vm1414_vm0, %v3172_v13, 0 }
 0x5f8   : > { %v3190_v62 = vpop.permute.xlu0 %3189 }
 0x5f9   : > { %v2980_v34 = vpop.permute.xlu1 %2979 }
 0x5fa   : > { %7182 = vmatprep.subr.bf16.mxu0 %v2980_v34 }
 0x5fb   : > { %7183 = vmatpush3.bf16.msra.mxu0 %v2980_v34 }
 0x5fc   : > { %6803 = vmatpush3.bf16.xpose.msra.mxu1 %v3229_v4  ;;  %3155 = vrot.lane.b32.xlu1 %v11467_v41, %s11298_s24  ;;  %v2984_v8 = vpop.permute.xlu0 %2983 }
 0x5fd   : > { %7184 = vmatprep.subr.bf16.mxu0 %v2982_v44  ;;  %7424 = vmatprep.subr.msk.bf16.mxu1 %vm1414_vm0, %v3188_v45  ;;  %v3174_v23 = vpop.permute.xlu1 %3173 }
 0x5fe   : > { %3546 = vrot.lane.b32.xlu0 %v11468_v12, %s11298_s24  ;;  %v3235_v42 = vsel %vm1414_vm0, %v3174_v23, 0 }
 0x5ff   : > { %7185 = vmatpush3.bf16.msra.mxu0 %v2982_v44 }
 0x600   : > { %3548 = vrot.lane.b32.xlu1 %v11469_v29, %s11298_s24  ;;  %7186 = vmatprep.subr.bf16.mxu0 %v2984_v8  ;;  %v2986_v43 = vpop.permute.xlu0 %2985 }
 0x601   : > { %v3176_v1 = vpop.permute.xlu1 %3175 }
 0x602   : > { %v3238_v17 = vsel %vm1414_vm0, %v3176_v1, 0 }
 0x603   : > { %7187 = vmatpush3.bf16.msra.mxu0 %v2984_v8 }
 0x604   : > { %6805 = vmatpush3.bf16.xpose.msra.mxu1 %v3232_v33  ;;  %3157 = vrot.lane.b32.xlu1 %v8394_v57, %s11298_s24  ;;  %v3192_v54 = vpop.permute.xlu0 %3191 }
 0x605   : > { %7188 = vmatprep.subr.bf16.mxu0 %v2986_v43  ;;  %7425 = vmatprep.subr.msk.bf16.mxu1 %vm1414_vm0, %v3190_v62  ;;  %v2988_v16 = vpop.permute.xlu1 %2987 }
 0x607   : > { %7189 = vmatpush3.bf16.msra.mxu0 %v2986_v43 }
 0x608   : > { %7190 = vmatprep.subr.bf16.mxu0 %v2988_v16  ;;  %v2990_v26 = vpop.permute.xlu0 %2989 }
 0x609   : > { %v3178_v37 = vpop.permute.xlu1 %3177 }
 0x60a   : > { %v3241_v52 = vsel %vm1414_vm0, %v3178_v37, 0 }
 0x60b   : > { %7191 = vmatpush3.bf16.msra.mxu0 %v2988_v16 }
 0x60c   : > { %6807 = vmatpush3.bf16.xpose.msra.mxu1 %v3235_v42  ;;  %7192 = vmatprep.subr.bf16.mxu0 %v2990_v26  ;;  %v3194_v49 = vpop.permute.xlu0 %3193 }
 0x60d   : > { %7426 = vmatprep.subr.msk.bf16.mxu1 %vm1414_vm0, %v3192_v54  ;;  %v2992_v15 = vpop.permute.xlu1 %2991 }
 0x60f   : > { %7193 = vmatpush3.bf16.msra.mxu0 %v2990_v26 }
 0x610   : > { %7194 = vmatprep.subr.bf16.mxu0 %v2992_v15  ;;  %v3148_v22 = vpop.permute.xlu0 %3147 }
 0x611   : > { %6812 = vmatprep.mubr.msk.bf16.mxu1 %vm1414_vm0, %v3148_v22  ;;  %v9378_v45 = vpop.permute.xlu1 %3538 }
 0x613   : > { %7195 = vmatpush3.bf16.msra.mxu0 %v2992_v15 }
 0x614   : > { %6809 = vmatpush3.bf16.xpose.msra.mxu1 %v3238_v17  ;;  %7428 = vmatprep.subr.msk.bf16.mxu0 %vm1414_vm0, %v9378_v45  ;;  %v3150_v44 = vpop.permute.xlu0 %3149 }
 0x615   : > { %7427 = vmatprep.subr.msk.bf16.mxu1 %vm1414_vm0, %v3194_v49  ;;  %v9384_v58 = vpop.permute.xlu1 %3540 }
 0x618   : > { %v9395_v4 = vpop.permute.xlu0 %3544 }
 0x619   : > { %v9388_v13 = vpop.permute.xlu1 %3542 }
 0x61c   : > { %6811 = vmatpush3.bf16.xpose.msra.mxu1 %v3241_v52 }
 0x61d   : > { %v3152_v62 = vpop.permute.xlu1 %3151 }
 0x621   : > { %v3154_v34 = vpop.permute.xlu1 %3153 }
 0x623   : > { %6813 = vmatmul.mubr.msk.bf16.vlgmr.msra.gmra.mrb[96].mxu1 %vm1414_vm0, %v3148_v22 }
 0x624   : > { %6814 = vmatprep.mubr.msk.bf16.mxu1 %vm1414_vm0, %v3150_v44 }
 0x62b   : > { %6815 = vmatmul.mubr.msk.bf16.gmra.mrb[100].mxu1 %vm1414_vm0, %v3150_v44 }
 0x62c   : > { %6816 = vmatprep.mubr.msk.bf16.mxu1 %vm1414_vm0, %v3152_v62 }
 0x633   : > { %6817 = vmatmul.mubr.msk.bf16.gmra.mrb[104].mxu1 %vm1414_vm0, %v3152_v62 }
 0x634   : > { %6818 = vmatprep.mubr.msk.bf16.mxu1 %vm1414_vm0, %v3154_v34 }
 0x63b   : > { %6819 = vmatmul.mubr.msk.bf16.gmra.mrb[108].mxu1 %vm1414_vm0, %v3154_v34 }
 0x652   : > { %v2822_v8 = vpop.xlane.xlu0 %2821 }
 0x653   : > { %v2851_v23 = vsub.f32 %v9237_v21, %v2822_v8 }
 0x655   : > { %v2869_v43 = vmul.f32 1.442695, %v2851_v23 }
 0x656   : > { %v2818_v1 = vpop.xlane.xlu0 %2817 }
 0x657   : > { %7664 = vpow2.f32 %v2869_v43  ;;  %v2849_v33 = vsub.f32 %v9244_v19, %v2818_v1 }
 0x659   : > { %v2865_v54 = vmul.f32 1.442695, %v2849_v33 }
 0x65a   : > { %v2824_v16 = vpop.xlane.xlu0 %2823 }
 0x65b   : > { %7666 = vpow2.f32 %v2865_v54  ;;  %v2852_v26 = vsub.f32 %v9252_v30, %v2824_v16 }
 0x65d   : > { %v2871_v37 = vmul.f32 1.442695, %v2852_v26 }
 0x65e   : > { %v2832_v42 = vpop.xlane.xlu0 %2831 }
 0x65f   : > { %7668 = vpow2.f32 %v2871_v37 }
 0x660   : > { %v2820_v49 = vpop.xlane.xlu1 %2819 }
 0x661   : > { %v9400_v15 = vpop.eup %7664  ;;  %v2850_v22 = vsub.f32 %v9270_v9, %v2820_v49  ;;  %v2856_v9 = vsub.f32 %v9263_v20, %v2832_v42 }
 0x662   : > { %2901 = vadd.xlane.f32.xlu1 %v9400_v15  ;;  %v2828_v21 = vpop.xlane.xlu0 %2827 }
 0x663   : > { %v2867_v17 = vmul.f32 1.442695, %v2850_v22  ;;  %v2854_v52 = vsub.f32 %v9278_v14, %v2828_v21  ;;  %v2879_v33 = vmul.f32 1.442695, %v2856_v9 }
 0x664   : > { %v2830_v19 = vpop.xlane.xlu1 %2829 }
 0x665   : > { %v9405_v44 = vpop.eup %7666  ;;  %7670 = vpow2.f32 %v2867_v17  ;;  %v2875_v62 = vmul.f32 1.442695, %v2854_v52  ;;  %v2855_v30 = vsub.f32 %v9286_v60, %v2830_v19 }
 0x666   : > { %2897 = vadd.xlane.f32.xlu0 %v9405_v44  ;;  %v2840_v16 = vpop.xlane.xlu0 %2839 }
 0x667   : > { %v2877_v34 = vmul.f32 1.442695, %v2855_v30  ;;  %7672 = vpow2.f32 %v2875_v62 }
 0x668   : > { %v2826_v8 = vpop.xlane.xlu1 %2825 }
 0x669   : > { %v9409_v23 = vpop.eup %7668  ;;  %7674 = vpow2.f32 %v2877_v34  ;;  %v2853_v43 = vsub.f32 %v9302_v11, %v2826_v8 }
 0x66a   : > { %2903 = vadd.xlane.f32.xlu1 %v9409_v23  ;;  %v2836_v21 = vpop.xlane.xlu0 %2835 }
 0x66b   : > { %v2873_v14 = vmul.f32 1.442695, %v2853_v43  ;;  %v2858_v19 = vsub.f32 %v9307_v31, %v2836_v21 }
 0x66c   : > { %v2838_v1 = vpop.xlane.xlu1 %2837 }
 0x66d   : > { %7676 = vpow2.f32 %v2873_v14  ;;  %v2859_v60 = vsub.f32 %v9314_v55, %v2838_v1  ;;  %v2860_v55 = vsub.f32 %v9294_v47, %v2840_v16  ;;  %v2883_v34 = vmul.f32 1.442695, %v2858_v19  ;;  %v11473_v19 = vld [vmem:[#allocation43_spill] sm:$0xff] }
 0x66e   : > { %7678 = vpow2.f32 %v2879_v33 }
 0x66f   : > { %v9415_v54 = vpop.eup %7670  ;;  %v2885_v37 = vmul.f32 1.442695, %v2859_v60 }
 0x670   : > { %v2834_v26 = vpop.xlane.xlu1 %2833  ;;  %2899 = vadd.xlane.f32.xlu1 %v9415_v54  ;;  %v2848_v16 = vpop.xlane.xlu0 %2847 }
 0x671   : > { %v2857_v20 = vsub.f32 %v9330_v36, %v2834_v26  ;;  %v9419_v42 = vpop.eup %7672  ;;  %7680 = vpow2.f32 %v2885_v37  ;;  %v2887_v36 = vmul.f32 1.442695, %v2860_v55  ;;  %v2864_v26 = vsub.f32 %v9336_v5, %v2848_v16 }
 0x673   : > { %v9421_v11 = vpop.eup %7674  ;;  %v2881_v22 = vmul.f32 1.442695, %v2857_v20  ;;  %v2895_v20 = vmul.f32 1.442695, %v2864_v26 }
 0x674   : > { %v2846_v49 = vpop.xlane.xlu1 %2845  ;;  %2909 = vadd.xlane.f32.xlu0 %v9421_v11  ;;  %2907 = vadd.xlane.f32.xlu1 %v9419_v42 }
 0x675   : > { %7682 = vpow2.f32 %v2881_v22  ;;  %v2863_v1 = vsub.f32 %v9347_v3, %v2846_v49  ;;  %v2844_v22 = vpop.xlane.xlu0 %2843 }
 0x676   : > { %7684 = vpow2.f32 %v2887_v36  ;;  %v11472_v36 = vld [vmem:[#allocation8_spill] sm:$0xff] }
 0x677   : > { %v9426_v17 = vpop.eup %7676  ;;  %7686 = vpow2.f32 %v2883_v34  ;;  %v2893_v33 = vmul.f32 1.442695, %v2863_v1  ;;  %v11475_v34 = vld [vmem:[#allocation35_spill] sm:$0xff] }
 0x678   : > { %v2842_v52 = vpop.xlane.xlu1 %2841  ;;  %2905 = vadd.xlane.f32.xlu0 %v9426_v17  ;;  %v9430_v62 = vpop.eup %7678 }
 0x679   : > { %v2861_v60 = vsub.f32 %v9355_v51, %v2842_v52  ;;  %7688 = vpow2.f32 %v2893_v33  ;;  %v2862_v51 = vsub.f32 %v9350_v59, %v2844_v22  ;;  %v11470_v59 = vld [vmem:[#allocation40_spill] sm:$0xff]  ;;  %v11471_v52 = vld [vmem:[#allocation39_spill] sm:$0xff]  ;;  %v9491_v1 = vpop.permute.xlu0 %3546 }
 0x67b   : > { %v9435_v47 = vpop.eup %7680  ;;  %v2889_v37 = vmul.f32 1.442695, %v2861_v60  ;;  %v2891_v49 = vmul.f32 1.442695, %v2862_v51 }
 0x67c   : > { %v3156_v30 = vpop.permute.xlu1 %3155  ;;  %2911 = vadd.xlane.f32.xlu0 %v9430_v62 }
 0x67d   : > { %6820 = vmatprep.mubr.msk.bf16.mxu1 %vm1414_vm0, %v3156_v30  ;;  %7690 = vpow2.f32 %v2889_v37 }
 0x67e   : > { %6821 = vmatmul.mubr.msk.bf16.gmra.mrb[112].mxu1 %vm1414_vm0, %v3156_v30  ;;  %7692 = vpow2.f32 %v2895_v20  ;;  %v11474_v30 = vld [vmem:[#allocation26_spill] sm:$0xff] }
 0x67f   : > { %v9440_v31 = vpop.eup %7682  ;;  %7694 = vpow2.f32 %v2891_v49 }
 0x680   : > { %v9437_v8 = vpop.permute.xlu1 %3548  ;;  %2917 = vadd.xlane.f32.xlu0 %v9435_v47  ;;  %v9447_v43 = vpop.eup %7684 }
 0x681   : > { %v9450_v14 = vpop.eup %7686 }
 0x683   : > { %v9458_v55 = vpop.eup %7688 }
 0x684   : > { %v3158_v9 = vpop.permute.xlu1 %3157  ;;  %2913 = vadd.xlane.f32.xlu0 %v9440_v31 }
 0x685   : > { %6822 = vmatprep.mubr.msk.bf16.mxu1 %vm1414_vm0, %v3158_v9  ;;  %3159 = vrot.lane.b32.xlu1 %v8414_v28, %s11298_s24 }
 0x686   : > { %6823 = vmatmul.mubr.msk.bf16.gmra.mrb[116].mxu1 %vm1414_vm0, %v3158_v9 }
 0x687   : > { %v9461_v3 = vpop.eup %7690 }
 0x688   : > { %2919 = vadd.xlane.f32.xlu0 %v9447_v43  ;;  %v9465_v5 = vpop.eup %7692 }
 0x689   : > { %v9468_v21 = vpop.eup %7694 }
 0x68c   : > { %2915 = vadd.xlane.f32.xlu0 %v9450_v14 }
 0x6a2   : > { %3550 = vrot.lane.b32.xlu0 %v8400_v18, %s11298_s24  ;;  %v9726_v18 = vld [vmem:[%s8684_s17] ss:$0 sm:$0xff] }
 0x6a9   : > { %2925 = vadd.xlane.f32.xlu1 %v9458_v55 }
 0x6ad   : > { %2921 = vadd.xlane.f32.xlu1 %v9461_v3 }
 0x6b1   : > { %2927 = vadd.xlane.f32.xlu1 %v9465_v5 }
 0x6c1   : > { %2923 = vadd.xlane.f32.xlu0 %v9468_v21 }
 0x6c2   : > { %3161 = vrot.lane.b32.xlu1 %v8434_v0, %s11298_s24 }
 0x6c6   : > { %3524 = vrot.lane.b32.xlu1 %v8438_v10, %s11298_s24 }
 0x6ca   : > { %3528 = vrot.lane.b32.xlu1 %v8349_v6, %s11298_s24 }
 0x6ce   : > { %3532 = vrot.lane.b32.xlu1 %v8391_v56, %s11298_s24 }
 0x6d2   : > { %3536 = vrot.lane.b32.xlu1 %v11470_v59, %s11298_s24 }
 0x6d7   : > { %3552 = vrot.lane.b32.xlu0 %v11471_v52, %s11298_s24 }
 0x6db   : > { %3522 = vrot.lane.b32.xlu0 %v11472_v36, %s11298_s24 }
 0x6df   : > { %3526 = vrot.lane.b32.xlu0 %v11473_v19, %s11298_s24 }
 0x6e3   : > { %3530 = vrot.lane.b32.xlu0 %v11474_v30, %s11298_s24 }
 0x6e7   : > { %3534 = vrot.lane.b32.xlu0 %v11475_v34, %s11298_s24  ;;  %s11478_s24 = smov 272  }
 0x6ef   : > { %v2902_v9 = vpop.xlane.xlu1 %2901 }
 0x6f3   : > { %v2898_v37 = vpop.xlane.xlu0 %2897 }
 0x6f6   : > { %v3301_v33 = vpop.f32.mrb[96].mxu1 }
 0x6f7   : > { %v3303_v60 = vpop.f32.mrb[97].mxu1  ;;  %3381 = vrot.lane.b32.xlu0 %v3301_v33, %s11476_s19  ;;  %v2904_v26 = vpop.xlane.xlu1 %2903 }
 0x6f8   : > { %v3305_v16 = vpop.f32.mrb[98].mxu1  ;;  %3384 = vrot.lane.b32.xlu1 %v3303_v60, %s11476_s19  ;;  %7696 = vrcp.f32 %v2904_v26 }
 0x6f9   : > { %v3307_v20 = vpop.f32.mrb[99].mxu1  ;;  %7698 = vrcp.f32 %v2898_v37 }
 0x6fa   : > { %7700 = vrcp.f32 %v2902_v9 }
 0x6fb   : > { %3389 = vrot.lane.b32.xlu0 %v3305_v16, %s11477_s1 }
 0x6fc   : > { %3393 = vrot.lane.b32.xlu1 %v3307_v20, %s11477_s1 }
 0x6fd   : > { %v2900_v22 = vpop.xlane.xlu1 %2899 }
 0x6fe   : > { %v3311_v51 = vpop.f32.mrb[100].mxu1  ;;  %7702 = vrcp.f32 %v2900_v22 }
 0x6ff   : > { %v3313_v49 = vpop.f32.mrb[101].mxu1  ;;  %3398 = vrot.lane.b32.xlu0 %v3311_v51, %s11478_s24 }
 0x700   : > { %v3315_v33 = vpop.f32.mrb[102].mxu1  ;;  %3402 = vrot.lane.b32.xlu1 %v3313_v49, %s11478_s24 }
 0x701   : > { %v3317_v34 = vpop.f32.mrb[103].mxu1  ;;  %v2908_v60 = vpop.xlane.xlu1 %2907 }
 0x702   : > { %v2910_v30 = vpop.xlane.xlu0 %2909  ;;  %v7697_v16 = vpop.eup %7696  ;;  %7704 = vrcp.f32 %v2908_v60 }
 0x703   : > { %3407 = vrot.lane.b32.xlu0 %v3315_v33, %s11479_s2  ;;  %v7699_v9 = vpop.eup %7698  ;;  %v2948_v33 = vmul.f32 %v7697_v16, %v9409_v23 }
 0x704   : > { %3411 = vrot.lane.b32.xlu1 %v3317_v34, %s11479_s2  ;;  %v7701_v22 = vpop.eup %7700  ;;  %v2945_v60 = vmul.f32 %v7699_v9, %v9405_v44 }
 0x705   : > { %v3160_v26 = vpop.permute.xlu1 %3159  ;;  %v2947_v56 = vmul.f32 %v7701_v22, %v9400_v15 }
 0x706   : > { %v3321_v37 = vpop.f32.mrb[104].mxu1  ;;  %v2906_v20 = vpop.xlane.xlu0 %2905  ;;  %6824 = vmatprep.mubr.msk.bf16.mxu1 %vm1414_vm0, %v3160_v26 }
 0x707   : > { %7706 = vrcp.f32 %v2906_v20  ;;  %v3323_v51 = vpop.f32.mrb[105].mxu1  ;;  %3416 = vrot.lane.b32.xlu0 %v3321_v37, %s11480_s3  ;;  %6825 = vmatmul.mubr.msk.bf16.gmra.mrb[120].mxu1 %vm1414_vm0, %v3160_v26  ;;  %v2962_v26 = vpack.c.bf16 %v2948_v33, %v2947_v56 }
 0x708   : > { %v7703_v49 = vpop.eup %7702  ;;  %v3325_v59 = vpop.f32.mrb[106].mxu1  ;;  %3420 = vrot.lane.b32.xlu1 %v3323_v51, %s11480_s3  ;;  %7708 = vrcp.f32 %v2910_v30  ;;  %v3579_v30 = vsel %vm1414_vm0, %v9378_v45, 0 }
 0x709   : > { %v3327_v34 = vpop.f32.mrb[107].mxu1  ;;  %v2946_v19 = vmul.f32 %v7703_v49, %v9415_v54 }
 0x70a   : > { %v2912_v20 = vpop.xlane.xlu0 %2911 }
 0x70b   : > { %7710 = vrcp.f32 %v2912_v20  ;;  %3425 = vrot.lane.b32.xlu0 %v3325_v59, %s11481_s4  ;;  %v2961_v37 = vpack.c.bf16 %v2946_v19, %v2945_v60 }
 0x70c   : > { %3429 = vrot.lane.b32.xlu1 %v3327_v34, %s11481_s4  ;;  %v7705_v44 = vpop.eup %7704  ;;  %v3582_v34 = vsel %vm1414_vm0, %v9384_v58, 0 }
 0x70d   : > { %7196 = vmatprep.mubr.bf16.mxu0 %v2961_v37  ;;  %v2950_v22 = vmul.f32 %v7705_v44, %v9419_v42  ;;  %v3585_v37 = vsel %vm1414_vm0, %v9388_v13, 0 }
 0x70e   : > { %v3331_v23 = vpop.f32.mrb[108].mxu1  ;;  %v2918_v16 = vpop.xlane.xlu0 %2917  ;;  %7197 = vmatmul.mubr.bf16.vlgmr.msra.gmra.mrb[96].mxu0 %v2962_v26 }
 0x70f   : > { %v3333_v9 = vpop.f32.mrb[109].mxu1  ;;  %3434 = vrot.lane.b32.xlu0 %v3331_v23, %s11412_s20  ;;  %7213 = vmatpush3.bf16.xpose.msra.mxu0 %v3579_v30  ;;  %v3588_v30 = vsel %vm1414_vm0, %v9395_v4, 0 }
 0x710   : > { %v3335_v15 = vpop.f32.mrb[110].mxu1  ;;  %3438 = vrot.lane.b32.xlu1 %v3333_v9, %s11412_s20  ;;  %7429 = vmatprep.subr.msk.bf16.mxu0 %vm1414_vm0, %v9384_v58 }
 0x711   : > { %v7707_v54 = vpop.eup %7706  ;;  %v3337_v56 = vpop.f32.mrb[111].mxu1 }
 0x712   : > { %v2914_v59 = vpop.xlane.xlu0 %2913  ;;  %v2949_v19 = vmul.f32 %v7707_v54, %v9426_v17  ;;  %v7709_v51 = vpop.eup %7708 }
 0x713   : > { %3443 = vrot.lane.b32.xlu0 %v3335_v15, %s11415_s23  ;;  %v2951_v60 = vmul.f32 %v7709_v51, %v9421_v11 }
 0x714   : > { %3447 = vrot.lane.b32.xlu1 %v3337_v56, %s11415_s23  ;;  %v2963_v45 = vpack.c.bf16 %v2950_v22, %v2949_v19 }
 0x715   : > { %v7711_v49 = vpop.eup %7710 }
 0x716   : > { %7200 = vmatprep.mubr.bf16.mxu0 %v2963_v45  ;;  %v2920_v33 = vpop.xlane.xlu0 %2919  ;;  %v2952_v20 = vmul.f32 %v7711_v49, %v9430_v62 }
 0x717   : > { %7215 = vmatpush3.bf16.xpose.msra.mxu0 %v3582_v34  ;;  %7712 = vrcp.f32 %v2920_v33 }
 0x718   : > { %7430 = vmatprep.subr.msk.bf16.mxu0 %vm1414_vm0, %v9388_v13  ;;  %v2964_v42 = vpack.c.bf16 %v2952_v20, %v2951_v60  ;;  %7714 = vrcp.f32 %v2914_v59 }
 0x719   : > { %7716 = vrcp.f32 %v2918_v16 }
 0x71a   : > { %7201 = vmatmul.mubr.bf16.gmra.mrb[100].mxu0 %v2964_v42  ;;  %v2916_v17 = vpop.xlane.xlu0 %2915 }
 0x71b   : > { %7718 = vrcp.f32 %v2916_v17 }
 0x71f   : > { %7217 = vmatpush3.bf16.xpose.msra.mxu0 %v3585_v37 }
 0x720   : > { %7431 = vmatprep.subr.msk.bf16.mxu0 %vm1414_vm0, %v9395_v4 }
 0x721   : > { %v7713_v58 = vpop.eup %7712 }
 0x722   : > { %v7715_v11 = vpop.eup %7714  ;;  %v2956_v23 = vmul.f32 %v7713_v58, %v9447_v43  ;;  %v3591_v43 = vsel %vm1414_vm0, %v9491_v1, 0 }
 0x723   : > { %v7717_v62 = vpop.eup %7716  ;;  %v2953_v16 = vmul.f32 %v7715_v11, %v9440_v31  ;;  %v3594_v31 = vsel %vm1414_vm0, %v9437_v8, 0 }
 0x724   : > { %v2955_v13 = vmul.f32 %v7717_v62, %v9435_v47 }
 0x725   : > { %v7719_v26 = vpop.eup %7718 }
 0x726   : > { %v2954_v44 = vmul.f32 %v7719_v26, %v9450_v14  ;;  %v2966_v15 = vpack.c.bf16 %v2956_v23, %v2955_v13  ;;  %v3551_v14 = vpop.permute.xlu0 %3550 }
 0x727   : > { %7219 = vmatpush3.bf16.xpose.msra.mxu0 %v3588_v30  ;;  %v3597_v56 = vsel %vm1414_vm0, %v3551_v14, 0 }
 0x728   : > { %7432 = vmatprep.subr.msk.bf16.mxu0 %vm1414_vm0, %v9491_v1  ;;  %v2965_v9 = vpack.c.bf16 %v2954_v44, %v2953_v16 }
 0x72a   : > { %7204 = vmatprep.mubr.bf16.mxu0 %v2965_v9 }
 0x72b   : > { %7205 = vmatmul.mubr.bf16.gmra.mrb[104].mxu0 %v2966_v15 }
 0x72f   : > { %7221 = vmatpush3.bf16.xpose.msra.mxu0 %v3591_v43 }
 0x730   : > { %7433 = vmatprep.subr.msk.bf16.mxu0 %vm1414_vm0, %v9437_v8 }
 0x736   : > { %v2926_v4 = vpop.xlane.xlu1 %2925 }
 0x737   : > { %7223 = vmatpush3.bf16.xpose.msra.mxu0 %v3594_v31 }
 0x738   : > { %7434 = vmatprep.subr.msk.bf16.mxu0 %vm1414_vm0, %v3551_v14 }
 0x73a   : > { %v2922_v47 = vpop.xlane.xlu1 %2921 }
 0x73e   : > { %v2928_v54 = vpop.xlane.xlu1 %2927 }
 0x73f   : > { %7225 = vmatpush3.bf16.xpose.msra.mxu0 %v3597_v56  ;;  %7720 = vrcp.f32 %v2928_v54 }
 0x740   : > { %7722 = vrcp.f32 %v2922_v47 }
 0x741   : > { %7724 = vrcp.f32 %v2926_v4 }
 0x742   : > { %v3162_v59 = vpop.permute.xlu1 %3161 }
 0x743   : > { %6826 = vmatprep.mubr.msk.bf16.mxu1 %vm1414_vm0, %v3162_v59 }
 0x744   : > { %6827 = vmatmul.mubr.msk.bf16.gmra.mrb[124].mxu1 %vm1414_vm0, %v3162_v59 }
 0x749   : > { %v7721_v33 = vpop.eup %7720 }
 0x74a   : > { %v7723_v34 = vpop.eup %7722  ;;  %v2960_v17 = vmul.f32 %v7721_v33, %v9465_v5  ;;  %v11519_v33 = vld [vmem:[#allocation51_spill] sm:$0xff] }
 0x74b   : > { %v7725_v60 = vpop.eup %7724  ;;  %v2957_v58 = vmul.f32 %v7723_v34, %v9461_v3  ;;  %v3525_v3 = vpop.permute.xlu1 %3524 }
 0x74c   : > { %v2959_v26 = vmul.f32 %v7725_v60, %v9458_v55 }
 0x74e   : > { %v2924_v1 = vpop.xlane.xlu0 %2923  ;;  %v2968_v16 = vpack.c.bf16 %v2960_v17, %v2959_v26 }
 0x74f   : > { %7726 = vrcp.f32 %v2924_v1 }
 0x751   : > { %v3341_v8 = vpop.f32.mrb[112].mxu1 }
 0x752   : > { %v3343_v19 = vpop.f32.mrb[113].mxu1  ;;  %3452 = vrot.lane.b32.xlu0 %v3341_v8, %s11421_s29  ;;  %v3553_v22 = vpop.permute.xlu0 %3552 }
 0x753   : > { %v3345_v51 = vpop.f32.mrb[114].mxu1  ;;  %3456 = vrot.lane.b32.xlu1 %v3343_v19, %s11421_s29  ;;  %7435 = vmatprep.subr.msk.bf16.mxu0 %vm1414_vm0, %v3553_v22  ;;  %v3600_v49 = vsel %vm1414_vm0, %v3553_v22, 0 }
 0x754   : > { %v3347_v45 = vpop.f32.mrb[115].mxu1  ;;  %7227 = vmatpush3.bf16.xpose.msra.mxu0 %v3600_v49 }
 0x756   : > { %3461 = vrot.lane.b32.xlu0 %v3345_v51, %s11423_s30  ;;  %v3523_v44 = vpop.permute.xlu0 %3522 }
 0x757   : > { %3465 = vrot.lane.b32.xlu1 %v3347_v45, %s11423_s30 }
 0x759   : > { %v7727_v20 = vpop.eup %7726  ;;  %v3351_v42 = vpop.f32.mrb[116].mxu1 }
 0x75a   : > { %v3353_v37 = vpop.f32.mrb[117].mxu1  ;;  %3470 = vrot.lane.b32.xlu0 %v3351_v42, %s11424_s28  ;;  %v2958_v11 = vmul.f32 %v7727_v20, %v9468_v21  ;;  %v3527_v5 = vpop.permute.xlu0 %3526 }
 0x75b   : > { %v3355_v62 = vpop.f32.mrb[118].mxu1  ;;  %3474 = vrot.lane.b32.xlu1 %v3353_v37, %s11424_s28  ;;  %v3529_v21 = vpop.permute.xlu1 %3528 }
 0x75c   : > { %v3357_v23 = vpop.f32.mrb[119].mxu1  ;;  %v2967_v30 = vpack.c.bf16 %v2958_v11, %v2957_v58 }
 0x75e   : > { %3479 = vrot.lane.b32.xlu0 %v3355_v62, %s11425_s27  ;;  %7208 = vmatprep.mubr.bf16.mxu0 %v2967_v30  ;;  %v3531_v55 = vpop.permute.xlu0 %3530  ;;  %v11497_v30 = vld [vmem:[#allocation24_spill] sm:$0xff] }
 0x75f   : > { %3483 = vrot.lane.b32.xlu1 %v3357_v23, %s11425_s27  ;;  %7209 = vmatmul.mubr.bf16.gmra.mrb[108].mxu0 %v2968_v16  ;;  %v3533_v13 = vpop.permute.xlu1 %3532  ;;  %v11496_v23 = vld [vmem:[#allocation45_spill] sm:$0xff]  ;;  %v11498_v16 = vld [vmem:[#allocation44_spill] sm:$0xff] }
 0x760   : > { %7228 = vmatprep.mubr.msk.bf16.mxu0 %vm1414_vm0, %v3523_v44  ;;  %v11499_v44 = vld [vmem:[#allocation23_spill] sm:$0xff] }
 0x762   : > { %v3535_v9 = vpop.permute.xlu0 %3534 }
 0x763   : > { %v3537_v15 = vpop.permute.xlu1 %3536 }
 0x767   : > { %7229 = vmatmul.mubr.msk.bf16.vlgmr.msra.gmra.mrb[112].mxu0 %vm1414_vm0, %v3525_v3  ;;  %v11500_v3 = vld [vmem:[#allocation28_spill] sm:$0xff] }
 0x768   : > { %7232 = vmatprep.mubr.msk.bf16.mxu0 %vm1414_vm0, %v3527_v5  ;;  %v11501_v5 = vld [vmem:[#allocation29_spill] sm:$0xff] }
 0x76f   : > { %7233 = vmatmul.mubr.msk.bf16.gmra.mrb[116].mxu0 %vm1414_vm0, %v3529_v21  ;;  %v11503_v21 = vld [vmem:[#allocation6_spill] sm:$0xff] }
 0x770   : > { %7236 = vmatprep.mubr.msk.bf16.mxu0 %vm1414_vm0, %v3531_v55  ;;  %v11504_v55 = vld [vmem:[#allocation47_spill] sm:$0xff] }
 0x777   : > { %7237 = vmatmul.mubr.msk.bf16.gmra.mrb[120].mxu0 %vm1414_vm0, %v3533_v13  ;;  %v11505_v13 = vld [vmem:[#allocation49_spill] sm:$0xff] }
 0x778   : > { %7240 = vmatprep.mubr.msk.bf16.mxu0 %vm1414_vm0, %v3535_v9  ;;  %v11506_v9 = vld [vmem:[#allocation46_spill] sm:$0xff] }
 0x77f   : > { %7241 = vmatmul.mubr.msk.bf16.gmra.mrb[124].mxu0 %vm1414_vm0, %v3537_v15 }
 0x7da   : > { %v3361_v43 = vpop.f32.mrb[120].mxu1 }
 0x7db   : > { %v3363_v4 = vpop.f32.mrb[121].mxu1  ;;  %3488 = vrot.lane.b32.xlu0 %v3361_v43, %s11426_s26 }
 0x7dc   : > { %v3365_v31 = vpop.f32.mrb[122].mxu1  ;;  %3492 = vrot.lane.b32.xlu1 %v3363_v4, %s11426_s26  ;;  %v11509_v4 = vld [vmem:[#allocation11_spill] sm:$0xff] }
 0x7dd   : > { %v3367_v14 = vpop.f32.mrb[123].mxu1 }
 0x7df   : > { %3497 = vrot.lane.b32.xlu0 %v3365_v31, %s11427_s25 }
 0x7e0   : > { %3501 = vrot.lane.b32.xlu1 %v3367_v14, %s11427_s25 }
 0x7e1   : > { %v9575_v47 = vpop.f32.mrb[96].mxu0 }
 0x7e2   : > { %11482 = vst [vmem:[#allocation61_spill] sm:$0xff] %v9575_v47  ;;  %v9577_v54 = vpop.f32.mrb[97].mxu0  ;;  %v11527_v47 = vld [vmem:[#allocation13_spill] sm:$0xff] }
 0x7e3   : > { %11483 = vst [vmem:[#allocation54_spill] sm:$0xff] %v9577_v54  ;;  %v9579_v56 = vpop.f32.mrb[98].mxu0 }
 0x7e4   : > { %11484 = vst [vmem:[#allocation63_spill] sm:$0xff] %v9579_v56  ;;  %v9583_v1 = vpop.f32.mrb[99].mxu0 }
 0x7e5   : > { %11485 = vst [vmem:[#allocation56_spill] sm:$0xff] %v9583_v1  ;;  %v11528_v1 = vld [vmem:[#allocation12_spill] sm:$0xff] }
 0x7ed   : > { %v9587_v19 = vpop.f32.mrb[100].mxu0 }
 0x7ee   : > { %11486 = vst [vmem:[#allocation52_spill] sm:$0xff] %v9587_v19  ;;  %v9589_v22 = vpop.f32.mrb[101].mxu0 }
 0x7ef   : > { %11487 = vst [vmem:[#allocation65_spill] sm:$0xff] %v9589_v22  ;;  %v9591_v51 = vpop.f32.mrb[102].mxu0 }
 0x7f0   : > { %11488 = vst [vmem:[#allocation58_spill] sm:$0xff] %v9591_v51  ;;  %v9595_v49 = vpop.f32.mrb[103].mxu0 }
 0x7f1   : > { %11489 = vst [vmem:[#allocation67_spill] sm:$0xff] %v9595_v49  ;;  %v11525_v49 = vld [vmem:[#allocation9_spill] sm:$0xff] }
 0x7fe   : > { %v9599_v34 = vpop.f32.mrb[104].mxu0 }
 0x7ff   : > { %11490 = vst [vmem:[#allocation59_spill] sm:$0xff] %v9599_v34  ;;  %v9601_v60 = vpop.f32.mrb[105].mxu0 }
 0x800   : > { %11491 = vst [vmem:[#allocation60_spill] sm:$0xff] %v9601_v60  ;;  %v9603_v20 = vpop.f32.mrb[106].mxu0 }
 0x801   : > { %11492 = vst [vmem:[#allocation62_spill] sm:$0xff] %v9603_v20  ;;  %v9607_v17 = vpop.f32.mrb[107].mxu0 }
 0x802   : > { %11493 = vst [vmem:[#allocation64_spill] sm:$0xff] %v9607_v17  ;;  %v11524_v17 = vld [vmem:[#allocation18_spill] sm:$0xff] }
 0x817   : > { %v3371_v58 = vpop.f32.mrb[124].mxu1 }
 0x818   : > { %v3373_v11 = vpop.f32.mrb[125].mxu1  ;;  %3506 = vrot.lane.b32.xlu0 %v3371_v58, %s11494_s5  ;;  %v11511_v58 = vld [vmem:[#allocation33_spill] sm:$0xff] }
 0x819   : > { %3510 = vrot.lane.b32.xlu1 %v3373_v11, %s11494_s5  ;;  %v3375_v62 = vpop.f32.mrb[126].mxu1 }
 0x81a   : > { %v3377_v26 = vpop.f32.mrb[127].mxu1 }
 0x81c   : > { %3515 = vrot.lane.b32.xlu0 %v3375_v62, %s11495_s6 }
 0x81d   : > { %3519 = vrot.lane.b32.xlu1 %v3377_v26, %s11495_s6  ;;  %v11513_v26 = vld [vmem:[#allocation48_spill] sm:$0xff] }
 0x820   : > { %4069 = vrot.lane.b32.xlu0 %v11496_v23, %s7990_s21  ;;  %v11514_v23 = vld [vmem:[#allocation5_spill] sm:$0xff] }
 0x821   : > { %4053 = vrot.lane.b32.xlu1 %v11497_v30, %s7990_s21 }
 0x824   : > { %4071 = vrot.lane.b32.xlu0 %v11498_v16, %s7990_s21 }
 0x825   : > { %4055 = vrot.lane.b32.xlu1 %v11499_v44, %s7990_s21  ;;  %v3382_v44 = vpop.permute.xlu0 %3381 }
 0x828   : > { %4059 = vrot.lane.b32.xlu0 %v11500_v3, %s7990_s21  ;;  %v11515_v3 = vld [vmem:[#allocation10_spill] sm:$0xff] }
 0x829   : > { %4057 = vrot.lane.b32.xlu1 %v11501_v5, %s7990_s21  ;;  %v3390_v62 = vpop.permute.xlu0 %3389 }
 0x82c   : > { %3867 = vrot.lane.b32.xlu0 %v11503_v21, %s11502_s16 }
 0x82d   : > { %4073 = vrot.lane.b32.xlu1 %v11504_v55, %s7990_s21  ;;  %v3385_v55 = vpop.permute.xlu1 %3384  ;;  %v3399_v8 = vpop.permute.xlu0 %3398 }
 0x830   : > { %4077 = vrot.lane.b32.xlu0 %v11505_v13, %s7990_s21  ;;  %v11516_v13 = vld [vmem:[#allocation32_spill] sm:$0xff] }
 0x831   : > { %4075 = vrot.lane.b32.xlu1 %v11506_v9, %s7990_s21  ;;  %v3394_v37 = vpop.permute.xlu1 %3393  ;;  %v3408_v20 = vpop.permute.xlu0 %3407 }
 0x832   : > { %v9635_v15 = vpop.f32.mrb[108].mxu0 }
 0x833   : > { %11507 = vst [vmem:[#allocation66_spill] sm:$0xff] %v9635_v15  ;;  %v9637_v43 = vpop.f32.mrb[109].mxu0 }
 0x834   : > { %11508 = vst [vmem:[#allocation57_spill] sm:$0xff] %v9637_v43  ;;  %3871 = vrot.lane.b32.xlu0 %v11509_v4, %s11502_s16  ;;  %v9641_v31 = vpop.f32.mrb[110].mxu0  ;;  %v11521_v43 = vld [vmem:[#allocation19_spill] sm:$0xff] }
 0x835   : > { %11510 = vst [vmem:[#allocation53_spill] sm:$0xff] %v9641_v31  ;;  %4061 = vrot.lane.b32.xlu1 %v11511_v58, %s7990_s21  ;;  %v9647_v11 = vpop.f32.mrb[111].mxu0  ;;  %v11517_v58 = vld [vmem:[#allocation15_spill] sm:$0xff] }
 0x836   : > { %11512 = vst [vmem:[#allocation68_spill] sm:$0xff] %v9647_v11  ;;  %v11522_v11 = vld [vmem:[#allocation37_spill] sm:$0xff] }
 0x838   : > { %4079 = vrot.lane.b32.xlu0 %v11513_v26, %s7990_s21  ;;  %v11518_v26 = vld [vmem:[#allocation38_spill] sm:$0xff] }
 0x839   : > { %3869 = vrot.lane.b32.xlu1 %v11514_v23, %s11502_s16 }
 0x83a   : > { %v7230_v30 = vpop.f32.mrb[112].mxu0 }
 0x83b   : > { %v3636_v16 = vpop.f32.mrb[113].mxu0 }
 0x83c   : > { %3873 = vrot.lane.b32.xlu0 %v11515_v3, %s11502_s16  ;;  %v9657_v5 = vpop.f32.mrb[114].mxu0 }
 0x83d   : > { %4063 = vrot.lane.b32.xlu1 %v11516_v13, %s7990_s21  ;;  %v9661_v9 = vpop.f32.mrb[115].mxu0  ;;  %v11520_v13 = vld [vmem:[#allocation14_spill] sm:$0xff] }
 0x840   : > { %3875 = vrot.lane.b32.xlu0 %v11517_v58, %s11502_s16  ;;  %v11531_v58 = vld [vmem:[#allocation20_spill] sm:$0xff] }
 0x841   : > { %4065 = vrot.lane.b32.xlu1 %v11518_v26, %s7990_s21  ;;  %v3403_v26 = vpop.permute.xlu1 %3402 }
 0x842   : > { %v9667_v14 = vpop.f32.mrb[116].mxu0  ;;  %v3404_v0 = vsel %vm1632_vm3, %v3399_v8, %v3403_v26 }
 0x843   : > { %v9669_v42 = vpop.f32.mrb[117].mxu0 }
 0x844   : > { %4081 = vrot.lane.b32.xlu0 %v11519_v33, %s7990_s21  ;;  %v7235_v45 = vpop.f32.mrb[118].mxu0  ;;  %v11523_v33 = vld [vmem:[#allocation50_spill] sm:$0xff] }
 0x845   : > { %3877 = vrot.lane.b32.xlu1 %v11520_v13, %s11502_s16  ;;  %v9675_v59 = vpop.f32.mrb[119].mxu0  ;;  %v3412_v22 = vpop.permute.xlu1 %3411 }
 0x846   : > { %v3413_v8 = vsel %vm1643_vm4, %v3408_v20, %v3412_v22 }
 0x847   : > { %v3648_v26 = vadd.f32 %v9657_v5, %v3413_v8 }
 0x848   : > { %3879 = vrot.lane.b32.xlu0 %v11521_v43, %s11502_s16 }
 0x849   : > { %4067 = vrot.lane.b32.xlu1 %v11522_v11, %s7990_s21  ;;  %v11526_v11 = vld [vmem:[#allocation7_spill] sm:$0xff]  ;;  %v3421_v54 = vpop.permute.xlu1 %3420  ;;  %v9748_v22 = vadd.f32 %v9726_v18, %v3648_v26 }
 0x84a   : > { %v9681_v15 = vpop.f32.mrb[120].mxu0 }
 0x84b   : > { %v9683_v31 = vpop.f32.mrb[121].mxu0 }
 0x84c   : > { %4083 = vrot.lane.b32.xlu0 %v11523_v33, %s7990_s21  ;;  %v9687_v60 = vpop.f32.mrb[122].mxu0  ;;  %v3417_v33 = vpop.permute.xlu0 %3416 }
 0x84d   : > { %3881 = vrot.lane.b32.xlu1 %v11524_v17, %s11502_s16  ;;  %v9691_v34 = vpop.f32.mrb[123].mxu0  ;;  %v3430_v13 = vpop.permute.xlu1 %3429 }
 0x850   : > { %4037 = vrot.lane.b32.xlu0 %v11525_v49, %s7990_s21  ;;  %v11529_v49 = vld [vmem:[#allocation16_spill] sm:$0xff]  ;;  %v3426_v43 = vpop.permute.xlu0 %3425 }
 0x851   : > { %4428 = vrot.lane.b32.xlu1 %v11526_v11, %s7990_s21  ;;  %v11530_v11 = vld [vmem:[#allocation17_spill] sm:$0xff]  ;;  %v3439_v4 = vpop.permute.xlu1 %3438 }
 0x852   : > { %v9697_v19 = vpop.f32.mrb[124].mxu0 }
 0x853   : > { %v9699_v51 = vpop.f32.mrb[125].mxu0 }
 0x854   : > { %4039 = vrot.lane.b32.xlu0 %v11527_v47, %s7990_s21  ;;  %v9703_v56 = vpop.f32.mrb[126].mxu0  ;;  %v11532_v47 = vld [vmem:[#allocation22_spill] sm:$0xff]  ;;  %v3435_v3 = vpop.permute.xlu0 %3434 }
 0x855   : > { %4430 = vrot.lane.b32.xlu1 %v11528_v1, %s7990_s21  ;;  %v9707_v17 = vpop.f32.mrb[127].mxu0  ;;  %v3448_v23 = vpop.permute.xlu1 %3447  ;;  %v3440_v5 = vsel %vm1676_vm7, %v3435_v3, %v3439_v4  ;;  %v3422_v4 = vsel %vm1654_vm5, %v3417_v33, %v3421_v54 }
 0x858   : > { %4432 = vrot.lane.b32.xlu0 %v11529_v49, %s7990_s21  ;;  %v3444_v1 = vpop.permute.xlu0 %3443 }
 0x859   : > { %4041 = vrot.lane.b32.xlu1 %v11530_v11, %s7990_s21  ;;  %v3457_v21 = vpop.permute.xlu1 %3456 }
 0x85c   : > { %4434 = vrot.lane.b32.xlu0 %v11531_v58, %s7990_s21  ;;  %v3453_v49 = vpop.permute.xlu0 %3452  ;;  %v3645_v58 = vadd.f32 %v7230_v30, %v3404_v0 }
 0x85d   : > { %4043 = vrot.lane.b32.xlu1 %v11532_v47, %s7990_s21  ;;  %v3466_v11 = vpop.permute.xlu1 %3465  ;;  %v3386_v47 = vsel %vm1610_vm1, %v3382_v44, %v3385_v55  ;;  %v3395_v44 = vsel %vm1621_vm2, %v3390_v62, %v3394_v37  ;;  %v3661_v62 = vadd.f32 %v9667_v14, %v3440_v5 }
 0x85e   : > { %v3637_v28 = vadd.f32 %v3636_v16, %v3386_v47  ;;  %v3640_v55 = vadd.f32 %v9661_v9, %v3395_v44  ;;  %v3449_v16 = vsel %vm1687_vm8, %v3444_v1, %v3448_v23  ;;  %v3431_v23 = vsel %vm1665_vm6, %v3426_v43, %v3430_v13 }
 0x85f   : > { %v9770_v14 = vadd.f32 %v9726_v18, %v3661_v62  ;;  %v3653_v1 = vadd.f32 %v9669_v42, %v3422_v4 }
 0x860   : > { %v3462_v36 = vpop.permute.xlu0 %3461  ;;  %v9736_v30 = vadd.f32 %v9726_v18, %v3637_v28  ;;  %v3664_v28 = vadd.f32 %v7235_v45, %v3449_v16  ;;  %v9754_v37 = vadd.f32 %v9726_v18, %v3640_v55  ;;  %v3656_v45 = vadd.f32 %v9675_v59, %v3431_v23 }
 0x861   : > { %4045 = vrot.lane.b32.xlu1 %v11467_v41, %s7990_s21  ;;  %v3475_v52 = vpop.permute.xlu1 %3474  ;;  %v9729_v41 = vadd.f32 %v9726_v18, %v3645_v58  ;;  %v9786_v42 = vadd.f32 %v9726_v18, %v3653_v1 }
 0x862   : > { %v9762_v9 = vadd.f32 %v9726_v18, %v3664_v28  ;;  %v9778_v59 = vadd.f32 %v9726_v18, %v3656_v45 }
 0x864   : > { %v3471_v10 = vpop.permute.xlu0 %3470 }
 0x865   : > { %v3484_v0 = vpop.permute.xlu1 %3483  ;;  %v3476_v54 = vsel %vm1720_vm11, %v3471_v10, %v3475_v52  ;;  %v3458_v10 = vsel %vm1698_vm9, %v3453_v49, %v3457_v21 }
 0x866   : > { %v3677_v8 = vadd.f32 %v9681_v15, %v3476_v54  ;;  %v3669_v44 = vadd.f32 %v9683_v31, %v3458_v10 }
 0x868   : > { %v3480_v29 = vpop.permute.xlu0 %3479  ;;  %v9802_v15 = vadd.f32 %v9726_v18, %v3677_v8  ;;  %v9818_v31 = vadd.f32 %v9726_v18, %v3669_v44 }
 0x869   : > { %v3493_v20 = vpop.permute.xlu1 %3492  ;;  %v3485_v43 = vsel %vm1731_vm12, %v3480_v29, %v3484_v0  ;;  %v3467_v29 = vsel %vm1709_vm10, %v3462_v36, %v3466_v11 }
 0x86a   : > { %v3680_v13 = vadd.f32 %v9687_v60, %v3485_v43  ;;  %v3672_v0 = vadd.f32 %v9691_v34, %v3467_v29 }
 0x86c   : > { %v3489_v58 = vpop.permute.xlu0 %3488  ;;  %v9794_v60 = vadd.f32 %v9726_v18, %v3680_v13  ;;  %v9813_v11 = vadd.f32 %v9726_v18, %v3672_v0 }
 0x86d   : > { %v3502_v47 = vpop.permute.xlu1 %3501 }
 0x870   : > { %v3498_v3 = vpop.permute.xlu0 %3497 }
 0x871   : > { %v3503_v5 = vsel %vm11534_vm14, %v3498_v3, %v3502_v47 }
 0x87b   : > { %3719 = vmax.xlane.f32.xlu0 %v9729_v41 }
 0x87f   : > { %3715 = vmax.xlane.f32.xlu0 %v9736_v30 }
 0x883   : > { %3721 = vmax.xlane.f32.xlu0 %v9748_v22 }
 0x885   : > { %3717 = vmax.xlane.f32.xlu1 %v9754_v37 }
 0x887   : > { %3729 = vmax.xlane.f32.xlu0 %v9762_v9 }
 0x889   : > { %3727 = vmax.xlane.f32.xlu1 %v9770_v14 }
 0x88a   : > { %v3507_v33 = vpop.permute.xlu0 %3506 }
 0x88b   : > { %v3511_v26 = vpop.permute.xlu1 %3510  ;;  %3725 = vmax.xlane.f32.xlu0 %v9778_v59 }
 0x88c   : > { %v3512_v36 = vsel %vm1764_vm15, %v3507_v33, %v3511_v26 }
 0x88d   : > { %3723 = vmax.xlane.f32.xlu1 %v9786_v42  ;;  %v3693_v16 = vadd.f32 %v9697_v19, %v3512_v36 }
 0x88e   : > { %v3516_v52 = vpop.permute.xlu0 %3515 }
 0x88f   : > { %v3520_v55 = vpop.permute.xlu1 %3519  ;;  %3737 = vmax.xlane.f32.xlu0 %v9794_v60 }
 0x890   : > { %v3521_v34 = vsel %vm11323_vm13, %v3516_v52, %v3520_v55  ;;  %vm11535_vm13 = vcmp.lt.s32.totalorder %v8675_v2, %v8833_v61  ;;  %v11536_v55 = vld [vmem:[#allocation30_spill] sm:$0xff] }
 0x891   : > { %v3696_v21 = vadd.f32 %v9703_v56, %v3521_v34  ;;  %3735 = vmax.xlane.f32.xlu1 %v9802_v15  ;;  %v3688_v56 = vadd.f32 %v9707_v17, %v3503_v5  ;;  %v3494_v19 = vsel %vm11535_vm13, %v3489_v58, %v3493_v20  ;;  %v9839_v17 = vadd.f32 %v9726_v18, %v3693_v16 }
 0x892   : > { %v4070_v49 = vpop.permute.xlu0 %4069  ;;  %v3685_v4 = vadd.f32 %v9699_v51, %v3494_v19 }
 0x893   : > { %v4054_v28 = vpop.permute.xlu1 %4053  ;;  %3733 = vmax.xlane.f32.xlu0 %v9813_v11  ;;  %7436 = vmatprep.subr.msk.bf16.mxu0 %vm1414_vm0, %v4070_v49  ;;  %v9830_v23 = vadd.f32 %v9726_v18, %v3696_v21  ;;  %v9842_v3 = vadd.f32 %v9726_v18, %v3688_v56 }
 0x894   : > { %v4110_v62 = vsel %vm1414_vm0, %v4054_v28, 0  ;;  %v9846_v43 = vadd.f32 %v9726_v18, %v3685_v4 }
 0x895   : > { %3731 = vmax.xlane.f32.xlu1 %v9818_v31  ;;  %6861 = vmatpush3.bf16.xpose.msra.mxu0 %v4110_v62 }
 0x896   : > { %v4072_v45 = vpop.permute.xlu0 %4071 }
 0x897   : > { %v4056_v1 = vpop.permute.xlu1 %4055  ;;  %3745 = vmax.xlane.f32.xlu0 %v9830_v23  ;;  %7437 = vmatprep.subr.msk.bf16.mxu0 %vm1414_vm0, %v4072_v45 }
 0x898   : > { %v4113_v51 = vsel %vm1414_vm0, %v4056_v1, 0 }
 0x899   : > { %3743 = vmax.xlane.f32.xlu1 %v9839_v17 }
 0x89a   : > { %v4060_v47 = vpop.permute.xlu0 %4059 }
 0x89b   : > { %v4058_v58 = vpop.permute.xlu1 %4057  ;;  %3741 = vmax.xlane.f32.xlu0 %v9842_v3  ;;  %v4119_v10 = vsel %vm1414_vm0, %v4060_v47, 0 }
 0x89c   : > { %v4116_v8 = vsel %vm1414_vm0, %v4058_v58, 0 }
 0x89d   : > { %3739 = vmax.xlane.f32.xlu1 %v9846_v43  ;;  %6863 = vmatpush3.bf16.xpose.msra.mxu0 %v4113_v51 }
 0x89e   : > { %v3868_v20 = vpop.permute.xlu0 %3867 }
 0x89f   : > { %v4074_v13 = vpop.permute.xlu1 %4073  ;;  %7244 = vmatprep.subr.bf16.mxu1 %v3868_v20 }
 0x8a0   : > { %7245 = vmatpush3.bf16.msra.mxu1 %v3868_v20  ;;  %7438 = vmatprep.subr.msk.bf16.mxu0 %vm1414_vm0, %v4074_v13 }
 0x8a2   : > { %v4078_v54 = vpop.permute.xlu0 %4077 }
 0x8a3   : > { %v4076_v33 = vpop.permute.xlu1 %4075 }
 0x8a5   : > { %6865 = vmatpush3.bf16.xpose.msra.mxu0 %v4116_v8 }
 0x8a6   : > { %7439 = vmatprep.subr.msk.bf16.mxu0 %vm1414_vm0, %v4076_v33  ;;  %v3872_v18 = vpop.permute.xlu0 %3871 }
 0x8a7   : > { %v4062_v26 = vpop.permute.xlu1 %4061 }
 0x8a8   : > { %v4122_v21 = vsel %vm1414_vm0, %v4062_v26, 0 }
 0x8aa   : > { %v4080_v29 = vpop.permute.xlu0 %4079 }
 0x8ab   : > { %v3870_v0 = vpop.permute.xlu1 %3869 }
 0x8ac   : > { %7246 = vmatprep.subr.bf16.mxu1 %v3870_v0 }
 0x8ad   : > { %7247 = vmatpush3.bf16.msra.mxu1 %v3870_v0  ;;  %6867 = vmatpush3.bf16.xpose.msra.mxu0 %v4119_v10 }
 0x8ae   : > { %4047 = vrot.lane.b32.xlu1 %v8394_v57, %s7990_s21  ;;  %7248 = vmatprep.subr.bf16.mxu1 %v3872_v18  ;;  %v3874_v52 = vpop.permute.xlu0 %3873 }
 0x8af   : > { %7440 = vmatprep.subr.msk.bf16.mxu0 %vm1414_vm0, %v4078_v54  ;;  %v4064_v44 = vpop.permute.xlu1 %4063 }
 0x8b0   : > { %v4125_v28 = vsel %vm1414_vm0, %v4064_v44, 0 }
 0x8b1   : > { %4436 = vrot.lane.b32.xlu0 %v11468_v12, %s7990_s21  ;;  %7249 = vmatpush3.bf16.msra.mxu1 %v3872_v18 }
 0x8b2   : > { %4438 = vrot.lane.b32.xlu1 %v11536_v55, %s7990_s21  ;;  %7250 = vmatprep.subr.bf16.mxu1 %v3874_v52  ;;  %v3876_v36 = vpop.permute.xlu0 %3875 }
 0x8b3   : > { %v4066_v34 = vpop.permute.xlu1 %4065 }
 0x8b4   : > { %v4128_v19 = vsel %vm1414_vm0, %v4066_v34, 0 }
 0x8b5   : > { %7251 = vmatpush3.bf16.msra.mxu1 %v3874_v52  ;;  %6869 = vmatpush3.bf16.xpose.msra.mxu0 %v4122_v21 }
 0x8b6   : > { %7252 = vmatprep.subr.bf16.mxu1 %v3876_v36  ;;  %7441 = vmatprep.subr.msk.bf16.mxu0 %vm1414_vm0, %v4080_v29  ;;  %v4082_v57 = vpop.permute.xlu0 %4081 }
 0x8b7   : > { %v3878_v49 = vpop.permute.xlu1 %3877 }
 0x8b9   : > { %7253 = vmatpush3.bf16.msra.mxu1 %v3876_v36 }
 0x8ba   : > { %7254 = vmatprep.subr.bf16.mxu1 %v3878_v49  ;;  %v3880_v16 = vpop.permute.xlu0 %3879 }
 0x8bb   : > { %v4068_v12 = vpop.permute.xlu1 %4067 }
 0x8bc   : > { %v4131_v4 = vsel %vm1414_vm0, %v4068_v12, 0 }
 0x8bd   : > { %7255 = vmatpush3.bf16.msra.mxu1 %v3878_v49  ;;  %6871 = vmatpush3.bf16.xpose.msra.mxu0 %v4125_v28 }
 0x8be   : > { %7256 = vmatprep.subr.bf16.mxu1 %v3880_v16  ;;  %7442 = vmatprep.subr.msk.bf16.mxu0 %vm1414_vm0, %v4082_v57  ;;  %v4084_v5 = vpop.permute.xlu0 %4083 }
 0x8bf   : > { %v3882_v62 = vpop.permute.xlu1 %3881 }
 0x8c1   : > { %7257 = vmatpush3.bf16.msra.mxu1 %v3880_v16 }
 0x8c2   : > { %7258 = vmatprep.subr.bf16.mxu1 %v3882_v62  ;;  %v4038_v56 = vpop.permute.xlu0 %4037 }
 0x8c3   : > { %6876 = vmatprep.mubr.msk.bf16.mxu0 %vm1414_vm0, %v4038_v56  ;;  %v9868_v45 = vpop.permute.xlu1 %4428 }
 0x8c5   : > { %7259 = vmatpush3.bf16.msra.mxu1 %v3882_v62  ;;  %6873 = vmatpush3.bf16.xpose.msra.mxu0 %v4128_v19  ;;  %v11537_v62 = vld [vmem:[#allocation36_spill] sm:$0xff]  ;;  %v11538_v19 = vld [vmem:[#allocation34_spill] sm:$0xff] }
 0x8c6   : > { %7443 = vmatprep.subr.msk.bf16.mxu0 %vm1414_vm0, %v4084_v5  ;;  %7444 = vmatprep.subr.msk.bf16.mxu1 %vm1414_vm0, %v9868_v45  ;;  %v4040_v1 = vpop.permute.xlu0 %4039 }
 0x8c7   : > { %v9876_v47 = vpop.permute.xlu1 %4430 }
 0x8ca   : > { %v9885_v13 = vpop.permute.xlu0 %4432 }
 0x8cb   : > { %v4042_v58 = vpop.permute.xlu1 %4041 }
 0x8cd   : > { %6875 = vmatpush3.bf16.xpose.msra.mxu0 %v4131_v4 }
 0x8ce   : > { %v9887_v54 = vpop.permute.xlu0 %4434 }
 0x8cf   : > { %v4044_v51 = vpop.permute.xlu1 %4043 }
 0x8d3   : > { %v4046_v20 = vpop.permute.xlu1 %4045 }
 0x8d4   : > { %6877 = vmatmul.mubr.msk.bf16.vlgmr.msra.gmra.mrb[128].mxu0 %vm1414_vm0, %v4038_v56 }
 0x8d5   : > { %6878 = vmatprep.mubr.msk.bf16.mxu0 %vm1414_vm0, %v4040_v1 }
 0x8dc   : > { %6879 = vmatmul.mubr.msk.bf16.gmra.mrb[132].mxu0 %vm1414_vm0, %v4040_v1 }
 0x8dd   : > { %6880 = vmatprep.mubr.msk.bf16.mxu0 %vm1414_vm0, %v4042_v58 }
 0x8e4   : > { %6881 = vmatmul.mubr.msk.bf16.gmra.mrb[136].mxu0 %vm1414_vm0, %v4042_v58 }
 0x8e5   : > { %6882 = vmatprep.mubr.msk.bf16.mxu0 %vm1414_vm0, %v4044_v51 }
 0x8ec   : > { %6883 = vmatmul.mubr.msk.bf16.gmra.mrb[140].mxu0 %vm1414_vm0, %v4044_v51 }
 0x8ed   : > { %6884 = vmatprep.mubr.msk.bf16.mxu0 %vm1414_vm0, %v4046_v20 }
 0x8f4   : > { %6885 = vmatmul.mubr.msk.bf16.gmra.mrb[144].mxu0 %vm1414_vm0, %v4046_v20 }
 0x908   : > { %v3720_v33 = vpop.xlane.xlu0 %3719 }
 0x909   : > { %v3749_v8 = vsub.f32 %v9729_v41, %v3720_v33 }
 0x90b   : > { %v3767_v18 = vmul.f32 1.442695, %v3749_v8 }
 0x90c   : > { %v3716_v26 = vpop.xlane.xlu0 %3715 }
 0x90d   : > { %7728 = vpow2.f32 %v3767_v18  ;;  %v3747_v29 = vsub.f32 %v9736_v30, %v3716_v26 }
 0x90f   : > { %v3763_v0 = vmul.f32 1.442695, %v3747_v29 }
 0x910   : > { %v3722_v10 = vpop.xlane.xlu0 %3721 }
 0x911   : > { %7730 = vpow2.f32 %v3763_v0  ;;  %v3750_v52 = vsub.f32 %v9748_v22, %v3722_v10 }
 0x912   : > { %v3718_v44 = vpop.xlane.xlu1 %3717 }
 0x913   : > { %v3769_v55 = vmul.f32 1.442695, %v3750_v52  ;;  %v3748_v36 = vsub.f32 %v9754_v37, %v3718_v44 }
 0x914   : > { %v3730_v56 = vpop.xlane.xlu0 %3729 }
 0x915   : > { %7732 = vpow2.f32 %v3769_v55  ;;  %v3765_v34 = vmul.f32 1.442695, %v3748_v36  ;;  %v3754_v33 = vsub.f32 %v9762_v9, %v3730_v56 }
 0x916   : > { %v3728_v21 = vpop.xlane.xlu1 %3727 }
 0x917   : > { %v9893_v57 = vpop.eup %7728  ;;  %7734 = vpow2.f32 %v3765_v34  ;;  %v3753_v1 = vsub.f32 %v9770_v14, %v3728_v21  ;;  %v3777_v29 = vmul.f32 1.442695, %v3754_v33  ;;  %v11542_v33 = vld [vmem:[#allocation21_spill] sm:$0xff] }
 0x918   : > { %3799 = vadd.xlane.f32.xlu1 %v9893_v57  ;;  %v3726_v4 = vpop.xlane.xlu0 %3725 }
 0x919   : > { %v3775_v51 = vmul.f32 1.442695, %v3753_v1  ;;  %v3752_v8 = vsub.f32 %v9778_v59, %v3726_v4 }
 0x91a   : > { %v3724_v41 = vpop.xlane.xlu1 %3723 }
 0x91b   : > { %v9896_v49 = vpop.eup %7730  ;;  %v3751_v20 = vsub.f32 %v9786_v42, %v3724_v41  ;;  %7736 = vpow2.f32 %v3775_v51  ;;  %v3773_v10 = vmul.f32 1.442695, %v3752_v8  ;;  %v11540_v51 = vld [vmem:[#allocation42_spill] sm:$0xff]  ;;  %v11543_v8 = vld [vmem:[#allocation8_spill] sm:$0xff] }
 0x91c   : > { %3795 = vadd.xlane.f32.xlu0 %v9896_v49  ;;  %v3738_v58 = vpop.xlane.xlu0 %3737 }
 0x91d   : > { %v3771_v18 = vmul.f32 1.442695, %v3751_v20  ;;  %v3758_v0 = vsub.f32 %v9794_v60, %v3738_v58  ;;  %v11539_v58 = vld [vmem:[#allocation39_spill] sm:$0xff]  ;;  %v11541_v20 = vld [vmem:[#allocation41_spill] sm:$0xff] }
 0x91e   : > { %v3736_v30 = vpop.xlane.xlu1 %3735 }
 0x91f   : > { %v9899_v16 = vpop.eup %7732  ;;  %7738 = vpow2.f32 %v3771_v18  ;;  %v3757_v52 = vsub.f32 %v9802_v15, %v3736_v30  ;;  %v3785_v14 = vmul.f32 1.442695, %v3758_v0  ;;  %v11544_v18 = vld [vmem:[#allocation31_spill] sm:$0xff]  ;;  %v11547_v0 = vld [vmem:[#allocation26_spill] sm:$0xff] }
 0x920   : > { %3801 = vadd.xlane.f32.xlu1 %v9899_v16  ;;  %v3734_v26 = vpop.xlane.xlu0 %3733  ;;  %7740 = vpow2.f32 %v3777_v29  ;;  %v11546_v29 = vld [vmem:[#allocation40_spill] sm:$0xff] }
 0x921   : > { %v9902_v37 = vpop.eup %7734  ;;  %v3756_v55 = vsub.f32 %v9813_v11, %v3734_v26  ;;  %7742 = vpow2.f32 %v3773_v10  ;;  %v3783_v42 = vmul.f32 1.442695, %v3757_v52  ;;  %v11545_v26 = vld [vmem:[#allocation43_spill] sm:$0xff] }
 0x922   : > { %v3732_v22 = vpop.xlane.xlu1 %3731  ;;  %7744 = vpow2.f32 %v3785_v14  ;;  %v11548_v10 = vld [vmem:[#allocation35_spill] sm:$0xff] }
 0x923   : > { %v3755_v9 = vsub.f32 %v9818_v31, %v3732_v22  ;;  %v3781_v59 = vmul.f32 1.442695, %v3756_v55  ;;  %7746 = vpow2.f32 %v3783_v42 }
 0x924   : > { %3797 = vadd.xlane.f32.xlu1 %v9902_v37  ;;  %v3746_v44 = vpop.xlane.xlu0 %3745 }
 0x925   : > { %v9919_v36 = vpop.eup %7736  ;;  %v3762_v34 = vsub.f32 %v9830_v23, %v3746_v44  ;;  %v3779_v60 = vmul.f32 1.442695, %v3755_v9  ;;  %7748 = vpow2.f32 %v3781_v59 }
 0x926   : > { %v3744_v12 = vpop.xlane.xlu1 %3743 }
 0x927   : > { %v3761_v15 = vsub.f32 %v9839_v17, %v3744_v12  ;;  %v3793_v11 = vmul.f32 1.442695, %v3762_v34  ;;  %7750 = vpow2.f32 %v3779_v60 }
 0x928   : > { %v3742_v21 = vpop.xlane.xlu0 %3741 }
 0x929   : > { %v9924_v41 = vpop.eup %7738  ;;  %v3760_v30 = vsub.f32 %v9842_v3, %v3742_v21  ;;  %v3791_v31 = vmul.f32 1.442695, %v3761_v15  ;;  %7752 = vpow2.f32 %v3793_v11 }
 0x92a   : > { %v3740_v28 = vpop.xlane.xlu1 %3739  ;;  %v9929_v23 = vpop.eup %7740 }
 0x92b   : > { %v3759_v22 = vsub.f32 %v9846_v43, %v3740_v28  ;;  %7754 = vpow2.f32 %v3791_v31 }
 0x92c   : > { %v9981_v44 = vpop.permute.xlu0 %4436 }
 0x92d   : > { %v3787_v17 = vmul.f32 1.442695, %v3759_v22 }
 0x92e   : > { %v4048_v5 = vpop.permute.xlu1 %4047 }
 0x92f   : > { %6886 = vmatprep.mubr.msk.bf16.mxu0 %vm1414_vm0, %v4048_v5 }
 0x930   : > { %6887 = vmatmul.mubr.msk.bf16.gmra.mrb[148].mxu0 %vm1414_vm0, %v4048_v5  ;;  %v9931_v5 = vpop.eup %7742 }
 0x931   : > { %v9935_v12 = vpop.eup %7744 }
 0x932   : > { %4049 = vrot.lane.b32.xlu0 %v11537_v62, %s7990_s21  ;;  %v3789_v62 = vmul.f32 1.442695, %v3760_v30  ;;  %v9937_v3 = vpop.eup %7746  ;;  %v9979_v52 = vpop.permute.xlu1 %4438 }
 0x933   : > { %v9941_v43 = vpop.eup %7748 }
 0x934   : > { %7756 = vpow2.f32 %v3789_v62  ;;  %v9943_v28 = vpop.eup %7750 }
 0x935   : > { %4440 = vrot.lane.b32.xlu1 %v11538_v19, %s7990_s21  ;;  %7758 = vpow2.f32 %v3787_v17  ;;  %v9947_v56 = vpop.eup %7752 }
 0x936   : > { %v9949_v19 = vpop.eup %7754 }
 0x93e   : > { %v9953_v4 = vpop.eup %7756 }
 0x93f   : > { %v9955_v1 = vpop.eup %7758 }
 0x951   : > { %3807 = vadd.xlane.f32.xlu0 %v9919_v36 }
 0x955   : > { %3803 = vadd.xlane.f32.xlu0 %v9924_v41 }
 0x959   : > { %3809 = vadd.xlane.f32.xlu0 %v9929_v23  ;;  %3805 = vadd.xlane.f32.xlu1 %v9931_v5 }
 0x95d   : > { %3815 = vadd.xlane.f32.xlu1 %v9937_v3  ;;  %3817 = vadd.xlane.f32.xlu0 %v9935_v12 }
 0x961   : > { %3811 = vadd.xlane.f32.xlu1 %v9943_v28  ;;  %3813 = vadd.xlane.f32.xlu0 %v9941_v43 }
 0x965   : > { %3823 = vadd.xlane.f32.xlu1 %v9949_v19  ;;  %3825 = vadd.xlane.f32.xlu0 %v9947_v56 }
 0x969   : > { %3819 = vadd.xlane.f32.xlu1 %v9955_v1  ;;  %3821 = vadd.xlane.f32.xlu0 %v9953_v4 }
 0x97a   : > { %4442 = vrot.lane.b32.xlu1 %v11539_v58, %s7990_s21 }
 0x97e   : > { %4414 = vrot.lane.b32.xlu1 %v11540_v51, %s7990_s21 }
 0x97f   : > { %4051 = vrot.lane.b32.xlu0 %v11541_v20, %s7990_s21 }
 0x982   : > { %4418 = vrot.lane.b32.xlu1 %v11542_v33, %s7990_s21 }
 0x983   : > { %4412 = vrot.lane.b32.xlu0 %v11543_v8, %s7990_s21 }
 0x986   : > { %4422 = vrot.lane.b32.xlu1 %v11544_v18, %s7990_s21 }
 0x987   : > { %4416 = vrot.lane.b32.xlu0 %v11545_v26, %s7990_s21 }
 0x98a   : > { %4426 = vrot.lane.b32.xlu1 %v11546_v29, %s7990_s21 }
 0x98b   : > { %4420 = vrot.lane.b32.xlu0 %v11547_v0, %s7990_s21 }
 0x98f   : > { %4424 = vrot.lane.b32.xlu0 %v11548_v10, %s7990_s21 }
 0x9a5   : > { %v3800_v55 = vpop.xlane.xlu1 %3799 }
 0x9a7   : > { %v4191_v14 = vpop.f32.mrb[128].mxu0 }
 0x9a8   : > { %v4193_v42 = vpop.f32.mrb[129].mxu0  ;;  %4271 = vrot.lane.b32.xlu0 %v4191_v14, %s11476_s19 }
 0x9a9   : > { %v4195_v9 = vpop.f32.mrb[130].mxu0  ;;  %4274 = vrot.lane.b32.xlu1 %v4193_v42, %s11476_s19  ;;  %v3796_v59 = vpop.xlane.xlu0 %3795 }
 0x9aa   : > { %v4197_v34 = vpop.f32.mrb[131].mxu0 }
 0x9ac   : > { %4279 = vrot.lane.b32.xlu0 %v4195_v9, %s11477_s1 }
 0x9ad   : > { %v3802_v60 = vpop.xlane.xlu1 %3801  ;;  %4283 = vrot.lane.b32.xlu1 %v4197_v34, %s11477_s1  ;;  %v4050_v15 = vpop.permute.xlu0 %4049  ;;  %v4469_v34 = vsel %vm1414_vm0, %v9868_v45, 0  ;;  %v4475_v45 = vsel %vm1414_vm0, %v9885_v13, 0 }
 0x9ae   : > { %6888 = vmatprep.mubr.msk.bf16.mxu0 %vm1414_vm0, %v4050_v15  ;;  %7760 = vrcp.f32 %v3802_v60 }
 0x9af   : > { %v4201_v21 = vpop.f32.mrb[132].mxu0  ;;  %6889 = vmatmul.mubr.msk.bf16.gmra.mrb[152].mxu0 %vm1414_vm0, %v4050_v15  ;;  %7762 = vrcp.f32 %v3796_v59  ;;  %v4472_v15 = vsel %vm1414_vm0, %v9876_v47, 0 }
 0x9b0   : > { %v4203_v11 = vpop.f32.mrb[133].mxu0  ;;  %4288 = vrot.lane.b32.xlu0 %v4201_v21, %s11478_s24  ;;  %7764 = vrcp.f32 %v3800_v55  ;;  %v4478_v21 = vsel %vm1414_vm0, %v9887_v54, 0 }
 0x9b1   : > { %v4205_v30 = vpop.f32.mrb[134].mxu0  ;;  %v3798_v31 = vpop.xlane.xlu1 %3797  ;;  %4292 = vrot.lane.b32.xlu1 %v4203_v11, %s11478_s24 }
 0x9b2   : > { %7766 = vrcp.f32 %v3798_v31  ;;  %v4207_v22 = vpop.f32.mrb[135].mxu0 }
 0x9b4   : > { %4297 = vrot.lane.b32.xlu0 %v4205_v30, %s11479_s2  ;;  %v4481_v30 = vsel %vm1414_vm0, %v9981_v44, 0 }
 0x9b5   : > { %4301 = vrot.lane.b32.xlu1 %v4207_v22, %s11479_s2  ;;  %v4441_v11 = vpop.permute.xlu1 %4440 }
 0x9b7   : > { %v4211_v62 = vpop.f32.mrb[136].mxu0 }
 0x9b8   : > { %v4213_v17 = vpop.f32.mrb[137].mxu0  ;;  %4306 = vrot.lane.b32.xlu0 %v4211_v62, %s11480_s3  ;;  %v7761_v58 = vpop.eup %7760  ;;  %v4484_v62 = vsel %vm1414_vm0, %v9979_v52, 0 }
 0x9b9   : > { %v4215_v51 = vpop.f32.mrb[138].mxu0  ;;  %4310 = vrot.lane.b32.xlu1 %v4213_v17, %s11480_s3  ;;  %v7763_v20 = vpop.eup %7762  ;;  %v3846_v26 = vmul.f32 %v7761_v58, %v9899_v16 }
 0x9ba   : > { %v4217_v33 = vpop.f32.mrb[139].mxu0  ;;  %v7765_v8 = vpop.eup %7764  ;;  %v3843_v29 = vmul.f32 %v7763_v20, %v9896_v49 }
 0x9bb   : > { %v3845_v10 = vmul.f32 %v7765_v8, %v9893_v57 }
 0x9bc   : > { %v7767_v18 = vpop.eup %7766  ;;  %4315 = vrot.lane.b32.xlu0 %v4215_v51, %s11481_s4 }
 0x9bd   : > { %4319 = vrot.lane.b32.xlu1 %v4217_v33, %s11481_s4  ;;  %v3844_v0 = vmul.f32 %v7767_v18, %v9902_v37  ;;  %v3860_v9 = vpack.c.bf16 %v3846_v26, %v3845_v10  ;;  %v4487_v26 = vsel %vm1414_vm0, %v4441_v11, 0 }
 0x9bf   : > { %v4221_v14 = vpop.f32.mrb[140].mxu0  ;;  %v3859_v55 = vpack.c.bf16 %v3844_v0, %v3843_v29 }
 0x9c0   : > { %v4223_v42 = vpop.f32.mrb[141].mxu0  ;;  %4324 = vrot.lane.b32.xlu0 %v4221_v14, %s11412_s20 }
 0x9c1   : > { %v4225_v59 = vpop.f32.mrb[142].mxu0  ;;  %4328 = vrot.lane.b32.xlu1 %v4223_v42, %s11412_s20  ;;  %7260 = vmatprep.mubr.bf16.mxu1 %v3859_v55 }
 0x9c2   : > { %7261 = vmatmul.mubr.bf16.vlgmr.msra.gmra.mrb[128].mxu1 %v3860_v9  ;;  %v4227_v16 = vpop.f32.mrb[143].mxu0 }
 0x9c3   : > { %7277 = vmatpush3.bf16.xpose.msra.mxu1 %v4469_v34 }
 0x9c4   : > { %7445 = vmatprep.subr.msk.bf16.mxu1 %vm1414_vm0, %v9876_v47  ;;  %4333 = vrot.lane.b32.xlu0 %v4225_v59, %s11415_s23 }
 0x9c5   : > { %4337 = vrot.lane.b32.xlu1 %v4227_v16, %s11415_s23 }
 0x9c7   : > { %v4231_v57 = vpop.f32.mrb[144].mxu0 }
 0x9c8   : > { %v4233_v49 = vpop.f32.mrb[145].mxu0  ;;  %4342 = vrot.lane.b32.xlu0 %v4231_v57, %s11421_s29 }
 0x9c9   : > { %v4235_v37 = vpop.f32.mrb[146].mxu0  ;;  %4346 = vrot.lane.b32.xlu1 %v4233_v49, %s11421_s29 }
 0x9ca   : > { %v4237_v60 = vpop.f32.mrb[147].mxu0 }
 0x9cb   : > { %7279 = vmatpush3.bf16.xpose.msra.mxu1 %v4472_v15 }
 0x9cc   : > { %7446 = vmatprep.subr.msk.bf16.mxu1 %vm1414_vm0, %v9885_v13  ;;  %4351 = vrot.lane.b32.xlu0 %v4235_v37, %s11423_s30 }
 0x9cd   : > { %4355 = vrot.lane.b32.xlu1 %v4237_v60, %s11423_s30 }
 0x9d3   : > { %7281 = vmatpush3.bf16.xpose.msra.mxu1 %v4475_v45 }
 0x9d4   : > { %7447 = vmatprep.subr.msk.bf16.mxu1 %vm1414_vm0, %v9887_v54 }
 0x9db   : > { %7283 = vmatpush3.bf16.xpose.msra.mxu1 %v4478_v21 }
 0x9dc   : > { %7448 = vmatprep.subr.msk.bf16.mxu1 %vm1414_vm0, %v9981_v44 }
 0x9de   : > { %v3808_v47 = vpop.xlane.xlu0 %3807 }
 0x9e2   : > { %v3804_v31 = vpop.xlane.xlu0 %3803 }
 0x9e3   : > { %7285 = vmatpush3.bf16.xpose.msra.mxu1 %v4481_v30  ;;  %7768 = vrcp.f32 %v3804_v31 }
 0x9e4   : > { %7449 = vmatprep.subr.msk.bf16.mxu1 %vm1414_vm0, %v9979_v52  ;;  %7770 = vrcp.f32 %v3808_v47 }
 0x9e6   : > { %v3806_v13 = vpop.xlane.xlu1 %3805  ;;  %v3810_v22 = vpop.xlane.xlu0 %3809 }
 0x9e7   : > { %7772 = vrcp.f32 %v3806_v13 }
 0x9e8   : > { %7774 = vrcp.f32 %v3810_v22 }
 0x9ea   : > { %v3816_v54 = vpop.xlane.xlu1 %3815  ;;  %v3818_v17 = vpop.xlane.xlu0 %3817 }
 0x9eb   : > { %7287 = vmatpush3.bf16.xpose.msra.mxu1 %v4484_v62  ;;  %7776 = vrcp.f32 %v3816_v54 }
 0x9ec   : > { %7450 = vmatprep.subr.msk.bf16.mxu1 %vm1414_vm0, %v4441_v11  ;;  %7778 = vrcp.f32 %v3818_v17 }
 0x9ed   : > { %v7769_v51 = vpop.eup %7768 }
 0x9ee   : > { %v3812_v44 = vpop.xlane.xlu1 %3811  ;;  %v3814_v58 = vpop.xlane.xlu0 %3813  ;;  %v3847_v52 = vmul.f32 %v7769_v51, %v9924_v41 }
 0x9ef   : > { %7780 = vrcp.f32 %v3812_v44  ;;  %v7771_v20 = vpop.eup %7770 }
 0x9f0   : > { %7782 = vrcp.f32 %v3814_v58  ;;  %v3849_v10 = vmul.f32 %v7771_v20, %v9919_v36 }
 0x9f1   : > { %v7773_v33 = vpop.eup %7772 }
 0x9f2   : > { %v7775_v8 = vpop.eup %7774  ;;  %v3824_v18 = vpop.xlane.xlu1 %3823  ;;  %v3848_v0 = vmul.f32 %v7773_v33, %v9931_v5 }
 0x9f3   : > { %v3826_v29 = vpop.xlane.xlu0 %3825  ;;  %7289 = vmatpush3.bf16.xpose.msra.mxu1 %v4487_v26  ;;  %v3850_v14 = vmul.f32 %v7775_v8, %v9929_v23  ;;  %7784 = vrcp.f32 %v3824_v18 }
 0x9f4   : > { %v3861_v55 = vpack.c.bf16 %v3848_v0, %v3847_v52  ;;  %7786 = vrcp.f32 %v3826_v29 }
 0x9f5   : > { %v3862_v42 = vpack.c.bf16 %v3850_v14, %v3849_v10  ;;  %v7777_v9 = vpop.eup %7776 }
 0x9f6   : > { %v3820_v59 = vpop.xlane.xlu1 %3819  ;;  %7264 = vmatprep.mubr.bf16.mxu1 %v3861_v55  ;;  %v7779_v34 = vpop.eup %7778  ;;  %v3853_v23 = vmul.f32 %v7777_v9, %v9937_v3 }
 0x9f7   : > { %v3822_v16 = vpop.xlane.xlu0 %3821  ;;  %7788 = vrcp.f32 %v3820_v59  ;;  %7265 = vmatmul.mubr.bf16.gmra.mrb[132].mxu1 %v3862_v42  ;;  %v3854_v37 = vmul.f32 %v7779_v34, %v9935_v12 }
 0x9f8   : > { %7790 = vrcp.f32 %v3822_v16 }
 0x9f9   : > { %v7781_v41 = vpop.eup %7780  ;;  %v3864_v47 = vpack.c.bf16 %v3854_v37, %v3853_v23 }
 0x9fa   : > { %v7783_v57 = vpop.eup %7782  ;;  %v4443_v5 = vpop.permute.xlu1 %4442  ;;  %v3851_v36 = vmul.f32 %v7781_v41, %v9943_v28 }
 0x9fb   : > { %v4052_v49 = vpop.permute.xlu0 %4051  ;;  %7451 = vmatprep.subr.msk.bf16.mxu1 %vm1414_vm0, %v4443_v5  ;;  %v4490_v60 = vsel %vm1414_vm0, %v4443_v5, 0  ;;  %v3852_v15 = vmul.f32 %v7783_v57, %v9941_v43 }
 0x9fc   : > { %6890 = vmatprep.mubr.msk.bf16.mxu0 %vm1414_vm0, %v4052_v49  ;;  %7291 = vmatpush3.bf16.xpose.msra.mxu1 %v4490_v60 }
 0x9fd   : > { %6891 = vmatmul.mubr.msk.bf16.gmra.mrb[156].mxu0 %vm1414_vm0, %v4052_v49  ;;  %v3863_v45 = vpack.c.bf16 %v3852_v15, %v3851_v36  ;;  %v7785_v21 = vpop.eup %7784 }
 0x9fe   : > { %v7787_v11 = vpop.eup %7786  ;;  %v3857_v30 = vmul.f32 %v7785_v21, %v9949_v19 }
 0x9ff   : > { %7268 = vmatprep.mubr.bf16.mxu1 %v3863_v45  ;;  %v3858_v31 = vmul.f32 %v7787_v11, %v9947_v56  ;;  %v4413_v58 = vpop.permute.xlu0 %4412  ;;  %v4415_v56 = vpop.permute.xlu1 %4414 }
 0xa00   : > { %7269 = vmatmul.mubr.bf16.gmra.mrb[136].mxu1 %v3864_v47 }
 0xa01   : > { %v7789_v3 = vpop.eup %7788  ;;  %v3866_v44 = vpack.c.bf16 %v3858_v31, %v3857_v30  ;;  %v10128_v31 = vld [vmem:[%s8684_s17] ss:$0 sm:$0xff] }
 0xa02   : > { %v7791_v28 = vpop.eup %7790  ;;  %v3855_v12 = vmul.f32 %v7789_v3, %v9955_v1 }
 0xa03   : > { %v4241_v13 = vpop.f32.mrb[148].mxu0  ;;  %v3856_v43 = vmul.f32 %v7791_v28, %v9953_v4  ;;  %v4417_v19 = vpop.permute.xlu0 %4416 }
 0xa04   : > { %v4243_v22 = vpop.f32.mrb[149].mxu0  ;;  %4360 = vrot.lane.b32.xlu0 %v4241_v13, %s11424_s28  ;;  %v4419_v4 = vpop.permute.xlu1 %4418  ;;  %v11549_v13 = vld [vmem:[#allocation6_spill] sm:$0xff] }
 0xa05   : > { %v4245_v54 = vpop.f32.mrb[150].mxu0  ;;  %4364 = vrot.lane.b32.xlu1 %v4243_v22, %s11424_s28  ;;  %v3865_v62 = vpack.c.bf16 %v3856_v43, %v3855_v12  ;;  %s11594_s28 = sld [smem:[#allocation77_spill]] }
 0xa06   : > { %v4247_v17 = vpop.f32.mrb[151].mxu0 }
 0xa07   : > { %7272 = vmatprep.mubr.bf16.mxu1 %v3865_v62  ;;  %v4421_v1 = vpop.permute.xlu0 %4420 }
 0xa08   : > { %7273 = vmatmul.mubr.bf16.gmra.mrb[140].mxu1 %v3866_v44  ;;  %4369 = vrot.lane.b32.xlu0 %v4245_v54, %s11425_s27  ;;  %v4423_v51 = vpop.permute.xlu1 %4422  ;;  %v11550_v44 = vld [vmem:[#allocation5_spill] sm:$0xff] }
 0xa09   : > { %7292 = vmatprep.mubr.msk.bf16.mxu1 %vm1414_vm0, %v4413_v58  ;;  %4373 = vrot.lane.b32.xlu1 %v4247_v17, %s11425_s27 }
 0xa0b   : > { %v4425_v20 = vpop.permute.xlu0 %4424 }
 0xa0c   : > { %v4427_v33 = vpop.permute.xlu1 %4426 }
 0xa10   : > { %7293 = vmatmul.mubr.msk.bf16.vlgmr.msra.gmra.mrb[144].mxu1 %vm1414_vm0, %v4415_v56 }
 0xa11   : > { %7296 = vmatprep.mubr.msk.bf16.mxu1 %vm1414_vm0, %v4417_v19 }
 0xa18   : > { %7297 = vmatmul.mubr.msk.bf16.gmra.mrb[148].mxu1 %vm1414_vm0, %v4419_v4 }
 0xa19   : > { %7300 = vmatprep.mubr.msk.bf16.mxu1 %vm1414_vm0, %v4421_v1 }
 0xa1a   : > { %v4272_v9 = vpop.permute.xlu0 %4271 }
 0xa1b   : > { %v4275_v16 = vpop.permute.xlu1 %4274 }
 0xa1c   : > { %v4276_v58 = vsel %vm1610_vm1, %v4272_v9, %v4275_v16  ;;  %vm11554_vm1 = vcmp.lt.s32.totalorder %v8675_v2, %v8881_v48  ;;  %v11556_v2 = vld [vmem:[#allocation15_spill] sm:$0xff] }
 0xa1e   : > { %v4280_v23 = vpop.permute.xlu0 %4279 }
 0xa1f   : > { %v4284_v60 = vpop.permute.xlu1 %4283 }
 0xa20   : > { %7301 = vmatmul.mubr.msk.bf16.gmra.mrb[152].mxu1 %vm1414_vm0, %v4423_v51  ;;  %v4285_v46 = vsel %vm1621_vm2, %v4280_v23, %v4284_v60  ;;  %vm11555_vm2 = vmmov %vm11534_vm14 }
 0xa21   : > { %7304 = vmatprep.mubr.msk.bf16.mxu1 %vm1414_vm0, %v4425_v20 }
 0xa22   : > { %v4289_v3 = vpop.permute.xlu0 %4288 }
 0xa23   : > { %v4293_v30 = vpop.permute.xlu1 %4292 }
 0xa26   : > { %v4298_v22 = vpop.permute.xlu0 %4297 }
 0xa27   : > { %v4302_v62 = vpop.permute.xlu1 %4301 }
 0xa28   : > { %7305 = vmatmul.mubr.msk.bf16.gmra.mrb[156].mxu1 %vm1414_vm0, %v4427_v33  ;;  %vm11553_vm0 = vmmov %vm11535_vm13 }
 0xa2a   : > { %v4307_v4 = vpop.permute.xlu0 %4306 }
 0xa2b   : > { %v4311_v1 = vpop.permute.xlu1 %4310 }
 0xa82   : > { %v4251_v8 = vpop.f32.mrb[152].mxu0 }
 0xa83   : > { %4378 = vrot.lane.b32.xlu0 %v4251_v8, %s11426_s26  ;;  %v4253_v18 = vpop.f32.mrb[153].mxu0 }
 0xa84   : > { %4382 = vrot.lane.b32.xlu1 %v4253_v18, %s11426_s26  ;;  %v4255_v26 = vpop.f32.mrb[154].mxu0  ;;  %v4316_v18 = vpop.permute.xlu0 %4315 }
 0xa85   : > { %v4257_v29 = vpop.f32.mrb[155].mxu0 }
 0xa87   : > { %4387 = vrot.lane.b32.xlu0 %v4255_v26, %s11427_s25  ;;  %v4320_v26 = vpop.permute.xlu1 %4319 }
 0xa88   : > { %4391 = vrot.lane.b32.xlu1 %v4257_v29, %s11427_s25  ;;  %s11593_s25 = sshll.u32 %s11597_s22, 6 }
 0xa89   : > { %s11091_s29 = scalar_lea.vmem %s11594_s28, %s11593_s25 }
 0xa8b   : > { %v4329_v19 = vpop.permute.xlu1 %4328 }
 0xa95   : > { %v10065_v52 = vpop.f32.mrb[128].mxu1 }
 0xa96   : > { %v10067_v0 = vpop.f32.mrb[129].mxu1 }
 0xa97   : > { %v10069_v10 = vpop.f32.mrb[130].mxu1 }
 0xa98   : > { %v10073_v55 = vpop.f32.mrb[131].mxu1 }
 0xa99   : > { %v3988_v42 = vpack.c.bf16 %v10073_v55, %v10067_v0 }
 0xaca   : > { %v10077_v59 = vpop.f32.mrb[132].mxu1 }
 0xacb   : > { %v10079_v34 = vpop.f32.mrb[133].mxu1 }
 0xacc   : > { %v10081_v41 = vpop.f32.mrb[134].mxu1 }
 0xacd   : > { %v10085_v5 = vpop.f32.mrb[135].mxu1 }
 0xad0   : > { %v4261_v36 = vpop.f32.mrb[156].mxu0 }
 0xad1   : > { %4396 = vrot.lane.b32.xlu0 %v4261_v36, %s11494_s5  ;;  %v4263_v37 = vpop.f32.mrb[157].mxu0  ;;  %v4294_v36 = vsel %vm1632_vm3, %v4289_v3, %v4293_v30  ;;  %v4303_v3 = vsel %vm1643_vm4, %v4298_v22, %v4302_v62  ;;  %v4321_v62 = vsel %vm1665_vm6, %v4316_v18, %v4320_v26  ;;  %v11551_v26 = vld [vmem:[#allocation11_spill] sm:$0xff]  ;;  %vm3138_vm3 = vcmask 523520  }
 0xad2   : > { %4400 = vrot.lane.b32.xlu1 %v4263_v37, %s11494_s5  ;;  %v4265_v15 = vpop.f32.mrb[158].mxu0  ;;  %vm4028_vm4 = vcmask 785920  }
 0xad3   : > { %v4267_v45 = vpop.f32.mrb[159].mxu0  ;;  %v10091_v21 = vpop.f32.mrb[136].mxu1 }
 0xad4   : > { %v10093_v47 = vpop.f32.mrb[137].mxu1 }
 0xad5   : > { %4405 = vrot.lane.b32.xlu0 %v4265_v15, %s11495_s6  ;;  %v10096_v11 = vpop.f32.mrb[138].mxu1 }
 0xad6   : > { %4409 = vrot.lane.b32.xlu1 %v4267_v45, %s11495_s6  ;;  %v10101_v12 = vpop.f32.mrb[139].mxu1 }
 0xada   : > { %4757 = vrot.lane.b32.xlu1 %v11549_v13, %s7990_s21  ;;  %v4325_v13 = vpop.permute.xlu0 %4324 }
 0xadb   : > { %v10107_v43 = vpop.f32.mrb[140].mxu1 }
 0xadc   : > { %v10109_v54 = vpop.f32.mrb[141].mxu1 }
 0xadd   : > { %v10111_v17 = vpop.f32.mrb[142].mxu1 }
 0xade   : > { %4759 = vrot.lane.b32.xlu1 %v11550_v44, %s7990_s21  ;;  %v10117_v56 = vpop.f32.mrb[143].mxu1  ;;  %v4334_v6 = vpop.permute.xlu0 %4333 }
 0xae2   : > { %v4343_v35 = vpop.permute.xlu0 %4342 }
 0xae3   : > { %v7294_v51 = vpop.f32.mrb[144].mxu1 }
 0xae4   : > { %v4526_v20 = vpop.f32.mrb[145].mxu1  ;;  %v4535_v15 = vadd.f32 %v7294_v51, %v4294_v36  ;;  %v4338_v51 = vpop.permute.xlu1 %4337 }
 0xae5   : > { %v7295_v33 = vpop.f32.mrb[146].mxu1  ;;  %v4527_v49 = vadd.f32 %v4526_v20, %v4276_v58  ;;  %v4339_v58 = vsel %vm1687_vm8, %v4334_v6, %v4338_v51 }
 0xae6   : > { %v4529_v8 = vpop.f32.mrb[147].mxu1  ;;  %v10131_v28 = vadd.f32 %v10128_v31, %v4535_v15  ;;  %v4538_v9 = vadd.f32 %v7295_v33, %v4303_v3 }
 0xae7   : > { %v10138_v36 = vadd.f32 %v10128_v31, %v4527_v49  ;;  %v4530_v22 = vadd.f32 %v4529_v8, %v4285_v46  ;;  %v4312_v8 = vsel %vm1654_vm5, %v4307_v4, %v4311_v1  ;;  %v4352_v1 = vpop.permute.xlu0 %4351  ;;  %vm4918_vm5 = vcmask 1048320  }
 0xae8   : > { %v10145_v20 = vadd.f32 %v10128_v31, %v4538_v9  ;;  %v4347_v4 = vpop.permute.xlu1 %4346 }
 0xae9   : > { %v10161_v23 = vadd.f32 %v10128_v31, %v4530_v22  ;;  %v4348_v32 = vsel %vm1698_vm9, %v4343_v35, %v4347_v4 }
 0xaeb   : > { %v7298_v29 = vpop.f32.mrb[148].mxu1 }
 0xaec   : > { %v4542_v37 = vpop.f32.mrb[149].mxu1 }
 0xaed   : > { %v7299_v45 = vpop.f32.mrb[150].mxu1  ;;  %v4543_v53 = vadd.f32 %v4542_v37, %v4312_v8  ;;  %v4361_v37 = vpop.permute.xlu0 %4360 }
 0xaee   : > { %v4545_v44 = vpop.f32.mrb[151].mxu1  ;;  %v4554_v15 = vadd.f32 %v7299_v45, %v4339_v58  ;;  %v4330_v45 = vsel %vm1676_vm7, %v4325_v13, %v4329_v19  ;;  %v4356_v13 = vpop.permute.xlu1 %4355 }
 0xaef   : > { %v4546_v6 = vadd.f32 %v4545_v44, %v4321_v62  ;;  %v4551_v60 = vadd.f32 %v7298_v29, %v4330_v45  ;;  %v10177_v19 = vadd.f32 %v10128_v31, %v4543_v53  ;;  %v11552_v29 = vld [vmem:[#allocation10_spill] sm:$0xff]  ;;  %v4357_v46 = vsel %vm1709_vm10, %v4352_v1, %v4356_v13 }
 0xaf0   : > { %v10155_v50 = vadd.f32 %v10128_v31, %v4554_v15 }
 0xaf1   : > { %v10165_v7 = vadd.f32 %v10128_v31, %v4546_v6  ;;  %v10172_v18 = vadd.f32 %v10128_v31, %v4551_v60  ;;  %v4370_v51 = vpop.permute.xlu0 %4369 }
 0xaf2   : > { %v4365_v44 = vpop.permute.xlu1 %4364 }
 0xaf3   : > { %v7302_v57 = vpop.f32.mrb[152].mxu1  ;;  %v4366_v6 = vsel %vm1720_vm11, %v4361_v37, %v4365_v44 }
 0xaf4   : > { %4609 = vmax.xlane.f32.xlu0 %v10131_v28  ;;  %v4558_v30 = vpop.f32.mrb[153].mxu1  ;;  %v4567_v45 = vadd.f32 %v7302_v57, %v4366_v6 }
 0xaf5   : > { %v7303_v16 = vpop.f32.mrb[154].mxu1  ;;  %v4379_v60 = vpop.permute.xlu0 %4378 }
 0xaf6   : > { %v4561_v14 = vpop.f32.mrb[155].mxu1  ;;  %v4374_v9 = vpop.permute.xlu1 %4373 }
 0xaf7   : > { %v4375_v58 = vsel %vm1731_vm12, %v4370_v51, %v4374_v9  ;;  %v4562_v62 = vadd.f32 %v4561_v14, %v4357_v46  ;;  %v4559_v14 = vadd.f32 %v4558_v30, %v4348_v32 }
 0xaf8   : > { %4605 = vmax.xlane.f32.xlu0 %v10138_v36  ;;  %v4570_v15 = vadd.f32 %v7303_v16, %v4375_v58  ;;  %v10204_v16 = vadd.f32 %v10128_v31, %v4567_v45 }
 0xaf9   : > { %v10198_v38 = vadd.f32 %v10128_v31, %v4562_v62  ;;  %v4388_v27 = vpop.permute.xlu0 %4387  ;;  %v10209_v53 = vadd.f32 %v10128_v31, %v4559_v14 }
 0xafa   : > { %v10191_v22 = vadd.f32 %v10128_v31, %v4570_v15  ;;  %v4383_v8 = vpop.permute.xlu1 %4382 }
 0xafb   : > { %v7306_v49 = vpop.f32.mrb[156].mxu1  ;;  %v4384_v30 = vsel %vm11553_vm0, %v4379_v60, %v4383_v8 }
 0xafc   : > { %4611 = vmax.xlane.f32.xlu0 %v10145_v20  ;;  %v4574_v33 = vpop.f32.mrb[157].mxu1 }
 0xafd   : > { %v7307_v3 = vpop.f32.mrb[158].mxu1  ;;  %v4575_v1 = vadd.f32 %v4574_v33, %v4384_v30 }
 0xafe   : > { %v4577_v39 = vpop.f32.mrb[159].mxu1  ;;  %v4392_v57 = vpop.permute.xlu1 %4391 }
 0xaff   : > { %v10226_v40 = vadd.f32 %v10128_v31, %v4575_v1  ;;  %v4393_v61 = vsel %vm11555_vm2, %v4388_v27, %v4392_v57 }
 0xb00   : > { %4619 = vmax.xlane.f32.xlu0 %v10155_v50  ;;  %v4578_v9 = vadd.f32 %v4577_v39, %v4393_v61 }
 0xb02   : > { %4607 = vmax.xlane.f32.xlu1 %v10161_v23 }
 0xb04   : > { %4615 = vmax.xlane.f32.xlu0 %v10165_v7 }
 0xb06   : > { %4617 = vmax.xlane.f32.xlu1 %v10172_v18 }
 0xb0a   : > { %4613 = vmax.xlane.f32.xlu1 %v10177_v19 }
 0xb1a   : > { %4761 = vrot.lane.b32.xlu0 %v11551_v26, %s7990_s21 }
 0xb1b   : > { %4763 = vrot.lane.b32.xlu1 %v11552_v29, %s7990_s21 }
 0xb39   : > { %4627 = vmax.xlane.f32.xlu0 %v10191_v22 }
 0xb3d   : > { %4623 = vmax.xlane.f32.xlu0 %v10198_v38 }
 0xb3f   : > { %4625 = vmax.xlane.f32.xlu1 %v10204_v16 }
 0xb43   : > { %4621 = vmax.xlane.f32.xlu1 %v10209_v53  ;;  %v4397_v26 = vpop.permute.xlu0 %4396 }
 0xb44   : > { %v4401_v29 = vpop.permute.xlu1 %4400 }
 0xb45   : > { %v4402_v25 = vsel %vm1764_vm15, %v4397_v26, %v4401_v29 }
 0xb46   : > { %v4583_v35 = vadd.f32 %v7306_v49, %v4402_v25 }
 0xb47   : > { %v4406_v4 = vpop.permute.xlu0 %4405 }
 0xb48   : > { %v4410_v13 = vpop.permute.xlu1 %4409  ;;  %v10219_v37 = vadd.f32 %v10128_v31, %v4583_v35 }
 0xb49   : > { %v4411_v44 = vsel %vm11554_vm1, %v4406_v4, %v4410_v13 }
 0xb4a   : > { %v4586_v51 = vadd.f32 %v7307_v3, %v4411_v44  ;;  %4633 = vmax.xlane.f32.xlu1 %v10219_v37  ;;  %v10237_v3 = vadd.f32 %v10128_v31, %v4578_v9  ;;  %v11558_v9 = vld [vmem:[#allocation19_spill] sm:$0xff] }
 0xb4c   : > { %v4758_v49 = vpop.permute.xlu1 %4757  ;;  %v10232_v33 = vadd.f32 %v10128_v31, %v4586_v51 }
 0xb4d   : > { %7308 = vmatprep.subr.bf16.mxu1 %v4758_v49 }
 0xb4e   : > { %7309 = vmatpush3.bf16.msra.mxu1 %v4758_v49  ;;  %4629 = vmax.xlane.f32.xlu1 %v10226_v40  ;;  %v11557_v49 = vld [vmem:[#allocation14_spill] sm:$0xff] }
 0xb4f   : > { %4635 = vmax.xlane.f32.xlu0 %v10232_v33 }
 0xb50   : > { %v4760_v48 = vpop.permute.xlu1 %4759 }
 0xb51   : > { %7310 = vmatprep.subr.bf16.mxu1 %v4760_v48 }
 0xb52   : > { %7311 = vmatpush3.bf16.msra.mxu1 %v4760_v48  ;;  %v11559_v48 = vld [vmem:[#allocation18_spill] sm:$0xff] }
 0xb53   : > { %4631 = vmax.xlane.f32.xlu0 %v10237_v3 }
 0xb5f   : > { %4765 = vrot.lane.b32.xlu1 %v11556_v2, %s7990_s21 }
 0xb81   : > { %v4610_v24 = vpop.xlane.xlu0 %4609 }
 0xb82   : > { %v4639_v39 = vsub.f32 %v10131_v28, %v4610_v24 }
 0xb84   : > { %v4657_v58 = vmul.f32 1.442695, %v4639_v39 }
 0xb85   : > { %v4606_v15 = vpop.xlane.xlu0 %4605 }
 0xb86   : > { %7792 = vpow2.f32 %v4657_v58  ;;  %v4637_v46 = vsub.f32 %v10138_v36, %v4606_v15 }
 0xb88   : > { %v4653_v62 = vmul.f32 1.442695, %v4637_v46 }
 0xb89   : > { %v4612_v6 = vpop.xlane.xlu0 %4611 }
 0xb8a   : > { %7794 = vpow2.f32 %v4653_v62  ;;  %v4640_v31 = vsub.f32 %v10145_v20, %v4612_v6 }
 0xb8c   : > { %v4659_v45 = vmul.f32 1.442695, %v4640_v31 }
 0xb8d   : > { %v4620_v60 = vpop.xlane.xlu0 %4619 }
 0xb8e   : > { %7796 = vpow2.f32 %v4659_v45  ;;  %v4644_v4 = vsub.f32 %v10155_v50, %v4620_v60 }
 0xb8f   : > { %v4608_v8 = vpop.xlane.xlu1 %4607 }
 0xb90   : > { %v10245_v32 = vpop.eup %7792  ;;  %v4638_v14 = vsub.f32 %v10161_v23, %v4608_v8 }
 0xb91   : > { %4689 = vadd.xlane.f32.xlu0 %v10245_v32  ;;  %v4616_v28 = vpop.xlane.xlu0 %4615 }
 0xb92   : > { %v4655_v27 = vmul.f32 1.442695, %v4638_v14  ;;  %v4642_v57 = vsub.f32 %v10165_v7, %v4616_v28 }
 0xb93   : > { %v4618_v36 = vpop.xlane.xlu1 %4617 }
 0xb94   : > { %v10250_v26 = vpop.eup %7794  ;;  %7798 = vpow2.f32 %v4655_v27  ;;  %v4663_v29 = vmul.f32 1.442695, %v4642_v57  ;;  %v4643_v20 = vsub.f32 %v10172_v18, %v4618_v36  ;;  %v4667_v18 = vmul.f32 1.442695, %v4644_v4 }
 0xb95   : > { %4685 = vadd.xlane.f32.xlu0 %v10250_v26  ;;  %v4762_v25 = vpop.permute.xlu0 %4761 }
 0xb96   : > { %v4665_v35 = vmul.f32 1.442695, %v4643_v20  ;;  %7312 = vmatprep.subr.bf16.mxu1 %v4762_v25  ;;  %7800 = vpow2.f32 %v4663_v29 }
 0xb97   : > { %v4614_v23 = vpop.xlane.xlu1 %4613  ;;  %7313 = vmatpush3.bf16.msra.mxu1 %v4762_v25 }
 0xb98   : > { %v10254_v30 = vpop.eup %7796  ;;  %7802 = vpow2.f32 %v4665_v35  ;;  %v4641_v7 = vsub.f32 %v10177_v19, %v4614_v23 }
 0xb99   : > { %4691 = vadd.xlane.f32.xlu0 %v10254_v30 }
 0xb9a   : > { %v4661_v1 = vmul.f32 1.442695, %v4641_v7 }
 0xb9b   : > { %v4764_v13 = vpop.permute.xlu1 %4763 }
 0xb9c   : > { %7804 = vpow2.f32 %v4661_v1  ;;  %7314 = vmatprep.subr.bf16.mxu1 %v4764_v13 }
 0xb9d   : > { %7315 = vmatpush3.bf16.msra.mxu1 %v4764_v13  ;;  %7806 = vpow2.f32 %v4667_v18  ;;  %v11560_v13 = vld [vmem:[#allocation56_spill] sm:$0xff]  ;;  %v11561_v18 = vld [vmem:[#allocation54_spill] sm:$0xff] }
 0xb9e   : > { %v10259_v44 = vpop.eup %7798 }
 0xb9f   : > { %4687 = vadd.xlane.f32.xlu0 %v10259_v44 }
 0xba0   : > { %v10262_v51 = vpop.eup %7800 }
 0xba2   : > { %v10264_v61 = vpop.eup %7802 }
 0xba3   : > { %4697 = vadd.xlane.f32.xlu1 %v10264_v61  ;;  %4695 = vadd.xlane.f32.xlu0 %v10262_v51 }
 0xba6   : > { %v10268_v50 = vpop.eup %7804 }
 0xba7   : > { %4693 = vadd.xlane.f32.xlu1 %v10268_v50  ;;  %v10271_v19 = vpop.eup %7806 }
 0xbab   : > { %4699 = vadd.xlane.f32.xlu1 %v10271_v19 }
 0xbb9   : > { %4767 = vrot.lane.b32.xlu0 %v11557_v49, %s7990_s21  ;;  %v11562_v49 = vpack.c.bf16 %v11560_v13, %v11561_v18 }
 0xbbc   : > { %4769 = vrot.lane.b32.xlu1 %v11558_v9, %s7990_s21  ;;  %v11563_v9 = vpack.c.bf16 %v10069_v10, %v10065_v52 }
 0xbc0   : > { %4771 = vrot.lane.b32.xlu1 %v11559_v48, %s7990_s21  ;;  %v11564_v48 = vld [vmem:[#allocation63_spill] sm:$0xff] }
 0xbc6   : > { %v4628_v2 = vpop.xlane.xlu0 %4627 }
 0xbc7   : > { %v4648_v45 = vsub.f32 %v10191_v22, %v4628_v2  ;;  %v11565_v2 = vld [vmem:[#allocation61_spill] sm:$0xff] }
 0xbc9   : > { %v4675_v14 = vmul.f32 1.442695, %v4648_v45 }
 0xbca   : > { %v4624_v39 = vpop.xlane.xlu0 %4623 }
 0xbcb   : > { %v4646_v58 = vsub.f32 %v10198_v38, %v4624_v39 }
 0xbcc   : > { %v4626_v24 = vpop.xlane.xlu1 %4625 }
 0xbcd   : > { %v4647_v46 = vsub.f32 %v10204_v16, %v4626_v24  ;;  %v4671_v31 = vmul.f32 1.442695, %v4646_v58  ;;  %v11566_v24 = vpack.c.bf16 %v11564_v48, %v11565_v2 }
 0xbcf   : > { %v4673_v60 = vmul.f32 1.442695, %v4647_v46 }
 0xbd0   : > { %v4622_v15 = vpop.xlane.xlu1 %4621 }
 0xbd1   : > { %v4645_v62 = vsub.f32 %v10209_v53, %v4622_v15 }
 0xbd3   : > { %v4669_v6 = vmul.f32 1.442695, %v4645_v62 }
 0xbd5   : > { %7808 = vpow2.f32 %v4669_v6 }
 0xbd6   : > { %7810 = vpow2.f32 %v4671_v31 }
 0xbd7   : > { %v4634_v8 = vpop.xlane.xlu1 %4633  ;;  %7812 = vpow2.f32 %v4673_v60 }
 0xbd8   : > { %v4651_v27 = vsub.f32 %v10219_v37, %v4634_v8  ;;  %7814 = vpow2.f32 %v4675_v14 }
 0xbda   : > { %v4681_v29 = vmul.f32 1.442695, %v4651_v27 }
 0xbdb   : > { %v4630_v28 = vpop.xlane.xlu1 %4629 }
 0xbdc   : > { %v4649_v38 = vsub.f32 %v10226_v40, %v4630_v28  ;;  %v4636_v57 = vpop.xlane.xlu0 %4635 }
 0xbdd   : > { %v4652_v20 = vsub.f32 %v10232_v33, %v4636_v57 }
 0xbde   : > { %v4677_v16 = vmul.f32 1.442695, %v4649_v38 }
 0xbdf   : > { %v10286_v36 = vpop.eup %7808  ;;  %v4766_v53 = vpop.permute.xlu1 %4765  ;;  %v4683_v23 = vmul.f32 1.442695, %v4652_v20 }
 0xbe0   : > { %7816 = vpow2.f32 %v4677_v16  ;;  %v4632_v22 = vpop.xlane.xlu0 %4631  ;;  %4701 = vadd.xlane.f32.xlu0 %v10286_v36  ;;  %7316 = vmatprep.subr.bf16.mxu1 %v4766_v53  ;;  %v10291_v37 = vpop.eup %7810 }
 0xbe1   : > { %v4650_v25 = vsub.f32 %v10237_v3, %v4632_v22  ;;  %7317 = vmatpush3.bf16.msra.mxu1 %v4766_v53  ;;  %v10293_v40 = vpop.eup %7812  ;;  %7818 = vpow2.f32 %v4681_v29 }
 0xbe2   : > { %v10297_v4 = vpop.eup %7814 }
 0xbe3   : > { %v4679_v35 = vmul.f32 1.442695, %v4650_v25 }
 0xbe4   : > { %4705 = vadd.xlane.f32.xlu0 %v10293_v40  ;;  %4703 = vadd.xlane.f32.xlu1 %v10291_v37 }
 0xbe5   : > { %7820 = vpow2.f32 %v4679_v35 }
 0xbe6   : > { %7822 = vpow2.f32 %v4683_v23 }
 0xbe8   : > { %4707 = vadd.xlane.f32.xlu0 %v10297_v4 }
 0xbea   : > { %v10300_v33 = vpop.eup %7816 }
 0xbeb   : > { %4709 = vadd.xlane.f32.xlu1 %v10300_v33  ;;  %v10303_v3 = vpop.eup %7818 }
 0xbef   : > { %v10305_v7 = vpop.eup %7820  ;;  %4713 = vadd.xlane.f32.xlu1 %v10303_v3 }
 0xbf0   : > { %4711 = vadd.xlane.f32.xlu0 %v10305_v7  ;;  %v10309_v1 = vpop.eup %7822 }
 0xbf4   : > { %4715 = vadd.xlane.f32.xlu0 %v10309_v1 }
 0xc00   : > { %3114 = vrot.lane.b32.xlu1 %v11562_v49, %s7990_s21 }
 0xc04   : > { %4004 = vrot.lane.b32.xlu1 %v3988_v42, %s11502_s16 }
 0xc08   : > { %4006 = vrot.lane.b32.xlu1 %v11563_v9, %s11502_s16 }
 0xc0a   : > { %3116 = vrot.lane.b32.xlu0 %v11566_v24, %s7990_s21 }
 0xc1e   : > { %v4690_v39 = vpop.xlane.xlu0 %4689 }
 0xc22   : > { %v4686_v58 = vpop.xlane.xlu0 %4685 }
 0xc23   : > { %7824 = vrcp.f32 %v4686_v58 }
 0xc26   : > { %v4692_v15 = vpop.xlane.xlu0 %4691 }
 0xc2c   : > { %v4688_v46 = vpop.xlane.xlu0 %4687 }
 0xc2d   : > { %7826 = vrcp.f32 %v4688_v46  ;;  %v7825_v52 = vpop.eup %7824 }
 0xc2e   : > { %7828 = vrcp.f32 %v4692_v15  ;;  %v4733_v31 = vmul.f32 %v7825_v52, %v10250_v26 }
 0xc2f   : > { %7830 = vrcp.f32 %v4690_v39 }
 0xc30   : > { %v4698_v62 = vpop.xlane.xlu1 %4697  ;;  %v4696_v6 = vpop.xlane.xlu0 %4695 }
 0xc31   : > { %7832 = vrcp.f32 %v4696_v6 }
 0xc34   : > { %v4694_v0 = vpop.xlane.xlu1 %4693  ;;  %v4768_v55 = vpop.permute.xlu0 %4767 }
 0xc35   : > { %7834 = vrcp.f32 %v4694_v0  ;;  %7318 = vmatprep.subr.bf16.mxu1 %v4768_v55 }
 0xc36   : > { %7319 = vmatpush3.bf16.msra.mxu1 %v4768_v55 }
 0xc37   : > { %v7827_v10 = vpop.eup %7826 }
 0xc38   : > { %v4700_v42 = vpop.xlane.xlu1 %4699  ;;  %v4734_v45 = vmul.f32 %v7827_v10, %v10259_v44  ;;  %v7829_v8 = vpop.eup %7828 }
 0xc39   : > { %7836 = vrcp.f32 %v4700_v42  ;;  %v7831_v28 = vpop.eup %7830  ;;  %v4736_v57 = vmul.f32 %v7829_v8, %v10254_v30 }
 0xc3a   : > { %v4749_v60 = vpack.c.bf16 %v4734_v45, %v4733_v31  ;;  %7838 = vrcp.f32 %v4698_v62  ;;  %v4735_v26 = vmul.f32 %v7831_v28, %v10245_v32  ;;  %v11567_v28 = vmov 0  }
 0xc3b   : > { %v7833_v27 = vpop.eup %7832 }
 0xc3c   : > { %v4770_v14 = vpop.permute.xlu1 %4769  ;;  %7324 = vmatprep.mubr.bf16.mxu1 %v4749_v60  ;;  %v4738_v44 = vmul.f32 %v7833_v27, %v10262_v51  ;;  %v4750_v29 = vpack.c.bf16 %v4736_v57, %v4735_v26  ;;  %v7544_v27 = vld [vmem:[%s11153_s7] sm:$0xff]   ;;  %v7550_v57 = vld [vmem:[%s11153_s7 + $0x30] sm:$0xff]  }
 0xc3d   : > { %7320 = vmatprep.subr.bf16.mxu1 %v4770_v14  ;;  %7340 = vmatprep.subr.bf16.mxu0 %v7544_v27 }
 0xc3e   : > { %7321 = vmatpush3.bf16.msra.mxu1 %v4770_v14  ;;  %7341 = vmatpush3.bf16.msra.mxu0 %v7544_v27 }
 0xc3f   : > { %v7835_v38 = vpop.eup %7834 }
 0xc40   : > { %v4772_v16 = vpop.permute.xlu1 %4771  ;;  %v4737_v53 = vmul.f32 %v7835_v38, %v10268_v50  ;;  %v7549_v38 = vld [vmem:[%s11153_s7 + $0x28] sm:$0xff]  }
 0xc41   : > { %7322 = vmatprep.subr.bf16.mxu1 %v4772_v16 }
 0xc42   : > { %7323 = vmatpush3.bf16.msra.mxu1 %v4772_v16  ;;  %v4751_v20 = vpack.c.bf16 %v4738_v44, %v4737_v53  ;;  %v7551_v16 = vld [vmem:[%s11153_s7 + $0x38] sm:$0xff]  }
 0xc43   : > { %v7837_v22 = vpop.eup %7836 }
 0xc44   : > { %v7839_v25 = vpop.eup %7838  ;;  %v4740_v35 = vmul.f32 %v7837_v22, %v10271_v19 }
 0xc45   : > { %7325 = vmatmul.mubr.bf16.vlgmr.msra.gmra.mrb[160].mxu1 %v4750_v29  ;;  %v4739_v23 = vmul.f32 %v7839_v25, %v10264_v61 }
 0xc46   : > { %7328 = vmatprep.mubr.bf16.mxu1 %v4751_v20 }
 0xc47   : > { %v4752_v30 = vpack.c.bf16 %v4740_v35, %v4739_v23  ;;  %v11568_v35 = vld [vmem:[#allocation58_spill] sm:$0xff]  ;;  %v11569_v23 = vld [vmem:[#allocation52_spill] sm:$0xff] }
 0xc4d   : > { %7329 = vmatmul.mubr.bf16.gmra.mrb[164].mxu1 %v4752_v30  ;;  %v11570_v30 = vpack.c.bf16 %v11568_v35, %v11569_v23 }
 0xc6d   : > { %v4702_v13 = vpop.xlane.xlu0 %4701 }
 0xc6e   : > { %7840 = vrcp.f32 %v4702_v13 }
 0xc71   : > { %v4704_v50 = vpop.xlane.xlu1 %4703  ;;  %v4706_v32 = vpop.xlane.xlu0 %4705 }
 0xc72   : > { %7842 = vrcp.f32 %v4704_v50  ;;  %v11571_v50 = vld [vmem:[#allocation67_spill] sm:$0xff] }
 0xc73   : > { %7844 = vrcp.f32 %v4706_v32  ;;  %v11572_v32 = vld [vmem:[#allocation65_spill] sm:$0xff] }
 0xc75   : > { %v4708_v18 = vpop.xlane.xlu0 %4707 }
 0xc76   : > { %7846 = vrcp.f32 %v4708_v18  ;;  %v11573_v18 = vpack.c.bf16 %v11571_v50, %v11572_v32 }
 0xc78   : > { %v4710_v51 = vpop.xlane.xlu1 %4709  ;;  %v7841_v49 = vpop.eup %7840 }
 0xc79   : > { %7848 = vrcp.f32 %v4710_v51  ;;  %v4741_v19 = vmul.f32 %v7841_v49, %v10286_v36 }
 0xc7c   : > { %v7843_v9 = vpop.eup %7842  ;;  %v4714_v48 = vpop.xlane.xlu1 %4713 }
 0xc7d   : > { %v4712_v2 = vpop.xlane.xlu0 %4711  ;;  %v4742_v61 = vmul.f32 %v7843_v9, %v10291_v37  ;;  %v7845_v24 = vpop.eup %7844 }
 0xc7e   : > { %7850 = vrcp.f32 %v4712_v2  ;;  %v4743_v62 = vmul.f32 %v7845_v24, %v10293_v40  ;;  %v11574_v2 = vpack.c.bf16 %v10081_v41, %v10077_v59  ;;  %v11577_v24 = vld [vmem:[#allocation59_spill] sm:$0xff]  ;;  %v11582_v59 = vpack.c.bf16 %v10096_v11, %v10091_v21  ;;  %v11587_v11 = vld [vmem:[#allocation68_spill] sm:$0xff] }
 0xc7f   : > { %v4753_v39 = vpack.c.bf16 %v4742_v61, %v4741_v19  ;;  %7852 = vrcp.f32 %v4714_v48  ;;  %v11575_v19 = vpack.c.bf16 %v10085_v5, %v10079_v34  ;;  %v11576_v61 = vld [vmem:[#allocation62_spill] sm:$0xff]  ;;  %v11583_v34 = vpack.c.bf16 %v10101_v12, %v10093_v47 }
 0xc80   : > { %v7847_v58 = vpop.eup %7846  ;;  %v3115_v15 = vpop.permute.xlu1 %3114 }
 0xc81   : > { %3139 = vst.msk [vmem:[#allocation2] sm:$0xff] %vm3138_vm3, %v3115_v15  ;;  %v4716_v46 = vpop.xlane.xlu0 %4715  ;;  %7332 = vmatprep.mubr.bf16.mxu1 %v4753_v39  ;;  %v4744_v6 = vmul.f32 %v7847_v58, %v10297_v4  ;;  %v11578_v39 = vpack.c.bf16 %v11576_v61, %v11577_v24  ;;  %v11579_v58 = vld [vmem:[#allocation64_spill] sm:$0xff] }
 0xc82   : > { %7854 = vrcp.f32 %v4716_v46  ;;  %v11580_v15 = vld [vmem:[#allocation60_spill] sm:$0xff] }
 0xc83   : > { %v4754_v36 = vpack.c.bf16 %v4744_v6, %v4743_v62  ;;  %v7849_v55 = vpop.eup %7848  ;;  %v11581_v46 = vpack.c.bf16 %v11579_v58, %v11580_v15 }
 0xc84   : > { %v4005_v0 = vpop.permute.xlu1 %4004  ;;  %v4745_v42 = vmul.f32 %v7849_v55, %v10300_v33  ;;  %v7545_v33 = vld [vmem:[%s11153_s7 + $0x8] sm:$0xff]   ;;  %v11585_v55 = vld [vmem:[#allocation66_spill] sm:$0xff] }
 0xc85   : > { %4029 = vst.msk [vmem:[#allocation2] sm:$0xff] %vm4028_vm4, %v4005_v0  ;;  %v3117_v37 = vpop.permute.xlu0 %3116  ;;  %7333 = vmatmul.mubr.bf16.gmra.mrb[168].mxu1 %v4754_v36  ;;  %7342 = vmatprep.subr.bf16.mxu0 %v7545_v33 }
 0xc86   : > { %3140 = vst.msk [vmem:[#allocation2 + $0x8] sm:$0xff] %vm3138_vm3, %v3117_v37  ;;  %7343 = vmatpush3.bf16.msra.mxu0 %v7545_v33  ;;  %v11584_v37 = vld [vmem:[#allocation53_spill] sm:$0xff] }
 0xc87   : > { %v11586_v21 = vpack.c.bf16 %v11584_v37, %v11585_v55 }
 0xc88   : > { %v7851_v52 = vpop.eup %7850  ;;  %v4007_v10 = vpop.permute.xlu1 %4006 }
 0xc89   : > { %4030 = vst.msk [vmem:[#allocation2 + $0x8] sm:$0xff] %vm4028_vm4, %v4007_v10  ;;  %v4746_v40 = vmul.f32 %v7851_v52, %v10305_v7  ;;  %v7853_v4 = vpop.eup %7852  ;;  %v7547_v7 = vld [vmem:[%s11153_s7 + $0x18] sm:$0xff]   ;;  %v11588_v52 = vld [vmem:[#allocation57_spill] sm:$0xff] }
 0xc8a   : > { %v4747_v60 = vmul.f32 %v7853_v4, %v10303_v3  ;;  %v7546_v3 = vld [vmem:[%s11153_s7 + $0x10] sm:$0xff]   ;;  %v11589_v47 = vpack.c.bf16 %v11587_v11, %v11588_v52  ;;  %v11591_v4 = vpack.c.bf16 %v10117_v56, %v10109_v54 }
 0xc8b   : > { %v4755_v31 = vpack.c.bf16 %v4746_v40, %v4745_v42  ;;  %7344 = vmatprep.subr.bf16.mxu0 %v7546_v3  ;;  %v11590_v42 = vpack.c.bf16 %v10111_v17, %v10107_v43 }
 0xc8c   : > { %v7855_v45 = vpop.eup %7854  ;;  %7345 = vmatpush3.bf16.msra.mxu0 %v7546_v3 }
 0xc8d   : > { %7336 = vmatprep.mubr.bf16.mxu1 %v4755_v31  ;;  %v4748_v8 = vmul.f32 %v7855_v45, %v10309_v1  ;;  %7346 = vmatprep.subr.bf16.mxu0 %v7547_v7  ;;  %v7548_v1 = vld [vmem:[%s11153_s7 + $0x20] sm:$0xff]  }
 0xc8f   : > { %v4756_v14 = vpack.c.bf16 %v4748_v8, %v4747_v60 }
 0xc90   : > { %7347 = vmatpush3.bf16.msra.mxu0 %v7547_v7 }
 0xc91   : > { %7337 = vmatmul.mubr.bf16.gmra.mrb[172].mxu1 %v4756_v14  ;;  %7348 = vmatprep.subr.bf16.mxu0 %v7548_v1 }
 0xc92   : > { %5471 = vmatprep.mubr.bf16.mxu1 %v11567_v28 }
 0xc94   : > { %7349 = vmatpush3.bf16.msra.mxu0 %v7548_v1 }
 0xc95   : > { %7350 = vmatprep.subr.bf16.mxu0 %v7549_v38 }
 0xc98   : > { %7351 = vmatpush3.bf16.msra.mxu0 %v7549_v38 }
 0xc99   : > { %7352 = vmatprep.subr.bf16.mxu0 %v7550_v57 }
 0xc9c   : > { %7353 = vmatpush3.bf16.msra.mxu0 %v7550_v57 }
 0xc9d   : > { %7354 = vmatprep.subr.bf16.mxu0 %v7551_v16 }
 0xca0   : > { %7355 = vmatpush3.bf16.msra.mxu0 %v7551_v16 }
 0xd18   : > { %v7326_v53 = vpop.f32.mrb[160].mxu1 }
 0xd19   : > { %v4815_v26 = vpop.f32.mrb[161].mxu1 }
 0xd1a   : > { %v7327_v44 = vpop.f32.mrb[162].mxu1 }
 0xd1b   : > { %v4879_v29 = vpack.c.bf16 %v7327_v44, %v7326_v53  ;;  %v4818_v22 = vpop.f32.mrb[163].mxu1 }
 0xd1c   : > { %v4878_v20 = vpack.c.bf16 %v4818_v22, %v4815_v26 }
 0xd1d   : > { %4896 = vrot.lane.b32.xlu1 %v4879_v29, %s11434_s18 }
 0xd1e   : > { %4894 = vrot.lane.b32.xlu0 %v4878_v20, %s11434_s18 }
 0xd20   : > { %v7330_v25 = vpop.f32.mrb[164].mxu1 }
 0xd21   : > { %3120 = vrot.lane.b32.xlu1 %v11570_v30, %s7990_s21  ;;  %v4831_v13 = vpop.f32.mrb[165].mxu1 }
 0xd22   : > { %3118 = vrot.lane.b32.xlu0 %v11573_v18, %s7990_s21  ;;  %v7331_v51 = vpop.f32.mrb[166].mxu1 }
 0xd23   : > { %v4881_v49 = vpack.c.bf16 %v7331_v51, %v7330_v25  ;;  %v4834_v9 = vpop.f32.mrb[167].mxu1  ;;  %v7955_v51 = vld [vmem:[%s8138_s0] sm:$0xff]  }
 0xd24   : > { %v4880_v48 = vpack.c.bf16 %v4834_v9, %v4831_v13 }
 0xd25   : > { %4010 = vrot.lane.b32.xlu1 %v11574_v2, %s11502_s16 }
 0xd26   : > { %4008 = vrot.lane.b32.xlu0 %v11575_v19, %s11502_s16  ;;  %v7956_v19 = vld [vmem:[%s8138_s0 + $0x8] sm:$0xff]  }
 0xd27   : > { %v4953_v61 = vunpack.c.l.bf16 %v7956_v19 }
 0xd29   : > { %4900 = vrot.lane.b32.xlu1 %v4881_v49, %s11434_s18  ;;  %v4951_v49 = vunpack.c.l.bf16 %v7955_v51 }
 0xd2a   : > { %4898 = vrot.lane.b32.xlu0 %v4880_v48, %s11434_s18  ;;  %v4952_v48 = vunpack.c.h.bf16 %v7955_v51 }
 0xd2d   : > { %3124 = vrot.lane.b32.xlu1 %v11578_v39, %s7990_s21 }
 0xd2e   : > { %3122 = vrot.lane.b32.xlu0 %v11581_v46, %s7990_s21 }
 0xd31   : > { %4014 = vrot.lane.b32.xlu1 %v11582_v59, %s11502_s16  ;;  %v4954_v59 = vunpack.c.h.bf16 %v7956_v19 }
 0xd32   : > { %4012 = vrot.lane.b32.xlu0 %v11583_v34, %s11502_s16 }
 0xd58   : > { %v7334_v41 = vpop.f32.mrb[168].mxu1 }
 0xd59   : > { %v4847_v5 = vpop.f32.mrb[169].mxu1 }
 0xd5a   : > { %v7335_v62 = vpop.f32.mrb[170].mxu1 }
 0xd5b   : > { %v4883_v6 = vpack.c.bf16 %v7335_v62, %v7334_v41  ;;  %v4850_v36 = vpop.f32.mrb[171].mxu1  ;;  %v7957_v41 = vld [vmem:[%s8138_s0 + $0x10] sm:$0xff]  }
 0xd5c   : > { %v4882_v0 = vpack.c.bf16 %v4850_v36, %v4847_v5  ;;  %v4955_v5 = vunpack.c.l.bf16 %v7957_v41 }
 0xd5d   : > { %4904 = vrot.lane.b32.xlu1 %v4883_v6, %s11434_s18  ;;  %v4956_v6 = vunpack.c.h.bf16 %v7957_v41 }
 0xd5e   : > { %4902 = vrot.lane.b32.xlu0 %v4882_v0, %s11434_s18  ;;  %v7958_v0 = vld [vmem:[%s8138_s0 + $0x18] sm:$0xff]  }
 0xd5f   : > { %v4957_v37 = vunpack.c.l.bf16 %v7958_v0  ;;  %v4958_v52 = vunpack.c.h.bf16 %v7958_v0 }
 0xd61   : > { %3128 = vrot.lane.b32.xlu1 %v11586_v21, %s7990_s21 }
 0xd62   : > { %3126 = vrot.lane.b32.xlu0 %v11589_v47, %s7990_s21 }
 0xd64   : > { %v7338_v12 = vpop.f32.mrb[172].mxu1 }
 0xd65   : > { %v4863_v10 = vpop.f32.mrb[173].mxu1  ;;  %4018 = vrot.lane.b32.xlu1 %v11590_v42, %s11502_s16  ;;  %v7959_v42 = vld [vmem:[%s8138_s0 + $0x20] sm:$0xff]  }
 0xd66   : > { %v7339_v40 = vpop.f32.mrb[174].mxu1  ;;  %4016 = vrot.lane.b32.xlu0 %v11591_v4, %s11502_s16 }
 0xd67   : > { %v4885_v31 = vpack.c.bf16 %v7339_v40, %v7338_v12  ;;  %v4866_v45 = vpop.f32.mrb[175].mxu1  ;;  %v4959_v40 = vunpack.c.l.bf16 %v7959_v42 }
 0xd68   : > { %v4884_v60 = vpack.c.bf16 %v4866_v45, %v4863_v10 }
 0xd69   : > { %4908 = vrot.lane.b32.xlu1 %v4885_v31, %s11434_s18  ;;  %v4960_v31 = vunpack.c.h.bf16 %v7959_v42 }
 0xd6a   : > { %4906 = vrot.lane.b32.xlu0 %v4884_v60, %s11434_s18  ;;  %v7960_v60 = vld [vmem:[%s8138_s0 + $0x28] sm:$0xff]  }
 0xd8f   : > { %v4897_v8 = vpop.permute.xlu1 %4896 }
 0xd90   : > { %4920 = vst.msk [vmem:[#allocation2 + $0x8] sm:$0xff] %vm4918_vm5, %v4897_v8  ;;  %v4895_v14 = vpop.permute.xlu0 %4894  ;;  %v4961_v8 = vunpack.c.l.bf16 %v7960_v60 }
 0xd91   : > { %4919 = vst.msk [vmem:[#allocation2] sm:$0xff] %vm4918_vm5, %v4895_v14 }
 0xd93   : > { %v3121_v43 = vpop.permute.xlu1 %3120 }
 0xd94   : > { %3142 = vst.msk [vmem:[#allocation2 + $0x18] sm:$0xff] %vm3138_vm3, %v3121_v43  ;;  %v3119_v17 = vpop.permute.xlu0 %3118 }
 0xd95   : > { %3141 = vst.msk [vmem:[#allocation2 + $0x10] sm:$0xff] %vm3138_vm3, %v3119_v17 }
 0xd97   : > { %v4011_v54 = vpop.permute.xlu1 %4010  ;;  %v4928_v33 = vld [vmem:[#allocation2 + $0x8] sm:$0xff] }
 0xd98   : > { %4032 = vst.msk [vmem:[#allocation2 + $0x18] sm:$0xff] %vm4028_vm4, %v4011_v54  ;;  %v4009_v56 = vpop.permute.xlu0 %4008  ;;  %v4927_v27 = vld [vmem:[#allocation2] sm:$0xff]  ;;  %v4962_v54 = vunpack.c.h.bf16 %v7960_v60  ;;  %v7561_v60 = vld [vmem:[%s11156_s10 + $0x30] ss:$8 sps:$4 sm:$0xff]  }
 0xd99   : > { %4031 = vst.msk [vmem:[#allocation2 + $0x10] sm:$0xff] %vm4028_vm4, %v4009_v56  ;;  %7356 = vmatprep.mubr.bf16.mxu0 %v4927_v27 }
 0xd9a   : > { %7357 = vmatmul.mubr.bf16.vlgmr.msra.gmra.mrb[160].mxu0 %v4928_v33 }
 0xd9b   : > { %v4901_v3 = vpop.permute.xlu1 %4900 }
 0xd9c   : > { %4922 = vst.msk [vmem:[#allocation2 + $0x18] sm:$0xff] %vm4918_vm5, %v4901_v3  ;;  %v4899_v7 = vpop.permute.xlu0 %4898  ;;  %v7961_v3 = vld [vmem:[%s8138_s0 + $0x30] sm:$0xff]  }
 0xd9d   : > { %4921 = vst.msk [vmem:[#allocation2 + $0x10] sm:$0xff] %vm4918_vm5, %v4899_v7  ;;  %v4963_v7 = vunpack.c.l.bf16 %v7961_v3 }
 0xd9f   : > { %v3125_v1 = vpop.permute.xlu1 %3124 }
 0xda0   : > { %3144 = vst.msk [vmem:[#allocation2 + $0x28] sm:$0xff] %vm3138_vm3, %v3125_v1  ;;  %v3123_v38 = vpop.permute.xlu0 %3122 }
 0xda1   : > { %3143 = vst.msk [vmem:[#allocation2 + $0x20] sm:$0xff] %vm3138_vm3, %v3123_v38  ;;  %v4964_v38 = vunpack.c.h.bf16 %v7961_v3  ;;  %v7572_v3 = vld [vmem:[%s11156_s10 + $0x64] ss:$8 sps:$4 sm:$0xff]  }
 0xda3   : > { %v4015_v57 = vpop.permute.xlu1 %4014  ;;  %v4930_v26 = vld [vmem:[#allocation2 + $0x18] sm:$0xff] }
 0xda4   : > { %4034 = vst.msk [vmem:[#allocation2 + $0x28] sm:$0xff] %vm4028_vm4, %v4015_v57  ;;  %v4013_v16 = vpop.permute.xlu0 %4012  ;;  %v4929_v53 = vld [vmem:[#allocation2 + $0x10] sm:$0xff] }
 0xda5   : > { %4033 = vst.msk [vmem:[#allocation2 + $0x20] sm:$0xff] %vm4028_vm4, %v4013_v16  ;;  %7360 = vmatprep.mubr.bf16.mxu0 %v4929_v53  ;;  %v7962_v16 = vld [vmem:[%s8138_s0 + $0x38] sm:$0xff]  }
 0xda6   : > { %7361 = vmatmul.mubr.bf16.gmra.mrb[164].mxu0 %v4930_v26  ;;  %v4965_v53 = vunpack.c.l.bf16 %v7962_v16 }
 0xdcf   : > { %v4905_v44 = vpop.permute.xlu1 %4904 }
 0xdd0   : > { %4924 = vst.msk [vmem:[#allocation2 + $0x28] sm:$0xff] %vm4918_vm5, %v4905_v44  ;;  %v4903_v29 = vpop.permute.xlu0 %4902 }
 0xdd1   : > { %4923 = vst.msk [vmem:[#allocation2 + $0x20] sm:$0xff] %vm4918_vm5, %v4903_v29 }
 0xdd3   : > { %v3129_v22 = vpop.permute.xlu1 %3128 }
 0xdd4   : > { %3146 = vst.msk [vmem:[#allocation2 + $0x38] sm:$0xff] %vm3138_vm3, %v3129_v22  ;;  %v3127_v20 = vpop.permute.xlu0 %3126  ;;  %v4966_v22 = vunpack.c.h.bf16 %v7962_v16 }
 0xdd5   : > { %3145 = vst.msk [vmem:[#allocation2 + $0x30] sm:$0xff] %vm3138_vm3, %v3127_v20 }
 0xdd7   : > { %v4019_v25 = vpop.permute.xlu1 %4018  ;;  %v4932_v30 = vld [vmem:[#allocation2 + $0x28] sm:$0xff] }
 0xdd8   : > { %4036 = vst.msk [vmem:[#allocation2 + $0x38] sm:$0xff] %vm4028_vm4, %v4019_v25  ;;  %v4017_v35 = vpop.permute.xlu0 %4016  ;;  %v4931_v23 = vld [vmem:[#allocation2 + $0x20] sm:$0xff] }
 0xdd9   : > { %4035 = vst.msk [vmem:[#allocation2 + $0x30] sm:$0xff] %vm4028_vm4, %v4017_v35  ;;  %7364 = vmatprep.mubr.bf16.mxu0 %v4931_v23  ;;  %v7552_v23 = vld [vmem:[%s11156_s10] ss:$8 sps:$4 sm:$0xff]  }
 0xdda   : > { %7365 = vmatmul.mubr.bf16.gmra.mrb[168].mxu0 %v4932_v30  ;;  %v7554_v30 = vld [vmem:[%s11156_s10 + $0x4] ss:$8 sps:$4 sm:$0xff]  }
 0xddb   : > { %v4909_v13 = vpop.permute.xlu1 %4908  ;;  %5439 = vmatprep.subr.bf16.mxu1 %v7554_v30 }
 0xddc   : > { %4926 = vst.msk [vmem:[#allocation2 + $0x38] sm:$0xff] %vm4918_vm5, %v4909_v13  ;;  %v4907_v50 = vpop.permute.xlu0 %4906  ;;  %v7557_v13 = vld [vmem:[%s11156_s10 + $0x14] ss:$8 sps:$4 sm:$0xff]   ;;  %5440 = vmatpush1.bf16.msra.mxu1 %v7552_v23 }
 0xddd   : > { %4925 = vst.msk [vmem:[#allocation2 + $0x30] sm:$0xff] %vm4918_vm5, %v4907_v50  ;;  %v7555_v50 = vld [vmem:[%s11156_s10 + $0x10] ss:$8 sps:$4 sm:$0xff]   ;;  %5441 = vmatprep.subr.bf16.mxu1 %v7557_v13 }
 0xde0   : > { %5442 = vmatpush1.bf16.msra.mxu1 %v7555_v50 }
 0xde3   : > { %v4934_v18 = vld [vmem:[#allocation2 + $0x38] sm:$0xff] }
 0xde4   : > { %v4933_v32 = vld [vmem:[#allocation2 + $0x30] sm:$0xff] }
 0xde5   : > { %7368 = vmatprep.mubr.bf16.mxu0 %v4933_v32 }
 0xde6   : > { %7369 = vmatmul.mubr.bf16.gmra.mrb[172].mxu0 %v4934_v18 }
 0xe6d   : > { %v7358_v9 = vpop.f32.mrb[160].mxu0 }
 0xe6e   : > { %v5049_v2 = vpop.f32.mrb[161].mxu0  ;;  %v10456_v46 = vadd.f32 %v7358_v9, %v4953_v61 }
 0xe6f   : > { %v10451_v24 = vadd.f32 %v5049_v2, %v4951_v49  ;;  %v7359_v39 = vpop.f32.mrb[162].mxu0 }
 0xe70   : > { %v5052_v58 = vpop.f32.mrb[163].mxu0  ;;  %v10460_v34 = vadd.f32 %v7359_v39, %v4954_v59 }
 0xe71   : > { %v10453_v15 = vadd.f32 %v5052_v58, %v4952_v48  ;;  %5114 = vadd.xlane.f32.xlu0 %v10451_v24 }
 0xe73   : > { %5116 = vadd.xlane.f32.xlu1 %v10453_v15 }
 0xe75   : > { %5118 = vadd.xlane.f32.xlu0 %v10456_v46 }
 0xe79   : > { %5120 = vadd.xlane.f32.xlu0 %v10460_v34  ;;  %v7362_v62 = vpop.f32.mrb[164].mxu0 }
 0xe7a   : > { %v5065_v36 = vpop.f32.mrb[165].mxu0  ;;  %v10470_v12 = vadd.f32 %v7362_v62, %v4957_v37 }
 0xe7b   : > { %v10465_v55 = vadd.f32 %v5065_v36, %v4955_v5  ;;  %v7363_v21 = vpop.f32.mrb[166].mxu0 }
 0xe7c   : > { %v5068_v11 = vpop.f32.mrb[167].mxu0  ;;  %v10473_v10 = vadd.f32 %v7363_v21, %v4958_v52 }
 0xe7d   : > { %v10467_v47 = vadd.f32 %v5068_v11, %v4956_v6  ;;  %5122 = vadd.xlane.f32.xlu1 %v10465_v55 }
 0xe7f   : > { %5124 = vadd.xlane.f32.xlu0 %v10467_v47 }
 0xe81   : > { %5126 = vadd.xlane.f32.xlu1 %v10470_v12 }
 0xe83   : > { %5128 = vadd.xlane.f32.xlu0 %v10473_v10 }
 0xead   : > { %v7366_v4 = vpop.f32.mrb[168].mxu0 }
 0xeae   : > { %v5081_v45 = vpop.f32.mrb[169].mxu0  ;;  %v10484_v27 = vadd.f32 %v7366_v4, %v4961_v8  ;;  %v7566_v8 = vld [vmem:[%s11156_s10 + $0x44] ss:$8 sps:$4 sm:$0xff]  }
 0xeaf   : > { %v10479_v14 = vadd.f32 %v5081_v45, %v4959_v40  ;;  %v7367_v43 = vpop.f32.mrb[170].mxu0 }
 0xeb0   : > { %v5084_v17 = vpop.f32.mrb[171].mxu0  ;;  %v10487_v33 = vadd.f32 %v7367_v43, %v4962_v54  ;;  %v7564_v43 = vld [vmem:[%s11156_s10 + $0x40] ss:$8 sps:$4 sm:$0xff]   ;;  %v7567_v54 = vld [vmem:[%s11156_s10 + $0x50] ss:$8 sps:$4 sm:$0xff]  }
 0xeb1   : > { %v10481_v56 = vadd.f32 %v5084_v17, %v4960_v31  ;;  %5130 = vadd.xlane.f32.xlu1 %v10479_v14  ;;  %v7560_v31 = vld [vmem:[%s11156_s10 + $0x24] ss:$8 sps:$4 sm:$0xff]   ;;  %v7569_v17 = vld [vmem:[%s11156_s10 + $0x54] ss:$8 sps:$4 sm:$0xff]  }
 0xeb2   : > { %5443 = vmatprep.subr.bf16.mxu1 %v7560_v31 }
 0xeb3   : > { %5132 = vadd.xlane.f32.xlu0 %v10481_v56 }
 0xeb5   : > { %5134 = vadd.xlane.f32.xlu1 %v10484_v27 }
 0xeb7   : > { %5136 = vadd.xlane.f32.xlu0 %v10487_v33 }
 0xeb9   : > { %v7370_v1 = vpop.f32.mrb[172].mxu0 }
 0xeba   : > { %v5097_v57 = vpop.f32.mrb[173].mxu0  ;;  %v10498_v25 = vadd.f32 %v7370_v1, %v4965_v53  ;;  %v7575_v1 = vld [vmem:[%s11156_s10 + $0x74] ss:$8 sps:$4 sm:$0xff]  }
 0xebb   : > { %v10493_v26 = vadd.f32 %v5097_v57, %v4963_v7  ;;  %v7371_v44 = vpop.f32.mrb[174].mxu0  ;;  %v7570_v7 = vld [vmem:[%s11156_s10 + $0x60] ss:$8 sps:$4 sm:$0xff]  }
 0xebc   : > { %v5100_v29 = vpop.f32.mrb[175].mxu0  ;;  %v10501_v35 = vadd.f32 %v7371_v44, %v4966_v22 }
 0xebd   : > { %v10495_v20 = vadd.f32 %v5100_v29, %v4964_v38  ;;  %5138 = vadd.xlane.f32.xlu1 %v10493_v26  ;;  %v7573_v38 = vld [vmem:[%s11156_s10 + $0x70] ss:$8 sps:$4 sm:$0xff]  }
 0xebf   : > { %5140 = vadd.xlane.f32.xlu0 %v10495_v20 }
 0xec1   : > { %5142 = vadd.xlane.f32.xlu1 %v10498_v25 }
 0xec3   : > { %5144 = vadd.xlane.f32.xlu0 %v10501_v35 }
 0xefe   : > { %v5115_v32 = vpop.xlane.xlu0 %5114 }
 0xeff   : > { %v5147_v18 = vmul.f32 0.0078125, %v5115_v32 }
 0xf00   : > { %v5117_v51 = vpop.xlane.xlu1 %5116 }
 0xf01   : > { %v10518_v49 = vsub.f32 %v10451_v24, %v5147_v18  ;;  %v5148_v9 = vmul.f32 0.0078125, %v5117_v51 }
 0xf02   : > { %v5119_v48 = vpop.xlane.xlu0 %5118 }
 0xf03   : > { %v10521_v2 = vsub.f32 %v10453_v15, %v5148_v9  ;;  %v5149_v19 = vmul.f32 0.0078125, %v5119_v48  ;;  %v5179_v61 = vmul.f32 %v10518_v49, %v10518_v49 }
 0xf05   : > { %v10526_v39 = vsub.f32 %v10456_v46, %v5149_v19  ;;  %5195 = vadd.xlane.f32.xlu1 %v5179_v61  ;;  %v5180_v58 = vmul.f32 %v10521_v2, %v10521_v2 }
 0xf06   : > { %v5121_v59 = vpop.xlane.xlu0 %5120 }
 0xf07   : > { %v5150_v41 = vmul.f32 0.0078125, %v5121_v59  ;;  %5197 = vadd.xlane.f32.xlu0 %v5180_v58  ;;  %v5181_v24 = vmul.f32 %v10526_v39, %v10526_v39 }
 0xf09   : > { %v10533_v15 = vsub.f32 %v10460_v34, %v5150_v41  ;;  %5199 = vadd.xlane.f32.xlu1 %v5181_v24 }
 0xf0a   : > { %v5123_v5 = vpop.xlane.xlu1 %5122 }
 0xf0b   : > { %v5151_v62 = vmul.f32 0.0078125, %v5123_v5  ;;  %v5182_v46 = vmul.f32 %v10533_v15, %v10533_v15 }
 0xf0c   : > { %v5125_v6 = vpop.xlane.xlu0 %5124 }
 0xf0d   : > { %v10538_v36 = vsub.f32 %v10465_v55, %v5151_v62  ;;  %v5152_v0 = vmul.f32 0.0078125, %v5125_v6  ;;  %5201 = vadd.xlane.f32.xlu0 %v5182_v46 }
 0xf0e   : > { %v5127_v37 = vpop.xlane.xlu1 %5126 }
 0xf0f   : > { %v10541_v21 = vsub.f32 %v10467_v47, %v5152_v0  ;;  %v5153_v11 = vmul.f32 0.0078125, %v5127_v37  ;;  %v5183_v34 = vmul.f32 %v10538_v36, %v10538_v36 }
 0xf10   : > { %v5129_v52 = vpop.xlane.xlu0 %5128 }
 0xf11   : > { %v10546_v42 = vsub.f32 %v10470_v12, %v5153_v11  ;;  %v5154_v40 = vmul.f32 0.0078125, %v5129_v52  ;;  %5203 = vadd.xlane.f32.xlu1 %v5183_v34  ;;  %v5184_v55 = vmul.f32 %v10541_v21, %v10541_v21  ;;  %v7558_v12 = vld [vmem:[%s11156_s10 + $0x20] ss:$8 sps:$4 sm:$0xff]  }
 0xf12   : > { %5444 = vmatpush1.bf16.msra.mxu1 %v7558_v12 }
 0xf13   : > { %v10551_v4 = vsub.f32 %v10473_v10, %v5154_v40  ;;  %5205 = vadd.xlane.f32.xlu0 %v5184_v55  ;;  %v5185_v47 = vmul.f32 %v10546_v42, %v10546_v42  ;;  %v7563_v10 = vld [vmem:[%s11156_s10 + $0x34] ss:$8 sps:$4 sm:$0xff]  }
 0xf14   : > { %5445 = vmatprep.subr.bf16.mxu1 %v7563_v10 }
 0xf15   : > { %5207 = vadd.xlane.f32.xlu1 %v5185_v47  ;;  %v5186_v45 = vmul.f32 %v10551_v4, %v10551_v4 }
 0xf16   : > { %5446 = vmatpush1.bf16.msra.mxu1 %v7561_v60 }
 0xf17   : > { %5209 = vadd.xlane.f32.xlu0 %v5186_v45  ;;  %5447 = vmatprep.subr.bf16.mxu1 %v7566_v8 }
 0xf1a   : > { %5448 = vmatpush1.bf16.msra.mxu1 %v7564_v43 }
 0xf1b   : > { %5449 = vmatprep.subr.bf16.mxu1 %v7569_v17  ;;  %v10636_v17 = vld [vmem:[%s11154_s8] ss:$0 sm:$0xff] }
 0xf1e   : > { %5450 = vmatpush1.bf16.msra.mxu1 %v7567_v54 }
 0xf1f   : > { %5451 = vmatprep.subr.bf16.mxu1 %v7572_v3 }
 0xf22   : > { %5452 = vmatpush1.bf16.msra.mxu1 %v7570_v7 }
 0xf23   : > { %5453 = vmatprep.subr.bf16.mxu1 %v7575_v1 }
 0xf26   : > { %5454 = vmatpush1.bf16.msra.mxu1 %v7573_v38 }
 0xf3e   : > { %v5131_v57 = vpop.xlane.xlu1 %5130 }
 0xf3f   : > { %v5155_v16 = vmul.f32 0.0078125, %v5131_v57 }
 0xf40   : > { %v5133_v53 = vpop.xlane.xlu0 %5132 }
 0xf41   : > { %v10594_v44 = vsub.f32 %v10479_v14, %v5155_v16  ;;  %v5156_v29 = vmul.f32 0.0078125, %v5133_v53 }
 0xf42   : > { %v5135_v22 = vpop.xlane.xlu1 %5134 }
 0xf43   : > { %v10597_v23 = vsub.f32 %v10481_v56, %v5156_v29  ;;  %v5157_v30 = vmul.f32 0.0078125, %v5135_v22  ;;  %v5187_v13 = vmul.f32 %v10594_v44, %v10594_v44 }
 0xf44   : > { %v5137_v50 = vpop.xlane.xlu0 %5136 }
 0xf45   : > { %v10602_v32 = vsub.f32 %v10484_v27, %v5157_v30  ;;  %v5158_v18 = vmul.f32 0.0078125, %v5137_v50  ;;  %5211 = vadd.xlane.f32.xlu1 %v5187_v13  ;;  %v5188_v51 = vmul.f32 %v10597_v23, %v10597_v23  ;;  %v10644_v50 = vld [vmem:[%s11155_s9] ss:$0 sm:$0xff] }
 0xf47   : > { %v10607_v14 = vsub.f32 %v10487_v33, %v5158_v18  ;;  %5213 = vadd.xlane.f32.xlu0 %v5188_v51  ;;  %v5189_v56 = vmul.f32 %v10602_v32, %v10602_v32 }
 0xf49   : > { %5215 = vadd.xlane.f32.xlu1 %v5189_v56  ;;  %v5190_v9 = vmul.f32 %v10607_v14, %v10607_v14 }
 0xf4a   : > { %v5139_v48 = vpop.xlane.xlu1 %5138 }
 0xf4b   : > { %v5159_v19 = vmul.f32 0.0078125, %v5139_v48  ;;  %5217 = vadd.xlane.f32.xlu0 %v5190_v9 }
 0xf4c   : > { %v5141_v27 = vpop.xlane.xlu0 %5140 }
 0xf4d   : > { %v10614_v61 = vsub.f32 %v10493_v26, %v5159_v19  ;;  %v5160_v58 = vmul.f32 0.0078125, %v5141_v27 }
 0xf4e   : > { %v5143_v59 = vpop.xlane.xlu1 %5142 }
 0xf4f   : > { %v10617_v33 = vsub.f32 %v10495_v20, %v5160_v58  ;;  %v5161_v41 = vmul.f32 0.0078125, %v5143_v59  ;;  %v5191_v24 = vmul.f32 %v10614_v61, %v10614_v61 }
 0xf50   : > { %v5145_v5 = vpop.xlane.xlu0 %5144 }
 0xf51   : > { %v10622_v62 = vsub.f32 %v10498_v25, %v5161_v41  ;;  %v5162_v46 = vmul.f32 0.0078125, %v5145_v5  ;;  %5219 = vadd.xlane.f32.xlu1 %v5191_v24  ;;  %v5192_v6 = vmul.f32 %v10617_v33, %v10617_v33 }
 0xf53   : > { %v10627_v26 = vsub.f32 %v10501_v35, %v5162_v46  ;;  %5221 = vadd.xlane.f32.xlu0 %v5192_v6  ;;  %v5193_v20 = vmul.f32 %v10622_v62, %v10622_v62 }
 0xf55   : > { %5223 = vadd.xlane.f32.xlu1 %v5193_v20  ;;  %v5194_v0 = vmul.f32 %v10627_v26, %v10627_v26 }
 0xf57   : > { %5225 = vadd.xlane.f32.xlu0 %v5194_v0 }
 0xf92   : > { %v5196_v37 = vpop.xlane.xlu1 %5195 }
 0xf93   : > { %v5227_v25 = vmul.f32 0.0078125, %v5196_v37 }
 0xf94   : > { %v5198_v11 = vpop.xlane.xlu0 %5197 }
 0xf95   : > { %v5243_v34 = vadd.f32 1e-12, %v5227_v25  ;;  %v5228_v52 = vmul.f32 0.0078125, %v5198_v11 }
 0xf96   : > { %v5200_v40 = vpop.xlane.xlu1 %5199 }
 0xf97   : > { %7856 = vrsqrt.f32 %v5243_v34  ;;  %v5244_v55 = vadd.f32 1e-12, %v5228_v52  ;;  %v5229_v47 = vmul.f32 0.0078125, %v5200_v40 }
 0xf99   : > { %7858 = vrsqrt.f32 %v5244_v55  ;;  %v5245_v35 = vadd.f32 1e-12, %v5229_v47 }
 0xf9a   : > { %v5202_v31 = vpop.xlane.xlu0 %5201 }
 0xf9b   : > { %7860 = vrsqrt.f32 %v5245_v35  ;;  %v5230_v12 = vmul.f32 0.0078125, %v5202_v31 }
 0xf9d   : > { %v5246_v45 = vadd.f32 1e-12, %v5230_v12 }
 0xf9e   : > { %v5204_v10 = vpop.xlane.xlu1 %5203 }
 0xf9f   : > { %7862 = vrsqrt.f32 %v5246_v45  ;;  %v5231_v60 = vmul.f32 0.0078125, %v5204_v10 }
 0xfa0   : > { %v5206_v8 = vpop.xlane.xlu0 %5205 }
 0xfa1   : > { %v7857_v43 = vpop.eup %7856  ;;  %v5247_v54 = vadd.f32 1e-12, %v5231_v60  ;;  %v5232_v3 = vmul.f32 0.0078125, %v5206_v8 }
 0xfa2   : > { %v5275_v7 = vmul.f32 %v7857_v43, %v10518_v49  ;;  %v5208_v1 = vpop.xlane.xlu1 %5207 }
 0xfa3   : > { %v7859_v38 = vpop.eup %7858  ;;  %7864 = vrsqrt.f32 %v5247_v54  ;;  %v5248_v57 = vadd.f32 1e-12, %v5232_v3  ;;  %v5233_v16 = vmul.f32 0.0078125, %v5208_v1 }
 0xfa4   : > { %v5297_v53 = vmul.f32 %v10636_v17, %v5275_v7  ;;  %v5276_v29 = vmul.f32 %v7859_v38, %v10521_v2  ;;  %v5210_v22 = vpop.xlane.xlu0 %5209 }
 0xfa5   : > { %v7861_v30 = vpop.eup %7860  ;;  %7866 = vrsqrt.f32 %v5248_v57  ;;  %v5234_v13 = vmul.f32 0.0078125, %v5210_v22  ;;  %v5249_v18 = vadd.f32 1e-12, %v5233_v16 }
 0xfa6   : > { %v5298_v49 = vmul.f32 %v10636_v17, %v5276_v29  ;;  %v10648_v56 = vadd.f32 %v10644_v50, %v5297_v53  ;;  %v5277_v2 = vmul.f32 %v7861_v30, %v10526_v39 }
 0xfa7   : > { %v5250_v51 = vadd.f32 1e-12, %v5234_v13 }
 0xfa8   : > { %v10651_v9 = vadd.f32 %v10644_v50, %v5298_v49  ;;  %v5299_v58 = vmul.f32 %v10636_v17, %v5277_v2 }
 0xfa9   : > { %v7863_v48 = vpop.eup %7862  ;;  %7868 = vrsqrt.f32 %v5250_v51 }
 0xfaa   : > { %v5335_v19 = vpack.c.bf16 %v10651_v9, %v10648_v56  ;;  %v5278_v27 = vmul.f32 %v7863_v48, %v10533_v15  ;;  %7870 = vrsqrt.f32 %v5249_v18  ;;  %v10664_v5 = vadd.f32 %v10644_v50, %v5299_v58 }
 0xfac   : > { %5472 = vmatmul.mubr.bf16.vlgmr.msra.gmra.mrb[176].mxu1 %v5335_v19  ;;  %v5300_v59 = vmul.f32 %v10636_v17, %v5278_v27 }
 0xfad   : > { %v7865_v41 = vpop.eup %7864  ;;  %5481 = vmatprep.mubr.bf16.mxu1 %v11567_v28 }
 0xfae   : > { %v10661_v24 = vadd.f32 %v10644_v50, %v5300_v59  ;;  %v5279_v46 = vmul.f32 %v7865_v41, %v10538_v36 }
 0xfaf   : > { %v7867_v39 = vpop.eup %7866 }
 0xfb0   : > { %v5280_v15 = vmul.f32 %v7867_v39, %v10541_v21  ;;  %v5336_v6 = vpack.c.bf16 %v10661_v24, %v10664_v5  ;;  %v5301_v37 = vmul.f32 %v10636_v17, %v5279_v46 }
 0xfb2   : > { %v5302_v20 = vmul.f32 %v10636_v17, %v5280_v15  ;;  %v10678_v36 = vadd.f32 %v10644_v50, %v5301_v37 }
 0xfb3   : > { %v7869_v0 = vpop.eup %7868 }
 0xfb4   : > { %5482 = vmatmul.mubr.bf16.gmra.mrb[180].mxu1 %v5336_v6  ;;  %v7871_v25 = vpop.eup %7870  ;;  %v10674_v11 = vadd.f32 %v10644_v50, %v5302_v20  ;;  %v5282_v34 = vmul.f32 %v7869_v0, %v10551_v4 }
 0xfb5   : > { %5491 = vmatprep.mubr.bf16.mxu1 %v11567_v28  ;;  %v5281_v21 = vmul.f32 %v7871_v25, %v10546_v42 }
 0xfb6   : > { %v5337_v52 = vpack.c.bf16 %v10674_v11, %v10678_v36  ;;  %v5304_v40 = vmul.f32 %v10636_v17, %v5282_v34 }
 0xfb7   : > { %v5303_v55 = vmul.f32 %v10636_v17, %v5281_v21 }
 0xfb8   : > { %v10687_v47 = vadd.f32 %v10644_v50, %v5304_v40 }
 0xfb9   : > { %v10690_v4 = vadd.f32 %v10644_v50, %v5303_v55 }
 0xfbb   : > { %v5338_v35 = vpack.c.bf16 %v10687_v47, %v10690_v4 }
 0xfbc   : > { %5492 = vmatmul.mubr.bf16.gmra.mrb[184].mxu1 %v5337_v52 }
 0xfbd   : > { %5501 = vmatprep.mubr.bf16.mxu1 %v11567_v28 }
 0xfc4   : > { %5502 = vmatmul.mubr.bf16.gmra.mrb[188].mxu1 %v5338_v35 }
 0xfc5   : > { %5511 = vmatprep.mubr.bf16.mxu1 %v11567_v28 }
 0xfd2   : > { %v5212_v42 = vpop.xlane.xlu1 %5211 }
 0xfd3   : > { %v5235_v31 = vmul.f32 0.0078125, %v5212_v42 }
 0xfd4   : > { %v5214_v12 = vpop.xlane.xlu0 %5213 }
 0xfd5   : > { %v5251_v45 = vadd.f32 1e-12, %v5235_v31  ;;  %v5236_v10 = vmul.f32 0.0078125, %v5214_v12 }
 0xfd6   : > { %v5216_v60 = vpop.xlane.xlu1 %5215 }
 0xfd7   : > { %7872 = vrsqrt.f32 %v5251_v45  ;;  %v5252_v8 = vadd.f32 1e-12, %v5236_v10  ;;  %v5237_v43 = vmul.f32 0.0078125, %v5216_v60 }
 0xfd8   : > { %v5218_v54 = vpop.xlane.xlu0 %5217 }
 0xfd9   : > { %7874 = vrsqrt.f32 %v5252_v8  ;;  %v5253_v3 = vadd.f32 1e-12, %v5237_v43  ;;  %v5238_v7 = vmul.f32 0.0078125, %v5218_v54 }
 0xfdb   : > { %7876 = vrsqrt.f32 %v5253_v3  ;;  %v5254_v1 = vadd.f32 1e-12, %v5238_v7  ;;  %v7580_v3 = vld [vmem:[%s11158_s12 + $0x50] sm:$0xff]  }
 0xfdc   : > { %v7581_v7 = vld [vmem:[%s11158_s12 + $0x10] sm:$0xff]  }
 0xfdd   : > { %7878 = vrsqrt.f32 %v5254_v1  ;;  %v7582_v1 = vld [vmem:[%s11158_s12 + $0x58] sm:$0xff]  }
 0xfde   : > { %v5220_v38 = vpop.xlane.xlu1 %5219 }
 0xfdf   : > { %v5239_v57 = vmul.f32 0.0078125, %v5220_v38  ;;  %v7583_v38 = vld [vmem:[%s11158_s12 + $0x18] sm:$0xff]  }
 0xfe0   : > { %v5222_v16 = vpop.xlane.xlu0 %5221 }
 0xfe1   : > { %v7873_v53 = vpop.eup %7872  ;;  %v5255_v29 = vadd.f32 1e-12, %v5239_v57  ;;  %v5240_v22 = vmul.f32 0.0078125, %v5222_v16  ;;  %v7584_v57 = vld [vmem:[%s11158_s12 + $0x60] sm:$0xff]  }
 0xfe2   : > { %v5224_v30 = vpop.xlane.xlu1 %5223  ;;  %v5283_v13 = vmul.f32 %v7873_v53, %v10594_v44  ;;  %v7585_v16 = vld [vmem:[%s11158_s12 + $0x20] sm:$0xff]   ;;  %v7586_v53 = vld [vmem:[%s11158_s12 + $0x68] sm:$0xff]  }
 0xfe3   : > { %v7875_v49 = vpop.eup %7874  ;;  %7880 = vrsqrt.f32 %v5255_v29  ;;  %v5256_v18 = vadd.f32 1e-12, %v5240_v22  ;;  %v5241_v51 = vmul.f32 0.0078125, %v5224_v30  ;;  %v7587_v29 = vld [vmem:[%s11158_s12 + $0x28] sm:$0xff]   ;;  %v7588_v22 = vld [vmem:[%s11158_s12 + $0x70] sm:$0xff]  }
 0xfe4   : > { %v5226_v2 = vpop.xlane.xlu0 %5225  ;;  %v5284_v48 = vmul.f32 %v7875_v49, %v10597_v23  ;;  %v5305_v19 = vmul.f32 %v10636_v17, %v5283_v13  ;;  %v7589_v30 = vld [vmem:[%s11158_s12 + $0x30] sm:$0xff]   ;;  %v7590_v13 = vld [vmem:[%s11158_s12 + $0x78] sm:$0xff]  }
 0xfe5   : > { %v7877_v27 = vpop.eup %7876  ;;  %7882 = vrsqrt.f32 %v5256_v18  ;;  %v5242_v58 = vmul.f32 0.0078125, %v5226_v2  ;;  %v5257_v39 = vadd.f32 1e-12, %v5241_v51  ;;  %v7591_v49 = vld [vmem:[%s11158_s12 + $0x38] sm:$0xff]   ;;  %v5568_v18 = vld [vmem:[%s11157_s11] sm:$0x3] }
 0xfe6   : > { %v5306_v59 = vmul.f32 %v10636_v17, %v5284_v48  ;;  %v10700_v15 = vadd.f32 %v10644_v50, %v5305_v19  ;;  %v5285_v6 = vmul.f32 %v7877_v27, %v10602_v32  ;;  %v5576_v51 = vsub.s32 1, %v8261_v63  ;;  %v11592_v2 = vld [vmem:[#allocation4_spill] sm:$0xff] }
 0xfe7   : > { %v7879_v41 = vpop.eup %7878  ;;  %v5258_v46 = vadd.f32 1e-12, %v5242_v58  ;;  %v5573_v48 = vrot.slane %v5568_v18, %v11592_v2 }
 0xfe8   : > { %v10703_v44 = vadd.f32 %v10644_v50, %v5306_v59  ;;  %v5286_v23 = vmul.f32 %v7879_v41, %v10607_v14  ;;  %v5307_v37 = vmul.f32 %v10636_v17, %v5285_v6  ;;  %v5577_v19 = vrot.slane %v5568_v18, %v5576_v51 }
 0xfe9   : > { %7884 = vrsqrt.f32 %v5258_v46  ;;  %v5580_v27 = vpack.c.bf16 %v5573_v48, %v5573_v48 }
 0xfea   : > { %v5339_v20 = vpack.c.bf16 %v10703_v44, %v10700_v15  ;;  %v5308_v0 = vmul.f32 %v10636_v17, %v5286_v23  ;;  %7886 = vrsqrt.f32 %v5257_v39  ;;  %v10716_v32 = vadd.f32 %v10644_v50, %v5307_v37 }
 0xfeb   : > { %v5581_v58 = vpack.c.bf16 %v5577_v19, %v5577_v19  ;;  %v5583_v59 = vpack.i.b16 %v5580_v27, %v5580_v27 }
 0xfec   : > { %5512 = vmatmul.mubr.bf16.gmra.mrb[192].mxu1 %v5339_v20  ;;  %v10713_v34 = vadd.f32 %v10644_v50, %v5308_v0 }
 0xfed   : > { %v7881_v25 = vpop.eup %7880  ;;  %5521 = vmatprep.mubr.bf16.mxu1 %v11567_v28  ;;  %v5590_v41 = vpack.i.b16 %v5581_v58, %v5581_v58  ;;  %v10800_v6 = vrot.slane %v5583_v59, %v11592_v2 }
 0xfee   : > { %v5287_v14 = vmul.f32 %v7881_v25, %v10614_v61  ;;  %v5340_v40 = vpack.c.bf16 %v10713_v34, %v10716_v32 }
 0xfef   : > { %v7883_v21 = vpop.eup %7882  ;;  %v10803_v20 = vrot.slane %v5590_v41, %v11592_v2 }
 0xff0   : > { %v5288_v52 = vmul.f32 %v7883_v21, %v10617_v33  ;;  %v5309_v42 = vmul.f32 %v10636_v17, %v5287_v14 }
 0xff2   : > { %v5310_v55 = vmul.f32 %v10636_v17, %v5288_v52  ;;  %v10730_v61 = vadd.f32 %v10644_v50, %v5309_v42 }
 0xff3   : > { %v7885_v35 = vpop.eup %7884 }
 0xff4   : > { %5522 = vmatmul.mubr.bf16.gmra.mrb[196].mxu1 %v5340_v40  ;;  %v7887_v31 = vpop.eup %7886  ;;  %v10726_v12 = vadd.f32 %v10644_v50, %v5310_v55  ;;  %v5290_v45 = vmul.f32 %v7885_v35, %v10627_v26 }
 0xff5   : > { %5531 = vmatprep.mubr.bf16.mxu1 %v11567_v28  ;;  %v5289_v33 = vmul.f32 %v7887_v31, %v10622_v62  ;;  %v7576_v62 = vld [vmem:[%s11158_s12 + $0x40] sm:$0xff]  }
 0xff6   : > { %v5341_v10 = vpack.c.bf16 %v10726_v12, %v10730_v61  ;;  %v5312_v60 = vmul.f32 %v10636_v17, %v5290_v45  ;;  %6940 = vmatprep.subr.bf16.mxu0 %v7576_v62  ;;  %7372 = vmatprep.subr.bf16.mxu1 %v7576_v62 }
 0xff7   : > { %v5311_v8 = vmul.f32 %v10636_v17, %v5289_v33  ;;  %v7577_v17 = vld [vmem:[%s11158_s12] sm:$0xff]  }
 0xff8   : > { %v10739_v43 = vadd.f32 %v10644_v50, %v5312_v60  ;;  %6941 = vmatpush3.bf16.msra.mxu0 %v7577_v17  ;;  %7380 = vmatpush3.bf16.msra.mxu1 %v7577_v17 }
 0xff9   : > { %v10742_v26 = vadd.f32 %v10644_v50, %v5311_v8  ;;  %v7579_v50 = vld [vmem:[%s11158_s12 + $0x8] sm:$0xff]  }
 0xffb   : > { %v5342_v54 = vpack.c.bf16 %v10739_v43, %v10742_v26 }
 0xffc   : > { %5532 = vmatmul.mubr.bf16.gmra.mrb[200].mxu1 %v5341_v10 }
 0xffd   : > { %5541 = vmatprep.mubr.bf16.mxu1 %v11567_v28  ;;  %v7578_v28 = vld [vmem:[%s11158_s12 + $0x48] sm:$0xff]  }
 0xffe   : > { %6942 = vmatprep.subr.bf16.mxu0 %v7578_v28  ;;  %7373 = vmatprep.subr.bf16.mxu1 %v7578_v28 }
 0xfff   : > { %6943 = vmatpush3.bf16.msra.mxu0 %v7579_v50  ;;  %7381 = vmatpush3.bf16.msra.mxu1 %v7579_v50 }
0x1000   : > { %6944 = vmatprep.subr.bf16.mxu0 %v7580_v3  ;;  %7374 = vmatprep.subr.bf16.mxu1 %v7580_v3 }
0x1003   : > { %6945 = vmatpush3.bf16.msra.mxu0 %v7581_v7  ;;  %7382 = vmatpush3.bf16.msra.mxu1 %v7581_v7 }
0x1004   : > { %5542 = vmatmul.mubr.bf16.gmra.mrb[204].mxu1 %v5342_v54  ;;  %6946 = vmatprep.subr.bf16.mxu0 %v7582_v1 }
0x1005   : > { %7375 = vmatprep.subr.bf16.mxu1 %v7582_v1 }
0x1007   : > { %6947 = vmatpush3.bf16.msra.mxu0 %v7583_v38  ;;  %7383 = vmatpush3.bf16.msra.mxu1 %v7583_v38 }
0x1008   : > { %6948 = vmatprep.subr.bf16.mxu0 %v7584_v57  ;;  %7376 = vmatprep.subr.bf16.mxu1 %v7584_v57 }
0x100b   : > { %6949 = vmatpush3.bf16.msra.mxu0 %v7585_v16  ;;  %7384 = vmatpush3.bf16.msra.mxu1 %v7585_v16 }
0x100c   : > { %6950 = vmatprep.subr.bf16.mxu0 %v7586_v53  ;;  %7377 = vmatprep.subr.bf16.mxu1 %v7586_v53 }
0x100f   : > { %6951 = vmatpush3.bf16.msra.mxu0 %v7587_v29  ;;  %7385 = vmatpush3.bf16.msra.mxu1 %v7587_v29 }
0x1010   : > { %6952 = vmatprep.subr.bf16.mxu0 %v7588_v22  ;;  %7378 = vmatprep.subr.bf16.mxu1 %v7588_v22 }
0x1013   : > { %6953 = vmatpush3.bf16.msra.mxu0 %v7589_v30  ;;  %7386 = vmatpush3.bf16.msra.mxu1 %v7589_v30 }
0x1014   : > { %6954 = vmatprep.subr.bf16.mxu0 %v7590_v13  ;;  %7379 = vmatprep.subr.bf16.mxu1 %v7590_v13 }
0x1017   : > { %6955 = vmatpush3.bf16.msra.mxu0 %v7591_v49  ;;  %7387 = vmatpush3.bf16.msra.mxu1 %v7591_v49 }
0x107f   : > { %v5473_v39 = vpop.f32.mrb[176].mxu1 }
0x1080   : > { %v5475_v46 = vpop.f32.mrb[177].mxu1 }
0x1081   : > { %v5477_v23 = vpop.f32.mrb[178].mxu1 }
0x1082   : > { %v5552_v0 = vpack.c.bf16 %v5477_v23, %v5473_v39  ;;  %v5479_v37 = vpop.f32.mrb[179].mxu1 }
0x1083   : > { %v5553_v25 = vpack.c.bf16 %v5479_v37, %v5475_v46 }
0x1084   : > { %v10806_v63 = vadd.bf16 %v10800_v6, %v5552_v0 }
0x1085   : > { %v10809_v21 = vadd.bf16 %v10803_v20, %v5553_v25 }
0x1086   : > { %v5612_v14 = vmul.bf16 %v10806_v63, %v10806_v63 }
0x1087   : > { %v5613_v52 = vmul.bf16 %v10809_v21, %v10809_v21  ;;  %v5483_v40 = vpop.f32.mrb[180].mxu1 }
0x1088   : > { %v5628_v55 = vmul.bf16 %v5612_v14, %v10806_v63  ;;  %v5485_v35 = vpop.f32.mrb[181].mxu1 }
0x1089   : > { %v5629_v42 = vmul.bf16 %v5613_v52, %v10809_v21  ;;  %v5487_v31 = vpop.f32.mrb[182].mxu1 }
0x108a   : > { %v5644_v45 = vmul.bf16 1027030327, %v5628_v55  ;;  %v5554_v33 = vpack.c.bf16 %v5487_v31, %v5483_v40  ;;  %v5489_v10 = vpop.f32.mrb[183].mxu1 }
0x108b   : > { %v5645_v60 = vmul.bf16 1027030327, %v5629_v42  ;;  %v5555_v8 = vpack.c.bf16 %v5489_v10, %v5485_v35 }
0x108c   : > { %v5660_v54 = vadd.bf16 %v5644_v45, %v10806_v63  ;;  %v10819_v62 = vadd.bf16 %v10800_v6, %v5554_v33 }
0x108d   : > { %v10822_v17 = vadd.bf16 %v10803_v20, %v5555_v8  ;;  %v5661_v28 = vadd.bf16 %v5645_v60, %v10809_v21 }
0x108e   : > { %v5676_v50 = vmul.bf16 1061961548, %v5660_v54  ;;  %v5614_v3 = vmul.bf16 %v10819_v62, %v10819_v62 }
0x108f   : > { %v5615_v7 = vmul.bf16 %v10822_v17, %v10822_v17  ;;  %v5493_v1 = vpop.f32.mrb[184].mxu1  ;;  %v5677_v38 = vmul.bf16 1061961548, %v5661_v28 }
0x1090   : > { %7888 = vtanh.bf16 %v5676_v50  ;;  %v5630_v57 = vmul.bf16 %v5614_v3, %v10819_v62  ;;  %v5495_v16 = vpop.f32.mrb[185].mxu1 }
0x1091   : > { %v5631_v53 = vmul.bf16 %v5615_v7, %v10822_v17  ;;  %v5497_v29 = vpop.f32.mrb[186].mxu1  ;;  %7890 = vtanh.bf16 %v5677_v38 }
0x1092   : > { %v5646_v22 = vmul.bf16 1027030327, %v5630_v57  ;;  %v5556_v30 = vpack.c.bf16 %v5497_v29, %v5493_v1  ;;  %v5499_v13 = vpop.f32.mrb[187].mxu1 }
0x1093   : > { %v5647_v49 = vmul.bf16 1027030327, %v5631_v53  ;;  %v5557_v18 = vpack.c.bf16 %v5499_v13, %v5495_v16 }
0x1094   : > { %v10832_v51 = vadd.bf16 %v10800_v6, %v5556_v30  ;;  %v5662_v2 = vadd.bf16 %v5646_v22, %v10819_v62 }
0x1095   : > { %v10836_v48 = vadd.bf16 %v10803_v20, %v5557_v18  ;;  %v5663_v19 = vadd.bf16 %v5647_v49, %v10822_v17 }
0x1096   : > { %v5616_v27 = vmul.bf16 %v10832_v51, %v10832_v51  ;;  %v5678_v58 = vmul.bf16 1061961548, %v5662_v2 }
0x1097   : > { %v5617_v59 = vmul.bf16 %v10836_v48, %v10836_v48  ;;  %v5503_v41 = vpop.f32.mrb[188].mxu1  ;;  %v5679_v39 = vmul.bf16 1061961548, %v5663_v19 }
0x1098   : > { %v5632_v46 = vmul.bf16 %v5616_v27, %v10832_v51  ;;  %v5505_v23 = vpop.f32.mrb[189].mxu1  ;;  %7892 = vtanh.bf16 %v5678_v58 }
0x1099   : > { %v5633_v0 = vmul.bf16 %v5617_v59, %v10836_v48  ;;  %v5507_v37 = vpop.f32.mrb[190].mxu1  ;;  %7894 = vtanh.bf16 %v5679_v39 }
0x109a   : > { %v5648_v25 = vmul.bf16 1027030327, %v5632_v46  ;;  %v5558_v14 = vpack.c.bf16 %v5507_v37, %v5503_v41  ;;  %v5509_v52 = vpop.f32.mrb[191].mxu1 }
0x109b   : > { %v7889_v40 = vpop.eup %7888  ;;  %v5649_v55 = vmul.bf16 1027030327, %v5633_v0  ;;  %v5559_v35 = vpack.c.bf16 %v5509_v52, %v5505_v23 }
0x109c   : > { %v7891_v42 = vpop.eup %7890  ;;  %v5708_v31 = vadd.bf16 1065369472, %v7889_v40  ;;  %v5602_v45 = vadd.bf16 %v10800_v6, %v5558_v14  ;;  %v5664_v33 = vadd.bf16 %v5648_v25, %v10832_v51 }
0x109d   : > { %v5603_v10 = vadd.bf16 %v10803_v20, %v5559_v35  ;;  %v5709_v60 = vadd.bf16 1065369472, %v7891_v42  ;;  %v5665_v8 = vadd.bf16 %v5649_v55, %v10836_v48 }
0x109e   : > { %v5724_v54 = vmul.bf16 1056980736, %v5708_v31  ;;  %v5618_v28 = vmul.bf16 %v5602_v45, %v5602_v45  ;;  %v5680_v50 = vmul.bf16 1061961548, %v5664_v33 }
0x109f   : > { %v5619_v3 = vmul.bf16 %v5603_v10, %v5603_v10  ;;  %v5725_v7 = vmul.bf16 1056980736, %v5709_v60  ;;  %v5681_v1 = vmul.bf16 1061961548, %v5665_v8 }
0x10a0   : > { %v5634_v38 = vmul.bf16 %v5618_v28, %v5602_v45  ;;  %7896 = vtanh.bf16 %v5680_v50  ;;  %v5740_v53 = vmul.bf16 %v5724_v54, %v10806_v63 }
0x10a1   : > { %v5635_v57 = vmul.bf16 %v5619_v3, %v5603_v10  ;;  %v5741_v16 = vmul.bf16 %v5725_v7, %v10809_v21  ;;  %7898 = vtanh.bf16 %v5681_v1 }
0x10a2   : > { %v5650_v29 = vmul.bf16 1027030327, %v5634_v38 }
0x10a3   : > { %v7893_v22 = vpop.eup %7892  ;;  %v5651_v30 = vmul.bf16 1027030327, %v5635_v57  ;;  %5923 = vmatprep.mubr.bf16.mxu0 %v5741_v16 }
0x10a4   : > { %v7895_v13 = vpop.eup %7894  ;;  %5924 = vmatmul.mubr.bf16.vlgmr.msra.gmra.mrb[176].mxu0 %v5740_v53  ;;  %v5710_v49 = vadd.bf16 1065369472, %v7893_v22  ;;  %v5666_v18 = vadd.bf16 %v5650_v29, %v5602_v45 }
0x10a5   : > { %v5711_v2 = vadd.bf16 1065369472, %v7895_v13  ;;  %v5667_v19 = vadd.bf16 %v5651_v30, %v5603_v10 }
0x10a6   : > { %v5726_v27 = vmul.bf16 1056980736, %v5710_v49  ;;  %v5682_v58 = vmul.bf16 1061961548, %v5666_v18 }
0x10a7   : > { %v5727_v59 = vmul.bf16 1056980736, %v5711_v2  ;;  %v5683_v41 = vmul.bf16 1061961548, %v5667_v19 }
0x10a8   : > { %7900 = vtanh.bf16 %v5682_v58  ;;  %v5742_v63 = vmul.bf16 %v5726_v27, %v10819_v62 }
0x10a9   : > { %v5743_v21 = vmul.bf16 %v5727_v59, %v10822_v17  ;;  %7902 = vtanh.bf16 %v5683_v41 }
0x10ab   : > { %v7897_v39 = vpop.eup %7896  ;;  %5931 = vmatprep.mubr.bf16.mxu0 %v5743_v21 }
0x10ac   : > { %v7899_v46 = vpop.eup %7898  ;;  %5932 = vmatmul.mubr.bf16.gmra.mrb[180].mxu0 %v5742_v63  ;;  %v5712_v23 = vadd.bf16 1065369472, %v7897_v39 }
0x10ad   : > { %v5713_v0 = vadd.bf16 1065369472, %v7899_v46 }
0x10ae   : > { %v5728_v37 = vmul.bf16 1056980736, %v5712_v23 }
0x10af   : > { %v5729_v25 = vmul.bf16 1056980736, %v5713_v0 }
0x10b0   : > { %v5744_v52 = vmul.bf16 %v5728_v37, %v10832_v51 }
0x10b1   : > { %v5745_v14 = vmul.bf16 %v5729_v25, %v10836_v48 }
0x10b3   : > { %v7901_v40 = vpop.eup %7900  ;;  %5939 = vmatprep.mubr.bf16.mxu0 %v5745_v14 }
0x10b4   : > { %v7903_v55 = vpop.eup %7902  ;;  %5940 = vmatmul.mubr.bf16.gmra.mrb[184].mxu0 %v5744_v52  ;;  %v5714_v17 = vadd.bf16 1065369472, %v7901_v40 }
0x10b5   : > { %v5715_v35 = vadd.bf16 1065369472, %v7903_v55 }
0x10b6   : > { %v5730_v42 = vmul.bf16 1056980736, %v5714_v17 }
0x10b7   : > { %v5731_v62 = vmul.bf16 1056980736, %v5715_v35 }
0x10b8   : > { %v5746_v33 = vmul.bf16 %v5730_v42, %v5602_v45 }
0x10b9   : > { %v5747_v31 = vmul.bf16 %v5731_v62, %v5603_v10 }
0x10bb   : > { %5947 = vmatprep.mubr.bf16.mxu0 %v5747_v31 }
0x10bc   : > { %5948 = vmatmul.mubr.bf16.gmra.mrb[188].mxu0 %v5746_v33 }
0x10bf   : > { %v5513_v60 = vpop.f32.mrb[192].mxu1 }
0x10c0   : > { %v5515_v8 = vpop.f32.mrb[193].mxu1 }
0x10c1   : > { %v5517_v54 = vpop.f32.mrb[194].mxu1 }
0x10c2   : > { %v5560_v28 = vpack.c.bf16 %v5517_v54, %v5513_v60  ;;  %v5519_v50 = vpop.f32.mrb[195].mxu1 }
0x10c3   : > { %v5561_v48 = vpack.c.bf16 %v5519_v50, %v5515_v8 }
0x10c4   : > { %v10856_v51 = vadd.bf16 %v10800_v6, %v5560_v28 }
0x10c5   : > { %v10859_v3 = vadd.bf16 %v10803_v20, %v5561_v48 }
0x10c6   : > { %v5620_v7 = vmul.bf16 %v10856_v51, %v10856_v51 }
0x10c7   : > { %v5621_v45 = vmul.bf16 %v10859_v3, %v10859_v3  ;;  %v5523_v10 = vpop.f32.mrb[196].mxu1 }
0x10c8   : > { %v5636_v1 = vmul.bf16 %v5620_v7, %v10856_v51  ;;  %v5525_v38 = vpop.f32.mrb[197].mxu1 }
0x10c9   : > { %v5637_v57 = vmul.bf16 %v5621_v45, %v10859_v3  ;;  %v5527_v16 = vpop.f32.mrb[198].mxu1 }
0x10ca   : > { %v5652_v53 = vmul.bf16 1027030327, %v5636_v1  ;;  %v5562_v29 = vpack.c.bf16 %v5527_v16, %v5523_v10  ;;  %v5529_v22 = vpop.f32.mrb[199].mxu1 }
0x10cb   : > { %v5653_v30 = vmul.bf16 1027030327, %v5637_v57  ;;  %v5563_v13 = vpack.c.bf16 %v5529_v22, %v5525_v38 }
0x10cc   : > { %v10868_v49 = vadd.bf16 %v10800_v6, %v5562_v29  ;;  %v5668_v18 = vadd.bf16 %v5652_v53, %v10856_v51 }
0x10cd   : > { %v10872_v2 = vadd.bf16 %v10803_v20, %v5563_v13  ;;  %v5669_v19 = vadd.bf16 %v5653_v30, %v10859_v3 }
0x10ce   : > { %v5622_v27 = vmul.bf16 %v10868_v49, %v10868_v49  ;;  %v5684_v58 = vmul.bf16 1061961548, %v5668_v18 }
0x10cf   : > { %v5623_v59 = vmul.bf16 %v10872_v2, %v10872_v2  ;;  %v5533_v41 = vpop.f32.mrb[200].mxu1  ;;  %v5685_v21 = vmul.bf16 1061961548, %v5669_v19 }
0x10d0   : > { %v5638_v63 = vmul.bf16 %v5622_v27, %v10868_v49  ;;  %v5535_v39 = vpop.f32.mrb[201].mxu1  ;;  %7904 = vtanh.bf16 %v5684_v58 }
0x10d1   : > { %v5639_v46 = vmul.bf16 %v5623_v59, %v10872_v2  ;;  %v5537_v23 = vpop.f32.mrb[202].mxu1  ;;  %7906 = vtanh.bf16 %v5685_v21 }
0x10d2   : > { %v5654_v0 = vmul.bf16 1027030327, %v5638_v63  ;;  %v5564_v37 = vpack.c.bf16 %v5537_v23, %v5533_v41  ;;  %v5539_v25 = vpop.f32.mrb[203].mxu1 }
0x10d3   : > { %v5655_v14 = vmul.bf16 1027030327, %v5639_v46  ;;  %v5565_v52 = vpack.c.bf16 %v5539_v25, %v5535_v39 }
0x10d4   : > { %v10882_v40 = vadd.bf16 %v10800_v6, %v5564_v37  ;;  %v5670_v55 = vadd.bf16 %v5654_v0, %v10868_v49 }
0x10d5   : > { %v10886_v17 = vadd.bf16 %v10803_v20, %v5565_v52  ;;  %v5671_v35 = vadd.bf16 %v5655_v14, %v10872_v2 }
0x10d6   : > { %v5624_v42 = vmul.bf16 %v10882_v40, %v10882_v40  ;;  %v5686_v62 = vmul.bf16 1061961548, %v5670_v55 }
0x10d7   : > { %v5625_v31 = vmul.bf16 %v10886_v17, %v10886_v17  ;;  %v5543_v33 = vpop.f32.mrb[204].mxu1  ;;  %v5687_v60 = vmul.bf16 1061961548, %v5671_v35 }
0x10d8   : > { %v5640_v8 = vmul.bf16 %v5624_v42, %v10882_v40  ;;  %v5545_v54 = vpop.f32.mrb[205].mxu1  ;;  %7908 = vtanh.bf16 %v5686_v62 }
0x10d9   : > { %v5641_v28 = vmul.bf16 %v5625_v31, %v10886_v17  ;;  %v5547_v50 = vpop.f32.mrb[206].mxu1  ;;  %7910 = vtanh.bf16 %v5687_v60 }
0x10da   : > { %v5656_v48 = vmul.bf16 1027030327, %v5640_v8  ;;  %v5566_v7 = vpack.c.bf16 %v5547_v50, %v5543_v33  ;;  %v5549_v45 = vpop.f32.mrb[207].mxu1 }
0x10db   : > { %v7905_v10 = vpop.eup %7904  ;;  %v5657_v1 = vmul.bf16 1027030327, %v5641_v28  ;;  %v5567_v38 = vpack.c.bf16 %v5549_v45, %v5545_v54 }
0x10dc   : > { %v7907_v57 = vpop.eup %7906  ;;  %v5672_v16 = vadd.bf16 %v5656_v48, %v10882_v40  ;;  %v5610_v53 = vadd.bf16 %v10800_v6, %v5566_v7  ;;  %v5716_v29 = vadd.bf16 1065369472, %v7905_v10 }
0x10dd   : > { %v5611_v22 = vadd.bf16 %v10803_v20, %v5567_v38  ;;  %v5717_v30 = vadd.bf16 1065369472, %v7907_v57  ;;  %v5673_v13 = vadd.bf16 %v5657_v1, %v10886_v17 }
0x10de   : > { %v5688_v18 = vmul.bf16 1061961548, %v5672_v16  ;;  %v5626_v19 = vmul.bf16 %v5610_v53, %v5610_v53  ;;  %v5732_v27 = vmul.bf16 1056980736, %v5716_v29  ;;  %v10908_v29 = vld [vmem:[%s11159_s13] ss:$0 sm:$0xff] }
0x10df   : > { %v5627_v58 = vmul.bf16 %v5611_v22, %v5611_v22  ;;  %v5733_v59 = vmul.bf16 1056980736, %v5717_v30  ;;  %v5689_v41 = vmul.bf16 1061961548, %v5673_v13 }
0x10e0   : > { %7912 = vtanh.bf16 %v5688_v18  ;;  %v5642_v21 = vmul.bf16 %v5626_v19, %v5610_v53  ;;  %v5748_v6 = vmul.bf16 %v5732_v27, %v10856_v51 }
0x10e1   : > { %v5643_v63 = vmul.bf16 %v5627_v58, %v5611_v22  ;;  %v5749_v39 = vmul.bf16 %v5733_v59, %v10859_v3  ;;  %7914 = vtanh.bf16 %v5689_v41 }
0x10e2   : > { %v5658_v46 = vmul.bf16 1027030327, %v5642_v21 }
0x10e3   : > { %v7909_v23 = vpop.eup %7908  ;;  %v5659_v20 = vmul.bf16 1027030327, %v5643_v63  ;;  %5955 = vmatprep.mubr.bf16.mxu0 %v5749_v39 }
0x10e4   : > { %v7911_v0 = vpop.eup %7910  ;;  %5956 = vmatmul.mubr.bf16.gmra.mrb[192].mxu0 %v5748_v6  ;;  %v5718_v37 = vadd.bf16 1065369472, %v7909_v23  ;;  %v5674_v25 = vadd.bf16 %v5658_v46, %v5610_v53 }
0x10e5   : > { %v5719_v14 = vadd.bf16 1065369472, %v7911_v0  ;;  %v5675_v52 = vadd.bf16 %v5659_v20, %v5611_v22 }
0x10e6   : > { %v5734_v55 = vmul.bf16 1056980736, %v5718_v37  ;;  %v5690_v35 = vmul.bf16 1061961548, %v5674_v25 }
0x10e7   : > { %v5735_v42 = vmul.bf16 1056980736, %v5719_v14  ;;  %v5691_v62 = vmul.bf16 1061961548, %v5675_v52 }
0x10e8   : > { %7916 = vtanh.bf16 %v5690_v35  ;;  %v5750_v31 = vmul.bf16 %v5734_v55, %v10868_v49 }
0x10e9   : > { %v5751_v3 = vmul.bf16 %v5735_v42, %v10872_v2  ;;  %7918 = vtanh.bf16 %v5691_v62 }
0x10eb   : > { %v7913_v51 = vpop.eup %7912  ;;  %5963 = vmatprep.mubr.bf16.mxu0 %v5751_v3 }
0x10ec   : > { %v7915_v33 = vpop.eup %7914  ;;  %v5720_v60 = vadd.bf16 1065369472, %v7913_v51  ;;  %5964 = vmatmul.mubr.bf16.gmra.mrb[196].mxu0 %v5750_v31 }
0x10ed   : > { %v5721_v8 = vadd.bf16 1065369472, %v7915_v33 }
0x10ee   : > { %v5736_v54 = vmul.bf16 1056980736, %v5720_v60 }
0x10ef   : > { %v5737_v28 = vmul.bf16 1056980736, %v5721_v8 }
0x10f0   : > { %v5752_v48 = vmul.bf16 %v5736_v54, %v10882_v40 }
0x10f1   : > { %v5753_v50 = vmul.bf16 %v5737_v28, %v10886_v17 }
0x10f3   : > { %v7917_v7 = vpop.eup %7916  ;;  %5971 = vmatprep.mubr.bf16.mxu1 %v5753_v50 }
0x10f4   : > { %v7919_v45 = vpop.eup %7918  ;;  %5972 = vmatmul.mubr.bf16.vlgmr.msra.gmra.mrb[208].mxu1 %v5752_v48  ;;  %v5722_v2 = vadd.bf16 1065369472, %v7917_v7 }
0x10f5   : > { %v5723_v10 = vadd.bf16 1065369472, %v7919_v45 }
0x10f6   : > { %v5738_v1 = vmul.bf16 1056980736, %v5722_v2 }
0x10f7   : > { %v5739_v49 = vmul.bf16 1056980736, %v5723_v10 }
0x10f8   : > { %v5754_v57 = vmul.bf16 %v5738_v1, %v5610_v53 }
0x10f9   : > { %v5755_v38 = vmul.bf16 %v5739_v49, %v5611_v22 }
0x10fb   : > { %5979 = vmatprep.mubr.bf16.mxu1 %v5755_v38 }
0x10fc   : > { %5980 = vmatmul.mubr.bf16.gmra.mrb[212].mxu1 %v5754_v57 }
0x1177   : > { %v6956_v16 = vpop.f32.mrb[176].mxu0 }
0x1178   : > { %v6957_v17 = vpop.f32.mrb[177].mxu0 }
0x1179   : > { %v6958_v40 = vadd.f32 %v6957_v17, %v6956_v16  ;;  %v6959_v30 = vpop.f32.mrb[178].mxu0 }
0x117a   : > { %v6960_v13 = vpop.f32.mrb[179].mxu0 }
0x117b   : > { %v5926_v18 = vadd.f32 %v6958_v40, %v10908_v29  ;;  %v6961_v19 = vadd.f32 %v6960_v13, %v6959_v30 }
0x117d   : > { %v5929_v27 = vadd.f32 %v6961_v19, %v10908_v29  ;;  %v10913_v22 = vadd.f32 %v5926_v18, %v10648_v56 }
0x117f   : > { %6006 = vadd.xlane.f32.xlu1 %v10913_v22  ;;  %v6962_v53 = vpop.f32.mrb[180].mxu0  ;;  %v10917_v58 = vadd.f32 %v5929_v27, %v10651_v9 }
0x1180   : > { %v6963_v59 = vpop.f32.mrb[181].mxu0 }
0x1181   : > { %v6964_v41 = vadd.f32 %v6963_v59, %v6962_v53  ;;  %6008 = vadd.xlane.f32.xlu0 %v10917_v58  ;;  %v6965_v21 = vpop.f32.mrb[182].mxu0 }
0x1182   : > { %v6966_v63 = vpop.f32.mrb[183].mxu0 }
0x1183   : > { %v5934_v39 = vadd.f32 %v6964_v41, %v10908_v29  ;;  %v6967_v46 = vadd.f32 %v6966_v63, %v6965_v21 }
0x1185   : > { %v5937_v6 = vadd.f32 %v6967_v46, %v10908_v29  ;;  %v10923_v56 = vadd.f32 %v5934_v39, %v10664_v5 }
0x1187   : > { %6010 = vadd.xlane.f32.xlu1 %v10923_v56  ;;  %v6968_v23 = vpop.f32.mrb[184].mxu0  ;;  %v10927_v9 = vadd.f32 %v5937_v6, %v10661_v24 }
0x1188   : > { %v6969_v20 = vpop.f32.mrb[185].mxu0 }
0x1189   : > { %v6970_v0 = vadd.f32 %v6969_v20, %v6968_v23  ;;  %6012 = vadd.xlane.f32.xlu0 %v10927_v9  ;;  %v6971_v37 = vpop.f32.mrb[186].mxu0 }
0x118a   : > { %v6972_v25 = vpop.f32.mrb[187].mxu0 }
0x118b   : > { %v5942_v14 = vadd.f32 %v6970_v0, %v10908_v29  ;;  %v6973_v52 = vadd.f32 %v6972_v25, %v6971_v37 }
0x118d   : > { %v5945_v55 = vadd.f32 %v6973_v52, %v10908_v29  ;;  %v10933_v5 = vadd.f32 %v5942_v14, %v10678_v36 }
0x118f   : > { %6014 = vadd.xlane.f32.xlu1 %v10933_v5  ;;  %v6974_v35 = vpop.f32.mrb[188].mxu0  ;;  %v10937_v24 = vadd.f32 %v5945_v55, %v10674_v11 }
0x1190   : > { %v6975_v42 = vpop.f32.mrb[189].mxu0 }
0x1191   : > { %v6976_v62 = vadd.f32 %v6975_v42, %v6974_v35  ;;  %6016 = vadd.xlane.f32.xlu0 %v10937_v24  ;;  %v6977_v3 = vpop.f32.mrb[190].mxu0 }
0x1192   : > { %v6978_v31 = vpop.f32.mrb[191].mxu0 }
0x1193   : > { %v5950_v51 = vadd.f32 %v6976_v62, %v10908_v29  ;;  %v6979_v33 = vadd.f32 %v6978_v31, %v6977_v3 }
0x1195   : > { %v5953_v60 = vadd.f32 %v6979_v33, %v10908_v29  ;;  %v10943_v36 = vadd.f32 %v5950_v51, %v10690_v4 }
0x1197   : > { %6018 = vadd.xlane.f32.xlu1 %v10943_v36  ;;  %v10947_v8 = vadd.f32 %v5953_v60, %v10687_v47 }
0x1199   : > { %6020 = vadd.xlane.f32.xlu0 %v10947_v8 }
0x11b7   : > { %v6980_v11 = vpop.f32.mrb[192].mxu0 }
0x11b8   : > { %v6981_v54 = vpop.f32.mrb[193].mxu0 }
0x11b9   : > { %v6982_v28 = vadd.f32 %v6981_v54, %v6980_v11  ;;  %v6983_v50 = vpop.f32.mrb[194].mxu0 }
0x11ba   : > { %v6984_v48 = vpop.f32.mrb[195].mxu0 }
0x11bb   : > { %v5958_v7 = vadd.f32 %v6982_v28, %v10908_v29  ;;  %v6985_v45 = vadd.f32 %v6984_v48, %v6983_v50 }
0x11bd   : > { %v5961_v2 = vadd.f32 %v6985_v45, %v10908_v29  ;;  %v10953_v4 = vadd.f32 %v5958_v7, %v10700_v15 }
0x11bf   : > { %6022 = vadd.xlane.f32.xlu1 %v10953_v4  ;;  %v6986_v10 = vpop.f32.mrb[196].mxu0  ;;  %v10957_v47 = vadd.f32 %v5961_v2, %v10703_v44 }
0x11c0   : > { %v6987_v1 = vpop.f32.mrb[197].mxu0 }
0x11c1   : > { %v6988_v49 = vadd.f32 %v6987_v1, %v6986_v10  ;;  %6024 = vadd.xlane.f32.xlu0 %v10957_v47  ;;  %v6989_v38 = vpop.f32.mrb[198].mxu0 }
0x11c2   : > { %v6990_v57 = vpop.f32.mrb[199].mxu0 }
0x11c3   : > { %v5966_v16 = vadd.f32 %v6988_v49, %v10908_v29  ;;  %v6991_v17 = vadd.f32 %v6990_v57, %v6989_v38 }
0x11c5   : > { %v5969_v40 = vadd.f32 %v6991_v17, %v10908_v29  ;;  %v10963_v15 = vadd.f32 %v5966_v16, %v10716_v32 }
0x11c7   : > { %6026 = vadd.xlane.f32.xlu1 %v10963_v15  ;;  %v6992_v30 = vpop.f32.mrb[208].mxu1  ;;  %v10967_v44 = vadd.f32 %v5969_v40, %v10713_v34 }
0x11c8   : > { %v6993_v13 = vpop.f32.mrb[209].mxu1 }
0x11c9   : > { %v6994_v18 = vadd.f32 %v6993_v13, %v6992_v30  ;;  %6028 = vadd.xlane.f32.xlu0 %v10967_v44  ;;  %v6995_v19 = vpop.f32.mrb[210].mxu1 }
0x11ca   : > { %v6996_v27 = vpop.f32.mrb[211].mxu1 }
0x11cb   : > { %v5974_v53 = vadd.f32 %v6994_v18, %v10908_v29  ;;  %v6997_v59 = vadd.f32 %v6996_v27, %v6995_v19 }
0x11cd   : > { %v5977_v41 = vadd.f32 %v6997_v59, %v10908_v29  ;;  %v10973_v32 = vadd.f32 %v5974_v53, %v10730_v61 }
0x11cf   : > { %6030 = vadd.xlane.f32.xlu1 %v10973_v32  ;;  %v6998_v21 = vpop.f32.mrb[212].mxu1  ;;  %v10977_v34 = vadd.f32 %v5977_v41, %v10726_v12 }
0x11d0   : > { %v6999_v63 = vpop.f32.mrb[213].mxu1 }
0x11d1   : > { %v7000_v39 = vadd.f32 %v6999_v63, %v6998_v21  ;;  %6032 = vadd.xlane.f32.xlu0 %v10977_v34  ;;  %v7001_v46 = vpop.f32.mrb[214].mxu1 }
0x11d2   : > { %v7002_v6 = vpop.f32.mrb[215].mxu1 }
0x11d3   : > { %v5982_v23 = vadd.f32 %v7000_v39, %v10908_v29  ;;  %v7003_v20 = vadd.f32 %v7002_v6, %v7001_v46 }
0x11d5   : > { %v5985_v0 = vadd.f32 %v7003_v20, %v10908_v29  ;;  %v10983_v61 = vadd.f32 %v5982_v23, %v10742_v26 }
0x11d7   : > { %6034 = vadd.xlane.f32.xlu1 %v10983_v61  ;;  %v10987_v37 = vadd.f32 %v5985_v0, %v10739_v43 }
0x11d9   : > { %6036 = vadd.xlane.f32.xlu0 %v10987_v37 }
0x120c   : > { %v6007_v12 = vpop.xlane.xlu1 %6006 }
0x120d   : > { %v6038_v25 = vmul.f32 0.0078125, %v6007_v12 }
0x120e   : > { %v6009_v14 = vpop.xlane.xlu0 %6008 }
0x120f   : > { %v10991_v52 = vsub.f32 %v10913_v22, %v6038_v25  ;;  %v6039_v55 = vmul.f32 0.0078125, %v6009_v14 }
0x1211   : > { %v10994_v35 = vsub.f32 %v10917_v58, %v6039_v55  ;;  %v6070_v26 = vmul.f32 %v10991_v52, %v10991_v52 }
0x1213   : > { %6086 = vadd.xlane.f32.xlu1 %v6070_v26  ;;  %v6071_v43 = vmul.f32 %v10994_v35, %v10994_v35 }
0x1214   : > { %v6011_v29 = vpop.xlane.xlu1 %6010 }
0x1215   : > { %v6040_v42 = vmul.f32 0.0078125, %v6011_v29  ;;  %6088 = vadd.xlane.f32.xlu0 %v6071_v43 }
0x1216   : > { %v6013_v62 = vpop.xlane.xlu0 %6012 }
0x1217   : > { %v11001_v3 = vsub.f32 %v10923_v56, %v6040_v42  ;;  %v6041_v22 = vmul.f32 0.0078125, %v6013_v62 }
0x1219   : > { %v11004_v31 = vsub.f32 %v10927_v9, %v6041_v22  ;;  %v6072_v58 = vmul.f32 %v11001_v3, %v11001_v3 }
0x121b   : > { %6090 = vadd.xlane.f32.xlu1 %v6072_v58  ;;  %v6073_v51 = vmul.f32 %v11004_v31, %v11004_v31 }
0x121c   : > { %v6015_v33 = vpop.xlane.xlu1 %6014 }
0x121d   : > { %v6042_v60 = vmul.f32 0.0078125, %v6015_v33  ;;  %6092 = vadd.xlane.f32.xlu0 %v6073_v51 }
0x121e   : > { %v6017_v11 = vpop.xlane.xlu0 %6016 }
0x121f   : > { %v11011_v54 = vsub.f32 %v10933_v5, %v6042_v60  ;;  %v6043_v56 = vmul.f32 0.0078125, %v6017_v11  ;;  %v11073_v60 = vld [vmem:[%s11160_s14] ss:$0 sm:$0xff] }
0x1221   : > { %v11014_v28 = vsub.f32 %v10937_v24, %v6043_v56  ;;  %v6074_v9 = vmul.f32 %v11011_v54, %v11011_v54 }
0x1223   : > { %6094 = vadd.xlane.f32.xlu1 %v6074_v9  ;;  %v6075_v50 = vmul.f32 %v11014_v28, %v11014_v28 }
0x1224   : > { %v6019_v48 = vpop.xlane.xlu1 %6018 }
0x1225   : > { %v6044_v7 = vmul.f32 0.0078125, %v6019_v48  ;;  %6096 = vadd.xlane.f32.xlu0 %v6075_v50 }
0x1226   : > { %v6021_v45 = vpop.xlane.xlu0 %6020 }
0x1227   : > { %v11021_v2 = vsub.f32 %v10943_v36, %v6044_v7  ;;  %v6045_v5 = vmul.f32 0.0078125, %v6021_v45 }
0x1229   : > { %v11024_v10 = vsub.f32 %v10947_v8, %v6045_v5  ;;  %v6076_v24 = vmul.f32 %v11021_v2, %v11021_v2  ;;  %v11081_v5 = vld [vmem:[%s11161_s15] ss:$0 sm:$0xff] }
0x122b   : > { %6098 = vadd.xlane.f32.xlu1 %v6076_v24  ;;  %v6077_v1 = vmul.f32 %v11024_v10, %v11024_v10 }
0x122d   : > { %6100 = vadd.xlane.f32.xlu0 %v6077_v1 }
0x124c   : > { %v6023_v49 = vpop.xlane.xlu1 %6022 }
0x124d   : > { %v6046_v38 = vmul.f32 0.0078125, %v6023_v49 }
0x124e   : > { %v6025_v57 = vpop.xlane.xlu0 %6024 }
0x124f   : > { %v11031_v16 = vsub.f32 %v10953_v4, %v6046_v38  ;;  %v6047_v36 = vmul.f32 0.0078125, %v6025_v57 }
0x1251   : > { %v11034_v17 = vsub.f32 %v10957_v47, %v6047_v36  ;;  %v6078_v8 = vmul.f32 %v11031_v16, %v11031_v16 }
0x1253   : > { %6102 = vadd.xlane.f32.xlu1 %v6078_v8  ;;  %v6079_v40 = vmul.f32 %v11034_v17, %v11034_v17 }
0x1254   : > { %v6027_v30 = vpop.xlane.xlu1 %6026 }
0x1255   : > { %v6048_v13 = vmul.f32 0.0078125, %v6027_v30  ;;  %6104 = vadd.xlane.f32.xlu0 %v6079_v40 }
0x1256   : > { %v6029_v18 = vpop.xlane.xlu0 %6028 }
0x1257   : > { %v11041_v19 = vsub.f32 %v10963_v15, %v6048_v13  ;;  %v6049_v4 = vmul.f32 0.0078125, %v6029_v18 }
0x1259   : > { %v11044_v27 = vsub.f32 %v10967_v44, %v6049_v4  ;;  %v6080_v47 = vmul.f32 %v11041_v19, %v11041_v19 }
0x125b   : > { %6106 = vadd.xlane.f32.xlu1 %v6080_v47  ;;  %v6081_v53 = vmul.f32 %v11044_v27, %v11044_v27 }
0x125c   : > { %v6031_v59 = vpop.xlane.xlu1 %6030 }
0x125d   : > { %v6050_v41 = vmul.f32 0.0078125, %v6031_v59  ;;  %6108 = vadd.xlane.f32.xlu0 %v6081_v53 }
0x125e   : > { %v6033_v21 = vpop.xlane.xlu0 %6032 }
0x125f   : > { %v11051_v63 = vsub.f32 %v10973_v32, %v6050_v41  ;;  %v6051_v15 = vmul.f32 0.0078125, %v6033_v21 }
0x1261   : > { %v11054_v39 = vsub.f32 %v10977_v34, %v6051_v15  ;;  %v6082_v44 = vmul.f32 %v11051_v63, %v11051_v63 }
0x1263   : > { %6110 = vadd.xlane.f32.xlu1 %v6082_v44  ;;  %v6083_v46 = vmul.f32 %v11054_v39, %v11054_v39 }
0x1264   : > { %v6035_v6 = vpop.xlane.xlu1 %6034 }
0x1265   : > { %v6052_v23 = vmul.f32 0.0078125, %v6035_v6  ;;  %6112 = vadd.xlane.f32.xlu0 %v6083_v46 }
0x1266   : > { %v6037_v20 = vpop.xlane.xlu0 %6036 }
0x1267   : > { %v11061_v0 = vsub.f32 %v10983_v61, %v6052_v23  ;;  %v6053_v32 = vmul.f32 0.0078125, %v6037_v20 }
0x1269   : > { %v11064_v12 = vsub.f32 %v10987_v37, %v6053_v32  ;;  %v6084_v34 = vmul.f32 %v11061_v0, %v11061_v0 }
0x126b   : > { %6114 = vadd.xlane.f32.xlu1 %v6084_v34  ;;  %v6085_v25 = vmul.f32 %v11064_v12, %v11064_v12 }
0x126d   : > { %6116 = vadd.xlane.f32.xlu0 %v6085_v25 }
0x12a0   : > { %v6087_v14 = vpop.xlane.xlu1 %6086 }
0x12a1   : > { %v6118_v55 = vmul.f32 0.0078125, %v6087_v14 }
0x12a2   : > { %v6089_v26 = vpop.xlane.xlu0 %6088 }
0x12a3   : > { %v6134_v43 = vadd.f32 1e-12, %v6118_v55  ;;  %v6119_v29 = vmul.f32 0.0078125, %v6089_v26 }
0x12a5   : > { %7920 = vrsqrt.f32 %v6134_v43  ;;  %v6135_v61 = vadd.f32 1e-12, %v6119_v29 }
0x12a7   : > { %7922 = vrsqrt.f32 %v6135_v61 }
0x12a8   : > { %v6091_v42 = vpop.xlane.xlu1 %6090 }
0x12a9   : > { %v6120_v62 = vmul.f32 0.0078125, %v6091_v42 }
0x12aa   : > { %v6093_v37 = vpop.xlane.xlu0 %6092 }
0x12ab   : > { %v6136_v22 = vadd.f32 1e-12, %v6120_v62  ;;  %v6121_v58 = vmul.f32 0.0078125, %v6093_v37 }
0x12ad   : > { %7924 = vrsqrt.f32 %v6136_v22  ;;  %v6137_v51 = vadd.f32 1e-12, %v6121_v58 }
0x12af   : > { %v7921_v33 = vpop.eup %7920  ;;  %7926 = vrsqrt.f32 %v6137_v51 }
0x12b0   : > { %v6166_v11 = vmul.f32 %v7921_v33, %v10991_v52  ;;  %v6095_v56 = vpop.xlane.xlu1 %6094 }
0x12b1   : > { %v7923_v9 = vpop.eup %7922  ;;  %v6122_v50 = vmul.f32 0.0078125, %v6095_v56 }
0x12b2   : > { %v6188_v48 = vmul.f32 %v11073_v60, %v6166_v11  ;;  %v6167_v7 = vmul.f32 %v7923_v9, %v10994_v35  ;;  %v6097_v45 = vpop.xlane.xlu0 %6096 }
0x12b3   : > { %v6138_v24 = vadd.f32 1e-12, %v6122_v50  ;;  %v6123_v1 = vmul.f32 0.0078125, %v6097_v45 }
0x12b4   : > { %v6189_v49 = vmul.f32 %v11073_v60, %v6167_v7  ;;  %v6210_v38 = vadd.f32 %v11081_v5, %v6188_v48 }
0x12b5   : > { %7928 = vrsqrt.f32 %v6138_v24  ;;  %v6139_v52 = vadd.f32 1e-12, %v6123_v1 }
0x12b6   : > { %v6211_v57 = vadd.f32 %v11081_v5, %v6189_v49 }
0x12b7   : > { %v7925_v36 = vpop.eup %7924  ;;  %7930 = vrsqrt.f32 %v6139_v52 }
0x12b8   : > { %v6584_v35 = vpack.c.bf16 %v6211_v57, %v6210_v38  ;;  %v6168_v8 = vmul.f32 %v7925_v36, %v11001_v3  ;;  %v6099_v40 = vpop.xlane.xlu1 %6098 }
0x12b9   : > { %v7927_v30 = vpop.eup %7926  ;;  %v6124_v13 = vmul.f32 0.0078125, %v6099_v40 }
0x12ba   : > { %6585 = vst [vmem:[%s11091_s29] sm:$0xff] %v6584_v35   ;;  %v6190_v18 = vmul.f32 %v11073_v60, %v6168_v8  ;;  %v6169_v4 = vmul.f32 %v7927_v30, %v11004_v31  ;;  %v6101_v47 = vpop.xlane.xlu0 %6100 }
0x12bb   : > { %v6140_v53 = vadd.f32 1e-12, %v6124_v13  ;;  %v6125_v59 = vmul.f32 0.0078125, %v6101_v47 }
0x12bc   : > { %v6191_v41 = vmul.f32 %v11073_v60, %v6169_v4  ;;  %v6212_v15 = vadd.f32 %v11081_v5, %v6190_v18 }
0x12bd   : > { %7932 = vrsqrt.f32 %v6140_v53  ;;  %v6141_v21 = vadd.f32 1e-12, %v6125_v59 }
0x12be   : > { %v6213_v3 = vadd.f32 %v11081_v5, %v6191_v41 }
0x12bf   : > { %v7929_v44 = vpop.eup %7928  ;;  %7934 = vrsqrt.f32 %v6141_v21 }
0x12c0   : > { %v6589_v46 = vpack.c.bf16 %v6213_v3, %v6212_v15  ;;  %v6170_v6 = vmul.f32 %v7929_v44, %v11011_v54 }
0x12c1   : > { %v7931_v23 = vpop.eup %7930 }
0x12c2   : > { %6621 = vst [vmem:[%s11091_s29 + $0x8] sm:$0xff] %v6589_v46   ;;  %v6192_v31 = vmul.f32 %v11073_v60, %v6170_v6  ;;  %v6171_v20 = vmul.f32 %v7931_v23, %v11014_v28 }
0x12c4   : > { %v6193_v32 = vmul.f32 %v11073_v60, %v6171_v20  ;;  %v6214_v34 = vadd.f32 %v11081_v5, %v6192_v31 }
0x12c6   : > { %v6215_v25 = vadd.f32 %v11081_v5, %v6193_v32 }
0x12c7   : > { %v7933_v14 = vpop.eup %7932 }
0x12c8   : > { %v6594_v55 = vpack.c.bf16 %v6215_v25, %v6214_v34  ;;  %v6172_v26 = vmul.f32 %v7933_v14, %v11021_v2 }
0x12c9   : > { %v7935_v43 = vpop.eup %7934 }
0x12ca   : > { %6622 = vst [vmem:[%s11091_s29 + $0x10] sm:$0xff] %v6594_v55   ;;  %v6194_v54 = vmul.f32 %v11073_v60, %v6172_v26  ;;  %v6173_v29 = vmul.f32 %v7935_v43, %v11024_v10 }
0x12cc   : > { %v6195_v61 = vmul.f32 %v11073_v60, %v6173_v29  ;;  %v6216_v28 = vadd.f32 %v11081_v5, %v6194_v54 }
0x12ce   : > { %v6217_v42 = vadd.f32 %v11081_v5, %v6195_v61 }
0x12d0   : > { %v6599_v62 = vpack.c.bf16 %v6217_v42, %v6216_v28 }
0x12d2   : > { %6623 = vst [vmem:[%s11091_s29 + $0x18] sm:$0xff] %v6599_v62  }
0x12e0   : > { %v6103_v37 = vpop.xlane.xlu1 %6102 }
0x12e1   : > { %v6126_v22 = vmul.f32 0.0078125, %v6103_v37 }
0x12e2   : > { %v6105_v58 = vpop.xlane.xlu0 %6104 }
0x12e3   : > { %v6142_v51 = vadd.f32 1e-12, %v6126_v22  ;;  %v6127_v33 = vmul.f32 0.0078125, %v6105_v58 }
0x12e5   : > { %7936 = vrsqrt.f32 %v6142_v51  ;;  %v6143_v2 = vadd.f32 1e-12, %v6127_v33 }
0x12e7   : > { %7938 = vrsqrt.f32 %v6143_v2 }
0x12e8   : > { %v6107_v11 = vpop.xlane.xlu1 %6106 }
0x12e9   : > { %v6128_v56 = vmul.f32 0.0078125, %v6107_v11 }
0x12ea   : > { %v6109_v9 = vpop.xlane.xlu0 %6108 }
0x12eb   : > { %v6144_v10 = vadd.f32 1e-12, %v6128_v56  ;;  %v6129_v50 = vmul.f32 0.0078125, %v6109_v9 }
0x12ed   : > { %7940 = vrsqrt.f32 %v6144_v10  ;;  %v6145_v48 = vadd.f32 1e-12, %v6129_v50 }
0x12ef   : > { %v7937_v7 = vpop.eup %7936  ;;  %7942 = vrsqrt.f32 %v6145_v48 }
0x12f0   : > { %v6174_v45 = vmul.f32 %v7937_v7, %v11031_v16  ;;  %v6111_v24 = vpop.xlane.xlu1 %6110 }
0x12f1   : > { %v7939_v1 = vpop.eup %7938  ;;  %v6130_v49 = vmul.f32 0.0078125, %v6111_v24 }
0x12f2   : > { %v6196_v52 = vmul.f32 %v11073_v60, %v6174_v45  ;;  %v6175_v38 = vmul.f32 %v7939_v1, %v11034_v17  ;;  %v6113_v57 = vpop.xlane.xlu0 %6112 }
0x12f3   : > { %v6146_v36 = vadd.f32 1e-12, %v6130_v49  ;;  %v6131_v35 = vmul.f32 0.0078125, %v6113_v57 }
0x12f4   : > { %v6197_v8 = vmul.f32 %v11073_v60, %v6175_v38  ;;  %v6218_v30 = vadd.f32 %v11081_v5, %v6196_v52 }
0x12f5   : > { %7944 = vrsqrt.f32 %v6146_v36  ;;  %v6147_v40 = vadd.f32 1e-12, %v6131_v35 }
0x12f6   : > { %v6219_v13 = vadd.f32 %v11081_v5, %v6197_v8 }
0x12f7   : > { %v7941_v16 = vpop.eup %7940  ;;  %7946 = vrsqrt.f32 %v6147_v40 }
0x12f8   : > { %v6604_v18 = vpack.c.bf16 %v6219_v13, %v6218_v30  ;;  %v6176_v4 = vmul.f32 %v7941_v16, %v11041_v19  ;;  %v6115_v47 = vpop.xlane.xlu1 %6114 }
0x12f9   : > { %v7943_v53 = vpop.eup %7942  ;;  %v6132_v17 = vmul.f32 0.0078125, %v6115_v47 }
0x12fa   : > { %6624 = vst [vmem:[%s11091_s29 + $0x20] sm:$0xff] %v6604_v18   ;;  %v6198_v59 = vmul.f32 %v11073_v60, %v6176_v4  ;;  %v6177_v41 = vmul.f32 %v7943_v53, %v11044_v27  ;;  %v6117_v21 = vpop.xlane.xlu0 %6116 }
0x12fb   : > { %v6148_v15 = vadd.f32 1e-12, %v6132_v17  ;;  %v6133_v3 = vmul.f32 0.0078125, %v6117_v21 }
0x12fc   : > { %v6199_v44 = vmul.f32 %v11073_v60, %v6177_v41  ;;  %v6220_v6 = vadd.f32 %v11081_v5, %v6198_v59 }
0x12fd   : > { %7948 = vrsqrt.f32 %v6148_v15  ;;  %v6149_v46 = vadd.f32 1e-12, %v6133_v3 }
0x12fe   : > { %v6221_v19 = vadd.f32 %v11081_v5, %v6199_v44 }
0x12ff   : > { %v7945_v23 = vpop.eup %7944  ;;  %7950 = vrsqrt.f32 %v6149_v46 }
0x1300   : > { %v6609_v31 = vpack.c.bf16 %v6221_v19, %v6220_v6  ;;  %v6178_v20 = vmul.f32 %v7945_v23, %v11051_v63 }
0x1301   : > { %v7947_v32 = vpop.eup %7946 }
0x1302   : > { %6625 = vst [vmem:[%s11091_s29 + $0x28] sm:$0xff] %v6609_v31   ;;  %v6200_v27 = vmul.f32 %v11073_v60, %v6178_v20  ;;  %v6179_v34 = vmul.f32 %v7947_v32, %v11054_v39 }
0x1304   : > { %v6201_v25 = vmul.f32 %v11073_v60, %v6179_v34  ;;  %v6222_v14 = vadd.f32 %v11081_v5, %v6200_v27 }
0x1306   : > { %v6223_v55 = vadd.f32 %v11081_v5, %v6201_v25 }
0x1307   : > { %v7949_v26 = vpop.eup %7948 }
0x1308   : > { %v6614_v43 = vpack.c.bf16 %v6223_v55, %v6222_v14  ;;  %v6180_v54 = vmul.f32 %v7949_v26, %v11061_v0 }
0x1309   : > { %v7951_v29 = vpop.eup %7950 }
0x130a   : > { %6626 = vst [vmem:[%s11091_s29 + $0x30] sm:$0xff] %v6614_v43   ;;  %v6202_v63 = vmul.f32 %v11073_v60, %v6180_v54  ;;  %v6181_v61 = vmul.f32 %v7951_v29, %v11064_v12 }
0x130c   : > { %v6203_v28 = vmul.f32 %v11073_v60, %v6181_v61  ;;  %v6224_v39 = vadd.f32 %v11081_v5, %v6202_v63 }
0x130e   : > { %v6225_v42 = vadd.f32 %v11081_v5, %v6203_v28 }
0x1310   : > { %v6619_v62 = vpack.c.bf16 %v6225_v42, %v6224_v39 }
0x1312   : > { %6627 = vst [vmem:[%s11091_s29 + $0x38] sm:$0xff] %v6619_v62  }
0x1313 PF: > { %s11595_s22 = sld [smem:[#allocation3_spill]] }
0x1319   : > { %s26_s21 = sadd.s32 1, %s11595_s22  }
0x131a   : > { %p23_p4 = scmp.ge.s32.totalorder %s26_s21, 4  }
0x131c   :  { %25 = sbr.rel (!%p23_p4) target bundleno = 9 (0x9), region = 117 }

</bundles_post_ra>
